<compile_context>
chip_gen: v7x
topology: tpu7x:2x2x1
jax: 0.10.0
libtpu: 0.0.40
codegen_flags: <defaults>
</compile_context>

<pallas_src>
import functools

import jax
import jax.numpy as jnp
from jax.experimental import pallas as pl
from jax.experimental.pallas import tpu as pltpu


def _disc_kernel(x_ref, w0_ref, *rest, pool, compute_dtype, quantized_w0,
                 lane_dense_head):
    """Fused Discriminator forward for one batch tile.

    Weight slabs: slab k, column g  ==  original column g*pool + k, so the Maxout over
    consecutive groups of `pool` features is a running elementwise max over `pool`
    full-width (lane-dense) dot products.
    """
    if quantized_w0:
        s0_ref, b0_ref, w1_ref, b1_ref, wy_ref, by_ref, o_ref = rest
    else:
        b0_ref, w1_ref, b1_ref, wy_ref, by_ref, o_ref = rest
        s0_ref = None

    # In-kernel cast: x stays f32 in HBM, becomes bf16 only for the MXU feed.
    x = x_ref[...].astype(compute_dtype)

    # ---- dh0: Linear(input_dim -> hidden_dim) + Maxout(pool), slab-wise ----
    m0 = None
    for k in range(pool):
        wk = w0_ref[k]
        if wk.dtype != compute_dtype:
            wk = wk.astype(compute_dtype)       # int8 -> bf16 is exact (|q| <= 127)
        h = jnp.dot(x, wk, preferred_element_type=jnp.float32)
        if quantized_w0:
            h = h * s0_ref[k]                   # per-output-column dequant scale (VPU)
        h = h + b0_ref[k]
        m0 = h if m0 is None else jnp.maximum(m0, h)

    # ---- h1: Linear(h1_dim -> h1_dim) + Maxout(pool), slab-wise ----
    m0c = m0.astype(compute_dtype)
    m1 = None
    for k in range(pool):
        h = jnp.dot(m0c, w1_ref[k], preferred_element_type=jnp.float32) + b1_ref[k]
        m1 = h if m1 is None else jnp.maximum(m1, h)

    # ---- y: Linear(y_dim -> output_dim) + Sigmoid ----
    if lane_dense_head:
        # out_dim == 1: VPU multiply + lane-axis reduce; avoids a 1/128-lane MXU matmul.
        logits = jnp.sum(m1 * wy_ref[...], axis=-1, keepdims=True) + by_ref[...]
    else:
        logits = jnp.dot(m1.astype(wy_ref.dtype), wy_ref[...],
                         preferred_element_type=jnp.float32) + by_ref[...]
    o_ref[...] = jax.nn.sigmoid(logits).astype(o_ref.dtype)


def _to_slabs(w, pool):
    """(in, out) weight -> (pool, in, out//pool); slab k, col g == original col g*pool+k."""
    d_in, d_out = w.shape
    return jnp.transpose(w.reshape(d_in, d_out // pool, pool), (2, 0, 1))


def _bias_to_slabs(b, pool):
    d_out = b.shape[0]
    return jnp.transpose(b.reshape(d_out // pool, pool), (1, 0)).reshape(
        pool, 1, d_out // pool)


def _pick_batch_tile(B, requested):
    if requested is not None:
        return requested
    if B <= 256:
        return B                # one grid step: weights streamed exactly once
    if B <= 1024 and B % 16 == 0:
        return B // 2           # two steps: one per TensorCore on v7x when big enough
    return 256                  # larger/odd batches: pad to a multiple of 256


def discriminator_forward(x, params, *, pool=5, weights="bf16", batch_tile=None):
    """Fused Discriminator forward.

    x: (B, input_dim) float32.
    params: w0 (in,hidden), b0 (hidden,), w1 (h1,h1), b1 (h1,), wy (y,out), by (out,).
    weights: "bf16" (default), "f32", or "int8" (int8 w0 + per-column scales; biggest
             win on bandwidth-starved v5e/v6e, still portable to v7x since the
             dequant happens on-chip).
    """
    assert weights in ("bf16", "f32", "int8")
    B, D = x.shape
    hidden = params["w0"].shape[1]
    assert hidden % pool == 0
    h1_dim = hidden // pool
    assert h1_dim % pool == 0
    y_dim = h1_dim // pool
    out_dim = params["wy"].shape[1]

    compute_dtype = jnp.float32 if weights == "f32" else jnp.bfloat16
    quantized_w0 = weights == "int8"

    # Maxout-friendly slab layouts (wrapper-side layout plumbing, not compute).
    w0_slabs = _to_slabs(params["w0"].astype(jnp.float32), pool)
    b0_slabs = _bias_to_slabs(params["b0"].astype(jnp.float32), pool)
    w1_slabs = _to_slabs(params["w1"].astype(jnp.float32), pool).astype(compute_dtype)
    b1_slabs = _bias_to_slabs(params["b1"].astype(jnp.float32), pool)
    by = params["by"].reshape(1, out_dim).astype(jnp.float32)

    if quantized_w0:
        absmax = jnp.maximum(jnp.max(jnp.abs(w0_slabs), axis=1, keepdims=True), 1e-12)
        s0 = (absmax / 127.0).astype(jnp.float32)                    # (pool, 1, h1_dim)
        w0_arg = jnp.clip(jnp.round(w0_slabs / s0), -127, 127).astype(jnp.int8)
    else:
        s0 = None
        w0_arg = w0_slabs.astype(compute_dtype)

    lane_dense_head = out_dim == 1
    if lane_dense_head:
        wy_arg = params["wy"].astype(jnp.float32).T                  # (1, y_dim) row
    else:
        wy_arg = params["wy"].astype(jnp.float32)                    # (y_dim, out_dim)

    # Batch tiling: pad to a multiple of the tile (never one giant fallback step).
    bt = _pick_batch_tile(B, batch_tile)
    padded_B = -(-B // bt) * bt
    if padded_B != B:
        x = jnp.pad(x, ((0, padded_B - B), (0, 0)))
    grid_steps = padded_B // bt

    if grid_steps <= 1:
        dim_sem = ("arbitrary",)
    elif grid_steps == 2:
        # Splitting 2 steps across v7x's two cores duplicates the resident-weight DMA;
        # only worth it once per-core MXU time can hide it (~>=320 rows per core).
        dim_sem = ("parallel",) if bt >= 320 else ("arbitrary",)
    else:
        dim_sem = ("parallel",)

    def _resident(shape):
        zeros = (0,) * len(shape)
        # Constant index_map -> fetched once; single buffer (no wasted double-buffer VMEM).
        return pl.BlockSpec(shape, lambda i, _z=zeros: _z, pipeline_mode=pl.Buffered(1))

    in_specs = [pl.BlockSpec((bt, D), lambda i: (i, 0)),             # x tile (pipelined)
                _resident((pool, D, h1_dim))]                        # w0 slabs
    args = [x, w0_arg]
    if quantized_w0:
        in_specs.append(_resident((pool, 1, h1_dim)))                # w0 dequant scales
        args.append(s0)
    in_specs += [_resident((pool, 1, h1_dim)),                       # b0 slabs
                 _resident((pool, h1_dim, y_dim)),                   # w1 slabs
                 _resident((pool, 1, y_dim)),                        # b1 slabs
                 _resident(wy_arg.shape),                            # wy
                 _resident((1, out_dim))]                            # by
    args += [b0_slabs, w1_slabs, b1_slabs, wy_arg, by]

    weight_bytes = sum(int(a.size) * a.dtype.itemsize for a in args[1:])
    cost = pl.CostEstimate(
        flops=2 * padded_B * (D * hidden + h1_dim * h1_dim + y_dim * out_dim),
        transcendentals=padded_B * out_dim,
        bytes_accessed=int(weight_bytes
                           + padded_B * D * x.dtype.itemsize
                           + padded_B * out_dim * 4),
    )

    kernel = functools.partial(
        _disc_kernel, pool=pool, compute_dtype=compute_dtype,
        quantized_w0=quantized_w0, lane_dense_head=lane_dense_head)

    out = pl.pallas_call(
        kernel,
        out_shape=jax.ShapeDtypeStruct((padded_B, out_dim), jnp.float32),
        grid_spec=pltpu.PrefetchScalarGridSpec(
            num_scalar_prefetch=0,
            grid=(grid_steps,),
            in_specs=in_specs,
            out_specs=pl.BlockSpec((bt, out_dim), lambda i: (i, 0)),
        ),
        compiler_params=pltpu.CompilerParams(
            dimension_semantics=dim_sem,
            # Right-sized: weights + double-buffered x tile + slab intermediates sit
            # well under 32 MiB, leaving headroom on v7x's 64 MiB per-core VMEM.
            vmem_limit_bytes=32 * 1024 * 1024,
        ),
        cost_estimate=cost,
    )(*args)
    return out[:B] if padded_B != B else out


def _reference_forward(x, params, pool):
    """Pure-JAX reference matching the PyTorch module exactly (un-permuted weights)."""
    def maxout(v):
        return v.reshape(*v.shape[:-1], v.shape[-1] // pool, pool).max(-1)

    h0 = x @ params["w0"] + params["b0"]
    m0 = maxout(h0)
    h1 = m0 @ params["w1"] + params["b1"]
    m1 = maxout(h1)
    y = m1 @ params["wy"] + params["by"]
    return jax.nn.sigmoid(y)


def _linear_init(key, fan_in, fan_out):
    # PyTorch nn.Linear default init: U(-1/sqrt(fan_in), 1/sqrt(fan_in))
    kw, kb = jax.random.split(key)
    bound = 1.0 / (fan_in ** 0.5)
    w = jax.random.uniform(kw, (fan_in, fan_out), jnp.float32, -bound, bound)
    b = jax.random.uniform(kb, (fan_out,), jnp.float32, -bound, bound)
    return w, b


if __name__ == "__main__":
    # Small, module-consistent shapes: hidden % pool == 0 and (hidden//pool) % pool == 0.
    B = 16
    INPUT_DIM = 512
    HIDDEN_DIM = 3200     # h1_dim = 640, y_dim = 128 (lane-aligned slab boundaries)
    OUTPUT_DIM = 1
    POOL = 5
    H1_DIM = HIDDEN_DIM // POOL
    Y_DIM = H1_DIM // POOL

    key = jax.random.PRNGKey(0)
    kx, k0, k1, k2 = jax.random.split(key, 4)

    w0, b0 = _linear_init(k0, INPUT_DIM, HIDDEN_DIM)
    w1, b1 = _linear_init(k1, H1_DIM, H1_DIM)
    wy, by = _linear_init(k2, Y_DIM, OUTPUT_DIM)
    params = {"w0": w0, "b0": b0, "w1": w1, "b1": b1, "wy": wy, "by": by}

    x = jax.random.normal(kx, (B, INPUT_DIM), jnp.float32)
    ref = jax.block_until_ready(_reference_forward(x, params, POOL))

    # Full-precision path.
    out_f32 = jax.block_until_ready(
        discriminator_forward(x, params, pool=POOL, weights="f32"))
    assert out_f32.shape == (B, OUTPUT_DIM), out_f32.shape
    assert jnp.allclose(out_f32, ref, atol=1e-5, rtol=1e-5), \
        float(jnp.max(jnp.abs(out_f32 - ref)))

    # Default path: bf16 weights, in-kernel x cast, f32 accumulation.
    out_bf16 = jax.block_until_ready(discriminator_forward(x, params, pool=POOL))
    assert jnp.allclose(out_bf16, ref, atol=2e-2, rtol=2e-2), \
        float(jnp.max(jnp.abs(out_bf16 - ref)))

    # int8-w0 path (per-column scales dequantized on the VPU after the dot).
    out_i8 = jax.block_until_ready(
        discriminator_forward(x, params, pool=POOL, weights="int8"))
    assert jnp.allclose(out_i8, ref, atol=3e-2, rtol=3e-2), \
        float(jnp.max(jnp.abs(out_i8 - ref)))

    # Padded / multi-step batch path (B not a multiple of the tile, grid > 2).
    x2 = jax.random.normal(jax.random.PRNGKey(1), (20, INPUT_DIM), jnp.float32)
    ref2 = jax.block_until_ready(_reference_forward(x2, params, POOL))
    out2 = jax.block_until_ready(
        discriminator_forward(x2, params, pool=POOL, batch_tile=8))
    assert out2.shape == (20, OUTPUT_DIM), out2.shape
    assert jnp.allclose(out2, ref2, atol=2e-2, rtol=2e-2), \
        float(jnp.max(jnp.abs(out2 - ref2)))

    print("KERNEL_OK")
</pallas_src>

<mosaic_0001>
module attributes {stable_mosaic.version = 11 : i64} {
  func.func @_disc_kernel(%arg0: i32, %arg1: memref<16x512xf32, #tpu.memory_space<vmem>>, %arg2: memref<5x512x640xf32, #tpu.memory_space<vmem>>, %arg3: memref<5x1x640xf32, #tpu.memory_space<vmem>>, %arg4: memref<5x640x128xf32, #tpu.memory_space<vmem>>, %arg5: memref<5x1x128xf32, #tpu.memory_space<vmem>>, %arg6: memref<1x128xf32, #tpu.memory_space<vmem>>, %arg7: memref<1x1xf32, #tpu.memory_space<vmem>>, %arg8: memref<16x1xf32, #tpu.memory_space<vmem>>) attributes {dimension_semantics = [#tpu.dimension_semantics<arbitrary>], iteration_bounds = array<i64: 1>, scalar_prefetch = 0 : i64, scratch_operands = 0 : i64, tpu.core_type = #tpu.core_type<tc>, window_params = [{transform_indices = @transform_0, window_bounds = array<i64: 16, 512>}, {pipeline_mode = #tpu.pipeline_mode<synchronous>, transform_indices = @transform_1, window_bounds = array<i64: 5, 512, 640>}, {pipeline_mode = #tpu.pipeline_mode<synchronous>, transform_indices = @transform_2, window_bounds = array<i64: 5, 1, 640>}, {pipeline_mode = #tpu.pipeline_mode<synchronous>, transform_indices = @transform_3, window_bounds = array<i64: 5, 640, 128>}, {pipeline_mode = #tpu.pipeline_mode<synchronous>, transform_indices = @transform_4, window_bounds = array<i64: 5, 1, 128>}, {pipeline_mode = #tpu.pipeline_mode<synchronous>, transform_indices = @transform_5, window_bounds = array<i64: 1, 128>}, {pipeline_mode = #tpu.pipeline_mode<synchronous>, transform_indices = @transform_6, window_bounds = array<i64: 1, 1>}, {transform_indices = @transform_7, window_bounds = array<i64: 16, 1>}]} {
    %c0 = arith.constant 0 : index
    %c0_0 = arith.constant 0 : index
    %0 = vector.load %arg1[%c0, %c0_0] : memref<16x512xf32, #tpu.memory_space<vmem>>, vector<16x512xf32>
    %c0_1 = arith.constant 0 : index
    %c0_2 = arith.constant 0 : index
    %c0_3 = arith.constant 0 : index
    %1 = vector.load %arg2[%c0_1, %c0_2, %c0_3] : memref<5x512x640xf32, #tpu.memory_space<vmem>>, vector<1x512x640xf32>
    %2 = vector.shape_cast %1 : vector<1x512x640xf32> to vector<512x640xf32>
    %cst = arith.constant dense<0.000000e+00> : vector<16x640xf32>
    %3 = tpu.matmul %0, %2, %cst {dimension_numbers = #tpu.dot_dimension_numbers<[1], [0], [0], [1], [0, 0, 1, 1], [], []>} : vector<16x512xf32>, vector<512x640xf32>, vector<16x640xf32> -> vector<16x640xf32>
    %c0_4 = arith.constant 0 : index
    %c0_5 = arith.constant 0 : index
    %c0_6 = arith.constant 0 : index
    %4 = vector.load %arg3[%c0_4, %c0_5, %c0_6] : memref<5x1x640xf32, #tpu.memory_space<vmem>>, vector<1x1x640xf32>
    %5 = vector.shape_cast %4 : vector<1x1x640xf32> to vector<1x640xf32>
    %6 = vector.broadcast %5 : vector<1x640xf32> to vector<16x640xf32>
    %7 = arith.addf %3, %6 : vector<16x640xf32>
    %c1 = arith.constant 1 : index
    %c0_7 = arith.constant 0 : index
    %c0_8 = arith.constant 0 : index
    %8 = vector.load %arg2[%c1, %c0_7, %c0_8] : memref<5x512x640xf32, #tpu.memory_space<vmem>>, vector<1x512x640xf32>
    %9 = vector.shape_cast %8 : vector<1x512x640xf32> to vector<512x640xf32>
    %cst_9 = arith.constant dense<0.000000e+00> : vector<16x640xf32>
    %10 = tpu.matmul %0, %9, %cst_9 {dimension_numbers = #tpu.dot_dimension_numbers<[1], [0], [0], [1], [0, 0, 1, 1], [], []>} : vector<16x512xf32>, vector<512x640xf32>, vector<16x640xf32> -> vector<16x640xf32>
    %c1_10 = arith.constant 1 : index
    %c0_11 = arith.constant 0 : index
    %c0_12 = arith.constant 0 : index
    %11 = vector.load %arg3[%c1_10, %c0_11, %c0_12] : memref<5x1x640xf32, #tpu.memory_space<vmem>>, vector<1x1x640xf32>
    %12 = vector.shape_cast %11 : vector<1x1x640xf32> to vector<1x640xf32>
    %13 = vector.broadcast %12 : vector<1x640xf32> to vector<16x640xf32>
    %14 = arith.addf %10, %13 : vector<16x640xf32>
    %15 = arith.maximumf %7, %14 : vector<16x640xf32>
    %c2 = arith.constant 2 : index
    %c0_13 = arith.constant 0 : index
    %c0_14 = arith.constant 0 : index
    %16 = vector.load %arg2[%c2, %c0_13, %c0_14] : memref<5x512x640xf32, #tpu.memory_space<vmem>>, vector<1x512x640xf32>
    %17 = vector.shape_cast %16 : vector<1x512x640xf32> to vector<512x640xf32>
    %cst_15 = arith.constant dense<0.000000e+00> : vector<16x640xf32>
    %18 = tpu.matmul %0, %17, %cst_15 {dimension_numbers = #tpu.dot_dimension_numbers<[1], [0], [0], [1], [0, 0, 1, 1], [], []>} : vector<16x512xf32>, vector<512x640xf32>, vector<16x640xf32> -> vector<16x640xf32>
    %c2_16 = arith.constant 2 : index
    %c0_17 = arith.constant 0 : index
    %c0_18 = arith.constant 0 : index
    %19 = vector.load %arg3[%c2_16, %c0_17, %c0_18] : memref<5x1x640xf32, #tpu.memory_space<vmem>>, vector<1x1x640xf32>
    %20 = vector.shape_cast %19 : vector<1x1x640xf32> to vector<1x640xf32>
    %21 = vector.broadcast %20 : vector<1x640xf32> to vector<16x640xf32>
    %22 = arith.addf %18, %21 : vector<16x640xf32>
    %23 = arith.maximumf %15, %22 : vector<16x640xf32>
    %c3 = arith.constant 3 : index
    %c0_19 = arith.constant 0 : index
    %c0_20 = arith.constant 0 : index
    %24 = vector.load %arg2[%c3, %c0_19, %c0_20] : memref<5x512x640xf32, #tpu.memory_space<vmem>>, vector<1x512x640xf32>
    %25 = vector.shape_cast %24 : vector<1x512x640xf32> to vector<512x640xf32>
    %cst_21 = arith.constant dense<0.000000e+00> : vector<16x640xf32>
    %26 = tpu.matmul %0, %25, %cst_21 {dimension_numbers = #tpu.dot_dimension_numbers<[1], [0], [0], [1], [0, 0, 1, 1], [], []>} : vector<16x512xf32>, vector<512x640xf32>, vector<16x640xf32> -> vector<16x640xf32>
    %c3_22 = arith.constant 3 : index
    %c0_23 = arith.constant 0 : index
    %c0_24 = arith.constant 0 : index
    %27 = vector.load %arg3[%c3_22, %c0_23, %c0_24] : memref<5x1x640xf32, #tpu.memory_space<vmem>>, vector<1x1x640xf32>
    %28 = vector.shape_cast %27 : vector<1x1x640xf32> to vector<1x640xf32>
    %29 = vector.broadcast %28 : vector<1x640xf32> to vector<16x640xf32>
    %30 = arith.addf %26, %29 : vector<16x640xf32>
    %31 = arith.maximumf %23, %30 : vector<16x640xf32>
    %c4 = arith.constant 4 : index
    %c0_25 = arith.constant 0 : index
    %c0_26 = arith.constant 0 : index
    %32 = vector.load %arg2[%c4, %c0_25, %c0_26] : memref<5x512x640xf32, #tpu.memory_space<vmem>>, vector<1x512x640xf32>
    %33 = vector.shape_cast %32 : vector<1x512x640xf32> to vector<512x640xf32>
    %cst_27 = arith.constant dense<0.000000e+00> : vector<16x640xf32>
    %34 = tpu.matmul %0, %33, %cst_27 {dimension_numbers = #tpu.dot_dimension_numbers<[1], [0], [0], [1], [0, 0, 1, 1], [], []>} : vector<16x512xf32>, vector<512x640xf32>, vector<16x640xf32> -> vector<16x640xf32>
    %c4_28 = arith.constant 4 : index
    %c0_29 = arith.constant 0 : index
    %c0_30 = arith.constant 0 : index
    %35 = vector.load %arg3[%c4_28, %c0_29, %c0_30] : memref<5x1x640xf32, #tpu.memory_space<vmem>>, vector<1x1x640xf32>
    %36 = vector.shape_cast %35 : vector<1x1x640xf32> to vector<1x640xf32>
    %37 = vector.broadcast %36 : vector<1x640xf32> to vector<16x640xf32>
    %38 = arith.addf %34, %37 : vector<16x640xf32>
    %39 = arith.maximumf %31, %38 : vector<16x640xf32>
    %c0_31 = arith.constant 0 : index
    %c0_32 = arith.constant 0 : index
    %c0_33 = arith.constant 0 : index
    %40 = vector.load %arg4[%c0_31, %c0_32, %c0_33] : memref<5x640x128xf32, #tpu.memory_space<vmem>>, vector<1x640x128xf32>
    %41 = vector.shape_cast %40 : vector<1x640x128xf32> to vector<640x128xf32>
    %cst_34 = arith.constant dense<0.000000e+00> : vector<16x128xf32>
    %42 = tpu.matmul %39, %41, %cst_34 {dimension_numbers = #tpu.dot_dimension_numbers<[1], [0], [0], [1], [0, 0, 1, 1], [], []>} : vector<16x640xf32>, vector<640x128xf32>, vector<16x128xf32> -> vector<16x128xf32>
    %c0_35 = arith.constant 0 : index
    %c0_36 = arith.constant 0 : index
    %c0_37 = arith.constant 0 : index
    %43 = vector.load %arg5[%c0_35, %c0_36, %c0_37] : memref<5x1x128xf32, #tpu.memory_space<vmem>>, vector<1x1x128xf32>
    %44 = vector.shape_cast %43 : vector<1x1x128xf32> to vector<1x128xf32>
    %45 = vector.broadcast %44 : vector<1x128xf32> to vector<16x128xf32>
    %46 = arith.addf %42, %45 : vector<16x128xf32>
    %c1_38 = arith.constant 1 : index
    %c0_39 = arith.constant 0 : index
    %c0_40 = arith.constant 0 : index
    %47 = vector.load %arg4[%c1_38, %c0_39, %c0_40] : memref<5x640x128xf32, #tpu.memory_space<vmem>>, vector<1x640x128xf32>
    %48 = vector.shape_cast %47 : vector<1x640x128xf32> to vector<640x128xf32>
    %cst_41 = arith.constant dense<0.000000e+00> : vector<16x128xf32>
    %49 = tpu.matmul %39, %48, %cst_41 {dimension_numbers = #tpu.dot_dimension_numbers<[1], [0], [0], [1], [0, 0, 1, 1], [], []>} : vector<16x640xf32>, vector<640x128xf32>, vector<16x128xf32> -> vector<16x128xf32>
    %c1_42 = arith.constant 1 : index
    %c0_43 = arith.constant 0 : index
    %c0_44 = arith.constant 0 : index
    %50 = vector.load %arg5[%c1_42, %c0_43, %c0_44] : memref<5x1x128xf32, #tpu.memory_space<vmem>>, vector<1x1x128xf32>
    %51 = vector.shape_cast %50 : vector<1x1x128xf32> to vector<1x128xf32>
    %52 = vector.broadcast %51 : vector<1x128xf32> to vector<16x128xf32>
    %53 = arith.addf %49, %52 : vector<16x128xf32>
    %54 = arith.maximumf %46, %53 : vector<16x128xf32>
    %c2_45 = arith.constant 2 : index
    %c0_46 = arith.constant 0 : index
    %c0_47 = arith.constant 0 : index
    %55 = vector.load %arg4[%c2_45, %c0_46, %c0_47] : memref<5x640x128xf32, #tpu.memory_space<vmem>>, vector<1x640x128xf32>
    %56 = vector.shape_cast %55 : vector<1x640x128xf32> to vector<640x128xf32>
    %cst_48 = arith.constant dense<0.000000e+00> : vector<16x128xf32>
    %57 = tpu.matmul %39, %56, %cst_48 {dimension_numbers = #tpu.dot_dimension_numbers<[1], [0], [0], [1], [0, 0, 1, 1], [], []>} : vector<16x640xf32>, vector<640x128xf32>, vector<16x128xf32> -> vector<16x128xf32>
    %c2_49 = arith.constant 2 : index
    %c0_50 = arith.constant 0 : index
    %c0_51 = arith.constant 0 : index
    %58 = vector.load %arg5[%c2_49, %c0_50, %c0_51] : memref<5x1x128xf32, #tpu.memory_space<vmem>>, vector<1x1x128xf32>
    %59 = vector.shape_cast %58 : vector<1x1x128xf32> to vector<1x128xf32>
    %60 = vector.broadcast %59 : vector<1x128xf32> to vector<16x128xf32>
    %61 = arith.addf %57, %60 : vector<16x128xf32>
    %62 = arith.maximumf %54, %61 : vector<16x128xf32>
    %c3_52 = arith.constant 3 : index
    %c0_53 = arith.constant 0 : index
    %c0_54 = arith.constant 0 : index
    %63 = vector.load %arg4[%c3_52, %c0_53, %c0_54] : memref<5x640x128xf32, #tpu.memory_space<vmem>>, vector<1x640x128xf32>
    %64 = vector.shape_cast %63 : vector<1x640x128xf32> to vector<640x128xf32>
    %cst_55 = arith.constant dense<0.000000e+00> : vector<16x128xf32>
    %65 = tpu.matmul %39, %64, %cst_55 {dimension_numbers = #tpu.dot_dimension_numbers<[1], [0], [0], [1], [0, 0, 1, 1], [], []>} : vector<16x640xf32>, vector<640x128xf32>, vector<16x128xf32> -> vector<16x128xf32>
    %c3_56 = arith.constant 3 : index
    %c0_57 = arith.constant 0 : index
    %c0_58 = arith.constant 0 : index
    %66 = vector.load %arg5[%c3_56, %c0_57, %c0_58] : memref<5x1x128xf32, #tpu.memory_space<vmem>>, vector<1x1x128xf32>
    %67 = vector.shape_cast %66 : vector<1x1x128xf32> to vector<1x128xf32>
    %68 = vector.broadcast %67 : vector<1x128xf32> to vector<16x128xf32>
    %69 = arith.addf %65, %68 : vector<16x128xf32>
    %70 = arith.maximumf %62, %69 : vector<16x128xf32>
    %c4_59 = arith.constant 4 : index
    %c0_60 = arith.constant 0 : index
    %c0_61 = arith.constant 0 : index
    %71 = vector.load %arg4[%c4_59, %c0_60, %c0_61] : memref<5x640x128xf32, #tpu.memory_space<vmem>>, vector<1x640x128xf32>
    %72 = vector.shape_cast %71 : vector<1x640x128xf32> to vector<640x128xf32>
    %cst_62 = arith.constant dense<0.000000e+00> : vector<16x128xf32>
    %73 = tpu.matmul %39, %72, %cst_62 {dimension_numbers = #tpu.dot_dimension_numbers<[1], [0], [0], [1], [0, 0, 1, 1], [], []>} : vector<16x640xf32>, vector<640x128xf32>, vector<16x128xf32> -> vector<16x128xf32>
    %c4_63 = arith.constant 4 : index
    %c0_64 = arith.constant 0 : index
    %c0_65 = arith.constant 0 : index
    %74 = vector.load %arg5[%c4_63, %c0_64, %c0_65] : memref<5x1x128xf32, #tpu.memory_space<vmem>>, vector<1x1x128xf32>
    %75 = vector.shape_cast %74 : vector<1x1x128xf32> to vector<1x128xf32>
    %76 = vector.broadcast %75 : vector<1x128xf32> to vector<16x128xf32>
    %77 = arith.addf %73, %76 : vector<16x128xf32>
    %78 = arith.maximumf %70, %77 : vector<16x128xf32>
    %c0_66 = arith.constant 0 : index
    %c0_67 = arith.constant 0 : index
    %79 = vector.load %arg6[%c0_66, %c0_67] : memref<1x128xf32, #tpu.memory_space<vmem>>, vector<1x128xf32>
    %80 = vector.broadcast %79 : vector<1x128xf32> to vector<16x128xf32>
    %81 = arith.mulf %78, %80 : vector<16x128xf32>
    %cst_68 = arith.constant dense<0.000000e+00> : vector<16xf32>
    %82 = vector.multi_reduction <add>, %81, %cst_68 [1] : vector<16x128xf32> to vector<16xf32>
    %83 = vector.shape_cast %82 : vector<16xf32> to vector<16x1xf32>
    %c0_69 = arith.constant 0 : index
    %c0_70 = arith.constant 0 : index
    %84 = vector.load %arg7[%c0_69, %c0_70] : memref<1x1xf32, #tpu.memory_space<vmem>>, vector<1x1xf32>
    %85 = vector.broadcast %84 : vector<1x1xf32> to vector<16x1xf32>
    %86 = arith.addf %83, %85 : vector<16x1xf32>
    %87 = arith.negf %86 : vector<16x1xf32>
    %88 = math.exp %87 : vector<16x1xf32>
    %cst_71 = arith.constant 1.000000e+00 : f32
    %89 = vector.broadcast %cst_71 : f32 to vector<16x1xf32>
    %90 = arith.addf %89, %88 : vector<16x1xf32>
    %91 = arith.divf %89, %90 : vector<16x1xf32>
    %c0_72 = arith.constant 0 : index
    %c0_73 = arith.constant 0 : index
    %92 = vector.load %arg8[%c0_72, %c0_73] : memref<16x1xf32, #tpu.memory_space<vmem>>, vector<16x1xf32>
    tpu.vector_store %arg8[%c0_72, %c0_73], %91 {strides = array<i32>} : memref<16x1xf32, #tpu.memory_space<vmem>>, vector<16x1xf32>,
    return
  }
  func.func @transform_0(%arg0: i32) -> (i32, i32) {
    %c0_i32 = arith.constant 0 : i32
    %c0_i32_0 = arith.constant 0 : i32
    return %arg0, %c0_i32 : i32, i32
  }
  func.func @transform_1(%arg0: i32) -> (i32, i32, i32) {
    %c0_i32 = arith.constant 0 : i32
    %c0_i32_0 = arith.constant 0 : i32
    %c0_i32_1 = arith.constant 0 : i32
    %c0_i32_2 = arith.constant 0 : i32
    return %c0_i32, %c0_i32_0, %c0_i32_1 : i32, i32, i32
  }
  func.func @transform_2(%arg0: i32) -> (i32, i32, i32) {
    %c0_i32 = arith.constant 0 : i32
    %c0_i32_0 = arith.constant 0 : i32
    %c0_i32_1 = arith.constant 0 : i32
    %c0_i32_2 = arith.constant 0 : i32
    return %c0_i32, %c0_i32_0, %c0_i32_1 : i32, i32, i32
  }
  func.func @transform_3(%arg0: i32) -> (i32, i32, i32) {
    %c0_i32 = arith.constant 0 : i32
    %c0_i32_0 = arith.constant 0 : i32
    %c0_i32_1 = arith.constant 0 : i32
    %c0_i32_2 = arith.constant 0 : i32
    return %c0_i32, %c0_i32_0, %c0_i32_1 : i32, i32, i32
  }
  func.func @transform_4(%arg0: i32) -> (i32, i32, i32) {
    %c0_i32 = arith.constant 0 : i32
    %c0_i32_0 = arith.constant 0 : i32
    %c0_i32_1 = arith.constant 0 : i32
    %c0_i32_2 = arith.constant 0 : i32
    return %c0_i32, %c0_i32_0, %c0_i32_1 : i32, i32, i32
  }
  func.func @transform_5(%arg0: i32) -> (i32, i32) {
    %c0_i32 = arith.constant 0 : i32
    %c0_i32_0 = arith.constant 0 : i32
    %c0_i32_1 = arith.constant 0 : i32
    return %c0_i32, %c0_i32_0 : i32, i32
  }
  func.func @transform_6(%arg0: i32) -> (i32, i32) {
    %c0_i32 = arith.constant 0 : i32
    %c0_i32_0 = arith.constant 0 : i32
    %c0_i32_1 = arith.constant 0 : i32
    return %c0_i32, %c0_i32_0 : i32, i32
  }
  func.func @transform_7(%arg0: i32) -> (i32, i32) {
    %c0_i32 = arith.constant 0 : i32
    %c0_i32_0 = arith.constant 0 : i32
    return %arg0, %c0_i32 : i32, i32
  }
}

</mosaic_0001>

<bundles_post_ra>
// kernel: tpu_custom_call.1
= control target key start
LH: loop header
LB: loop body
LE: loop exit
PB: predicated region body
PF: predicated region fallthrough
CT: control target
= control target key end

     0   :  { %s9878_s0 = inlined_call_operand.hbm [shape: f32[16,512], index: 0, kind: input, shape index: {}]   ;;  %s9879_s1 = inlined_call_operand.hbm [shape: f32[5,512,640], index: 1, kind: input, shape index: {}]   ;;  %s9880_s2 = inlined_call_operand.hbm [shape: f32[5,1,640], index: 2, kind: input, shape index: {}]   ;;  %s9881_s3 = inlined_call_operand.hbm [shape: f32[5,640,128], index: 3, kind: input, shape index: {}]   ;;  %s9882_s4 = inlined_call_operand.hbm [shape: f32[5,1,128], index: 4, kind: input, shape index: {}]   ;;  %s9883_s5 = inlined_call_operand.hbm [shape: f32[1,128], index: 5, kind: input, shape index: {}]   ;;  %s9884_s6 = inlined_call_operand.<no memory space> [shape: f32[1,1], index: 6, kind: input, shape index: {}]   ;;  %s9885_s7 = inlined_call_operand.vmem [shape: f32[16,1], index: 7, kind: output, shape index: {}]  }
   0x1   :  { %v12_v0 = vstv %s9884_s6 }
   0x2   :  { %13 = vst [vmem:[#allocation2] sm:$0x1] %v12_v0 }
   0x3   :  { %14 = vsyncpa [#allocation4], 0 }
   0x4   :  { %15 = vsyncpa [#allocation6], 0 }
   0x5   :  { %16 = vsyncpa [#allocation9], 0 }
   0x6   :  { %17 = vsyncpa [#allocation12], 0  ;;  %s9202_s26 = smov [#allocation5]   ;;  %s9062_s30 = scalar_lea.hbm %s9879_s1, 204800 }
   0x7   :  { %s35_s27 = sshll.u32 %s9202_s26, 4  ;;  %p9063_p0 = scmp.ne.s32.totalorder %s9879_s1, %s9062_s30  ;;  %s36_s27 = int_to_ptr.vmem [resolvable:$true] %s35_s27 }
   0x8   :  { %p9066_p1 = scmp.lt.u32.totalorder %s9062_s30, %s9879_s1 }
   0xa   :  { %p9068_p2 = pnand %p9066_p1, %p9063_p0 }
   0xc   :  { %9071 = shalt.err (!%p9068_p2)
}
   0xd   :  { %s9072_s6 = scalar_lea.vmem %s36_s27, 204800  ;;  %p9077_p4 = scmp.lt.s32.totalorder %s36_s27, %s36_s27 }
   0xe   :  { %p9073_p3 = scmp.ne.s32.totalorder %s36_s27, %s9072_s6  ;;  %p9078_p5 = scmp.lt.s32.totalorder %s9072_s6, %s9072_s6 }
  0x10   :  { %p9079_p6 = por %p9078_p5, %p9077_p4 }
  0x12   :  { %p9080_p7 = pnand %p9079_p6, %p9073_p3 }
  0x14   :  { %9083 = shalt.err (!%p9080_p7)
}
  0x15   :  { %s9203_s12 = smov 640   ;;  %s9204_s13 = smov 40  }
  0x16   :  { %41 = dma.hbm_to_vmem [thread:$0]  %s9879_s1, 204800, %s36_s27, [#allocation6], %s9203_s12, %s9203_s12, %s9204_s13  }
  0x17   :  { %s9205_s16 = smov [#allocation8]   ;;  %s9084_s20 = scalar_lea.hbm %s9881_s3, 51200 }
  0x18   :  { %s59_s17 = sshll.u32 %s9205_s16, 4  ;;  %p9085_p8 = scmp.ne.s32.totalorder %s9881_s3, %s9084_s20  ;;  %s60_s17 = int_to_ptr.vmem [resolvable:$true] %s59_s17 }
  0x19   :  { %p9088_p9 = scmp.lt.u32.totalorder %s9084_s20, %s9881_s3 }
  0x1b   :  { %p9090_p10 = pnand %p9088_p9, %p9085_p8 }
  0x1d   :  { %9093 = shalt.err (!%p9090_p10)
}
  0x1e   :  { %s9094_s25 = scalar_lea.vmem %s60_s17, 51200  ;;  %p9099_p12 = scmp.lt.s32.totalorder %s60_s17, %s60_s17 }
  0x1f   :  { %p9095_p11 = scmp.ne.s32.totalorder %s60_s17, %s9094_s25  ;;  %p9100_p13 = scmp.lt.s32.totalorder %s9094_s25, %s9094_s25 }
  0x21   :  { %p9101_p0 = por %p9100_p13, %p9099_p12 }
  0x23   :  { %p9102_p1 = pnand %p9101_p0, %p9095_p11 }
  0x25   :  { %9105 = shalt.err (!%p9102_p1)
}
  0x26   :  { %s9206_s1 = smov 128   ;;  %s9207_s26 = smov 8  }
  0x27   :  { %65 = dma.hbm_to_vmem [thread:$0]  %s9881_s3, 51200, %s60_s17, [#allocation9], %s9206_s1, %s9206_s1, %s9207_s26  }
  0x28   :  { %s9208_s29 = smov [#allocation3]   ;;  %s9106_s10 = scalar_lea.hbm %s9878_s0, 1024 }
  0x29   :  { %s23_s30 = sshll.u32 %s9208_s29, 4  ;;  %p9107_p2 = scmp.ne.s32.totalorder %s9878_s0, %s9106_s10  ;;  %s24_s30 = int_to_ptr.vmem [resolvable:$true] %s23_s30 }
  0x2a   :  { %p9110_p3 = scmp.lt.u32.totalorder %s9106_s10, %s9878_s0 }
  0x2c   :  { %p9112_p4 = pnand %p9110_p3, %p9107_p2 }
  0x2e   :  { %9115 = shalt.err (!%p9112_p4)
}
  0x2f   :  { %s9116_s14 = scalar_lea.vmem %s24_s30, 1024  ;;  %p9121_p6 = scmp.lt.s32.totalorder %s24_s30, %s24_s30 }
  0x30   :  { %p9117_p5 = scmp.ne.s32.totalorder %s24_s30, %s9116_s14  ;;  %p9122_p7 = scmp.lt.s32.totalorder %s9116_s14, %s9116_s14 }
  0x32   :  { %p9123_p8 = por %p9122_p7, %p9121_p6 }
  0x34   :  { %p9124_p9 = pnand %p9123_p8, %p9117_p5 }
  0x36   :  { %9127 = shalt.err (!%p9124_p9)
}
  0x37   :  { %s9209_s3 = smov 512   ;;  %s9210_s15 = smov 32  }
  0x38   :  { %29 = dma.hbm_to_vmem [thread:$0]  %s9878_s0, 1024, %s24_s30, [#allocation4], %s9209_s3, %s9209_s3, %s9210_s15  }
  0x39   :  { %s9211_s18 = smov [#allocation7]   ;;  %s9128_s22 = scalar_lea.hbm %s9880_s2, 400 }
  0x3a   :  { %s47_s19 = sshll.u32 %s9211_s18, 4  ;;  %p9129_p10 = scmp.ne.s32.totalorder %s9880_s2, %s9128_s22  ;;  %s48_s19 = int_to_ptr.vmem [resolvable:$true] %s47_s19 }
  0x3b   :  { %p9132_p11 = scmp.lt.u32.totalorder %s9128_s22, %s9880_s2 }
  0x3d   :  { %p9134_p12 = pnand %p9132_p11, %p9129_p10 }
  0x3f   :  { %9137 = shalt.err (!%p9134_p12)
}
  0x40   :  { %s9138_s26 = scalar_lea.vmem %s48_s19, 400  ;;  %s9142_s0 = scalar_lea.vmem %s48_s19, 416 }
  0x41   :  { %p9139_p13 = scmp.ne.s32.totalorder %s48_s19, %s9138_s26  ;;  %p9143_p0 = scmp.lt.s32.totalorder %s48_s19, %s48_s19 }
  0x42   :  { %p9144_p1 = scmp.lt.s32.totalorder %s9142_s0, %s9138_s26 }
  0x44   :  { %p9145_p2 = por %p9144_p1, %p9143_p0 }
  0x46   :  { %p9146_p3 = pnand %p9145_p2, %p9139_p13 }
  0x48   :  { %9149 = shalt.err (!%p9146_p3)
}
  0x49   :  { %s9212_s27 = smov 80   ;;  %s9213_s28 = smov 5  }
  0x4a   :  { %53 = dma.hbm_to_vmem [thread:$0]  %s9880_s2, 400, %s48_s19, [#allocation6], %s9212_s27, %s9212_s27, %s9213_s28  }
  0x4b   :  { %s9214_s8 = smov [#allocation10]   ;;  %s9150_s6 = scalar_lea.hbm %s9882_s4, 80 }
  0x4c   :  { %s71_s9 = sshll.u32 %s9214_s8, 4  ;;  %p9151_p4 = scmp.ne.s32.totalorder %s9882_s4, %s9150_s6  ;;  %s72_s9 = int_to_ptr.vmem [resolvable:$true] %s71_s9 }
  0x4d   :  { %p9154_p5 = scmp.lt.u32.totalorder %s9150_s6, %s9882_s4 }
  0x4f   :  { %p9156_p6 = pnand %p9154_p5, %p9151_p4 }
  0x51   :  { %9159 = shalt.err (!%p9156_p6)
}
  0x52   :  { %s9160_s15 = scalar_lea.vmem %s72_s9, 80  ;;  %s9164_s2 = scalar_lea.vmem %s72_s9, 96 }
  0x53   :  { %p9161_p7 = scmp.ne.s32.totalorder %s72_s9, %s9160_s15  ;;  %p9165_p8 = scmp.lt.s32.totalorder %s72_s9, %s72_s9 }
  0x54   :  { %p9166_p9 = scmp.lt.s32.totalorder %s9164_s2, %s9160_s15 }
  0x56   :  { %p9167_p10 = por %p9166_p9, %p9165_p8 }
  0x58   :  { %p9168_p11 = pnand %p9167_p10, %p9161_p7 }
  0x5a   :  { %9171 = shalt.err (!%p9168_p11)
}
  0x5b   :  { %s9215_s16 = smov 16   ;;  %s9216_s17 = smov 1  }
  0x5c   :  { %77 = dma.hbm_to_vmem [thread:$0]  %s9882_s4, 80, %s72_s9, [#allocation9], %s9215_s16, %s9215_s16, %s9216_s17  }
  0x5d   :  { %s9217_s20 = smov [#allocation11]   ;;  %s9172_s24 = scalar_lea.hbm %s9883_s5, 16 }
  0x5e   :  { %s84_s21 = sshll.u32 %s9217_s20, 4  ;;  %p9173_p12 = scmp.ne.s32.totalorder %s9883_s5, %s9172_s24  ;;  %s85_s21 = int_to_ptr.vmem [resolvable:$true] %s84_s21 }
  0x5f   :  { %p9176_p13 = scmp.lt.u32.totalorder %s9172_s24, %s9883_s5 }
  0x61   :  { %p9178_p0 = pnand %p9176_p13, %p9173_p12 }
  0x63   :  { %9181 = shalt.err (!%p9178_p0)
}
  0x64   :  { %s9182_s27 = scalar_lea.vmem %s85_s21, 16  ;;  %s9186_s4 = scalar_lea.vmem %s85_s21, 32 }
  0x65   :  { %p9183_p1 = scmp.ne.s32.totalorder %s85_s21, %s9182_s27  ;;  %p9187_p2 = scmp.lt.s32.totalorder %s85_s21, %s85_s21 }
  0x66   :  { %p9188_p3 = scmp.lt.s32.totalorder %s9186_s4, %s9182_s27 }
  0x68   :  { %p9189_p4 = por %p9188_p3, %p9187_p2 }
  0x6a   :  { %p9190_p5 = pnand %p9189_p4, %p9183_p1 }
  0x6c   :  { %9193 = shalt.err (!%p9190_p5)
}
  0x6d   :  { %87 = dma.hbm_to_vmem [thread:$0]  %s9883_s5, 16, %s85_s21, [#allocation12]  }
  0x6e   :  { %9194 = dma.done.wait [#allocation4], 1024  }
  0x6f   :  { %9195 = vsyncadd [#allocation4], 4294966272 }
  0x70   :  { %9196 = dma.done.wait [#allocation6], 205200  }
  0x71   :  { %9197 = vsyncadd [#allocation6], 4294762096 }
  0x72   :  { %9198 = dma.done.wait [#allocation9], 51280  }
  0x73   :  { %9199 = vsyncadd [#allocation9], 4294916016 }
  0x74   :  { %9200 = dma.done.wait [#allocation12], 16  }
  0x75   :  { %9201 = vsyncadd [#allocation12], 4294967280  ;;  %v117_v1 = vld [vmem:[#allocation5 + $0x8] sm:$0xff]  ;;  %v122_v2 = vld [vmem:[#allocation5 + $0x30] sm:$0xff]  ;;  %vm5799_vm0 = vcmask 7168  }
  0x76   :  { %v119_v3 = vld [vmem:[#allocation5 + $0x18] sm:$0xff]  ;;  %v6844_v4 = vpack.c.bf16 %v122_v2, %v117_v1  ;;  %v124_v5 = vld [vmem:[#allocation5 + $0x40] sm:$0xff]  ;;  %v121_v7 = vld [vmem:[#allocation5 + $0x28] sm:$0xff] }
  0x77   :  { %v116_v6 = vld [vmem:[#allocation5] sm:$0xff]  ;;  %v6972_v8 = vpack.c.bf16 %v124_v5, %v119_v3  ;;  %v118_v10 = vld [vmem:[#allocation5 + $0x10] sm:$0xff]  ;;  %v123_v11 = vld [vmem:[#allocation5 + $0x38] sm:$0xff] }
  0x78   :  { %v6846_v9 = vpack.c.bf16 %v121_v7, %v116_v6  ;;  %v127_v12 = vld [vmem:[#allocation5 + $0x58] sm:$0xff]  ;;  %6845 = vmatprep.subr.bf16.mxu0 %v6844_v4  ;;  %v6974_v13 = vpack.c.bf16 %v123_v11, %v118_v10  ;;  %v132_v14 = vld [vmem:[#allocation5 + $0x80] sm:$0xff]  ;;  %v129_v15 = vld [vmem:[#allocation5 + $0x68] sm:$0xff] }
  0x79   :  { %v134_v16 = vld [vmem:[#allocation5 + $0x90] sm:$0xff]  ;;  %6973 = vmatprep.subr.bf16.mxu1 %v6972_v8  ;;  %v6848_v17 = vpack.c.bf16 %v132_v14, %v127_v12  ;;  %v131_v20 = vld [vmem:[#allocation5 + $0x78] sm:$0xff]  ;;  %v128_v21 = vld [vmem:[#allocation5 + $0x60] sm:$0xff] }
  0x7a   :  { %6847 = vmatpush1.bf16.msra.mxu0 %v6846_v9  ;;  %v6976_v18 = vpack.c.bf16 %v134_v16, %v129_v15  ;;  %v126_v19 = vld [vmem:[#allocation5 + $0x50] sm:$0xff]  ;;  %6975 = vmatpush1.bf16.msra.mxu1 %v6974_v13  ;;  %v133_v23 = vld [vmem:[#allocation5 + $0x88] sm:$0xff]  ;;  %v139_v28 = vld [vmem:[#allocation5 + $0xb8] sm:$0xff] }
  0x7b   :  { %v6850_v22 = vpack.c.bf16 %v131_v20, %v126_v19  ;;  %v137_v24 = vld [vmem:[#allocation5 + $0xa8] sm:$0xff]  ;;  %v142_v25 = vld [vmem:[#allocation5 + $0xd0] sm:$0xff]  ;;  %6849 = vmatprep.subr.bf16.mxu0 %v6848_v17  ;;  %v6978_v26 = vpack.c.bf16 %v133_v23, %v128_v21  ;;  %v144_v29 = vld [vmem:[#allocation5 + $0xe0] sm:$0xff] }
  0x7c   :  { %6977 = vmatprep.subr.bf16.mxu1 %v6976_v18  ;;  %v6852_v27 = vpack.c.bf16 %v142_v25, %v137_v24  ;;  %v136_v30 = vld [vmem:[#allocation5 + $0xa0] sm:$0xff]  ;;  %v6980_v31 = vpack.c.bf16 %v144_v29, %v139_v28  ;;  %v141_v32 = vld [vmem:[#allocation5 + $0xc8] sm:$0xff]  ;;  %v138_v33 = vld [vmem:[#allocation5 + $0xb0] sm:$0xff] }
  0x7d   :  { %v143_v34 = vld [vmem:[#allocation5 + $0xd8] sm:$0xff]  ;;  %v6854_v35 = vpack.c.bf16 %v141_v32, %v136_v30  ;;  %v152_v37 = vld [vmem:[#allocation5 + $0x120] sm:$0xff]  ;;  %v149_v38 = vld [vmem:[#allocation5 + $0x108] sm:$0xff] }
  0x7e   :  { %6851 = vmatpush1.bf16.msra.mxu0 %v6850_v22  ;;  %v147_v36 = vld [vmem:[#allocation5 + $0xf8] sm:$0xff]  ;;  %6979 = vmatpush1.bf16.msra.mxu1 %v6978_v26  ;;  %v6982_v39 = vpack.c.bf16 %v143_v34, %v138_v33  ;;  %v154_v41 = vld [vmem:[#allocation5 + $0x130] sm:$0xff]  ;;  %v148_v45 = vld [vmem:[#allocation5 + $0x100] sm:$0xff] }
  0x7f   :  { %6853 = vmatprep.subr.bf16.mxu0 %v6852_v27  ;;  %v6856_v40 = vpack.c.bf16 %v152_v37, %v147_v36  ;;  %v146_v42 = vld [vmem:[#allocation5 + $0xf0] sm:$0xff]  ;;  %v151_v43 = vld [vmem:[#allocation5 + $0x118] sm:$0xff]  ;;  %6981 = vmatprep.subr.bf16.mxu1 %v6980_v31  ;;  %v6984_v44 = vpack.c.bf16 %v154_v41, %v149_v38  ;;  %v153_v46 = vld [vmem:[#allocation5 + $0x128] sm:$0xff] }
  0x80   :  { %v157_v47 = vld [vmem:[#allocation5 + $0x148] sm:$0xff]  ;;  %v162_v48 = vld [vmem:[#allocation5 + $0x170] sm:$0xff]  ;;  %v159_v49 = vld [vmem:[#allocation5 + $0x158] sm:$0xff]  ;;  %v6858_v51 = vpack.c.bf16 %v151_v43, %v146_v42  ;;  %v6986_v52 = vpack.c.bf16 %v153_v46, %v148_v45 }
  0x81   :  { %v164_v50 = vld [vmem:[#allocation5 + $0x180] sm:$0xff]  ;;  %v6860_v53 = vpack.c.bf16 %v162_v48, %v157_v47  ;;  %v161_v55 = vld [vmem:[#allocation5 + $0x168] sm:$0xff]  ;;  %v158_v56 = vld [vmem:[#allocation5 + $0x150] sm:$0xff] }
  0x82   :  { %6855 = vmatpush1.bf16.msra.mxu0 %v6854_v35  ;;  %6983 = vmatpush1.bf16.msra.mxu1 %v6982_v39  ;;  %v156_v54 = vld [vmem:[#allocation5 + $0x140] sm:$0xff]  ;;  %v6988_v57 = vpack.c.bf16 %v164_v50, %v159_v49  ;;  %v163_v58 = vld [vmem:[#allocation5 + $0x178] sm:$0xff]  ;;  %v169_v61 = vld [vmem:[#allocation5 + $0x1a8] sm:$0xff] }
  0x83   :  { %6857 = vmatprep.subr.bf16.mxu0 %v6856_v40  ;;  %6985 = vmatprep.subr.bf16.mxu1 %v6984_v44  ;;  %v167_v59 = vld [vmem:[#allocation5 + $0x198] sm:$0xff]  ;;  %v172_v60 = vld [vmem:[#allocation5 + $0x1c0] sm:$0xff]  ;;  %v174_v62 = vld [vmem:[#allocation5 + $0x1d0] sm:$0xff]  ;;  %v6862_v63 = vpack.c.bf16 %v161_v55, %v156_v54  ;;  %v6990_v0 = vpack.c.bf16 %v163_v58, %v158_v56 }
  0x84   :  { %v6864_v1 = vpack.c.bf16 %v172_v60, %v167_v59  ;;  %v166_v2 = vld [vmem:[#allocation5 + $0x190] sm:$0xff]  ;;  %v171_v3 = vld [vmem:[#allocation5 + $0x1b8] sm:$0xff]  ;;  %v168_v4 = vld [vmem:[#allocation5 + $0x1a0] sm:$0xff]  ;;  %v6992_v5 = vpack.c.bf16 %v174_v62, %v169_v61 }
  0x85   :  { %v173_v6 = vld [vmem:[#allocation5 + $0x1c8] sm:$0xff]  ;;  %v182_v8 = vld [vmem:[#allocation5 + $0x210] sm:$0xff]  ;;  %v179_v9 = vld [vmem:[#allocation5 + $0x1f8] sm:$0xff]  ;;  %v6866_v11 = vpack.c.bf16 %v171_v3, %v166_v2 }
  0x86   :  { %6859 = vmatpush1.bf16.msra.mxu0 %v6858_v51  ;;  %6987 = vmatpush1.bf16.msra.mxu1 %v6986_v52  ;;  %v177_v7 = vld [vmem:[#allocation5 + $0x1e8] sm:$0xff]  ;;  %v184_v10 = vld [vmem:[#allocation5 + $0x220] sm:$0xff]  ;;  %v6994_v12 = vpack.c.bf16 %v173_v6, %v168_v4  ;;  %v178_v16 = vld [vmem:[#allocation5 + $0x1f0] sm:$0xff] }
  0x87   :  { %6861 = vmatprep.subr.bf16.mxu0 %v6860_v53  ;;  %6989 = vmatprep.subr.bf16.mxu1 %v6988_v57  ;;  %v6868_v13 = vpack.c.bf16 %v182_v8, %v177_v7  ;;  %v176_v14 = vld [vmem:[#allocation5 + $0x1e0] sm:$0xff]  ;;  %v181_v15 = vld [vmem:[#allocation5 + $0x208] sm:$0xff]  ;;  %v6996_v17 = vpack.c.bf16 %v184_v10, %v179_v9  ;;  %v183_v18 = vld [vmem:[#allocation5 + $0x218] sm:$0xff] }
  0x88   :  { %v187_v19 = vld [vmem:[#allocation5 + $0x238] sm:$0xff]  ;;  %v192_v20 = vld [vmem:[#allocation5 + $0x260] sm:$0xff]  ;;  %v189_v21 = vld [vmem:[#allocation5 + $0x248] sm:$0xff]  ;;  %v6870_v23 = vpack.c.bf16 %v181_v15, %v176_v14  ;;  %v6998_v24 = vpack.c.bf16 %v183_v18, %v178_v16 }
  0x89   :  { %v194_v22 = vld [vmem:[#allocation5 + $0x270] sm:$0xff]  ;;  %v6872_v25 = vpack.c.bf16 %v192_v20, %v187_v19  ;;  %v191_v27 = vld [vmem:[#allocation5 + $0x258] sm:$0xff]  ;;  %v188_v28 = vld [vmem:[#allocation5 + $0x240] sm:$0xff] }
  0x8a   :  { %6863 = vmatpush1.bf16.msra.mxu0 %v6862_v63  ;;  %6991 = vmatpush1.bf16.msra.mxu1 %v6990_v0  ;;  %v186_v26 = vld [vmem:[#allocation5 + $0x230] sm:$0xff]  ;;  %v7000_v29 = vpack.c.bf16 %v194_v22, %v189_v21  ;;  %v193_v30 = vld [vmem:[#allocation5 + $0x268] sm:$0xff]  ;;  %v199_v33 = vld [vmem:[#allocation5 + $0x298] sm:$0xff] }
  0x8b   :  { %6865 = vmatprep.subr.bf16.mxu0 %v6864_v1  ;;  %6993 = vmatprep.subr.bf16.mxu1 %v6992_v5  ;;  %v197_v31 = vld [vmem:[#allocation5 + $0x288] sm:$0xff]  ;;  %v202_v32 = vld [vmem:[#allocation5 + $0x2b0] sm:$0xff]  ;;  %v204_v34 = vld [vmem:[#allocation5 + $0x2c0] sm:$0xff]  ;;  %v6874_v35 = vpack.c.bf16 %v191_v27, %v186_v26  ;;  %v7002_v36 = vpack.c.bf16 %v193_v30, %v188_v28 }
  0x8c   :  { %v6876_v37 = vpack.c.bf16 %v202_v32, %v197_v31  ;;  %v196_v38 = vld [vmem:[#allocation5 + $0x280] sm:$0xff]  ;;  %v201_v39 = vld [vmem:[#allocation5 + $0x2a8] sm:$0xff]  ;;  %v198_v40 = vld [vmem:[#allocation5 + $0x290] sm:$0xff]  ;;  %v7004_v41 = vpack.c.bf16 %v204_v34, %v199_v33 }
  0x8d   :  { %v203_v42 = vld [vmem:[#allocation5 + $0x2b8] sm:$0xff]  ;;  %v212_v44 = vld [vmem:[#allocation5 + $0x300] sm:$0xff]  ;;  %v209_v45 = vld [vmem:[#allocation5 + $0x2e8] sm:$0xff]  ;;  %v6878_v47 = vpack.c.bf16 %v201_v39, %v196_v38 }
  0x8e   :  { %6867 = vmatpush1.bf16.msra.mxu0 %v6866_v11  ;;  %6995 = vmatpush1.bf16.msra.mxu1 %v6994_v12  ;;  %v207_v43 = vld [vmem:[#allocation5 + $0x2d8] sm:$0xff]  ;;  %v214_v46 = vld [vmem:[#allocation5 + $0x310] sm:$0xff]  ;;  %v7006_v48 = vpack.c.bf16 %v203_v42, %v198_v40  ;;  %v208_v52 = vld [vmem:[#allocation5 + $0x2e0] sm:$0xff] }
  0x8f   :  { %6869 = vmatprep.subr.bf16.mxu0 %v6868_v13  ;;  %6997 = vmatprep.subr.bf16.mxu1 %v6996_v17  ;;  %v6880_v49 = vpack.c.bf16 %v212_v44, %v207_v43  ;;  %v206_v50 = vld [vmem:[#allocation5 + $0x2d0] sm:$0xff]  ;;  %v211_v51 = vld [vmem:[#allocation5 + $0x2f8] sm:$0xff]  ;;  %v7008_v53 = vpack.c.bf16 %v214_v46, %v209_v45  ;;  %v213_v54 = vld [vmem:[#allocation5 + $0x308] sm:$0xff] }
  0x90   :  { %v217_v55 = vld [vmem:[#allocation5 + $0x328] sm:$0xff]  ;;  %v222_v56 = vld [vmem:[#allocation5 + $0x350] sm:$0xff]  ;;  %v219_v57 = vld [vmem:[#allocation5 + $0x338] sm:$0xff]  ;;  %v6882_v59 = vpack.c.bf16 %v211_v51, %v206_v50  ;;  %v7010_v60 = vpack.c.bf16 %v213_v54, %v208_v52 }
  0x91   :  { %v224_v58 = vld [vmem:[#allocation5 + $0x360] sm:$0xff]  ;;  %v6884_v61 = vpack.c.bf16 %v222_v56, %v217_v55  ;;  %v221_v63 = vld [vmem:[#allocation5 + $0x348] sm:$0xff]  ;;  %v218_v0 = vld [vmem:[#allocation5 + $0x330] sm:$0xff] }
  0x92   :  { %6871 = vmatpush1.bf16.msra.mxu0 %v6870_v23  ;;  %6999 = vmatpush1.bf16.msra.mxu1 %v6998_v24  ;;  %v216_v62 = vld [vmem:[#allocation5 + $0x320] sm:$0xff]  ;;  %v7012_v1 = vpack.c.bf16 %v224_v58, %v219_v57  ;;  %v223_v2 = vld [vmem:[#allocation5 + $0x358] sm:$0xff]  ;;  %v229_v5 = vld [vmem:[#allocation5 + $0x388] sm:$0xff] }
  0x93   :  { %6873 = vmatprep.subr.bf16.mxu0 %v6872_v25  ;;  %7001 = vmatprep.subr.bf16.mxu1 %v7000_v29  ;;  %v227_v3 = vld [vmem:[#allocation5 + $0x378] sm:$0xff]  ;;  %v232_v4 = vld [vmem:[#allocation5 + $0x3a0] sm:$0xff]  ;;  %v234_v6 = vld [vmem:[#allocation5 + $0x3b0] sm:$0xff]  ;;  %v6886_v7 = vpack.c.bf16 %v221_v63, %v216_v62  ;;  %v7014_v9 = vpack.c.bf16 %v223_v2, %v218_v0 }
  0x94   :  { %v226_v8 = vld [vmem:[#allocation5 + $0x370] sm:$0xff]  ;;  %v6888_v10 = vpack.c.bf16 %v232_v4, %v227_v3  ;;  %v231_v11 = vld [vmem:[#allocation5 + $0x398] sm:$0xff]  ;;  %v228_v12 = vld [vmem:[#allocation5 + $0x380] sm:$0xff]  ;;  %v7016_v14 = vpack.c.bf16 %v234_v6, %v229_v5 }
  0x95   :  { %v233_v13 = vld [vmem:[#allocation5 + $0x3a8] sm:$0xff]  ;;  %v242_v16 = vld [vmem:[#allocation5 + $0x3f0] sm:$0xff]  ;;  %v239_v18 = vld [vmem:[#allocation5 + $0x3d8] sm:$0xff]  ;;  %v6890_v20 = vpack.c.bf16 %v231_v11, %v226_v8 }
  0x96   :  { %6875 = vmatpush1.bf16.msra.mxu0 %v6874_v35  ;;  %7003 = vmatpush1.bf16.msra.mxu1 %v7002_v36  ;;  %v237_v15 = vld [vmem:[#allocation5 + $0x3c8] sm:$0xff]  ;;  %v244_v19 = vld [vmem:[#allocation5 + $0x400] sm:$0xff]  ;;  %v7018_v21 = vpack.c.bf16 %v233_v13, %v228_v12  ;;  %v238_v25 = vld [vmem:[#allocation5 + $0x3d0] sm:$0xff] }
  0x97   :  { %6877 = vmatprep.subr.bf16.mxu0 %v6876_v37  ;;  %7005 = vmatprep.subr.bf16.mxu1 %v7004_v41  ;;  %v9333_v17 = vld [vmem:[#allocation3 + $0x8] sm:$0xff]  ;;  %v6892_v22 = vpack.c.bf16 %v242_v16, %v237_v15  ;;  %v236_v23 = vld [vmem:[#allocation5 + $0x3c0] sm:$0xff]  ;;  %v7020_v26 = vpack.c.bf16 %v244_v19, %v239_v18  ;;  %v243_v27 = vld [vmem:[#allocation5 + $0x3f8] sm:$0xff] }
  0x98   :  { %527 = vmatprep.mubr.f32.mxu0 %v9333_v17  ;;  %681 = vmatprep.mubr.f32.mxu1 %v9333_v17  ;;  %v241_v24 = vld [vmem:[#allocation5 + $0x3e8] sm:$0xff]  ;;  %v247_v28 = vld [vmem:[#allocation5 + $0x418] sm:$0xff]  ;;  %v252_v29 = vld [vmem:[#allocation5 + $0x440] sm:$0xff]  ;;  %v7022_v33 = vpack.c.bf16 %v243_v27, %v238_v25 }
  0x99   :  { %v249_v30 = vld [vmem:[#allocation5 + $0x428] sm:$0xff]  ;;  %v254_v31 = vld [vmem:[#allocation5 + $0x450] sm:$0xff]  ;;  %v6894_v32 = vpack.c.bf16 %v241_v24, %v236_v23  ;;  %v6896_v34 = vpack.c.bf16 %v252_v29, %v247_v28  ;;  %v251_v36 = vld [vmem:[#allocation5 + $0x438] sm:$0xff] }
  0x9a   :  { %6879 = vmatpush1.bf16.msra.mxu0 %v6878_v47  ;;  %7007 = vmatpush1.bf16.msra.mxu1 %v7006_v48  ;;  %v246_v35 = vld [vmem:[#allocation5 + $0x410] sm:$0xff]  ;;  %v248_v37 = vld [vmem:[#allocation5 + $0x420] sm:$0xff]  ;;  %v7024_v38 = vpack.c.bf16 %v254_v31, %v249_v30  ;;  %v253_v39 = vld [vmem:[#allocation5 + $0x448] sm:$0xff] }
  0x9b   :  { %6881 = vmatprep.subr.bf16.mxu0 %v6880_v49  ;;  %7009 = vmatprep.subr.bf16.mxu1 %v7008_v53  ;;  %v257_v40 = vld [vmem:[#allocation5 + $0x468] sm:$0xff]  ;;  %v262_v41 = vld [vmem:[#allocation5 + $0x490] sm:$0xff]  ;;  %v259_v42 = vld [vmem:[#allocation5 + $0x478] sm:$0xff]  ;;  %v6898_v44 = vpack.c.bf16 %v251_v36, %v246_v35  ;;  %v7026_v45 = vpack.c.bf16 %v253_v39, %v248_v37 }
  0x9c   :  { %v264_v43 = vld [vmem:[#allocation5 + $0x4a0] sm:$0xff]  ;;  %v6900_v46 = vpack.c.bf16 %v262_v41, %v257_v40  ;;  %v261_v48 = vld [vmem:[#allocation5 + $0x488] sm:$0xff]  ;;  %v258_v49 = vld [vmem:[#allocation5 + $0x470] sm:$0xff] }
  0x9d   :  { %v256_v47 = vld [vmem:[#allocation5 + $0x460] sm:$0xff]  ;;  %v7028_v50 = vpack.c.bf16 %v264_v43, %v259_v42  ;;  %v263_v51 = vld [vmem:[#allocation5 + $0x498] sm:$0xff]  ;;  %v269_v54 = vld [vmem:[#allocation5 + $0x4c8] sm:$0xff] }
  0x9e   :  { %6883 = vmatpush1.bf16.msra.mxu0 %v6882_v59  ;;  %7011 = vmatpush1.bf16.msra.mxu1 %v7010_v60  ;;  %v267_v52 = vld [vmem:[#allocation5 + $0x4b8] sm:$0xff]  ;;  %v272_v53 = vld [vmem:[#allocation5 + $0x4e0] sm:$0xff]  ;;  %v274_v55 = vld [vmem:[#allocation5 + $0x4f0] sm:$0xff]  ;;  %v6902_v56 = vpack.c.bf16 %v261_v48, %v256_v47  ;;  %v7030_v57 = vpack.c.bf16 %v263_v51, %v258_v49 }
  0x9f   :  { %6885 = vmatprep.subr.bf16.mxu0 %v6884_v61  ;;  %7013 = vmatprep.subr.bf16.mxu1 %v7012_v1  ;;  %v6904_v58 = vpack.c.bf16 %v272_v53, %v267_v52  ;;  %v266_v59 = vld [vmem:[#allocation5 + $0x4b0] sm:$0xff]  ;;  %v271_v60 = vld [vmem:[#allocation5 + $0x4d8] sm:$0xff]  ;;  %v268_v61 = vld [vmem:[#allocation5 + $0x4c0] sm:$0xff]  ;;  %v7032_v62 = vpack.c.bf16 %v274_v55, %v269_v54 }
  0xa0   :  { %v273_v63 = vld [vmem:[#allocation5 + $0x4e8] sm:$0xff]  ;;  %v282_v1 = vld [vmem:[#allocation5 + $0x530] sm:$0xff]  ;;  %v279_v2 = vld [vmem:[#allocation5 + $0x518] sm:$0xff]  ;;  %v6906_v4 = vpack.c.bf16 %v271_v60, %v266_v59 }
  0xa1   :  { %v277_v0 = vld [vmem:[#allocation5 + $0x508] sm:$0xff]  ;;  %v284_v3 = vld [vmem:[#allocation5 + $0x540] sm:$0xff]  ;;  %v7034_v5 = vpack.c.bf16 %v273_v63, %v268_v61  ;;  %v283_v11 = vld [vmem:[#allocation5 + $0x538] sm:$0xff] }
  0xa2   :  { %6887 = vmatpush1.bf16.msra.mxu0 %v6886_v7  ;;  %7015 = vmatpush1.bf16.msra.mxu1 %v7014_v9  ;;  %v6908_v6 = vpack.c.bf16 %v282_v1, %v277_v0  ;;  %v276_v7 = vld [vmem:[#allocation5 + $0x500] sm:$0xff]  ;;  %v281_v8 = vld [vmem:[#allocation5 + $0x528] sm:$0xff]  ;;  %v278_v9 = vld [vmem:[#allocation5 + $0x510] sm:$0xff] }
  0xa3   :  { %6889 = vmatprep.subr.bf16.mxu0 %v6888_v10  ;;  %7017 = vmatprep.subr.bf16.mxu1 %v7016_v14  ;;  %v7036_v10 = vpack.c.bf16 %v284_v3, %v279_v2  ;;  %v287_v12 = vld [vmem:[#allocation5 + $0x558] sm:$0xff]  ;;  %v292_v13 = vld [vmem:[#allocation5 + $0x580] sm:$0xff]  ;;  %v289_v14 = vld [vmem:[#allocation5 + $0x568] sm:$0xff]  ;;  %v6910_v18 = vpack.c.bf16 %v281_v8, %v276_v7  ;;  %v7038_v19 = vpack.c.bf16 %v283_v11, %v278_v9 }
  0xa4   :  { %v294_v15 = vld [vmem:[#allocation5 + $0x590] sm:$0xff]  ;;  %v9337_v16 = vld [vmem:[#allocation3] sm:$0xff]  ;;  %v293_v25 = vld [vmem:[#allocation5 + $0x588] sm:$0xff] }
  0xa5   :  { %v288_v23 = vld [vmem:[#allocation5 + $0x560] sm:$0xff]  ;;  %v7040_v24 = vpack.c.bf16 %v294_v15, %v289_v14  ;;  %v302_v27 = vld [vmem:[#allocation5 + $0x5d0] sm:$0xff]  ;;  %v299_v28 = vld [vmem:[#allocation5 + $0x5b8] sm:$0xff] }
  0xa6   :  { %6891 = vmatpush1.bf16.msra.mxu0 %v6890_v20  ;;  %7019 = vmatpush1.bf16.msra.mxu1 %v7018_v21  ;;  %v6912_v20 = vpack.c.bf16 %v292_v13, %v287_v12  ;;  %v286_v21 = vld [vmem:[#allocation5 + $0x550] sm:$0xff]  ;;  %v304_v29 = vld [vmem:[#allocation5 + $0x5e0] sm:$0xff]  ;;  %v7042_v31 = vpack.c.bf16 %v293_v25, %v288_v23  ;;  %v303_v37 = vld [vmem:[#allocation5 + $0x5d8] sm:$0xff] }
  0xa7   :  { %6893 = vmatprep.subr.bf16.mxu0 %v6892_v22  ;;  %7021 = vmatprep.subr.bf16.mxu1 %v7020_v26  ;;  %v291_v22 = vld [vmem:[#allocation5 + $0x578] sm:$0xff]  ;;  %v297_v26 = vld [vmem:[#allocation5 + $0x5a8] sm:$0xff]  ;;  %v298_v35 = vld [vmem:[#allocation5 + $0x5b0] sm:$0xff]  ;;  %v7044_v36 = vpack.c.bf16 %v304_v29, %v299_v28 }
  0xa8   :  { %v6914_v30 = vpack.c.bf16 %v291_v22, %v286_v21  ;;  %v312_v39 = vld [vmem:[#allocation5 + $0x620] sm:$0xff]  ;;  %v309_v40 = vld [vmem:[#allocation5 + $0x608] sm:$0xff]  ;;  %v314_v41 = vld [vmem:[#allocation5 + $0x630] sm:$0xff]  ;;  %v7046_v43 = vpack.c.bf16 %v303_v37, %v298_v35 }
  0xa9   :  { %v308_v47 = vld [vmem:[#allocation5 + $0x600] sm:$0xff]  ;;  %v7048_v48 = vpack.c.bf16 %v314_v41, %v309_v40  ;;  %v313_v49 = vld [vmem:[#allocation5 + $0x628] sm:$0xff]  ;;  %v322_v51 = vld [vmem:[#allocation5 + $0x670] sm:$0xff] }
  0xaa   :  { %6895 = vmatpush1.bf16.msra.mxu0 %v6894_v32  ;;  %7023 = vmatpush1.bf16.msra.mxu1 %v7022_v33  ;;  %v6916_v32 = vpack.c.bf16 %v302_v27, %v297_v26  ;;  %v296_v33 = vld [vmem:[#allocation5 + $0x5a0] sm:$0xff]  ;;  %v319_v52 = vld [vmem:[#allocation5 + $0x658] sm:$0xff]  ;;  %v7050_v55 = vpack.c.bf16 %v313_v49, %v308_v47  ;;  %v318_v59 = vld [vmem:[#allocation5 + $0x650] sm:$0xff] }
  0xab   :  { %6897 = vmatprep.subr.bf16.mxu0 %v6896_v34  ;;  %7025 = vmatprep.subr.bf16.mxu1 %v7024_v38  ;;  %v301_v34 = vld [vmem:[#allocation5 + $0x5c8] sm:$0xff]  ;;  %v307_v38 = vld [vmem:[#allocation5 + $0x5f8] sm:$0xff]  ;;  %v324_v53 = vld [vmem:[#allocation5 + $0x680] sm:$0xff] }
  0xac   :  { %v6918_v42 = vpack.c.bf16 %v301_v34, %v296_v33  ;;  %v7052_v60 = vpack.c.bf16 %v324_v53, %v319_v52  ;;  %v323_v61 = vld [vmem:[#allocation5 + $0x678] sm:$0xff]  ;;  %v332_v63 = vld [vmem:[#allocation5 + $0x6c0] sm:$0xff]  ;;  %v329_v0 = vld [vmem:[#allocation5 + $0x6a8] sm:$0xff] }
  0xad   :  { %v334_v1 = vld [vmem:[#allocation5 + $0x6d0] sm:$0xff]  ;;  %v7054_v3 = vpack.c.bf16 %v323_v61, %v318_v59  ;;  %v328_v7 = vld [vmem:[#allocation5 + $0x6a0] sm:$0xff]  ;;  %v333_v9 = vld [vmem:[#allocation5 + $0x6c8] sm:$0xff] }
  0xae   :  { %6899 = vmatpush1.bf16.msra.mxu0 %v6898_v44  ;;  %7027 = vmatpush1.bf16.msra.mxu1 %v7026_v45  ;;  %v6920_v44 = vpack.c.bf16 %v312_v39, %v307_v38  ;;  %v306_v45 = vld [vmem:[#allocation5 + $0x5f0] sm:$0xff]  ;;  %v7056_v8 = vpack.c.bf16 %v334_v1, %v329_v0  ;;  %v339_v12 = vld [vmem:[#allocation5 + $0x6f8] sm:$0xff]  ;;  %v344_v13 = vld [vmem:[#allocation5 + $0x720] sm:$0xff] }
  0xaf   :  { %6901 = vmatprep.subr.bf16.mxu0 %v6900_v46  ;;  %7029 = vmatprep.subr.bf16.mxu1 %v7028_v50  ;;  %v311_v46 = vld [vmem:[#allocation5 + $0x618] sm:$0xff]  ;;  %v317_v50 = vld [vmem:[#allocation5 + $0x648] sm:$0xff]  ;;  %v342_v11 = vld [vmem:[#allocation5 + $0x710] sm:$0xff]  ;;  %v7060_v25 = vpack.c.bf16 %v344_v13, %v339_v12 }
  0xb0   :  { %v6922_v54 = vpack.c.bf16 %v311_v46, %v306_v45  ;;  %v9341_v14 = vld [vmem:[#allocation3 + $0x28] sm:$0xff]  ;;  %v338_v23 = vld [vmem:[#allocation5 + $0x6f0] sm:$0xff]  ;;  %v347_v26 = vld [vmem:[#allocation5 + $0x738] sm:$0xff] }
  0xb1   :  { %v341_v22 = vld [vmem:[#allocation5 + $0x708] sm:$0xff]  ;;  %v352_v27 = vld [vmem:[#allocation5 + $0x760] sm:$0xff]  ;;  %v9347_v28 = vld [vmem:[#allocation3 + $0x18] sm:$0xff] }
  0xb2   :  { %6903 = vmatpush1.bf16.msra.mxu0 %v6902_v56  ;;  %7031 = vmatpush1.bf16.msra.mxu1 %v7030_v57  ;;  %v6924_v56 = vpack.c.bf16 %v322_v51, %v317_v50  ;;  %v316_v57 = vld [vmem:[#allocation5 + $0x640] sm:$0xff]  ;;  %v349_v29 = vld [vmem:[#allocation5 + $0x748] sm:$0xff]  ;;  %v6936_v33 = vpack.c.bf16 %v352_v27, %v347_v26  ;;  %v346_v34 = vld [vmem:[#allocation5 + $0x730] sm:$0xff] }
  0xb3   :  { %6905 = vmatprep.subr.bf16.mxu0 %v6904_v58  ;;  %7033 = vmatprep.subr.bf16.mxu1 %v7032_v62  ;;  %v321_v58 = vld [vmem:[#allocation5 + $0x668] sm:$0xff]  ;;  %v327_v62 = vld [vmem:[#allocation5 + $0x698] sm:$0xff]  ;;  %v362_v40 = vld [vmem:[#allocation5 + $0x7b0] sm:$0xff] }
  0xb4   :  { %v6926_v2 = vpack.c.bf16 %v321_v58, %v316_v57  ;;  %v351_v35 = vld [vmem:[#allocation5 + $0x758] sm:$0xff]  ;;  %v353_v38 = vld [vmem:[#allocation5 + $0x768] sm:$0xff]  ;;  %v356_v46 = vld [vmem:[#allocation5 + $0x780] sm:$0xff] }
  0xb5   :  { %v357_v39 = vld [vmem:[#allocation5 + $0x788] sm:$0xff]  ;;  %v359_v41 = vld [vmem:[#allocation5 + $0x798] sm:$0xff]  ;;  %v372_v52 = vld [vmem:[#allocation5 + $0x800] sm:$0xff] }
  0xb6   :  { %6907 = vmatpush1.bf16.msra.mxu0 %v6906_v4  ;;  %7035 = vmatpush1.bf16.msra.mxu1 %v7034_v5  ;;  %v6928_v4 = vpack.c.bf16 %v332_v63, %v327_v62  ;;  %v326_v5 = vld [vmem:[#allocation5 + $0x690] sm:$0xff]  ;;  %v6940_v45 = vpack.c.bf16 %v362_v40, %v357_v39  ;;  %v361_v47 = vld [vmem:[#allocation5 + $0x7a8] sm:$0xff]  ;;  %v363_v50 = vld [vmem:[#allocation5 + $0x7b8] sm:$0xff] }
  0xb7   :  { %6909 = vmatprep.subr.bf16.mxu0 %v6908_v6  ;;  %7037 = vmatprep.subr.bf16.mxu1 %v7036_v10  ;;  %v331_v6 = vld [vmem:[#allocation5 + $0x6b8] sm:$0xff]  ;;  %v337_v10 = vld [vmem:[#allocation5 + $0x6e8] sm:$0xff]  ;;  %v366_v58 = vld [vmem:[#allocation5 + $0x7d0] sm:$0xff] }
  0xb8   :  { %v6930_v15 = vpack.c.bf16 %v331_v6, %v326_v5  ;;  %v6932_v21 = vpack.c.bf16 %v342_v11, %v337_v10  ;;  %v367_v51 = vld [vmem:[#allocation5 + $0x7d8] sm:$0xff]  ;;  %v369_v53 = vld [vmem:[#allocation5 + $0x7e8] sm:$0xff]  ;;  %v382_v0 = vld [vmem:[#allocation5 + $0x850] sm:$0xff] }
  0xb9   :  { %528 = vmatmul.mubr.f32.vlgmr.msra.gmra.mrb[0].mxu0 %v9337_v16  ;;  %682 = vmatmul.mubr.f32.vlgmr.msra.gmra.mrb[0].mxu1 %v9337_v16  ;;  %v6944_v57 = vpack.c.bf16 %v372_v52, %v367_v51  ;;  %v371_v59 = vld [vmem:[#allocation5 + $0x7f8] sm:$0xff]  ;;  %v373_v62 = vld [vmem:[#allocation5 + $0x808] sm:$0xff]  ;;  %v376_v6 = vld [vmem:[#allocation5 + $0x820] sm:$0xff] }
  0xba   :  { %6911 = vmatpush1.bf16.msra.mxu0 %v6910_v18  ;;  %7039 = vmatpush1.bf16.msra.mxu1 %v7038_v19  ;;  %v336_v18 = vld [vmem:[#allocation5 + $0x6e0] sm:$0xff]  ;;  %v377_v63 = vld [vmem:[#allocation5 + $0x828] sm:$0xff]  ;;  %v379_v1 = vld [vmem:[#allocation5 + $0x838] sm:$0xff] }
  0xbb   :  { %6913 = vmatprep.subr.bf16.mxu0 %v6912_v20  ;;  %7041 = vmatprep.subr.bf16.mxu1 %v7040_v24  ;;  %v9344_v19 = vld [vmem:[#allocation3 + $0x20] sm:$0xff]  ;;  %v7058_v20 = vpack.c.bf16 %v333_v9, %v328_v7  ;;  %v343_v24 = vld [vmem:[#allocation5 + $0x718] sm:$0xff]  ;;  %v6948_v5 = vpack.c.bf16 %v382_v0, %v377_v63  ;;  %v381_v7 = vld [vmem:[#allocation5 + $0x848] sm:$0xff] }
  0xbc   :  { %533 = vmatprep.mubr.f32.mxu0 %v9341_v14  ;;  %687 = vmatprep.mubr.f32.mxu1 %v9341_v14  ;;  %v383_v10 = vld [vmem:[#allocation5 + $0x858] sm:$0xff]  ;;  %v392_v12 = vld [vmem:[#allocation5 + $0x8a0] sm:$0xff]  ;;  %v389_v13 = vld [vmem:[#allocation5 + $0x888] sm:$0xff] }
  0xbd   :  { %534 = vmatmul.mubr.f32.gmra.mrb[2].mxu0 %v9344_v19  ;;  %688 = vmatmul.mubr.f32.gmra.mrb[2].mxu1 %v9344_v19  ;;  %v387_v11 = vld [vmem:[#allocation5 + $0x878] sm:$0xff]  ;;  %v393_v26 = vld [vmem:[#allocation5 + $0x8a8] sm:$0xff] }
  0xbe   :  { %6915 = vmatpush1.bf16.msra.mxu0 %v6914_v30  ;;  %7043 = vmatpush1.bf16.msra.mxu1 %v7042_v31  ;;  %v354_v30 = vld [vmem:[#allocation5 + $0x770] sm:$0xff]  ;;  %v6934_v31 = vpack.c.bf16 %v341_v22, %v336_v18  ;;  %v6950_v18 = vpack.c.bf16 %v381_v7, %v376_v6  ;;  %v397_v27 = vld [vmem:[#allocation5 + $0x8c8] sm:$0xff]  ;;  %v403_v39 = vld [vmem:[#allocation5 + $0x8f8] sm:$0xff] }
  0xbf   :  { %6917 = vmatprep.subr.bf16.mxu0 %v6916_v32  ;;  %7045 = vmatprep.subr.bf16.mxu1 %v7044_v36  ;;  %v7062_v32 = vpack.c.bf16 %v343_v24, %v338_v23  ;;  %v348_v36 = vld [vmem:[#allocation5 + $0x740] sm:$0xff]  ;;  %v7064_v37 = vpack.c.bf16 %v354_v30, %v349_v29  ;;  %v386_v22 = vld [vmem:[#allocation5 + $0x870] sm:$0xff]  ;;  %v391_v23 = vld [vmem:[#allocation5 + $0x898] sm:$0xff] }
  0xc0   :  { %604 = vmatprep.mubr.f32.mxu0 %v9347_v28  ;;  %758 = vmatprep.mubr.f32.mxu1 %v9347_v28  ;;  %v388_v24 = vld [vmem:[#allocation5 + $0x880] sm:$0xff]  ;;  %v402_v29 = vld [vmem:[#allocation5 + $0x8f0] sm:$0xff]  ;;  %v399_v30 = vld [vmem:[#allocation5 + $0x8d8] sm:$0xff] }
  0xc1   :  { %v407_v40 = vld [vmem:[#allocation5 + $0x918] sm:$0xff]  ;;  %v413_v51 = vld [vmem:[#allocation5 + $0x948] sm:$0xff]  ;;  %v426_v7 = vld [vmem:[#allocation5 + $0x9b0] sm:$0xff] }
  0xc2   :  { %6919 = vmatpush1.bf16.msra.mxu0 %v6918_v42  ;;  %7047 = vmatpush1.bf16.msra.mxu1 %v7046_v43  ;;  %v364_v42 = vld [vmem:[#allocation5 + $0x7c0] sm:$0xff]  ;;  %v6938_v43 = vpack.c.bf16 %v351_v35, %v346_v34  ;;  %v6956_v34 = vpack.c.bf16 %v402_v29, %v397_v27  ;;  %v417_v52 = vld [vmem:[#allocation5 + $0x968] sm:$0xff]  ;;  %v423_v63 = vld [vmem:[#allocation5 + $0x998] sm:$0xff] }
  0xc3   :  { %6921 = vmatprep.subr.bf16.mxu0 %v6920_v44  ;;  %7049 = vmatprep.subr.bf16.mxu1 %v7048_v48  ;;  %v7066_v44 = vpack.c.bf16 %v353_v38, %v348_v36  ;;  %v358_v48 = vld [vmem:[#allocation5 + $0x790] sm:$0xff]  ;;  %v7068_v49 = vpack.c.bf16 %v364_v42, %v359_v41  ;;  %v396_v35 = vld [vmem:[#allocation5 + $0x8c0] sm:$0xff]  ;;  %v401_v36 = vld [vmem:[#allocation5 + $0x8e8] sm:$0xff] }
  0xc4   :  { %v412_v41 = vld [vmem:[#allocation5 + $0x940] sm:$0xff]  ;;  %v409_v42 = vld [vmem:[#allocation5 + $0x928] sm:$0xff]  ;;  %v427_v0 = vld [vmem:[#allocation5 + $0x9b8] sm:$0xff] }
  0xc5   :  { %v285_v27 = vld [vmem:[#allocation5 + $0x548] sm:$0xff]  ;;  %v9353_v29 = vld [vmem:[#allocation3 + $0x10] sm:$0xff] }
  0xc6   :  { %6923 = vmatpush1.bf16.msra.mxu0 %v6922_v54  ;;  %7051 = vmatpush1.bf16.msra.mxu1 %v7050_v55  ;;  %v374_v54 = vld [vmem:[#allocation5 + $0x810] sm:$0xff]  ;;  %v6942_v55 = vpack.c.bf16 %v361_v47, %v356_v46  ;;  %v6960_v46 = vpack.c.bf16 %v412_v41, %v407_v40  ;;  %v295_v41 = vld [vmem:[#allocation5 + $0x598] sm:$0xff] }
  0xc7   :  { %6925 = vmatprep.subr.bf16.mxu0 %v6924_v56  ;;  %7053 = vmatprep.subr.bf16.mxu1 %v7052_v60  ;;  %v7070_v56 = vpack.c.bf16 %v363_v50, %v358_v48  ;;  %v368_v60 = vld [vmem:[#allocation5 + $0x7e0] sm:$0xff]  ;;  %v7072_v61 = vpack.c.bf16 %v374_v54, %v369_v53  ;;  %v406_v47 = vld [vmem:[#allocation5 + $0x910] sm:$0xff]  ;;  %v411_v48 = vld [vmem:[#allocation5 + $0x938] sm:$0xff] }
  0xc8   :  { %v422_v53 = vld [vmem:[#allocation5 + $0x990] sm:$0xff]  ;;  %v419_v54 = vld [vmem:[#allocation5 + $0x978] sm:$0xff] }
  0xca   :  { %6927 = vmatpush1.bf16.msra.mxu0 %v6926_v2  ;;  %7055 = vmatpush1.bf16.msra.mxu1 %v7054_v3  ;;  %v384_v2 = vld [vmem:[#allocation5 + $0x860] sm:$0xff]  ;;  %v6946_v3 = vpack.c.bf16 %v371_v59, %v366_v58  ;;  %v6964_v58 = vpack.c.bf16 %v422_v53, %v417_v52  ;;  %v145_v52 = vld [vmem:[#allocation5 + $0xe8] sm:$0xff] }
  0xcb   :  { %6929 = vmatprep.subr.bf16.mxu0 %v6928_v4  ;;  %7057 = vmatprep.subr.bf16.mxu1 %v7056_v8  ;;  %v7074_v4 = vpack.c.bf16 %v373_v62, %v368_v60  ;;  %v378_v8 = vld [vmem:[#allocation5 + $0x830] sm:$0xff]  ;;  %v7076_v9 = vpack.c.bf16 %v384_v2, %v379_v1  ;;  %v416_v59 = vld [vmem:[#allocation5 + $0x960] sm:$0xff]  ;;  %v421_v60 = vld [vmem:[#allocation5 + $0x988] sm:$0xff] }
  0xcc   :  { %v432_v1 = vld [vmem:[#allocation5 + $0x9e0] sm:$0xff]  ;;  %v429_v2 = vld [vmem:[#allocation5 + $0x9c8] sm:$0xff] }
  0xcd   :  { %v6968_v6 = vpack.c.bf16 %v432_v1, %v427_v0  ;;  %v300_v53 = vld [vmem:[#allocation5 + $0x5c0] sm:$0xff]  ;;  %v155_v0 = vld [vmem:[#allocation5 + $0x138] sm:$0xff]  ;;  %v310_v1 = vld [vmem:[#allocation5 + $0x610] sm:$0xff] }
  0xce   :  { %6931 = vmatpush1.bf16.msra.mxu0 %v6930_v15  ;;  %7059 = vmatpush1.bf16.msra.mxu1 %v7058_v20  ;;  %v394_v15 = vld [vmem:[#allocation5 + $0x8b0] sm:$0xff]  ;;  %v7078_v20 = vpack.c.bf16 %v383_v10, %v378_v8  ;;  %v431_v8 = vld [vmem:[#allocation5 + $0x9d8] sm:$0xff] }
  0xcf   :  { %6933 = vmatprep.subr.bf16.mxu0 %v6932_v21  ;;  %7061 = vmatprep.subr.bf16.mxu1 %v7060_v25  ;;  %v6952_v21 = vpack.c.bf16 %v392_v12, %v387_v11  ;;  %v7080_v25 = vpack.c.bf16 %v394_v15, %v389_v13  ;;  %v433_v11 = vld [vmem:[#allocation5 + $0x9e8] sm:$0xff]  ;;  %v200_v12 = vld [vmem:[#allocation5 + $0x2a0] sm:$0xff] }
  0xd0   :  { %v205_v13 = vld [vmem:[#allocation5 + $0x2c8] sm:$0xff]  ;;  %v360_v15 = vld [vmem:[#allocation5 + $0x7a0] sm:$0xff] }
  0xd2   :  { %6935 = vmatpush1.bf16.msra.mxu0 %v6934_v31  ;;  %7063 = vmatpush1.bf16.msra.mxu1 %v7062_v32  ;;  %v404_v31 = vld [vmem:[#allocation5 + $0x900] sm:$0xff]  ;;  %v6954_v32 = vpack.c.bf16 %v391_v23, %v386_v22  ;;  %v7100_v22 = vpack.c.bf16 %v205_v13, %v200_v12  ;;  %v165_v12 = vld [vmem:[#allocation5 + $0x188] sm:$0xff] }
  0xd3   :  { %6937 = vmatprep.subr.bf16.mxu0 %v6936_v33  ;;  %7065 = vmatprep.subr.bf16.mxu1 %v7064_v37  ;;  %v7082_v33 = vpack.c.bf16 %v393_v26, %v388_v24  ;;  %v398_v37 = vld [vmem:[#allocation5 + $0x8d0] sm:$0xff]  ;;  %v7084_v38 = vpack.c.bf16 %v404_v31, %v399_v30  ;;  %v120_v23 = vld [vmem:[#allocation5 + $0x20] sm:$0xff]  ;;  %v125_v24 = vld [vmem:[#allocation5 + $0x48] sm:$0xff] }
  0xd4   :  { %v280_v26 = vld [vmem:[#allocation5 + $0x520] sm:$0xff]  ;;  %v210_v30 = vld [vmem:[#allocation5 + $0x2f0] sm:$0xff]  ;;  %v215_v31 = vld [vmem:[#allocation5 + $0x318] sm:$0xff] }
  0xd5   :  { %v7104_v40 = vpack.c.bf16 %v215_v31, %v210_v30  ;;  %v320_v13 = vld [vmem:[#allocation5 + $0x660] sm:$0xff]  ;;  %v335_v31 = vld [vmem:[#allocation5 + $0x6d8] sm:$0xff] }
  0xd6   :  { %6939 = vmatpush1.bf16.msra.mxu0 %v6938_v43  ;;  %7067 = vmatpush1.bf16.msra.mxu1 %v7066_v44  ;;  %v414_v43 = vld [vmem:[#allocation5 + $0x950] sm:$0xff]  ;;  %v6958_v44 = vpack.c.bf16 %v401_v36, %v396_v35  ;;  %v375_v35 = vld [vmem:[#allocation5 + $0x818] sm:$0xff]  ;;  %v7134_v36 = vpack.c.bf16 %v285_v27, %v280_v26 }
  0xd7   :  { %6941 = vmatprep.subr.bf16.mxu0 %v6940_v45  ;;  %7069 = vmatprep.subr.bf16.mxu1 %v7068_v49  ;;  %v7086_v45 = vpack.c.bf16 %v403_v39, %v398_v37  ;;  %v408_v49 = vld [vmem:[#allocation5 + $0x920] sm:$0xff]  ;;  %v7088_v50 = vpack.c.bf16 %v414_v43, %v409_v42  ;;  %v130_v37 = vld [vmem:[#allocation5 + $0x70] sm:$0xff]  ;;  %v225_v43 = vld [vmem:[#allocation5 + $0x368] sm:$0xff] }
  0xd8   :  { %v290_v39 = vld [vmem:[#allocation5 + $0x570] sm:$0xff]  ;;  %v220_v42 = vld [vmem:[#allocation5 + $0x340] sm:$0xff]  ;;  %v175_v26 = vld [vmem:[#allocation5 + $0x1d8] sm:$0xff] }
  0xd9   :  { %v330_v27 = vld [vmem:[#allocation5 + $0x6b0] sm:$0xff] }
  0xda   :  { %6943 = vmatpush1.bf16.msra.mxu0 %v6942_v55  ;;  %7071 = vmatpush1.bf16.msra.mxu1 %v7070_v56  ;;  %v424_v55 = vld [vmem:[#allocation5 + $0x9a0] sm:$0xff]  ;;  %v6962_v56 = vpack.c.bf16 %v411_v48, %v406_v47  ;;  %v9359_v47 = vld [vmem:[#allocation3 + $0x30] sm:$0xff] }
  0xdb   :  { %6945 = vmatprep.subr.bf16.mxu0 %v6944_v57  ;;  %7073 = vmatprep.subr.bf16.mxu1 %v7072_v61  ;;  %v7090_v57 = vpack.c.bf16 %v413_v51, %v408_v49  ;;  %v418_v61 = vld [vmem:[#allocation5 + $0x970] sm:$0xff]  ;;  %v7092_v62 = vpack.c.bf16 %v424_v55, %v419_v54  ;;  %v7138_v49 = vpack.c.bf16 %v295_v41, %v290_v39  ;;  %v140_v51 = vld [vmem:[#allocation5 + $0xc0] sm:$0xff]  ;;  %v305_v55 = vld [vmem:[#allocation5 + $0x5e8] sm:$0xff] }
  0xdc   :  { %v185_v41 = vld [vmem:[#allocation5 + $0x228] sm:$0xff] }
  0xde   :  { %6947 = vmatpush1.bf16.msra.mxu0 %v6946_v3  ;;  %7075 = vmatpush1.bf16.msra.mxu1 %v7074_v4  ;;  %v434_v3 = vld [vmem:[#allocation5 + $0x9f0] sm:$0xff]  ;;  %v6966_v4 = vpack.c.bf16 %v421_v60, %v416_v59  ;;  %v395_v59 = vld [vmem:[#allocation5 + $0x8b8] sm:$0xff]  ;;  %v7110_v60 = vpack.c.bf16 %v145_v52, %v140_v51 }
  0xdf   :  { %6949 = vmatprep.subr.bf16.mxu0 %v6948_v5  ;;  %7077 = vmatprep.subr.bf16.mxu1 %v7076_v9  ;;  %v7094_v5 = vpack.c.bf16 %v423_v63, %v418_v61  ;;  %v428_v9 = vld [vmem:[#allocation5 + $0x9c0] sm:$0xff]  ;;  %v7096_v10 = vpack.c.bf16 %v434_v3, %v429_v2  ;;  %v7142_v61 = vpack.c.bf16 %v305_v55, %v300_v53  ;;  %v150_v63 = vld [vmem:[#allocation5 + $0x110] sm:$0xff]  ;;  %v315_v3 = vld [vmem:[#allocation5 + $0x638] sm:$0xff] }
  0xe0   :  { %v190_v53 = vld [vmem:[#allocation5 + $0x250] sm:$0xff] }
  0xe1   :  { %v350_v55 = vld [vmem:[#allocation5 + $0x750] sm:$0xff] }
  0xe2   :  { %6951 = vmatpush1.bf16.msra.mxu0 %v6950_v18  ;;  %7079 = vmatpush1.bf16.msra.mxu1 %v7078_v20  ;;  %v365_v18 = vld [vmem:[#allocation5 + $0x7c8] sm:$0xff]  ;;  %v6970_v20 = vpack.c.bf16 %v431_v8, %v426_v7  ;;  %v7114_v8 = vpack.c.bf16 %v155_v0, %v150_v63 }
  0xe3   :  { %6953 = vmatprep.subr.bf16.mxu0 %v6952_v21  ;;  %7081 = vmatprep.subr.bf16.mxu1 %v7080_v25  ;;  %v7098_v21 = vpack.c.bf16 %v433_v11, %v428_v9  ;;  %v7132_v25 = vpack.c.bf16 %v365_v18, %v360_v15  ;;  %v405_v7 = vld [vmem:[#allocation5 + $0x908] sm:$0xff]  ;;  %v7146_v9 = vpack.c.bf16 %v315_v3, %v310_v1  ;;  %v160_v11 = vld [vmem:[#allocation5 + $0x160] sm:$0xff]  ;;  %v924_v3 = vld [vmem:[#allocation5 + $0xa10] sm:$0xff] }
  0xe4   :  { %v325_v18 = vld [vmem:[#allocation5 + $0x688] sm:$0xff]  ;;  %v922_v1 = vld [vmem:[#allocation5 + $0xa00] sm:$0xff] }
  0xe6   :  { %6955 = vmatpush1.bf16.msra.mxu0 %v6954_v32  ;;  %7083 = vmatpush1.bf16.msra.mxu1 %v7082_v33  ;;  %v7102_v32 = vpack.c.bf16 %v125_v24, %v120_v23  ;;  %v9355_v33 = vld [vmem:[#allocation3 + $0x38] sm:$0xff]  ;;  %v7118_v23 = vpack.c.bf16 %v165_v12, %v160_v11 }
  0xe7   :  { %6957 = vmatprep.subr.bf16.mxu0 %v6956_v34  ;;  %7085 = vmatprep.subr.bf16.mxu1 %v7084_v38  ;;  %v370_v34 = vld [vmem:[#allocation5 + $0x7f0] sm:$0xff]  ;;  %v135_v38 = vld [vmem:[#allocation5 + $0x98] sm:$0xff] }
  0xe8   :  { %v7106_v48 = vpack.c.bf16 %v135_v38, %v130_v37  ;;  %v7154_v38 = vpack.c.bf16 %v335_v31, %v330_v27  ;;  %v942_v27 = vld [vmem:[#allocation5 + $0xaa0] sm:$0xff]  ;;  %v944_v31 = vld [vmem:[#allocation5 + $0xab0] sm:$0xff] }
  0xea   :  { %6959 = vmatpush1.bf16.msra.mxu0 %v6958_v44  ;;  %7087 = vmatpush1.bf16.msra.mxu1 %v7086_v45  ;;  %v7136_v44 = vpack.c.bf16 %v375_v35, %v370_v34  ;;  %v380_v45 = vld [vmem:[#allocation5 + $0x840] sm:$0xff]  ;;  %v265_v34 = vld [vmem:[#allocation5 + $0x4a8] sm:$0xff] }
  0xeb   :  { %6961 = vmatprep.subr.bf16.mxu0 %v6960_v46  ;;  %7089 = vmatprep.subr.bf16.mxu1 %v7088_v50  ;;  %v385_v46 = vld [vmem:[#allocation5 + $0x868] sm:$0xff]  ;;  %v7108_v50 = vpack.c.bf16 %v225_v43, %v220_v42  ;;  %v420_v35 = vld [vmem:[#allocation5 + $0x980] sm:$0xff] }
  0xec   :  { %v7140_v54 = vpack.c.bf16 %v385_v46, %v380_v45  ;;  %v340_v42 = vld [vmem:[#allocation5 + $0x700] sm:$0xff]  ;;  %v270_v45 = vld [vmem:[#allocation5 + $0x4d0] sm:$0xff]  ;;  %v275_v46 = vld [vmem:[#allocation5 + $0x4f8] sm:$0xff] }
  0xed   :  { %v7128_v52 = vpack.c.bf16 %v275_v46, %v270_v45  ;;  %v968_v45 = vld [vmem:[#allocation5 + $0xb70] sm:$0xff]  ;;  %v9028_v46 = vld [vmem:[#allocation3 + $0x8] sm:$0xff] }
  0xee   :  { %6963 = vmatpush1.bf16.msra.mxu0 %v6962_v56  ;;  %7091 = vmatpush1.bf16.msra.mxu1 %v7090_v57  ;;  %v230_v56 = vld [vmem:[#allocation5 + $0x390] sm:$0xff]  ;;  %v235_v57 = vld [vmem:[#allocation5 + $0x3b8] sm:$0xff] }
  0xef   :  { %6965 = vmatprep.subr.bf16.mxu0 %v6964_v58  ;;  %7093 = vmatprep.subr.bf16.mxu1 %v7092_v62  ;;  %v390_v58 = vld [vmem:[#allocation5 + $0x890] sm:$0xff]  ;;  %v7112_v62 = vpack.c.bf16 %v235_v57, %v230_v56  ;;  %v355_v57 = vld [vmem:[#allocation5 + $0x778] sm:$0xff] }
  0xf0   :  { %v7144_v2 = vpack.c.bf16 %v395_v59, %v390_v58  ;;  %v923_v58 = vld [vmem:[#allocation5 + $0xa08] sm:$0xff]  ;;  %v928_v59 = vld [vmem:[#allocation5 + $0xa30] sm:$0xff]  ;;  %v7162_v63 = vpack.c.bf16 %v355_v57, %v350_v55  ;;  %v973_v55 = vld [vmem:[#allocation5 + $0xb98] sm:$0xff] }
  0xf1   :  { %v7164_v0 = vpack.c.bf16 %v928_v59, %v923_v58  ;;  %v975_v57 = vld [vmem:[#allocation5 + $0xba8] sm:$0xff]  ;;  %v980_v58 = vld [vmem:[#allocation5 + $0xbd0] sm:$0xff] }
  0xf2   :  { %6967 = vmatpush1.bf16.msra.mxu0 %v6966_v4  ;;  %7095 = vmatpush1.bf16.msra.mxu1 %v7094_v5  ;;  %v240_v4 = vld [vmem:[#allocation5 + $0x3e0] sm:$0xff]  ;;  %v245_v5 = vld [vmem:[#allocation5 + $0x408] sm:$0xff] }
  0xf3   :  { %6969 = vmatprep.subr.bf16.mxu0 %v6968_v6  ;;  %7097 = vmatprep.subr.bf16.mxu1 %v7096_v10  ;;  %v400_v6 = vld [vmem:[#allocation5 + $0x8e0] sm:$0xff]  ;;  %v7116_v10 = vpack.c.bf16 %v245_v5, %v240_v4  ;;  %v929_v5 = vld [vmem:[#allocation5 + $0xa38] sm:$0xff] }
  0xf4   :  { %v7148_v15 = vpack.c.bf16 %v405_v7, %v400_v6  ;;  %v933_v6 = vld [vmem:[#allocation5 + $0xa58] sm:$0xff]  ;;  %v938_v7 = vld [vmem:[#allocation5 + $0xa80] sm:$0xff]  ;;  %v7294_v11 = vpack.c.bf16 %v929_v5, %v924_v3  ;;  %v983_v3 = vld [vmem:[#allocation5 + $0xbe8] sm:$0xff] }
  0xf5   :  { %v7168_v12 = vpack.c.bf16 %v938_v7, %v933_v6  ;;  %v985_v5 = vld [vmem:[#allocation5 + $0xbf8] sm:$0xff]  ;;  %v990_v6 = vld [vmem:[#allocation5 + $0xc20] sm:$0xff] }
  0xf6   :  { %6971 = vmatpush1.bf16.msra.mxu0 %v6970_v20  ;;  %7099 = vmatpush1.bf16.msra.mxu1 %v7098_v21  ;;  %v250_v20 = vld [vmem:[#allocation5 + $0x430] sm:$0xff]  ;;  %v255_v21 = vld [vmem:[#allocation5 + $0x458] sm:$0xff] }
  0xf7   :  { %7101 = vmatprep.subr.bf16.mxu0 %v7100_v22  ;;  %7133 = vmatprep.subr.bf16.mxu1 %v7132_v25  ;;  %v410_v22 = vld [vmem:[#allocation5 + $0x930] sm:$0xff]  ;;  %v7120_v24 = vpack.c.bf16 %v255_v21, %v250_v20  ;;  %v939_v21 = vld [vmem:[#allocation5 + $0xa88] sm:$0xff] }
  0xf8   :  { %v170_v25 = vld [vmem:[#allocation5 + $0x1b0] sm:$0xff] }
  0xf9   :  { %605 = vmatmul.mubr.f32.vlgmr.msra.gmra.mrb[0].mxu0 %v9353_v29  ;;  %759 = vmatmul.mubr.f32.vlgmr.msra.gmra.mrb[0].mxu1 %v9353_v29  ;;  %v7122_v37 = vpack.c.bf16 %v175_v26, %v170_v25 }
  0xfa   :  { %7103 = vmatpush3.bf16.msra.mxu0 %v7102_v32  ;;  %7135 = vmatpush3.bf16.msra.mxu1 %v7134_v36  ;;  %v260_v32 = vld [vmem:[#allocation5 + $0x480] sm:$0xff]  ;;  %v425_v36 = vld [vmem:[#allocation5 + $0x9a8] sm:$0xff] }
  0xfb   :  { %610 = vmatprep.mubr.f32.mxu0 %v9355_v33  ;;  %764 = vmatprep.mubr.f32.mxu1 %v9355_v33  ;;  %v7124_v39 = vpack.c.bf16 %v265_v34, %v260_v32  ;;  %v7156_v43 = vpack.c.bf16 %v425_v36, %v420_v35  ;;  %v949_v34 = vld [vmem:[#allocation5 + $0xad8] sm:$0xff]  ;;  %v958_v36 = vld [vmem:[#allocation5 + $0xb20] sm:$0xff] }
  0xfc   :  { %7105 = vmatprep.subr.bf16.mxu0 %v7104_v40  ;;  %7137 = vmatprep.subr.bf16.mxu1 %v7136_v44  ;;  %v180_v40 = vld [vmem:[#allocation5 + $0x200] sm:$0xff]  ;;  %v345_v44 = vld [vmem:[#allocation5 + $0x728] sm:$0xff]  ;;  %v953_v35 = vld [vmem:[#allocation5 + $0xaf8] sm:$0xff] }
  0xfd   :  { %611 = vmatmul.mubr.f32.gmra.mrb[2].mxu0 %v9359_v47  ;;  %765 = vmatmul.mubr.f32.gmra.mrb[2].mxu1 %v9359_v47  ;;  %v7158_v51 = vpack.c.bf16 %v345_v44, %v340_v42  ;;  %v954_v42 = vld [vmem:[#allocation5 + $0xb00] sm:$0xff]  ;;  %v963_v44 = vld [vmem:[#allocation5 + $0xb48] sm:$0xff] }
  0xfe   :  { %7107 = vmatpush3.bf16.msra.mxu0 %v7106_v48  ;;  %7139 = vmatpush3.bf16.msra.mxu1 %v7138_v49  ;;  %v430_v48 = vld [vmem:[#allocation5 + $0x9d0] sm:$0xff]  ;;  %v435_v49 = vld [vmem:[#allocation5 + $0x9f8] sm:$0xff] }
  0xff   :  { %7109 = vmatprep.subr.bf16.mxu0 %v7108_v50  ;;  %7141 = vmatprep.subr.bf16.mxu1 %v7140_v54  ;;  %v7126_v50 = vpack.c.bf16 %v185_v41, %v180_v40  ;;  %v195_v54 = vld [vmem:[#allocation5 + $0x278] sm:$0xff]  ;;  %v7160_v56 = vpack.c.bf16 %v435_v49, %v430_v48  ;;  %v952_v40 = vld [vmem:[#allocation5 + $0xaf0] sm:$0xff]  ;;  %v7180_v49 = vpack.c.bf16 %v968_v45, %v963_v44 }
 0x100   :  { %835 = vmatprep.mubr.f32.mxu0 %v9333_v17  ;;  %910 = vmatprep.mubr.f32.mxu1 %v9347_v28  ;;  %v415_v17 = vld [vmem:[#allocation5 + $0x958] sm:$0xff]  ;;  %v7150_v28 = vpack.c.bf16 %v325_v18, %v320_v13  ;;  %v932_v13 = vld [vmem:[#allocation5 + $0xa50] sm:$0xff]  ;;  %v934_v18 = vld [vmem:[#allocation5 + $0xa60] sm:$0xff] }
 0x101   :  { %v7152_v30 = vpack.c.bf16 %v415_v17, %v410_v22  ;;  %v943_v22 = vld [vmem:[#allocation5 + $0xaa8] sm:$0xff]  ;;  %v948_v17 = vld [vmem:[#allocation5 + $0xad0] sm:$0xff]  ;;  %v7298_v25 = vpack.c.bf16 %v939_v21, %v934_v18  ;;  %v957_v41 = vld [vmem:[#allocation5 + $0xb18] sm:$0xff] }
 0x102   :  { %7111 = vmatpush3.bf16.msra.mxu0 %v7110_v60  ;;  %7143 = vmatpush3.bf16.msra.mxu1 %v7142_v61  ;;  %v925_v60 = vld [vmem:[#allocation5 + $0xa18] sm:$0xff]  ;;  %v930_v61 = vld [vmem:[#allocation5 + $0xa40] sm:$0xff]  ;;  %v7172_v26 = vpack.c.bf16 %v948_v17, %v943_v22  ;;  %v7178_v48 = vpack.c.bf16 %v957_v41, %v952_v40  ;;  %v995_v21 = vld [vmem:[#allocation5 + $0xc48] sm:$0xff] }
 0x103   :  { %7113 = vmatprep.subr.bf16.mxu0 %v7112_v62  ;;  %7145 = vmatprep.subr.bf16.mxu1 %v7144_v2  ;;  %v7130_v62 = vpack.c.bf16 %v195_v54, %v190_v53  ;;  %v927_v2 = vld [vmem:[#allocation5 + $0xa28] sm:$0xff]  ;;  %v7292_v4 = vpack.c.bf16 %v930_v61, %v925_v60  ;;  %v969_v54 = vld [vmem:[#allocation5 + $0xb78] sm:$0xff]  ;;  %v1000_v22 = vld [vmem:[#allocation5 + $0xc70] sm:$0xff] }
 0x104   :  { %v993_v18 = vld [vmem:[#allocation5 + $0xc38] sm:$0xff]  ;;  %v1020_v44 = vld [vmem:[#allocation5 + $0xd10] sm:$0xff] }
 0x105   :  { %v1009_v41 = vld [vmem:[#allocation5 + $0xcb8] sm:$0xff] }
 0x106   :  { %7115 = vmatpush3.bf16.msra.mxu0 %v7114_v8  ;;  %7147 = vmatpush3.bf16.msra.mxu1 %v7146_v9  ;;  %v935_v8 = vld [vmem:[#allocation5 + $0xa68] sm:$0xff]  ;;  %v940_v9 = vld [vmem:[#allocation5 + $0xa90] sm:$0xff] }
 0x107   :  { %7117 = vmatprep.subr.bf16.mxu0 %v7116_v10  ;;  %7149 = vmatprep.subr.bf16.mxu1 %v7148_v15  ;;  %v7166_v10 = vpack.c.bf16 %v927_v2, %v922_v1  ;;  %v937_v15 = vld [vmem:[#allocation5 + $0xa78] sm:$0xff]  ;;  %v7296_v20 = vpack.c.bf16 %v940_v9, %v935_v8  ;;  %v7312_v1 = vpack.c.bf16 %v980_v58, %v975_v57  ;;  %v979_v2 = vld [vmem:[#allocation5 + $0xbc8] sm:$0xff]  ;;  %v1022_v58 = vld [vmem:[#allocation5 + $0xd20] sm:$0xff] }
 0x10a   :  { %7119 = vmatpush3.bf16.msra.mxu0 %v7118_v23  ;;  %7151 = vmatpush3.bf16.msra.mxu1 %v7150_v28  ;;  %v945_v23 = vld [vmem:[#allocation5 + $0xab8] sm:$0xff]  ;;  %v950_v28 = vld [vmem:[#allocation5 + $0xae0] sm:$0xff] }
 0x10b   :  { %7121 = vmatprep.subr.bf16.mxu0 %v7120_v24  ;;  %7153 = vmatprep.subr.bf16.mxu1 %v7152_v30  ;;  %v7170_v24 = vpack.c.bf16 %v937_v15, %v932_v13  ;;  %v947_v30 = vld [vmem:[#allocation5 + $0xac8] sm:$0xff]  ;;  %v7300_v32 = vpack.c.bf16 %v950_v28, %v945_v23  ;;  %v7316_v13 = vpack.c.bf16 %v990_v6, %v985_v5  ;;  %v989_v15 = vld [vmem:[#allocation5 + $0xc18] sm:$0xff]  ;;  %v1032_v6 = vld [vmem:[#allocation5 + $0xd70] sm:$0xff] }
 0x10e   :  { %7123 = vmatpush3.bf16.msra.mxu0 %v7122_v37  ;;  %7155 = vmatpush3.bf16.msra.mxu1 %v7154_v38  ;;  %v960_v37 = vld [vmem:[#allocation5 + $0xb30] sm:$0xff]  ;;  %v7302_v38 = vpack.c.bf16 %v949_v34, %v944_v31  ;;  %v1003_v31 = vld [vmem:[#allocation5 + $0xc88] sm:$0xff]  ;;  %v1005_v34 = vld [vmem:[#allocation5 + $0xc98] sm:$0xff] }
 0x10f   :  { %7125 = vmatprep.subr.bf16.mxu0 %v7124_v39  ;;  %7157 = vmatprep.subr.bf16.mxu1 %v7156_v43  ;;  %v7176_v39 = vpack.c.bf16 %v958_v36, %v953_v35  ;;  %v1010_v35 = vld [vmem:[#allocation5 + $0xcc0] sm:$0xff] }
 0x110   :  { %v7324_v40 = vpack.c.bf16 %v1010_v35, %v1005_v34  ;;  %v1052_v35 = vld [vmem:[#allocation5 + $0xe10] sm:$0xff] }
 0x112   :  { %7127 = vmatpush3.bf16.msra.mxu0 %v7126_v50  ;;  %7159 = vmatpush3.bf16.msra.mxu1 %v7158_v51  ;;  %v962_v50 = vld [vmem:[#allocation5 + $0xb40] sm:$0xff]  ;;  %v967_v51 = vld [vmem:[#allocation5 + $0xb68] sm:$0xff] }
 0x113   :  { %7129 = vmatprep.subr.bf16.mxu0 %v7128_v52  ;;  %7161 = vmatprep.subr.bf16.mxu1 %v7160_v56  ;;  %v964_v52 = vld [vmem:[#allocation5 + $0xb50] sm:$0xff]  ;;  %v978_v56 = vld [vmem:[#allocation5 + $0xbc0] sm:$0xff]  ;;  %v7182_v59 = vpack.c.bf16 %v967_v51, %v962_v50  ;;  %v1019_v50 = vld [vmem:[#allocation5 + $0xd08] sm:$0xff] }
 0x114   :  { %v7310_v60 = vpack.c.bf16 %v969_v54, %v964_v52  ;;  %v7184_v61 = vpack.c.bf16 %v978_v56, %v973_v55  ;;  %v1023_v51 = vld [vmem:[#allocation5 + $0xd28] sm:$0xff]  ;;  %v1028_v52 = vld [vmem:[#allocation5 + $0xd50] sm:$0xff]  ;;  %v1030_v54 = vld [vmem:[#allocation5 + $0xd60] sm:$0xff] }
 0x115   :  { %v7204_v57 = vpack.c.bf16 %v1028_v52, %v1023_v51 }
 0x116   :  { %7131 = vmatpush3.bf16.msra.mxu0 %v7130_v62  ;;  %7163 = vmatpush3.bf16.msra.mxu1 %v7162_v63  ;;  %v972_v62 = vld [vmem:[#allocation5 + $0xb90] sm:$0xff]  ;;  %v977_v63 = vld [vmem:[#allocation5 + $0xbb8] sm:$0xff] }
 0x117   :  { %7165 = vmatprep.subr.bf16.mxu0 %v7164_v0  ;;  %7293 = vmatprep.subr.bf16.mxu1 %v7292_v4  ;;  %v974_v0 = vld [vmem:[#allocation5 + $0xba0] sm:$0xff]  ;;  %v988_v4 = vld [vmem:[#allocation5 + $0xc10] sm:$0xff]  ;;  %v7186_v7 = vpack.c.bf16 %v977_v63, %v972_v62  ;;  %v1029_v62 = vld [vmem:[#allocation5 + $0xd58] sm:$0xff] }
 0x118   :  { %v7314_v8 = vpack.c.bf16 %v979_v2, %v974_v0  ;;  %v7188_v9 = vpack.c.bf16 %v988_v4, %v983_v3  ;;  %v1033_v63 = vld [vmem:[#allocation5 + $0xd78] sm:$0xff]  ;;  %v1038_v0 = vld [vmem:[#allocation5 + $0xda0] sm:$0xff]  ;;  %v1040_v2 = vld [vmem:[#allocation5 + $0xdb0] sm:$0xff] }
 0x119   :  { %836 = vmatmul.mubr.f32.vlgmr.msra.gmra.mrb[4].mxu0 %v9337_v16  ;;  %911 = vmatmul.mubr.f32.vlgmr.msra.gmra.mrb[4].mxu1 %v9353_v29  ;;  %v955_v16 = vld [vmem:[#allocation5 + $0xb08] sm:$0xff]  ;;  %v7174_v29 = vpack.c.bf16 %v947_v30, %v942_v27  ;;  %v7320_v27 = vpack.c.bf16 %v1000_v22, %v995_v21  ;;  %v7208_v5 = vpack.c.bf16 %v1038_v0, %v1033_v63  ;;  %v1042_v22 = vld [vmem:[#allocation5 + $0xdc0] sm:$0xff] }
 0x11a   :  { %7167 = vmatpush1.bf16.msra.mxu0 %v7166_v10  ;;  %7295 = vmatpush1.bf16.msra.mxu1 %v7294_v11  ;;  %v7304_v43 = vpack.c.bf16 %v960_v37, %v955_v16  ;;  %v982_v10 = vld [vmem:[#allocation5 + $0xbe0] sm:$0xff]  ;;  %v987_v11 = vld [vmem:[#allocation5 + $0xc08] sm:$0xff] }
 0x11b   :  { %7169 = vmatprep.subr.bf16.mxu0 %v7168_v12  ;;  %7297 = vmatprep.subr.bf16.mxu1 %v7296_v20  ;;  %v984_v12 = vld [vmem:[#allocation5 + $0xbf0] sm:$0xff]  ;;  %v998_v20 = vld [vmem:[#allocation5 + $0xc60] sm:$0xff]  ;;  %v7190_v17 = vpack.c.bf16 %v987_v11, %v982_v10  ;;  %v999_v30 = vld [vmem:[#allocation5 + $0xc68] sm:$0xff] }
 0x11c   :  { %840 = vmatprep.mubr.f32.mxu0 %v9341_v14  ;;  %915 = vmatprep.mubr.f32.mxu1 %v9355_v33  ;;  %v959_v14 = vld [vmem:[#allocation5 + $0xb28] sm:$0xff]  ;;  %v970_v33 = vld [vmem:[#allocation5 + $0xb80] sm:$0xff]  ;;  %v7318_v23 = vpack.c.bf16 %v989_v15, %v984_v12  ;;  %v7192_v28 = vpack.c.bf16 %v998_v20, %v993_v18  ;;  %v1048_v12 = vld [vmem:[#allocation5 + $0xdf0] sm:$0xff] }
 0x11d   :  { %841 = vmatmul.mubr.f32.gmra.mrb[6].mxu0 %v9344_v19  ;;  %916 = vmatmul.mubr.f32.gmra.mrb[6].mxu1 %v9359_v47  ;;  %v965_v19 = vld [vmem:[#allocation5 + $0xb58] sm:$0xff]  ;;  %v7306_v47 = vpack.c.bf16 %v959_v14, %v954_v42  ;;  %v1015_v14 = vld [vmem:[#allocation5 + $0xce8] sm:$0xff]  ;;  %v1050_v15 = vld [vmem:[#allocation5 + $0xe00] sm:$0xff] }
 0x11e   :  { %7171 = vmatpush1.bf16.msra.mxu0 %v7170_v24  ;;  %7299 = vmatpush1.bf16.msra.mxu1 %v7298_v25  ;;  %v7308_v53 = vpack.c.bf16 %v970_v33, %v965_v19  ;;  %v992_v24 = vld [vmem:[#allocation5 + $0xc30] sm:$0xff]  ;;  %v997_v25 = vld [vmem:[#allocation5 + $0xc58] sm:$0xff]  ;;  %v1039_v10 = vld [vmem:[#allocation5 + $0xda8] sm:$0xff] }
 0x11f   :  { %7173 = vmatprep.subr.bf16.mxu0 %v7172_v26  ;;  %7301 = vmatprep.subr.bf16.mxu1 %v7300_v32  ;;  %v994_v26 = vld [vmem:[#allocation5 + $0xc40] sm:$0xff]  ;;  %v1008_v32 = vld [vmem:[#allocation5 + $0xcb0] sm:$0xff]  ;;  %v7194_v36 = vpack.c.bf16 %v997_v25, %v992_v24  ;;  %v1013_v42 = vld [vmem:[#allocation5 + $0xcd8] sm:$0xff] }
 0x120   :  { %1334 = vmatprep.mubr.f32.mxu0 %v9028_v46  ;;  %1488 = vmatprep.mubr.f32.mxu1 %v9028_v46  ;;  %v7322_v16 = vpack.c.bf16 %v999_v30, %v994_v26  ;;  %v7196_v37 = vpack.c.bf16 %v1008_v32, %v1003_v31  ;;  %v1012_v33 = vld [vmem:[#allocation5 + $0xcd0] sm:$0xff]  ;;  %v1043_v11 = vld [vmem:[#allocation5 + $0xdc8] sm:$0xff]  ;;  %v1049_v24 = vld [vmem:[#allocation5 + $0xdf8] sm:$0xff] }
 0x121   :  { %v7212_v21 = vpack.c.bf16 %v1048_v12, %v1043_v11  ;;  %v1053_v25 = vld [vmem:[#allocation5 + $0xe18] sm:$0xff]  ;;  %v1058_v26 = vld [vmem:[#allocation5 + $0xe40] sm:$0xff]  ;;  %v1060_v30 = vld [vmem:[#allocation5 + $0xe50] sm:$0xff] }
 0x122   :  { %7175 = vmatpush1.bf16.msra.mxu0 %v7174_v29  ;;  %7303 = vmatpush1.bf16.msra.mxu1 %v7302_v38  ;;  %v1002_v29 = vld [vmem:[#allocation5 + $0xc80] sm:$0xff]  ;;  %v1007_v38 = vld [vmem:[#allocation5 + $0xca8] sm:$0xff]  ;;  %v7216_v34 = vpack.c.bf16 %v1058_v26, %v1053_v25 }
 0x123   :  { %7177 = vmatprep.subr.bf16.mxu0 %v7176_v39  ;;  %7305 = vmatprep.subr.bf16.mxu1 %v7304_v43  ;;  %v1004_v39 = vld [vmem:[#allocation5 + $0xc90] sm:$0xff]  ;;  %v1018_v43 = vld [vmem:[#allocation5 + $0xd00] sm:$0xff]  ;;  %v7198_v45 = vpack.c.bf16 %v1007_v38, %v1002_v29  ;;  %v1059_v29 = vld [vmem:[#allocation5 + $0xe48] sm:$0xff] }
 0x124   :  { %v7326_v46 = vpack.c.bf16 %v1009_v41, %v1004_v39  ;;  %v7200_v19 = vpack.c.bf16 %v1018_v43, %v1013_v42  ;;  %v1063_v38 = vld [vmem:[#allocation5 + $0xe68] sm:$0xff]  ;;  %v1068_v39 = vld [vmem:[#allocation5 + $0xe90] sm:$0xff]  ;;  %v1070_v41 = vld [vmem:[#allocation5 + $0xea0] sm:$0xff] }
 0x125   :  { %v1110_v25 = vld [vmem:[#allocation5 + $0xfe0] sm:$0xff] }
 0x126   :  { %7179 = vmatpush1.bf16.msra.mxu0 %v7178_v48  ;;  %7307 = vmatpush1.bf16.msra.mxu1 %v7306_v47  ;;  %v1017_v48 = vld [vmem:[#allocation5 + $0xcf8] sm:$0xff]  ;;  %v1014_v47 = vld [vmem:[#allocation5 + $0xce0] sm:$0xff] }
 0x127   :  { %7181 = vmatprep.subr.bf16.mxu0 %v7180_v49  ;;  %7309 = vmatprep.subr.bf16.mxu1 %v7308_v53  ;;  %v7328_v49 = vpack.c.bf16 %v1020_v44, %v1015_v14  ;;  %v1025_v53 = vld [vmem:[#allocation5 + $0xd38] sm:$0xff]  ;;  %v7202_v55 = vpack.c.bf16 %v1017_v48, %v1012_v33  ;;  %v7330_v56 = vpack.c.bf16 %v1019_v50, %v1014_v47  ;;  %v1062_v44 = vld [vmem:[#allocation5 + $0xe60] sm:$0xff]  ;;  %v1080_v50 = vld [vmem:[#allocation5 + $0xef0] sm:$0xff] }
 0x128   :  { %v7220_v14 = vpack.c.bf16 %v1068_v39, %v1063_v38  ;;  %v1069_v33 = vld [vmem:[#allocation5 + $0xe98] sm:$0xff]  ;;  %v1078_v47 = vld [vmem:[#allocation5 + $0xee0] sm:$0xff]  ;;  %v1115_v38 = vld [vmem:[#allocation5 + $0x1008] sm:$0xff] }
 0x129   :  { %v1073_v48 = vld [vmem:[#allocation5 + $0xeb8] sm:$0xff]  ;;  %v1120_v39 = vld [vmem:[#allocation5 + $0x1030] sm:$0xff] }
 0x12a   :  { %7183 = vmatpush1.bf16.msra.mxu0 %v7182_v59  ;;  %7311 = vmatpush1.bf16.msra.mxu1 %v7310_v60  ;;  %v1027_v59 = vld [vmem:[#allocation5 + $0xd48] sm:$0xff]  ;;  %v1024_v60 = vld [vmem:[#allocation5 + $0xd30] sm:$0xff] }
 0x12b   :  { %7185 = vmatprep.subr.bf16.mxu0 %v7184_v61  ;;  %7313 = vmatprep.subr.bf16.mxu1 %v7312_v1  ;;  %v7332_v61 = vpack.c.bf16 %v1030_v54, %v1025_v53  ;;  %v1035_v1 = vld [vmem:[#allocation5 + $0xd88] sm:$0xff]  ;;  %v7206_v3 = vpack.c.bf16 %v1027_v59, %v1022_v58  ;;  %v7334_v4 = vpack.c.bf16 %v1029_v62, %v1024_v60  ;;  %v1072_v54 = vld [vmem:[#allocation5 + $0xeb0] sm:$0xff]  ;;  %v1090_v62 = vld [vmem:[#allocation5 + $0xf40] sm:$0xff] }
 0x12c   :  { %v7224_v53 = vpack.c.bf16 %v1078_v47, %v1073_v48  ;;  %v1079_v58 = vld [vmem:[#allocation5 + $0xee8] sm:$0xff]  ;;  %v1088_v60 = vld [vmem:[#allocation5 + $0xf30] sm:$0xff]  ;;  %v9385_v47 = vld [vmem:[#allocation3 + $0x18] sm:$0xff] }
 0x12d   :  { %v1083_v59 = vld [vmem:[#allocation5 + $0xf08] sm:$0xff]  ;;  %v1128_v48 = vld [vmem:[#allocation5 + $0x1070] sm:$0xff] }
 0x12e   :  { %7187 = vmatpush1.bf16.msra.mxu0 %v7186_v7  ;;  %7315 = vmatpush1.bf16.msra.mxu1 %v7314_v8  ;;  %v1037_v7 = vld [vmem:[#allocation5 + $0xd98] sm:$0xff]  ;;  %v1034_v8 = vld [vmem:[#allocation5 + $0xd80] sm:$0xff] }
 0x12f   :  { %7189 = vmatprep.subr.bf16.mxu0 %v7188_v9  ;;  %7317 = vmatprep.subr.bf16.mxu1 %v7316_v13  ;;  %v7336_v9 = vpack.c.bf16 %v1040_v2, %v1035_v1  ;;  %v1045_v13 = vld [vmem:[#allocation5 + $0xdd8] sm:$0xff]  ;;  %v7210_v18 = vpack.c.bf16 %v1037_v7, %v1032_v6  ;;  %v7338_v20 = vpack.c.bf16 %v1039_v10, %v1034_v8  ;;  %v1082_v2 = vld [vmem:[#allocation5 + $0xf00] sm:$0xff]  ;;  %v1100_v10 = vld [vmem:[#allocation5 + $0xf90] sm:$0xff] }
 0x130   :  { %v7228_v1 = vpack.c.bf16 %v1088_v60, %v1083_v59  ;;  %v1089_v6 = vld [vmem:[#allocation5 + $0xf38] sm:$0xff]  ;;  %v1098_v8 = vld [vmem:[#allocation5 + $0xf80] sm:$0xff] }
 0x131   :  { %v1093_v7 = vld [vmem:[#allocation5 + $0xf58] sm:$0xff]  ;;  %v1138_v60 = vld [vmem:[#allocation5 + $0x10c0] sm:$0xff] }
 0x132   :  { %7191 = vmatpush1.bf16.msra.mxu0 %v7190_v17  ;;  %7319 = vmatpush1.bf16.msra.mxu1 %v7318_v23  ;;  %v1047_v17 = vld [vmem:[#allocation5 + $0xde8] sm:$0xff]  ;;  %v1044_v23 = vld [vmem:[#allocation5 + $0xdd0] sm:$0xff]  ;;  %v1133_v59 = vld [vmem:[#allocation5 + $0x1098] sm:$0xff] }
 0x133   :  { %7193 = vmatprep.subr.bf16.mxu0 %v7192_v28  ;;  %7321 = vmatprep.subr.bf16.mxu1 %v7320_v27  ;;  %v7340_v28 = vpack.c.bf16 %v1050_v15, %v1045_v13  ;;  %v1055_v27 = vld [vmem:[#allocation5 + $0xe28] sm:$0xff]  ;;  %v7214_v31 = vpack.c.bf16 %v1047_v17, %v1042_v22  ;;  %v7342_v32 = vpack.c.bf16 %v1049_v24, %v1044_v23  ;;  %v1092_v15 = vld [vmem:[#allocation5 + $0xf50] sm:$0xff]  ;;  %v1105_v24 = vld [vmem:[#allocation5 + $0xfb8] sm:$0xff] }
 0x134   :  { %v7232_v13 = vpack.c.bf16 %v1098_v8, %v1093_v7  ;;  %v1099_v22 = vld [vmem:[#allocation5 + $0xf88] sm:$0xff]  ;;  %v1108_v23 = vld [vmem:[#allocation5 + $0xfd0] sm:$0xff] }
 0x135   :  { %v1103_v17 = vld [vmem:[#allocation5 + $0xfa8] sm:$0xff]  ;;  %v1148_v8 = vld [vmem:[#allocation5 + $0x1110] sm:$0xff] }
 0x136   :  { %7195 = vmatpush1.bf16.msra.mxu0 %v7194_v36  ;;  %7323 = vmatpush1.bf16.msra.mxu1 %v7322_v16  ;;  %v1057_v36 = vld [vmem:[#allocation5 + $0xe38] sm:$0xff]  ;;  %v1054_v16 = vld [vmem:[#allocation5 + $0xe20] sm:$0xff]  ;;  %v1143_v7 = vld [vmem:[#allocation5 + $0x10e8] sm:$0xff] }
 0x137   :  { %7197 = vmatprep.subr.bf16.mxu0 %v7196_v37  ;;  %7325 = vmatprep.subr.bf16.mxu1 %v7324_v40  ;;  %v7344_v37 = vpack.c.bf16 %v1060_v30, %v1055_v27  ;;  %v1065_v40 = vld [vmem:[#allocation5 + $0xe78] sm:$0xff]  ;;  %v7218_v42 = vpack.c.bf16 %v1057_v36, %v1052_v35  ;;  %v7346_v43 = vpack.c.bf16 %v1059_v29, %v1054_v16  ;;  %v9377_v29 = vld [vmem:[#allocation3 + $0x28] sm:$0xff] }
 0x138   :  { %v7236_v30 = vpack.c.bf16 %v1108_v23, %v1103_v17  ;;  %v7364_v35 = vpack.c.bf16 %v1110_v25, %v1105_v24  ;;  %v1109_v36 = vld [vmem:[#allocation5 + $0xfd8] sm:$0xff]  ;;  %v1158_v23 = vld [vmem:[#allocation5 + $0x1160] sm:$0xff]  ;;  %v1155_v24 = vld [vmem:[#allocation5 + $0x1148] sm:$0xff] }
 0x139   :  { %v1113_v16 = vld [vmem:[#allocation5 + $0xff8] sm:$0xff]  ;;  %v1160_v25 = vld [vmem:[#allocation5 + $0x1170] sm:$0xff] }
 0x13a   :  { %7199 = vmatpush1.bf16.msra.mxu0 %v7198_v45  ;;  %7327 = vmatpush1.bf16.msra.mxu1 %v7326_v46  ;;  %v1067_v45 = vld [vmem:[#allocation5 + $0xe88] sm:$0xff]  ;;  %v1064_v46 = vld [vmem:[#allocation5 + $0xe70] sm:$0xff]  ;;  %v1153_v17 = vld [vmem:[#allocation5 + $0x1138] sm:$0xff] }
 0x13b   :  { %7201 = vmatprep.subr.bf16.mxu0 %v7200_v19  ;;  %7329 = vmatprep.subr.bf16.mxu1 %v7328_v49  ;;  %v7348_v19 = vpack.c.bf16 %v1070_v41, %v1065_v40  ;;  %v1075_v49 = vld [vmem:[#allocation5 + $0xec8] sm:$0xff]  ;;  %v7222_v51 = vpack.c.bf16 %v1067_v45, %v1062_v44  ;;  %v7350_v52 = vpack.c.bf16 %v1069_v33, %v1064_v46  ;;  %v9381_v40 = vld [vmem:[#allocation3 + $0x20] sm:$0xff]  ;;  %v1117_v44 = vld [vmem:[#allocation5 + $0x1018] sm:$0xff] }
 0x13c   :  { %v1114_v45 = vld [vmem:[#allocation5 + $0x1000] sm:$0xff]  ;;  %v7368_v46 = vpack.c.bf16 %v1120_v39, %v1115_v38  ;;  %v1123_v33 = vld [vmem:[#allocation5 + $0x1048] sm:$0xff]  ;;  %v1165_v38 = vld [vmem:[#allocation5 + $0x1198] sm:$0xff] }
 0x13d   :  { %v1170_v39 = vld [vmem:[#allocation5 + $0x11c0] sm:$0xff] }
 0x13e   :  { %7203 = vmatpush1.bf16.msra.mxu0 %v7202_v55  ;;  %7331 = vmatpush1.bf16.msra.mxu1 %v7330_v56  ;;  %v1077_v55 = vld [vmem:[#allocation5 + $0xed8] sm:$0xff]  ;;  %v1074_v56 = vld [vmem:[#allocation5 + $0xec0] sm:$0xff] }
 0x13f   :  { %7205 = vmatprep.subr.bf16.mxu0 %v7204_v57  ;;  %7333 = vmatprep.subr.bf16.mxu1 %v7332_v61  ;;  %v7352_v57 = vpack.c.bf16 %v1080_v50, %v1075_v49  ;;  %v1085_v61 = vld [vmem:[#allocation5 + $0xf18] sm:$0xff]  ;;  %v7226_v63 = vpack.c.bf16 %v1077_v55, %v1072_v54  ;;  %v7354_v0 = vpack.c.bf16 %v1079_v58, %v1074_v56  ;;  %v1130_v50 = vld [vmem:[#allocation5 + $0x1080] sm:$0xff]  ;;  %v1127_v55 = vld [vmem:[#allocation5 + $0x1068] sm:$0xff] }
 0x140   :  { %v1125_v49 = vld [vmem:[#allocation5 + $0x1058] sm:$0xff]  ;;  %v1122_v54 = vld [vmem:[#allocation5 + $0x1040] sm:$0xff]  ;;  %v1124_v56 = vld [vmem:[#allocation5 + $0x1050] sm:$0xff] }
 0x141   :  { %v1129_v58 = vld [vmem:[#allocation5 + $0x1078] sm:$0xff] }
 0x142   :  { %7207 = vmatpush1.bf16.msra.mxu0 %v7206_v3  ;;  %7335 = vmatpush1.bf16.msra.mxu1 %v7334_v4  ;;  %v1087_v3 = vld [vmem:[#allocation5 + $0xf28] sm:$0xff]  ;;  %v1084_v4 = vld [vmem:[#allocation5 + $0xf10] sm:$0xff] }
 0x143   :  { %7209 = vmatprep.subr.bf16.mxu0 %v7208_v5  ;;  %7337 = vmatprep.subr.bf16.mxu1 %v7336_v9  ;;  %v7356_v5 = vpack.c.bf16 %v1090_v62, %v1085_v61  ;;  %v1095_v9 = vld [vmem:[#allocation5 + $0xf68] sm:$0xff]  ;;  %v7230_v11 = vpack.c.bf16 %v1087_v3, %v1082_v2  ;;  %v7358_v12 = vpack.c.bf16 %v1089_v6, %v1084_v4  ;;  %v1140_v62 = vld [vmem:[#allocation5 + $0x10d0] sm:$0xff]  ;;  %v1137_v3 = vld [vmem:[#allocation5 + $0x10b8] sm:$0xff] }
 0x144   :  { %v1135_v61 = vld [vmem:[#allocation5 + $0x10a8] sm:$0xff]  ;;  %v1132_v2 = vld [vmem:[#allocation5 + $0x1090] sm:$0xff]  ;;  %v1134_v4 = vld [vmem:[#allocation5 + $0x10a0] sm:$0xff] }
 0x145   :  { %v1139_v6 = vld [vmem:[#allocation5 + $0x10c8] sm:$0xff] }
 0x146   :  { %7211 = vmatpush1.bf16.msra.mxu0 %v7210_v18  ;;  %7339 = vmatpush1.bf16.msra.mxu1 %v7338_v20  ;;  %v1097_v18 = vld [vmem:[#allocation5 + $0xf78] sm:$0xff]  ;;  %v1094_v20 = vld [vmem:[#allocation5 + $0xf60] sm:$0xff] }
 0x147   :  { %7213 = vmatprep.subr.bf16.mxu0 %v7212_v21  ;;  %7341 = vmatprep.subr.bf16.mxu1 %v7340_v28  ;;  %v7360_v21 = vpack.c.bf16 %v1100_v10, %v1095_v9  ;;  %v9373_v28 = vld [vmem:[#allocation3] sm:$0xff]  ;;  %v7234_v26 = vpack.c.bf16 %v1097_v18, %v1092_v15  ;;  %v7362_v27 = vpack.c.bf16 %v1099_v22, %v1094_v20  ;;  %v1145_v9 = vld [vmem:[#allocation5 + $0x10f8] sm:$0xff]  ;;  %v1147_v18 = vld [vmem:[#allocation5 + $0x1108] sm:$0xff] }
 0x148   :  { %v1150_v10 = vld [vmem:[#allocation5 + $0x1120] sm:$0xff]  ;;  %v1144_v20 = vld [vmem:[#allocation5 + $0x10f0] sm:$0xff]  ;;  %v1149_v22 = vld [vmem:[#allocation5 + $0x1118] sm:$0xff] }
 0x149   :  { %v1142_v15 = vld [vmem:[#allocation5 + $0x10e0] sm:$0xff] }
 0x14a   :  { %7215 = vmatpush1.bf16.msra.mxu0 %v7214_v31  ;;  %7343 = vmatpush1.bf16.msra.mxu1 %v7342_v32  ;;  %v1102_v31 = vld [vmem:[#allocation5 + $0xfa0] sm:$0xff]  ;;  %v1107_v32 = vld [vmem:[#allocation5 + $0xfc8] sm:$0xff] }
 0x14b   :  { %7217 = vmatprep.subr.bf16.mxu0 %v7216_v34  ;;  %7345 = vmatprep.subr.bf16.mxu1 %v7344_v37  ;;  %v1104_v34 = vld [vmem:[#allocation5 + $0xfb0] sm:$0xff]  ;;  %v1118_v37 = vld [vmem:[#allocation5 + $0x1020] sm:$0xff]  ;;  %v7238_v41 = vpack.c.bf16 %v1107_v32, %v1102_v31  ;;  %v1157_v32 = vld [vmem:[#allocation5 + $0x1158] sm:$0xff] }
 0x14c   :  { %v1152_v31 = vld [vmem:[#allocation5 + $0x1130] sm:$0xff] }
 0x14e   :  { %7219 = vmatpush1.bf16.msra.mxu0 %v7218_v42  ;;  %7347 = vmatpush1.bf16.msra.mxu1 %v7346_v43  ;;  %v7366_v42 = vpack.c.bf16 %v1109_v36, %v1104_v34  ;;  %v7240_v43 = vpack.c.bf16 %v1118_v37, %v1113_v16  ;;  %v1154_v34 = vld [vmem:[#allocation5 + $0x1140] sm:$0xff]  ;;  %v1159_v36 = vld [vmem:[#allocation5 + $0x1168] sm:$0xff]  ;;  %v1168_v37 = vld [vmem:[#allocation5 + $0x11b0] sm:$0xff] }
 0x14f   :  { %7221 = vmatprep.subr.bf16.mxu0 %v7220_v14  ;;  %7349 = vmatprep.subr.bf16.mxu1 %v7348_v19  ;;  %v1112_v14 = vld [vmem:[#allocation5 + $0xff0] sm:$0xff]  ;;  %v1119_v19 = vld [vmem:[#allocation5 + $0x1028] sm:$0xff] }
 0x150   :  { %v1163_v16 = vld [vmem:[#allocation5 + $0x1188] sm:$0xff] }
 0x152   :  { %7223 = vmatpush1.bf16.msra.mxu0 %v7222_v51  ;;  %7351 = vmatpush1.bf16.msra.mxu1 %v7350_v52  ;;  %v7242_v51 = vpack.c.bf16 %v1117_v44, %v1112_v14  ;;  %v7370_v52 = vpack.c.bf16 %v1119_v19, %v1114_v45  ;;  %v1162_v14 = vld [vmem:[#allocation5 + $0x1180] sm:$0xff]  ;;  %v1167_v44 = vld [vmem:[#allocation5 + $0x11a8] sm:$0xff]  ;;  %v1164_v45 = vld [vmem:[#allocation5 + $0x1190] sm:$0xff] }
 0x153   :  { %7225 = vmatprep.subr.bf16.mxu0 %v7224_v53  ;;  %7353 = vmatprep.subr.bf16.mxu1 %v7352_v57  ;;  %v7244_v53 = vpack.c.bf16 %v1128_v48, %v1123_v33  ;;  %v7372_v57 = vpack.c.bf16 %v1130_v50, %v1125_v49  ;;  %v1169_v19 = vld [vmem:[#allocation5 + $0x11b8] sm:$0xff]  ;;  %v1178_v48 = vld [vmem:[#allocation5 + $0x1200] sm:$0xff]  ;;  %v1175_v49 = vld [vmem:[#allocation5 + $0x11e8] sm:$0xff] }
 0x154   :  { %v1173_v33 = vld [vmem:[#allocation5 + $0x11d8] sm:$0xff]  ;;  %v1180_v50 = vld [vmem:[#allocation5 + $0x1210] sm:$0xff] }
 0x156   :  { %7227 = vmatpush1.bf16.msra.mxu0 %v7226_v63  ;;  %7355 = vmatpush1.bf16.msra.mxu1 %v7354_v0  ;;  %v7246_v63 = vpack.c.bf16 %v1127_v55, %v1122_v54  ;;  %v7374_v0 = vpack.c.bf16 %v1129_v58, %v1124_v56  ;;  %v1172_v54 = vld [vmem:[#allocation5 + $0x11d0] sm:$0xff]  ;;  %v1177_v55 = vld [vmem:[#allocation5 + $0x11f8] sm:$0xff]  ;;  %v1174_v56 = vld [vmem:[#allocation5 + $0x11e0] sm:$0xff] }
 0x157   :  { %7229 = vmatprep.subr.bf16.mxu0 %v7228_v1  ;;  %7357 = vmatprep.subr.bf16.mxu1 %v7356_v5  ;;  %v7248_v1 = vpack.c.bf16 %v1138_v60, %v1133_v59  ;;  %v7376_v5 = vpack.c.bf16 %v1140_v62, %v1135_v61  ;;  %v1179_v58 = vld [vmem:[#allocation5 + $0x1208] sm:$0xff]  ;;  %v1188_v60 = vld [vmem:[#allocation5 + $0x1250] sm:$0xff]  ;;  %v1185_v61 = vld [vmem:[#allocation5 + $0x1238] sm:$0xff] }
 0x158   :  { %v1183_v59 = vld [vmem:[#allocation5 + $0x1228] sm:$0xff]  ;;  %v1190_v62 = vld [vmem:[#allocation5 + $0x1260] sm:$0xff] }
 0x159   :  { %1335 = vmatmul.mubr.f32.vlgmr.msra.gmra.mrb[8].mxu0 %v9373_v28  ;;  %1489 = vmatmul.mubr.f32.vlgmr.msra.gmra.mrb[8].mxu1 %v9373_v28 }
 0x15a   :  { %7231 = vmatpush1.bf16.msra.mxu0 %v7230_v11  ;;  %7359 = vmatpush1.bf16.msra.mxu1 %v7358_v12  ;;  %v7250_v11 = vpack.c.bf16 %v1137_v3, %v1132_v2  ;;  %v7378_v12 = vpack.c.bf16 %v1139_v6, %v1134_v4  ;;  %v1182_v2 = vld [vmem:[#allocation5 + $0x1220] sm:$0xff]  ;;  %v1187_v3 = vld [vmem:[#allocation5 + $0x1248] sm:$0xff]  ;;  %v1184_v4 = vld [vmem:[#allocation5 + $0x1230] sm:$0xff] }
 0x15b   :  { %7233 = vmatprep.subr.bf16.mxu0 %v7232_v13  ;;  %7361 = vmatprep.subr.bf16.mxu1 %v7360_v21  ;;  %v7252_v13 = vpack.c.bf16 %v1148_v8, %v1143_v7  ;;  %v7380_v21 = vpack.c.bf16 %v1150_v10, %v1145_v9  ;;  %v1189_v6 = vld [vmem:[#allocation5 + $0x1258] sm:$0xff]  ;;  %v1198_v8 = vld [vmem:[#allocation5 + $0x12a0] sm:$0xff]  ;;  %v1195_v9 = vld [vmem:[#allocation5 + $0x1288] sm:$0xff] }
 0x15c   :  { %1340 = vmatprep.mubr.f32.mxu0 %v9377_v29  ;;  %1494 = vmatprep.mubr.f32.mxu1 %v9377_v29  ;;  %v1193_v7 = vld [vmem:[#allocation5 + $0x1278] sm:$0xff]  ;;  %v1200_v10 = vld [vmem:[#allocation5 + $0x12b0] sm:$0xff] }
 0x15d   :  { %1341 = vmatmul.mubr.f32.gmra.mrb[10].mxu0 %v9381_v40  ;;  %1495 = vmatmul.mubr.f32.gmra.mrb[10].mxu1 %v9381_v40 }
 0x15e   :  { %7235 = vmatpush1.bf16.msra.mxu0 %v7234_v26  ;;  %7363 = vmatpush1.bf16.msra.mxu1 %v7362_v27  ;;  %v7254_v26 = vpack.c.bf16 %v1147_v18, %v1142_v15  ;;  %v7382_v27 = vpack.c.bf16 %v1149_v22, %v1144_v20  ;;  %v1192_v15 = vld [vmem:[#allocation5 + $0x1270] sm:$0xff]  ;;  %v1197_v18 = vld [vmem:[#allocation5 + $0x1298] sm:$0xff]  ;;  %v1194_v20 = vld [vmem:[#allocation5 + $0x1280] sm:$0xff] }
 0x15f   :  { %7237 = vmatprep.subr.bf16.mxu0 %v7236_v30  ;;  %7365 = vmatprep.subr.bf16.mxu1 %v7364_v35  ;;  %v7256_v30 = vpack.c.bf16 %v1158_v23, %v1153_v17  ;;  %v7384_v35 = vpack.c.bf16 %v1160_v25, %v1155_v24  ;;  %v1199_v22 = vld [vmem:[#allocation5 + $0x12a8] sm:$0xff]  ;;  %v1208_v23 = vld [vmem:[#allocation5 + $0x12f0] sm:$0xff]  ;;  %v1205_v24 = vld [vmem:[#allocation5 + $0x12d8] sm:$0xff] }
 0x160   :  { %1411 = vmatprep.mubr.f32.mxu0 %v9385_v47  ;;  %1565 = vmatprep.mubr.f32.mxu1 %v9385_v47  ;;  %v1203_v17 = vld [vmem:[#allocation5 + $0x12c8] sm:$0xff]  ;;  %v1210_v25 = vld [vmem:[#allocation5 + $0x1300] sm:$0xff] }
 0x162   :  { %7239 = vmatpush1.bf16.msra.mxu0 %v7238_v41  ;;  %7367 = vmatpush1.bf16.msra.mxu1 %v7366_v42  ;;  %v7258_v41 = vpack.c.bf16 %v1157_v32, %v1152_v31  ;;  %v7386_v42 = vpack.c.bf16 %v1159_v36, %v1154_v34  ;;  %v1202_v31 = vld [vmem:[#allocation5 + $0x12c0] sm:$0xff]  ;;  %v1207_v32 = vld [vmem:[#allocation5 + $0x12e8] sm:$0xff]  ;;  %v1204_v34 = vld [vmem:[#allocation5 + $0x12d0] sm:$0xff] }
 0x163   :  { %7241 = vmatprep.subr.bf16.mxu0 %v7240_v43  ;;  %7369 = vmatprep.subr.bf16.mxu1 %v7368_v46  ;;  %v7260_v43 = vpack.c.bf16 %v1168_v37, %v1163_v16  ;;  %v7388_v46 = vpack.c.bf16 %v1170_v39, %v1165_v38  ;;  %v1209_v36 = vld [vmem:[#allocation5 + $0x12f8] sm:$0xff]  ;;  %v1218_v37 = vld [vmem:[#allocation5 + $0x1340] sm:$0xff]  ;;  %v1215_v38 = vld [vmem:[#allocation5 + $0x1328] sm:$0xff] }
 0x164   :  { %v1213_v16 = vld [vmem:[#allocation5 + $0x1318] sm:$0xff]  ;;  %v1220_v39 = vld [vmem:[#allocation5 + $0x1350] sm:$0xff] }
 0x166   :  { %7243 = vmatpush1.bf16.msra.mxu0 %v7242_v51  ;;  %7371 = vmatpush1.bf16.msra.mxu1 %v7370_v52  ;;  %v7262_v51 = vpack.c.bf16 %v1167_v44, %v1162_v14  ;;  %v7390_v52 = vpack.c.bf16 %v1169_v19, %v1164_v45  ;;  %v1212_v14 = vld [vmem:[#allocation5 + $0x1310] sm:$0xff]  ;;  %v1217_v44 = vld [vmem:[#allocation5 + $0x1338] sm:$0xff]  ;;  %v1214_v45 = vld [vmem:[#allocation5 + $0x1320] sm:$0xff] }
 0x167   :  { %7245 = vmatprep.subr.bf16.mxu0 %v7244_v53  ;;  %7373 = vmatprep.subr.bf16.mxu1 %v7372_v57  ;;  %v7264_v53 = vpack.c.bf16 %v1178_v48, %v1173_v33  ;;  %v7392_v57 = vpack.c.bf16 %v1180_v50, %v1175_v49  ;;  %v1219_v19 = vld [vmem:[#allocation5 + $0x1348] sm:$0xff]  ;;  %v1228_v48 = vld [vmem:[#allocation5 + $0x1390] sm:$0xff]  ;;  %v1225_v49 = vld [vmem:[#allocation5 + $0x1378] sm:$0xff] }
 0x168   :  { %v1223_v33 = vld [vmem:[#allocation5 + $0x1368] sm:$0xff]  ;;  %v1230_v50 = vld [vmem:[#allocation5 + $0x13a0] sm:$0xff] }
 0x16a   :  { %7247 = vmatpush1.bf16.msra.mxu0 %v7246_v63  ;;  %7375 = vmatpush1.bf16.msra.mxu1 %v7374_v0  ;;  %v7266_v63 = vpack.c.bf16 %v1177_v55, %v1172_v54  ;;  %v7394_v0 = vpack.c.bf16 %v1179_v58, %v1174_v56  ;;  %v1222_v54 = vld [vmem:[#allocation5 + $0x1360] sm:$0xff]  ;;  %v1227_v55 = vld [vmem:[#allocation5 + $0x1388] sm:$0xff]  ;;  %v1224_v56 = vld [vmem:[#allocation5 + $0x1370] sm:$0xff] }
 0x16b   :  { %7249 = vmatprep.subr.bf16.mxu0 %v7248_v1  ;;  %7377 = vmatprep.subr.bf16.mxu1 %v7376_v5  ;;  %v7268_v1 = vpack.c.bf16 %v1188_v60, %v1183_v59  ;;  %v7396_v5 = vpack.c.bf16 %v1190_v62, %v1185_v61  ;;  %v1229_v58 = vld [vmem:[#allocation5 + $0x1398] sm:$0xff]  ;;  %v1238_v60 = vld [vmem:[#allocation5 + $0x13e0] sm:$0xff]  ;;  %v1235_v61 = vld [vmem:[#allocation5 + $0x13c8] sm:$0xff] }
 0x16c   :  { %v1233_v59 = vld [vmem:[#allocation5 + $0x13b8] sm:$0xff]  ;;  %v1240_v62 = vld [vmem:[#allocation5 + $0x13f0] sm:$0xff] }
 0x16e   :  { %7251 = vmatpush1.bf16.msra.mxu0 %v7250_v11  ;;  %7379 = vmatpush1.bf16.msra.mxu1 %v7378_v12  ;;  %v7270_v11 = vpack.c.bf16 %v1187_v3, %v1182_v2  ;;  %v7398_v12 = vpack.c.bf16 %v1189_v6, %v1184_v4  ;;  %v1232_v2 = vld [vmem:[#allocation5 + $0x13b0] sm:$0xff]  ;;  %v1237_v3 = vld [vmem:[#allocation5 + $0x13d8] sm:$0xff]  ;;  %v1234_v4 = vld [vmem:[#allocation5 + $0x13c0] sm:$0xff] }
 0x16f   :  { %7253 = vmatprep.subr.bf16.mxu0 %v7252_v13  ;;  %7381 = vmatprep.subr.bf16.mxu1 %v7380_v21  ;;  %v7272_v13 = vpack.c.bf16 %v1198_v8, %v1193_v7  ;;  %v7400_v21 = vpack.c.bf16 %v1200_v10, %v1195_v9  ;;  %v1239_v6 = vld [vmem:[#allocation5 + $0x13e8] sm:$0xff]  ;;  %v1006_v7 = vld [vmem:[#allocation5 + $0xca0] sm:$0xff] }
 0x170   :  { %v1011_v8 = vld [vmem:[#allocation5 + $0xcc8] sm:$0xff]  ;;  %v1166_v9 = vld [vmem:[#allocation5 + $0x11a0] sm:$0xff] }
 0x171   :  { %v1171_v10 = vld [vmem:[#allocation5 + $0x11c8] sm:$0xff] }
 0x172   :  { %7255 = vmatpush1.bf16.msra.mxu0 %v7254_v26  ;;  %7383 = vmatpush1.bf16.msra.mxu1 %v7382_v27  ;;  %v7274_v26 = vpack.c.bf16 %v1197_v18, %v1192_v15  ;;  %v7402_v27 = vpack.c.bf16 %v1199_v22, %v1194_v20  ;;  %v926_v15 = vld [vmem:[#allocation5 + $0xa20] sm:$0xff]  ;;  %v931_v18 = vld [vmem:[#allocation5 + $0xa48] sm:$0xff]  ;;  %v7452_v20 = vpack.c.bf16 %v1171_v10, %v1166_v9 }
 0x173   :  { %7257 = vmatprep.subr.bf16.mxu0 %v7256_v30  ;;  %7385 = vmatprep.subr.bf16.mxu1 %v7384_v35  ;;  %v7276_v30 = vpack.c.bf16 %v1208_v23, %v1203_v17  ;;  %v7404_v35 = vpack.c.bf16 %v1210_v25, %v1205_v24  ;;  %v1091_v22 = vld [vmem:[#allocation5 + $0xf48] sm:$0xff]  ;;  %v1016_v17 = vld [vmem:[#allocation5 + $0xcf0] sm:$0xff]  ;;  %v1021_v23 = vld [vmem:[#allocation5 + $0xd18] sm:$0xff]  ;;  %v7422_v24 = vpack.c.bf16 %v931_v18, %v926_v15 }
 0x174   :  { %v1176_v25 = vld [vmem:[#allocation5 + $0x11f0] sm:$0xff]  ;;  %v1131_v10 = vld [vmem:[#allocation5 + $0x1088] sm:$0xff]  ;;  %v1221_v15 = vld [vmem:[#allocation5 + $0x1358] sm:$0xff] }
 0x176   :  { %7259 = vmatpush1.bf16.msra.mxu0 %v7258_v41  ;;  %7387 = vmatpush1.bf16.msra.mxu1 %v7386_v42  ;;  %v7278_v41 = vpack.c.bf16 %v1207_v32, %v1202_v31  ;;  %v7406_v42 = vpack.c.bf16 %v1209_v36, %v1204_v34  ;;  %v941_v31 = vld [vmem:[#allocation5 + $0xa98] sm:$0xff]  ;;  %v1096_v32 = vld [vmem:[#allocation5 + $0xf70] sm:$0xff]  ;;  %v7424_v34 = vpack.c.bf16 %v1021_v23, %v1016_v17  ;;  %v1026_v36 = vld [vmem:[#allocation5 + $0xd40] sm:$0xff] }
 0x177   :  { %7261 = vmatprep.subr.bf16.mxu0 %v7260_v43  ;;  %7389 = vmatprep.subr.bf16.mxu1 %v7388_v46  ;;  %v7280_v43 = vpack.c.bf16 %v1218_v37, %v1213_v16  ;;  %v7408_v46 = vpack.c.bf16 %v1220_v39, %v1215_v38  ;;  %v1031_v16 = vld [vmem:[#allocation5 + $0xd68] sm:$0xff]  ;;  %v9389_v37 = vld [vmem:[#allocation3 + $0x10] sm:$0xff]  ;;  %v1186_v39 = vld [vmem:[#allocation5 + $0x1240] sm:$0xff] }
 0x178   :  { %v1136_v17 = vld [vmem:[#allocation5 + $0x10b0] sm:$0xff] }
 0x17a   :  { %7263 = vmatpush1.bf16.msra.mxu0 %v7262_v51  ;;  %7391 = vmatpush1.bf16.msra.mxu1 %v7390_v52  ;;  %v7282_v51 = vpack.c.bf16 %v1217_v44, %v1212_v14  ;;  %v7410_v52 = vpack.c.bf16 %v1219_v19, %v1214_v45  ;;  %v7428_v44 = vpack.c.bf16 %v1031_v16, %v1026_v36  ;;  %v946_v45 = vld [vmem:[#allocation5 + $0xac0] sm:$0xff]  ;;  %v991_v36 = vld [vmem:[#allocation5 + $0xc28] sm:$0xff] }
 0x17b   :  { %7265 = vmatprep.subr.bf16.mxu0 %v7264_v53  ;;  %7393 = vmatprep.subr.bf16.mxu1 %v7392_v57  ;;  %v7284_v53 = vpack.c.bf16 %v1228_v48, %v1223_v33  ;;  %v7412_v57 = vpack.c.bf16 %v1230_v50, %v1225_v49  ;;  %v1106_v19 = vld [vmem:[#allocation5 + $0xfc0] sm:$0xff]  ;;  %v1111_v48 = vld [vmem:[#allocation5 + $0xfe8] sm:$0xff]  ;;  %v1036_v49 = vld [vmem:[#allocation5 + $0xd90] sm:$0xff] }
 0x17c   :  { %v1041_v50 = vld [vmem:[#allocation5 + $0xdb8] sm:$0xff]  ;;  %v1146_v16 = vld [vmem:[#allocation5 + $0x1100] sm:$0xff] }
 0x17e   :  { %7267 = vmatpush1.bf16.msra.mxu0 %v7266_v63  ;;  %7395 = vmatpush1.bf16.msra.mxu1 %v7394_v0  ;;  %v7286_v63 = vpack.c.bf16 %v1227_v55, %v1222_v54  ;;  %v7414_v0 = vpack.c.bf16 %v1229_v58, %v1224_v56  ;;  %v7462_v55 = vpack.c.bf16 %v1111_v48, %v1106_v19  ;;  %v961_v58 = vld [vmem:[#allocation5 + $0xb38] sm:$0xff] }
 0x17f   :  { %7269 = vmatprep.subr.bf16.mxu0 %v7268_v1  ;;  %7397 = vmatprep.subr.bf16.mxu1 %v7396_v5  ;;  %v7288_v1 = vpack.c.bf16 %v1238_v60, %v1233_v59  ;;  %v7416_v5 = vpack.c.bf16 %v1240_v62, %v1235_v61  ;;  %v7432_v56 = vpack.c.bf16 %v1041_v50, %v1036_v49  ;;  %v1116_v59 = vld [vmem:[#allocation5 + $0x1010] sm:$0xff]  ;;  %v1121_v61 = vld [vmem:[#allocation5 + $0x1038] sm:$0xff]  ;;  %v1046_v62 = vld [vmem:[#allocation5 + $0xde0] sm:$0xff] }
 0x180   :  { %v1001_v48 = vld [vmem:[#allocation5 + $0xc78] sm:$0xff]  ;;  %v1156_v49 = vld [vmem:[#allocation5 + $0x1150] sm:$0xff] }
 0x182   :  { %7271 = vmatpush1.bf16.msra.mxu0 %v7270_v11  ;;  %7399 = vmatpush1.bf16.msra.mxu1 %v7398_v12  ;;  %v7290_v11 = vpack.c.bf16 %v1237_v3, %v1232_v2  ;;  %v7418_v12 = vpack.c.bf16 %v1239_v6, %v1234_v4  ;;  %v1211_v2 = vld [vmem:[#allocation5 + $0x1308] sm:$0xff]  ;;  %v7466_v4 = vpack.c.bf16 %v1121_v61, %v1116_v59  ;;  %v966_v6 = vld [vmem:[#allocation5 + $0xb60] sm:$0xff] }
 0x183   :  { %7273 = vmatprep.subr.bf16.mxu0 %v7272_v13  ;;  %7401 = vmatprep.subr.bf16.mxu1 %v7400_v21  ;;  %v7420_v13 = vpack.c.bf16 %v1011_v8, %v1006_v7  ;;  %v1086_v21 = vld [vmem:[#allocation5 + $0xf20] sm:$0xff]  ;;  %v971_v7 = vld [vmem:[#allocation5 + $0xb88] sm:$0xff] }
 0x184   :  { %v1126_v8 = vld [vmem:[#allocation5 + $0x1060] sm:$0xff]  ;;  %v7438_v18 = vpack.c.bf16 %v971_v7, %v966_v6  ;;  %v1744_v61 = vld [vmem:[#allocation5 + $0x1428] sm:$0xff] }
 0x186   :  { %7275 = vmatpush1.bf16.msra.mxu0 %v7274_v26  ;;  %7403 = vmatpush1.bf16.msra.mxu1 %v7402_v27  ;;  %v1181_v26 = vld [vmem:[#allocation5 + $0x1218] sm:$0xff]  ;;  %v7454_v27 = vpack.c.bf16 %v1091_v22, %v1086_v21  ;;  %v976_v21 = vld [vmem:[#allocation5 + $0xbb0] sm:$0xff] }
 0x187   :  { %7277 = vmatprep.subr.bf16.mxu0 %v7276_v30  ;;  %7405 = vmatprep.subr.bf16.mxu1 %v7404_v35  ;;  %v936_v30 = vld [vmem:[#allocation5 + $0xa70] sm:$0xff]  ;;  %v1101_v35 = vld [vmem:[#allocation5 + $0xf98] sm:$0xff]  ;;  %v7456_v38 = vpack.c.bf16 %v1181_v26, %v1176_v25  ;;  %v1066_v25 = vld [vmem:[#allocation5 + $0xe80] sm:$0xff] }
 0x188   :  { %v7458_v14 = vpack.c.bf16 %v1101_v35, %v1096_v32  ;;  %v981_v22 = vld [vmem:[#allocation5 + $0xbd8] sm:$0xff]  ;;  %v1071_v26 = vld [vmem:[#allocation5 + $0xea8] sm:$0xff]  ;;  %v986_v35 = vld [vmem:[#allocation5 + $0xc00] sm:$0xff] }
 0x18a   :  { %7279 = vmatpush1.bf16.msra.mxu0 %v7278_v41  ;;  %7407 = vmatpush1.bf16.msra.mxu1 %v7406_v42  ;;  %v1191_v41 = vld [vmem:[#allocation5 + $0x1268] sm:$0xff]  ;;  %v7426_v42 = vpack.c.bf16 %v941_v31, %v936_v30  ;;  %v7442_v31 = vpack.c.bf16 %v981_v22, %v976_v21 }
 0x18b   :  { %7281 = vmatprep.subr.bf16.mxu0 %v7280_v43  ;;  %7409 = vmatprep.subr.bf16.mxu1 %v7408_v46  ;;  %v9393_v43 = vld [vmem:[#allocation3 + $0x38] sm:$0xff]  ;;  %v951_v46 = vld [vmem:[#allocation5 + $0xae8] sm:$0xff]  ;;  %v7460_v33 = vpack.c.bf16 %v1191_v41, %v1186_v39  ;;  %v1076_v41 = vld [vmem:[#allocation5 + $0xed0] sm:$0xff] }
 0x18c   :  { %v7430_v54 = vpack.c.bf16 %v951_v46, %v946_v45  ;;  %v1231_v30 = vld [vmem:[#allocation5 + $0x13a8] sm:$0xff]  ;;  %v7446_v45 = vpack.c.bf16 %v991_v36, %v986_v35  ;;  %v1769_v35 = vld [vmem:[#allocation5 + $0x14f0] sm:$0xff]  ;;  %v1774_v36 = vld [vmem:[#allocation5 + $0x1518] sm:$0xff] }
 0x18d   :  { %v1151_v39 = vld [vmem:[#allocation5 + $0x1128] sm:$0xff] }
 0x18e   :  { %7283 = vmatpush1.bf16.msra.mxu0 %v7282_v51  ;;  %7411 = vmatpush1.bf16.msra.mxu1 %v7410_v52  ;;  %v9397_v51 = vld [vmem:[#allocation3 + $0x30] sm:$0xff]  ;;  %v7478_v46 = vpack.c.bf16 %v1151_v39, %v1146_v16  ;;  %v1771_v16 = vld [vmem:[#allocation5 + $0x1500] sm:$0xff]  ;;  %v1776_v39 = vld [vmem:[#allocation5 + $0x1528] sm:$0xff] }
 0x18f   :  { %7285 = vmatprep.subr.bf16.mxu0 %v7284_v53  ;;  %7413 = vmatprep.subr.bf16.mxu1 %v7412_v57  ;;  %v1196_v52 = vld [vmem:[#allocation5 + $0x1290] sm:$0xff]  ;;  %v1201_v53 = vld [vmem:[#allocation5 + $0x12b8] sm:$0xff] }
 0x190   :  { %v956_v57 = vld [vmem:[#allocation5 + $0xb10] sm:$0xff]  ;;  %v7464_v60 = vpack.c.bf16 %v1201_v53, %v1196_v52  ;;  %v1161_v52 = vld [vmem:[#allocation5 + $0x1178] sm:$0xff]  ;;  %v1740_v53 = vld [vmem:[#allocation5 + $0x1408] sm:$0xff] }
 0x191   :  { %v7434_v3 = vpack.c.bf16 %v961_v58, %v956_v57  ;;  %v7482_v58 = vpack.c.bf16 %v1161_v52, %v1156_v49  ;;  %v1790_v49 = vld [vmem:[#allocation5 + $0x1598] sm:$0xff]  ;;  %v1792_v52 = vld [vmem:[#allocation5 + $0x15a8] sm:$0xff] }
 0x192   :  { %7287 = vmatpush1.bf16.msra.mxu0 %v7286_v63  ;;  %7415 = vmatpush1.bf16.msra.mxu1 %v7414_v0  ;;  %v1051_v63 = vld [vmem:[#allocation5 + $0xe08] sm:$0xff] }
 0x193   :  { %7289 = vmatprep.subr.bf16.mxu0 %v7288_v1  ;;  %7417 = vmatprep.subr.bf16.mxu1 %v7416_v5  ;;  %v9401_v0 = vld [vmem:[#allocation3 + $0x8] sm:$0xff]  ;;  %v1206_v1 = vld [vmem:[#allocation5 + $0x12e0] sm:$0xff]  ;;  %v7436_v5 = vpack.c.bf16 %v1051_v63, %v1046_v62  ;;  %v1741_v63 = vld [vmem:[#allocation5 + $0x1410] sm:$0xff] }
 0x194   :  { %v7468_v9 = vpack.c.bf16 %v1211_v2, %v1206_v1  ;;  %v1746_v1 = vld [vmem:[#allocation5 + $0x1438] sm:$0xff] }
 0x195   :  { %v1750_v2 = vld [vmem:[#allocation5 + $0x1458] sm:$0xff]  ;;  %v7614_v7 = vpack.c.bf16 %v1746_v1, %v1741_v63  ;;  %v1807_v1 = vld [vmem:[#allocation5 + $0x1620] sm:$0xff] }
 0x196   :  { %7291 = vmatpush1.bf16.msra.mxu0 %v7290_v11  ;;  %7419 = vmatpush1.bf16.msra.mxu1 %v7418_v12  ;;  %v1056_v11 = vld [vmem:[#allocation5 + $0xe30] sm:$0xff]  ;;  %v1061_v12 = vld [vmem:[#allocation5 + $0xe58] sm:$0xff] }
 0x197   :  { %7421 = vmatprep.subr.bf16.mxu0 %v7420_v13  ;;  %7453 = vmatprep.subr.bf16.mxu1 %v7452_v20  ;;  %v1216_v13 = vld [vmem:[#allocation5 + $0x1330] sm:$0xff]  ;;  %v7440_v20 = vpack.c.bf16 %v1061_v12, %v1056_v11  ;;  %v1802_v63 = vld [vmem:[#allocation5 + $0x15f8] sm:$0xff] }
 0x198   :  { %v7472_v23 = vpack.c.bf16 %v1221_v15, %v1216_v13  ;;  %v1756_v13 = vld [vmem:[#allocation5 + $0x1488] sm:$0xff] }
 0x199   :  { %1412 = vmatmul.mubr.f32.vlgmr.msra.gmra.mrb[8].mxu0 %v9389_v37  ;;  %1566 = vmatmul.mubr.f32.vlgmr.msra.gmra.mrb[8].mxu1 %v9389_v37  ;;  %v1760_v15 = vld [vmem:[#allocation5 + $0x14a8] sm:$0xff] }
 0x19a   :  { %7423 = vmatpush3.bf16.msra.mxu0 %v7422_v24  ;;  %7455 = vmatpush3.bf16.msra.mxu1 %v7454_v27  ;;  %v1141_v24 = vld [vmem:[#allocation5 + $0x10d8] sm:$0xff]  ;;  %v1226_v27 = vld [vmem:[#allocation5 + $0x1380] sm:$0xff] }
 0x19b   :  { %1417 = vmatprep.mubr.f32.mxu0 %v9393_v43  ;;  %1571 = vmatprep.mubr.f32.mxu1 %v9393_v43  ;;  %v7474_v32 = vpack.c.bf16 %v1141_v24, %v1136_v17  ;;  %v1764_v24 = vld [vmem:[#allocation5 + $0x14c8] sm:$0xff] }
 0x19c   :  { %7425 = vmatprep.subr.bf16.mxu0 %v7424_v34  ;;  %7457 = vmatprep.subr.bf16.mxu1 %v7456_v38  ;;  %v7444_v34 = vpack.c.bf16 %v1071_v26, %v1066_v25  ;;  %v7476_v38 = vpack.c.bf16 %v1231_v30, %v1226_v27  ;;  %v1761_v25 = vld [vmem:[#allocation5 + $0x14b0] sm:$0xff]  ;;  %v1766_v27 = vld [vmem:[#allocation5 + $0x14d8] sm:$0xff] }
 0x19d   :  { %1418 = vmatmul.mubr.f32.gmra.mrb[10].mxu0 %v9397_v51  ;;  %1572 = vmatmul.mubr.f32.gmra.mrb[10].mxu1 %v9397_v51  ;;  %v1770_v30 = vld [vmem:[#allocation5 + $0x14f8] sm:$0xff] }
 0x19e   :  { %7427 = vmatpush3.bf16.msra.mxu0 %v7426_v42  ;;  %7459 = vmatpush3.bf16.msra.mxu1 %v7458_v14  ;;  %v1081_v42 = vld [vmem:[#allocation5 + $0xef8] sm:$0xff]  ;;  %v1236_v14 = vld [vmem:[#allocation5 + $0x13d0] sm:$0xff] }
 0x19f   :  { %7429 = vmatprep.subr.bf16.mxu0 %v7428_v44  ;;  %7461 = vmatprep.subr.bf16.mxu1 %v7460_v33  ;;  %v1241_v44 = vld [vmem:[#allocation5 + $0x13f8] sm:$0xff]  ;;  %v7448_v19 = vpack.c.bf16 %v1081_v42, %v1076_v41  ;;  %v996_v33 = vld [vmem:[#allocation5 + $0xc50] sm:$0xff]  ;;  %v1780_v41 = vld [vmem:[#allocation5 + $0x1548] sm:$0xff] }
 0x1a0   :  { %1642 = vmatprep.mubr.f32.mxu0 %v9401_v0  ;;  %1717 = vmatprep.mubr.f32.mxu1 %v9385_v47  ;;  %v7470_v47 = vpack.c.bf16 %v1131_v10, %v1126_v8  ;;  %v7480_v50 = vpack.c.bf16 %v1241_v44, %v1236_v14  ;;  %v7450_v57 = vpack.c.bf16 %v1001_v48, %v996_v33  ;;  %v1749_v8 = vld [vmem:[#allocation5 + $0x1450] sm:$0xff]  ;;  %v1751_v10 = vld [vmem:[#allocation5 + $0x1460] sm:$0xff]  ;;  %v1786_v48 = vld [vmem:[#allocation5 + $0x1578] sm:$0xff] }
 0x1a1   :  { %v7618_v22 = vpack.c.bf16 %v1756_v13, %v1751_v10  ;;  %v1787_v42 = vld [vmem:[#allocation5 + $0x1580] sm:$0xff]  ;;  %v7626_v14 = vpack.c.bf16 %v1776_v39, %v1771_v16  ;;  %v1806_v10 = vld [vmem:[#allocation5 + $0x1618] sm:$0xff] }
 0x1a2   :  { %7431 = vmatpush3.bf16.msra.mxu0 %v7430_v54  ;;  %7463 = vmatpush3.bf16.msra.mxu1 %v7462_v55  ;;  %v1745_v54 = vld [vmem:[#allocation5 + $0x1430] sm:$0xff]  ;;  %v1742_v55 = vld [vmem:[#allocation5 + $0x1418] sm:$0xff]  ;;  %v1819_v39 = vld [vmem:[#allocation5 + $0x1680] sm:$0xff] }
 0x1a3   :  { %7433 = vmatprep.subr.bf16.mxu0 %v7432_v56  ;;  %7465 = vmatprep.subr.bf16.mxu1 %v7464_v60  ;;  %v1747_v56 = vld [vmem:[#allocation5 + $0x1440] sm:$0xff]  ;;  %v7484_v59 = vpack.c.bf16 %v1745_v54, %v1740_v53  ;;  %v1797_v53 = vld [vmem:[#allocation5 + $0x15d0] sm:$0xff] }
 0x1a4   :  { %v1739_v60 = vld [vmem:[#allocation5 + $0x1400] sm:$0xff]  ;;  %v7612_v62 = vpack.c.bf16 %v1747_v56, %v1742_v55  ;;  %v1789_v56 = vld [vmem:[#allocation5 + $0x1590] sm:$0xff] }
 0x1a5   :  { %v7486_v6 = vpack.c.bf16 %v1744_v61, %v1739_v60  ;;  %v1796_v60 = vld [vmem:[#allocation5 + $0x15c8] sm:$0xff] }
 0x1a6   :  { %7435 = vmatpush3.bf16.msra.mxu0 %v7434_v3  ;;  %7467 = vmatpush3.bf16.msra.mxu1 %v7466_v4  ;;  %v1755_v3 = vld [vmem:[#allocation5 + $0x1480] sm:$0xff]  ;;  %v1752_v4 = vld [vmem:[#allocation5 + $0x1468] sm:$0xff] }
 0x1a7   :  { %7437 = vmatprep.subr.bf16.mxu0 %v7436_v5  ;;  %7469 = vmatprep.subr.bf16.mxu1 %v7468_v9  ;;  %v1757_v5 = vld [vmem:[#allocation5 + $0x1490] sm:$0xff]  ;;  %v1754_v9 = vld [vmem:[#allocation5 + $0x1478] sm:$0xff]  ;;  %v7488_v11 = vpack.c.bf16 %v1755_v3, %v1750_v2  ;;  %v1800_v61 = vld [vmem:[#allocation5 + $0x15e8] sm:$0xff] }
 0x1a8   :  { %v7616_v12 = vpack.c.bf16 %v1757_v5, %v1752_v4  ;;  %v7490_v21 = vpack.c.bf16 %v1754_v9, %v1749_v8  ;;  %v1799_v5 = vld [vmem:[#allocation5 + $0x15e0] sm:$0xff]  ;;  %v7636_v9 = vpack.c.bf16 %v1807_v1, %v1802_v63  ;;  %v1846_v1 = vld [vmem:[#allocation5 + $0x1758] sm:$0xff] }
 0x1aa   :  { %7439 = vmatpush3.bf16.msra.mxu0 %v7438_v18  ;;  %7471 = vmatpush3.bf16.msra.mxu1 %v7470_v47  ;;  %v1765_v18 = vld [vmem:[#allocation5 + $0x14d0] sm:$0xff]  ;;  %v1762_v47 = vld [vmem:[#allocation5 + $0x14b8] sm:$0xff] }
 0x1ab   :  { %7441 = vmatprep.subr.bf16.mxu0 %v7440_v20  ;;  %7473 = vmatprep.subr.bf16.mxu1 %v7472_v23  ;;  %v1767_v20 = vld [vmem:[#allocation5 + $0x14e0] sm:$0xff]  ;;  %v7492_v17 = vpack.c.bf16 %v1765_v18, %v1760_v15  ;;  %v1812_v18 = vld [vmem:[#allocation5 + $0x1648] sm:$0xff] }
 0x1ac   :  { %v1759_v23 = vld [vmem:[#allocation5 + $0x14a0] sm:$0xff]  ;;  %v7620_v26 = vpack.c.bf16 %v1767_v20, %v1762_v47  ;;  %v1817_v47 = vld [vmem:[#allocation5 + $0x1670] sm:$0xff] }
 0x1ae   :  { %7443 = vmatpush3.bf16.msra.mxu0 %v7442_v31  ;;  %7475 = vmatpush3.bf16.msra.mxu1 %v7474_v32  ;;  %v1777_v31 = vld [vmem:[#allocation5 + $0x1530] sm:$0xff]  ;;  %v7622_v32 = vpack.c.bf16 %v1766_v27, %v1761_v25  ;;  %v1811_v25 = vld [vmem:[#allocation5 + $0x1640] sm:$0xff]  ;;  %v7640_v27 = vpack.c.bf16 %v1817_v47, %v1812_v18  ;;  %v1856_v47 = vld [vmem:[#allocation5 + $0x17a8] sm:$0xff] }
 0x1af   :  { %7445 = vmatprep.subr.bf16.mxu0 %v7444_v34  ;;  %7477 = vmatprep.subr.bf16.mxu1 %v7476_v38 }
 0x1b2   :  { %7447 = vmatpush3.bf16.msra.mxu0 %v7446_v45  ;;  %7479 = vmatpush3.bf16.msra.mxu1 %v7478_v46  ;;  %v1779_v45 = vld [vmem:[#allocation5 + $0x1540] sm:$0xff]  ;;  %v1784_v46 = vld [vmem:[#allocation5 + $0x1568] sm:$0xff] }
 0x1b3   :  { %7449 = vmatprep.subr.bf16.mxu0 %v7448_v19  ;;  %7481 = vmatprep.subr.bf16.mxu1 %v7480_v50  ;;  %v1781_v19 = vld [vmem:[#allocation5 + $0x1550] sm:$0xff]  ;;  %v1795_v50 = vld [vmem:[#allocation5 + $0x15c0] sm:$0xff]  ;;  %v7502_v54 = vpack.c.bf16 %v1784_v46, %v1779_v45 }
 0x1b4   :  { %v7504_v55 = vpack.c.bf16 %v1795_v50, %v1790_v49  ;;  %v1837_v45 = vld [vmem:[#allocation5 + $0x1710] sm:$0xff]  ;;  %v1834_v49 = vld [vmem:[#allocation5 + $0x16f8] sm:$0xff]  ;;  %v1831_v50 = vld [vmem:[#allocation5 + $0x16e0] sm:$0xff] }
 0x1b6   :  { %7451 = vmatpush3.bf16.msra.mxu0 %v7450_v57  ;;  %7483 = vmatpush3.bf16.msra.mxu1 %v7482_v58  ;;  %v1794_v57 = vld [vmem:[#allocation5 + $0x15b8] sm:$0xff]  ;;  %v1791_v58 = vld [vmem:[#allocation5 + $0x15a0] sm:$0xff] }
 0x1b7   :  { %7485 = vmatprep.subr.bf16.mxu0 %v7484_v59  ;;  %7613 = vmatprep.subr.bf16.mxu1 %v7612_v62  ;;  %v7632_v59 = vpack.c.bf16 %v1797_v53, %v1792_v52  ;;  %v1805_v62 = vld [vmem:[#allocation5 + $0x1610] sm:$0xff]  ;;  %v7506_v2 = vpack.c.bf16 %v1794_v57, %v1789_v56  ;;  %v7634_v3 = vpack.c.bf16 %v1796_v60, %v1791_v58  ;;  %v1836_v53 = vld [vmem:[#allocation5 + $0x1708] sm:$0xff]  ;;  %v1847_v56 = vld [vmem:[#allocation5 + $0x1760] sm:$0xff] }
 0x1b8   :  { %v7508_v4 = vpack.c.bf16 %v1805_v62, %v1800_v61  ;;  %v7650_v58 = vpack.c.bf16 %v1836_v53, %v1831_v50  ;;  %v1839_v60 = vld [vmem:[#allocation5 + $0x1720] sm:$0xff]  ;;  %v1844_v61 = vld [vmem:[#allocation5 + $0x1748] sm:$0xff]  ;;  %v1841_v62 = vld [vmem:[#allocation5 + $0x1730] sm:$0xff] }
 0x1b9   :  { %1643 = vmatmul.mubr.f32.vlgmr.msra.gmra.mrb[12].mxu0 %v9373_v28  ;;  %1718 = vmatmul.mubr.f32.vlgmr.msra.gmra.mrb[12].mxu1 %v9389_v37  ;;  %v1775_v28 = vld [vmem:[#allocation5 + $0x1520] sm:$0xff]  ;;  %v1772_v37 = vld [vmem:[#allocation5 + $0x1508] sm:$0xff]  ;;  %v1882_v50 = vld [vmem:[#allocation5 + $0x1878] sm:$0xff] }
 0x1ba   :  { %7487 = vmatpush1.bf16.msra.mxu0 %v7486_v6  ;;  %7615 = vmatpush1.bf16.msra.mxu1 %v7614_v7  ;;  %v7496_v34 = vpack.c.bf16 %v1775_v28, %v1770_v30  ;;  %v7624_v38 = vpack.c.bf16 %v1777_v31, %v1772_v37  ;;  %v1804_v6 = vld [vmem:[#allocation5 + $0x1608] sm:$0xff]  ;;  %v1801_v7 = vld [vmem:[#allocation5 + $0x15f0] sm:$0xff]  ;;  %v436_v53 = vld [vmem:[#allocation7] sm:$0x1f] }
 0x1bb   :  { %1647 = vmatprep.mubr.f32.mxu0 %v9377_v29  ;;  %7489 = vmatprep.subr.bf16.mxu0 %v7488_v11  ;;  %v7494_v29 = vpack.c.bf16 %v1764_v24, %v1759_v23  ;;  %v1810_v11 = vld [vmem:[#allocation5 + $0x1638] sm:$0xff]  ;;  %v1809_v23 = vld [vmem:[#allocation5 + $0x1630] sm:$0xff]  ;;  %v1816_v30 = vld [vmem:[#allocation5 + $0x1668] sm:$0xff] }
 0x1bc   :  { %7617 = vmatprep.subr.bf16.mxu1 %v7616_v12  ;;  %1722 = vmatprep.mubr.f32.mxu1 %v9393_v43  ;;  %v1782_v43 = vld [vmem:[#allocation5 + $0x1558] sm:$0xff]  ;;  %v1815_v12 = vld [vmem:[#allocation5 + $0x1660] sm:$0xff]  ;;  %v1820_v28 = vld [vmem:[#allocation5 + $0x1688] sm:$0xff]  ;;  %v7642_v16 = vpack.c.bf16 %v1816_v30, %v1811_v25 }
 0x1bd   :  { %1648 = vmatmul.mubr.f32.gmra.mrb[14].mxu0 %v9381_v40  ;;  %1723 = vmatmul.mubr.f32.gmra.mrb[14].mxu1 %v9397_v51  ;;  %v1785_v40 = vld [vmem:[#allocation5 + $0x1570] sm:$0xff]  ;;  %v7498_v51 = vpack.c.bf16 %v1774_v36, %v1769_v35  ;;  %v7628_v33 = vpack.c.bf16 %v1787_v42, %v1782_v43  ;;  %v1814_v24 = vld [vmem:[#allocation5 + $0x1658] sm:$0xff] }
 0x1be   :  { %7491 = vmatpush1.bf16.msra.mxu0 %v7490_v21  ;;  %7619 = vmatpush1.bf16.msra.mxu1 %v7618_v22  ;;  %v7500_v44 = vpack.c.bf16 %v1785_v40, %v1780_v41  ;;  %v7510_v21 = vpack.c.bf16 %v1804_v6, %v1799_v5  ;;  %v7638_v22 = vpack.c.bf16 %v1806_v10, %v1801_v7  ;;  %v1825_v37 = vld [vmem:[#allocation5 + $0x16b0] sm:$0xff]  ;;  %v1824_v41 = vld [vmem:[#allocation5 + $0x16a8] sm:$0xff]  ;;  %v1826_v42 = vld [vmem:[#allocation5 + $0x16b8] sm:$0xff] }
 0x1bf   :  { %7493 = vmatprep.subr.bf16.mxu0 %v7492_v17  ;;  %7621 = vmatprep.subr.bf16.mxu1 %v7620_v26  ;;  %v7512_v17 = vpack.c.bf16 %v1815_v12, %v1810_v11  ;;  %v7514_v36 = vpack.c.bf16 %v1814_v24, %v1809_v23  ;;  %v1821_v40 = vld [vmem:[#allocation5 + $0x1690] sm:$0xff]  ;;  %v7518_v46 = vpack.c.bf16 %v1824_v41, %v1819_v39  ;;  %v1854_v11 = vld [vmem:[#allocation5 + $0x1798] sm:$0xff]  ;;  %v1851_v12 = vld [vmem:[#allocation5 + $0x1780] sm:$0xff]  ;;  %v438_v24 = vlaneseq }
 0x1c0   :  { %2151 = vmatprep.mubr.f32.mxu0 %v9401_v0  ;;  %2305 = vmatprep.mubr.f32.mxu1 %v9401_v0  ;;  %v7630_v0 = vpack.c.bf16 %v1786_v48, %v1781_v19  ;;  %v7646_v19 = vpack.c.bf16 %v1826_v42, %v1821_v40  ;;  %v1829_v48 = vld [vmem:[#allocation5 + $0x16d0] sm:$0xff]  ;;  %v7526_v6 = vpack.c.bf16 %v1844_v61, %v1839_v60  ;;  %v1867_v23 = vld [vmem:[#allocation5 + $0x1800] sm:$0xff]  ;;  %v1872_v39 = vld [vmem:[#allocation5 + $0x1828] sm:$0xff] }
 0x1c1   :  { %v7522_v57 = vpack.c.bf16 %v1834_v49, %v1829_v48  ;;  %v1857_v5 = vld [vmem:[#allocation5 + $0x17b0] sm:$0xff]  ;;  %v7654_v7 = vpack.c.bf16 %v1846_v1, %v1841_v62  ;;  %v9429_v40 = vshrl.u32 %v438_v24, 7  ;;  %v1880_v48 = vld [vmem:[#allocation5 + $0x1868] sm:$0xff]  ;;  %v1886_v62 = vld [vmem:[#allocation5 + $0x1898] sm:$0xff] }
 0x1c2   :  { %7495 = vmatpush1.bf16.msra.mxu0 %v7494_v29  ;;  %7623 = vmatpush1.bf16.msra.mxu1 %v7622_v32  ;;  %v1822_v32 = vld [vmem:[#allocation5 + $0x1698] sm:$0xff]  ;;  %v1849_v10 = vld [vmem:[#allocation5 + $0x1770] sm:$0xff]  ;;  %v1895_v1 = vld [vmem:[#allocation5 + $0x18e0] sm:$0xff] }
 0x1c3   :  { %7497 = vmatprep.subr.bf16.mxu0 %v7496_v34  ;;  %7625 = vmatprep.subr.bf16.mxu1 %v7624_v38  ;;  %v1827_v34 = vld [vmem:[#allocation5 + $0x16c0] sm:$0xff]  ;;  %v7516_v38 = vpack.c.bf16 %v1825_v37, %v1820_v28  ;;  %v7530_v25 = vpack.c.bf16 %v1854_v11, %v1849_v10  ;;  %v1864_v37 = vld [vmem:[#allocation5 + $0x17e8] sm:$0xff]  ;;  %v1877_v41 = vld [vmem:[#allocation5 + $0x1850] sm:$0xff] }
 0x1c4   :  { %v7644_v43 = vpack.c.bf16 %v1827_v34, %v1822_v32  ;;  %v1859_v28 = vld [vmem:[#allocation5 + $0x17c0] sm:$0xff]  ;;  %v1861_v32 = vld [vmem:[#allocation5 + $0x17d0] sm:$0xff]  ;;  %v1900_v24 = vld [vmem:[#allocation5 + $0x1908] sm:$0xff] }
 0x1c5   :  { %v1885_v49 = vld [vmem:[#allocation5 + $0x1890] sm:$0xff] }
 0x1c6   :  { %7499 = vmatpush1.bf16.msra.mxu0 %v7498_v51  ;;  %7627 = vmatpush1.bf16.msra.mxu1 %v7626_v14  ;;  %v1830_v51 = vld [vmem:[#allocation5 + $0x16d8] sm:$0xff]  ;;  %v1835_v14 = vld [vmem:[#allocation5 + $0x1700] sm:$0xff] }
 0x1c7   :  { %7501 = vmatprep.subr.bf16.mxu0 %v7500_v44  ;;  %7629 = vmatprep.subr.bf16.mxu1 %v7628_v33  ;;  %v1832_v44 = vld [vmem:[#allocation5 + $0x16e8] sm:$0xff]  ;;  %v7520_v33 = vpack.c.bf16 %v1835_v14, %v1830_v51  ;;  %v1869_v14 = vld [vmem:[#allocation5 + $0x1810] sm:$0xff] }
 0x1c8   :  { %v7648_v52 = vpack.c.bf16 %v1837_v45, %v1832_v44  ;;  %v1874_v44 = vld [vmem:[#allocation5 + $0x1838] sm:$0xff]  ;;  %v1871_v45 = vld [vmem:[#allocation5 + $0x1820] sm:$0xff] }
 0x1ca   :  { %7503 = vmatpush1.bf16.msra.mxu0 %v7502_v54  ;;  %7631 = vmatpush1.bf16.msra.mxu1 %v7630_v0  ;;  %v1840_v54 = vld [vmem:[#allocation5 + $0x1728] sm:$0xff]  ;;  %v1845_v0 = vld [vmem:[#allocation5 + $0x1750] sm:$0xff] }
 0x1cb   :  { %7505 = vmatprep.subr.bf16.mxu0 %v7504_v55  ;;  %7633 = vmatprep.subr.bf16.mxu1 %v7632_v59  ;;  %v1842_v55 = vld [vmem:[#allocation5 + $0x1738] sm:$0xff]  ;;  %v7524_v59 = vpack.c.bf16 %v1845_v0, %v1840_v54  ;;  %v7538_v54 = vpack.c.bf16 %v1874_v44, %v1869_v14 }
 0x1cc   :  { %v9413_v8 = vpop.f32.mrb[0].mxu0  ;;  %v9415_v13 = vpop.f32.mrb[0].mxu1  ;;  %v7652_v63 = vpack.c.bf16 %v1847_v56, %v1842_v55  ;;  %v7540_v55 = vpack.c.bf16 %v1885_v49, %v1880_v48  ;;  %v1879_v56 = vld [vmem:[#allocation5 + $0x1860] sm:$0xff]  ;;  %v1912_v49 = vld [vmem:[#allocation5 + $0x1968] sm:$0xff] }
 0x1cd   :  { %v9417_v15 = vpop.f32.mrb[1].mxu0  ;;  %v9419_v20 = vpop.f32.mrb[1].mxu1 }
 0x1ce   :  { %7507 = vmatpush1.bf16.msra.mxu0 %v7506_v2  ;;  %7635 = vmatpush1.bf16.msra.mxu1 %v7634_v3  ;;  %v1850_v2 = vld [vmem:[#allocation5 + $0x1778] sm:$0xff]  ;;  %v1855_v3 = vld [vmem:[#allocation5 + $0x17a0] sm:$0xff] }
 0x1cf   :  { %7509 = vmatprep.subr.bf16.mxu0 %v7508_v4  ;;  %7637 = vmatprep.subr.bf16.mxu1 %v7636_v9  ;;  %v1852_v4 = vld [vmem:[#allocation5 + $0x1788] sm:$0xff]  ;;  %v7528_v9 = vpack.c.bf16 %v1855_v3, %v1850_v2 }
 0x1d0   :  { %v9421_v26 = vpop.f32.mrb[2].mxu0  ;;  %v9423_v31 = vpop.f32.mrb[2].mxu1  ;;  %v7656_v18 = vpack.c.bf16 %v1857_v5, %v1852_v4  ;;  %v1892_v4 = vld [vmem:[#allocation5 + $0x18c8] sm:$0xff]  ;;  %v1897_v5 = vld [vmem:[#allocation5 + $0x18f0] sm:$0xff] }
 0x1d1   :  { %v9425_v29 = vpop.f32.mrb[3].mxu0  ;;  %v9427_v35 = vpop.f32.mrb[3].mxu1 }
 0x1d2   :  { %7511 = vmatpush1.bf16.msra.mxu0 %v7510_v21  ;;  %7639 = vmatpush1.bf16.msra.mxu1 %v7638_v22  ;;  %v1860_v21 = vld [vmem:[#allocation5 + $0x17c8] sm:$0xff]  ;;  %v1865_v22 = vld [vmem:[#allocation5 + $0x17f0] sm:$0xff] }
 0x1d3   :  { %7513 = vmatprep.subr.bf16.mxu0 %v7512_v17  ;;  %7641 = vmatprep.subr.bf16.mxu1 %v7640_v27  ;;  %v1862_v17 = vld [vmem:[#allocation5 + $0x17d8] sm:$0xff]  ;;  %v7658_v27 = vpack.c.bf16 %v1856_v47, %v1851_v12  ;;  %v7532_v30 = vpack.c.bf16 %v1865_v22, %v1860_v21  ;;  %v1891_v21 = vld [vmem:[#allocation5 + $0x18c0] sm:$0xff] }
 0x1d4   :  { %v7660_v34 = vpack.c.bf16 %v1867_v23, %v1862_v17  ;;  %v1894_v47 = vld [vmem:[#allocation5 + $0x18d8] sm:$0xff]  ;;  %v7672_v17 = vpack.c.bf16 %v1897_v5, %v1892_v4  ;;  %v1896_v23 = vld [vmem:[#allocation5 + $0x18e8] sm:$0xff]  ;;  %v1919_v5 = vld [vmem:[#allocation5 + $0x19a0] sm:$0xff] }
 0x1d6   :  { %7515 = vmatpush1.bf16.msra.mxu0 %v7514_v36  ;;  %7643 = vmatpush1.bf16.msra.mxu1 %v7642_v16  ;;  %v1866_v36 = vld [vmem:[#allocation5 + $0x17f8] sm:$0xff] }
 0x1d7   :  { %7517 = vmatprep.subr.bf16.mxu0 %v7516_v38  ;;  %7645 = vmatprep.subr.bf16.mxu1 %v7644_v43  ;;  %v1870_v16 = vld [vmem:[#allocation5 + $0x1818] sm:$0xff]  ;;  %v1875_v38 = vld [vmem:[#allocation5 + $0x1840] sm:$0xff]  ;;  %v7534_v43 = vpack.c.bf16 %v1864_v37, %v1859_v28  ;;  %v7662_v42 = vpack.c.bf16 %v1866_v36, %v1861_v32 }
 0x1d8   :  { %v7536_v51 = vpack.c.bf16 %v1875_v38, %v1870_v16  ;;  %v1907_v28 = vld [vmem:[#allocation5 + $0x1940] sm:$0xff] }
 0x1da   :  { %7519 = vmatpush1.bf16.msra.mxu0 %v7518_v46  ;;  %7647 = vmatpush1.bf16.msra.mxu1 %v7646_v19  ;;  %v9432_v46 = vsub.s32 4, %v9429_v40  ;;  %v7664_v19 = vpack.c.bf16 %v1877_v41, %v1872_v39  ;;  %v7674_v39 = vpack.c.bf16 %v1896_v23, %v1891_v21  ;;  %v1937_v21 = vld [vmem:[#allocation5 + $0x1a30] sm:$0xff] }
 0x1db   :  { %7521 = vmatprep.subr.bf16.mxu0 %v7520_v33  ;;  %7649 = vmatprep.subr.bf16.mxu1 %v7648_v52  ;;  %v1876_v33 = vld [vmem:[#allocation5 + $0x1848] sm:$0xff]  ;;  %v1887_v52 = vld [vmem:[#allocation5 + $0x18a0] sm:$0xff] }
 0x1dc   :  { %v7666_v0 = vpack.c.bf16 %v1876_v33, %v1871_v45  ;;  %v457_v60 = vrot.slane %v436_v53, %v9432_v46  ;;  %v7668_v61 = vpack.c.bf16 %v1887_v52, %v1882_v50  ;;  %v1906_v45 = vld [vmem:[#allocation5 + $0x1938] sm:$0xff]  ;;  %v1915_v33 = vld [vmem:[#allocation5 + $0x1980] sm:$0xff]  ;;  %v1917_v50 = vld [vmem:[#allocation5 + $0x1990] sm:$0xff] }
 0x1de   :  { %7523 = vmatpush1.bf16.msra.mxu0 %v7522_v57  ;;  %7651 = vmatpush1.bf16.msra.mxu1 %v7650_v58  ;;  %v1884_v57 = vld [vmem:[#allocation5 + $0x1888] sm:$0xff]  ;;  %v1881_v58 = vld [vmem:[#allocation5 + $0x1870] sm:$0xff] }
 0x1df   :  { %7525 = vmatprep.subr.bf16.mxu0 %v7524_v59  ;;  %7653 = vmatprep.subr.bf16.mxu1 %v7652_v63  ;;  %v1890_v63 = vld [vmem:[#allocation5 + $0x18b8] sm:$0xff]  ;;  %v7670_v11 = vpack.c.bf16 %v1886_v62, %v1881_v58  ;;  %v7680_v58 = vpack.c.bf16 %v1917_v50, %v1912_v49  ;;  %v1925_v62 = vld [vmem:[#allocation5 + $0x19d0] sm:$0xff]  ;;  %v1952_v49 = vld [vmem:[#allocation5 + $0x1aa8] sm:$0xff] }
 0x1e0   :  { %v7544_v12 = vpack.c.bf16 %v1895_v1, %v1890_v63  ;;  %v9439_v63 = vld [vmem:[#allocation3] sm:$0xff]  ;;  %v1957_v50 = vld [vmem:[#allocation5 + $0x1ad0] sm:$0xff] }
 0x1e1   :  { %v1927_v1 = vld [vmem:[#allocation5 + $0x19e0] sm:$0xff] }
 0x1e2   :  { %7527 = vmatpush1.bf16.msra.mxu0 %v7526_v6  ;;  %7655 = vmatpush1.bf16.msra.mxu1 %v7654_v7 }
 0x1e3   :  { %7529 = vmatprep.subr.bf16.mxu0 %v7528_v9  ;;  %7657 = vmatprep.subr.bf16.mxu1 %v7656_v18  ;;  %v7542_v9 = vpack.c.bf16 %v1884_v57, %v1879_v56  ;;  %v1889_v18 = vld [vmem:[#allocation5 + $0x18b0] sm:$0xff]  ;;  %v1914_v56 = vld [vmem:[#allocation5 + $0x1978] sm:$0xff]  ;;  %v1911_v57 = vld [vmem:[#allocation5 + $0x1960] sm:$0xff] }
 0x1e4   :  { %v7546_v36 = vpack.c.bf16 %v1894_v47, %v1889_v18  ;;  %v9443_v18 = vld [vmem:[#allocation3 + $0x28] sm:$0xff] }
 0x1e5   :  { %v1932_v47 = vld [vmem:[#allocation5 + $0x1a08] sm:$0xff] }
 0x1e6   :  { %7531 = vmatpush1.bf16.msra.mxu0 %v7530_v25  ;;  %7659 = vmatpush1.bf16.msra.mxu1 %v7658_v27  ;;  %v1905_v25 = vld [vmem:[#allocation5 + $0x1930] sm:$0xff] }
 0x1e7   :  { %7533 = vmatprep.subr.bf16.mxu0 %v7532_v30  ;;  %7661 = vmatprep.subr.bf16.mxu1 %v7660_v34  ;;  %v1902_v30 = vld [vmem:[#allocation5 + $0x1918] sm:$0xff]  ;;  %v7548_v41 = vpack.c.bf16 %v1905_v25, %v1900_v24  ;;  %v1929_v25 = vld [vmem:[#allocation5 + $0x19f0] sm:$0xff] }
 0x1e8   :  { %v7676_v44 = vpack.c.bf16 %v1907_v28, %v1902_v30  ;;  %v1931_v30 = vld [vmem:[#allocation5 + $0x1a00] sm:$0xff]  ;;  %v7688_v28 = vpack.c.bf16 %v1937_v21, %v1932_v47  ;;  %v1972_v47 = vld [vmem:[#allocation5 + $0x1b48] sm:$0xff]  ;;  %v1977_v21 = vld [vmem:[#allocation5 + $0x1b70] sm:$0xff] }
 0x1ea   :  { %7535 = vmatpush1.bf16.msra.mxu0 %v7534_v43  ;;  %7663 = vmatpush1.bf16.msra.mxu1 %v7662_v42  ;;  %v1899_v43 = vld [vmem:[#allocation5 + $0x1900] sm:$0xff]  ;;  %v1904_v42 = vld [vmem:[#allocation5 + $0x1928] sm:$0xff] }
 0x1eb   :  { %7537 = vmatprep.subr.bf16.mxu0 %v7536_v51  ;;  %7665 = vmatprep.subr.bf16.mxu1 %v7664_v19  ;;  %v1901_v51 = vld [vmem:[#allocation5 + $0x1910] sm:$0xff]  ;;  %v1910_v19 = vld [vmem:[#allocation5 + $0x1958] sm:$0xff]  ;;  %v7550_v52 = vpack.c.bf16 %v1904_v42, %v1899_v43 }
 0x1ec   :  { %v5851_v59 = vpop.f32.mrb[4].mxu0  ;;  %v5889_v3 = vpop.f32.mrb[4].mxu1 }
 0x1ed   :  { %v5852_v2 = vpop.f32.mrb[5].mxu0  ;;  %v5890_v7 = vpop.f32.mrb[5].mxu1 }
 0x1ee   :  { %v5853_v6 = vadd.f32 %v5852_v2, %v5851_v59  ;;  %7539 = vmatpush1.bf16.msra.mxu0 %v7538_v54  ;;  %7667 = vmatpush1.bf16.msra.mxu1 %v7666_v0  ;;  %v5891_v10 = vadd.f32 %v5890_v7, %v5889_v3  ;;  %v7678_v54 = vpack.c.bf16 %v1906_v45, %v1901_v51  ;;  %v1916_v59 = vld [vmem:[#allocation5 + $0x1988] sm:$0xff]  ;;  %v1921_v7 = vld [vmem:[#allocation5 + $0x19b0] sm:$0xff]  ;;  %v1939_v51 = vld [vmem:[#allocation5 + $0x1a40] sm:$0xff] }
 0x1ef   :  { %7541 = vmatprep.subr.bf16.mxu0 %v7540_v55  ;;  %7669 = vmatprep.subr.bf16.mxu1 %v7668_v61  ;;  %v7552_v0 = vpack.c.bf16 %v1915_v33, %v1910_v19  ;;  %v1909_v55 = vld [vmem:[#allocation5 + $0x1950] sm:$0xff]  ;;  %v1920_v61 = vld [vmem:[#allocation5 + $0x19a8] sm:$0xff]  ;;  %v7682_v3 = vpack.c.bf16 %v1916_v59, %v1911_v57  ;;  %v1946_v19 = vld [vmem:[#allocation5 + $0x1a78] sm:$0xff] }
 0x1f0   :  { %v838_v22 = vadd.f32 %v5853_v6, %v457_v60  ;;  %v5854_v27 = vpop.f32.mrb[6].mxu0  ;;  %v5892_v32 = vpop.f32.mrb[6].mxu1  ;;  %v7554_v2 = vpack.c.bf16 %v1914_v56, %v1909_v55  ;;  %v7556_v4 = vpack.c.bf16 %v1925_v62, %v1920_v61  ;;  %v1924_v6 = vld [vmem:[#allocation5 + $0x19c8] sm:$0xff]  ;;  %v1950_v33 = vld [vmem:[#allocation5 + $0x1a98] sm:$0xff]  ;;  %v1949_v55 = vld [vmem:[#allocation5 + $0x1a90] sm:$0xff] }
 0x1f1   :  { %v5855_v37 = vpop.f32.mrb[7].mxu0  ;;  %v5893_v38 = vpop.f32.mrb[7].mxu1  ;;  %v1954_v56 = vld [vmem:[#allocation5 + $0x1ab8] sm:$0xff]  ;;  %v1951_v57 = vld [vmem:[#allocation5 + $0x1aa0] sm:$0xff]  ;;  %v1956_v59 = vld [vmem:[#allocation5 + $0x1ac8] sm:$0xff] }
 0x1f2   :  { %v9435_v34 = vadd.f32 %v5891_v10, %v838_v22  ;;  %7543 = vmatpush1.bf16.msra.mxu0 %v7542_v9  ;;  %v5856_v16 = vadd.f32 %v5855_v37, %v5854_v27  ;;  %7671 = vmatpush1.bf16.msra.mxu1 %v7670_v11  ;;  %v5894_v14 = vadd.f32 %v5893_v38, %v5892_v32  ;;  %v1926_v10 = vld [vmem:[#allocation5 + $0x19d8] sm:$0xff]  ;;  %v9447_v22 = vld [vmem:[#allocation3 + $0x20] sm:$0xff]  ;;  %v1936_v37 = vld [vmem:[#allocation5 + $0x1a28] sm:$0xff] }
 0x1f3   :  { %7545 = vmatprep.subr.bf16.mxu0 %v7544_v12  ;;  %7673 = vmatprep.subr.bf16.mxu1 %v7672_v17  ;;  %v1930_v11 = vld [vmem:[#allocation5 + $0x19f8] sm:$0xff]  ;;  %v1935_v12 = vld [vmem:[#allocation5 + $0x1a20] sm:$0xff]  ;;  %v7558_v17 = vpack.c.bf16 %v1924_v6, %v1919_v5  ;;  %v7686_v23 = vpack.c.bf16 %v1926_v10, %v1921_v7  ;;  %v1940_v32 = vld [vmem:[#allocation5 + $0x1a48] sm:$0xff]  ;;  %v7690_v43 = vpack.c.bf16 %v1936_v37, %v1931_v30 }
 0x1f4   :  { %v843_v48 = vadd.f32 %v5856_v16, %v457_v60  ;;  %v1922_v60 = vld [vmem:[#allocation5 + $0x19b8] sm:$0xff]  ;;  %v7560_v24 = vpack.c.bf16 %v1935_v12, %v1930_v11  ;;  %v1960_v61 = vld [vmem:[#allocation5 + $0x1ae8] sm:$0xff]  ;;  %v1965_v62 = vld [vmem:[#allocation5 + $0x1b10] sm:$0xff] }
 0x1f5   :  { %v7684_v9 = vpack.c.bf16 %v1927_v1, %v1922_v60  ;;  %v1934_v27 = vld [vmem:[#allocation5 + $0x1a18] sm:$0xff]  ;;  %v1967_v1 = vld [vmem:[#allocation5 + $0x1b20] sm:$0xff]  ;;  %v1964_v6 = vld [vmem:[#allocation5 + $0x1b08] sm:$0xff] }
 0x1f6   :  { %7547 = vmatpush1.bf16.msra.mxu0 %v7546_v36  ;;  %v9437_v53 = vadd.f32 %v5894_v14, %v843_v48  ;;  %7675 = vmatpush1.bf16.msra.mxu1 %v7674_v39  ;;  %v1945_v36 = vld [vmem:[#allocation5 + $0x1a70] sm:$0xff]  ;;  %v9451_v16 = vld [vmem:[#allocation3 + $0x18] sm:$0xff]  ;;  %v1947_v39 = vld [vmem:[#allocation5 + $0x1a80] sm:$0xff] }
 0x1f7   :  { %7549 = vmatprep.subr.bf16.mxu0 %v7548_v41  ;;  %7677 = vmatprep.subr.bf16.mxu1 %v7676_v44  ;;  %v1942_v38 = vld [vmem:[#allocation5 + $0x1a58] sm:$0xff]  ;;  %v7562_v41 = vpack.c.bf16 %v1934_v27, %v1929_v25  ;;  %v7564_v42 = vpack.c.bf16 %v1945_v36, %v1940_v32  ;;  %v1944_v14 = vld [vmem:[#allocation5 + $0x1a68] sm:$0xff]  ;;  %v1941_v44 = vld [vmem:[#allocation5 + $0x1a50] sm:$0xff] }
 0x1f8   :  { %v7692_v45 = vpack.c.bf16 %v1947_v39, %v1942_v38  ;;  %v1955_v48 = vld [vmem:[#allocation5 + $0x1ac0] sm:$0xff]  ;;  %v1962_v60 = vld [vmem:[#allocation5 + $0x1af8] sm:$0xff]  ;;  %v1961_v7 = vld [vmem:[#allocation5 + $0x1af0] sm:$0xff] }
 0x1f9   :  { %2152 = vmatmul.mubr.f32.vlgmr.msra.gmra.mrb[16].mxu0 %v9439_v63  ;;  %2306 = vmatmul.mubr.f32.vlgmr.msra.gmra.mrb[16].mxu1 %v9439_v63  ;;  %v1959_v5 = vld [vmem:[#allocation5 + $0x1ae0] sm:$0xff]  ;;  %v1966_v10 = vld [vmem:[#allocation5 + $0x1b18] sm:$0xff]  ;;  %v1969_v25 = vld [vmem:[#allocation5 + $0x1b30] sm:$0xff] }
 0x1fa   :  { %7551 = vmatpush1.bf16.msra.mxu0 %v7550_v52  ;;  %7679 = vmatpush1.bf16.msra.mxu1 %v7678_v54  ;;  %v7566_v52 = vpack.c.bf16 %v1944_v14, %v1939_v51  ;;  %v7694_v54 = vpack.c.bf16 %v1946_v19, %v1941_v44  ;;  %v1970_v11 = vld [vmem:[#allocation5 + $0x1b38] sm:$0xff]  ;;  %v1975_v12 = vld [vmem:[#allocation5 + $0x1b60] sm:$0xff]  ;;  %v1976_v37 = vld [vmem:[#allocation5 + $0x1b68] sm:$0xff] }
 0x1fb   :  { %7553 = vmatprep.subr.bf16.mxu0 %v7552_v0  ;;  %7681 = vmatprep.subr.bf16.mxu1 %v7680_v58  ;;  %v7568_v0 = vpack.c.bf16 %v1955_v48, %v1950_v33  ;;  %v7696_v58 = vpack.c.bf16 %v1957_v50, %v1952_v49  ;;  %v1974_v27 = vld [vmem:[#allocation5 + $0x1b58] sm:$0xff]  ;;  %v1971_v30 = vld [vmem:[#allocation5 + $0x1b40] sm:$0xff]  ;;  %v1980_v32 = vld [vmem:[#allocation5 + $0x1b88] sm:$0xff] }
 0x1fc   :  { %2157 = vmatprep.mubr.f32.mxu0 %v9443_v18  ;;  %2311 = vmatprep.mubr.f32.mxu1 %v9443_v18  ;;  %v1985_v36 = vld [vmem:[#allocation5 + $0x1bb0] sm:$0xff]  ;;  %v1982_v38 = vld [vmem:[#allocation5 + $0x1b98] sm:$0xff]  ;;  %v1987_v39 = vld [vmem:[#allocation5 + $0x1bc0] sm:$0xff] }
 0x1fd   :  { %2158 = vmatmul.mubr.f32.gmra.mrb[18].mxu0 %v9447_v22  ;;  %2312 = vmatmul.mubr.f32.gmra.mrb[18].mxu1 %v9447_v22  ;;  %v1979_v51 = vld [vmem:[#allocation5 + $0x1b80] sm:$0xff]  ;;  %v1984_v14 = vld [vmem:[#allocation5 + $0x1ba8] sm:$0xff]  ;;  %v1981_v44 = vld [vmem:[#allocation5 + $0x1b90] sm:$0xff] }
 0x1fe   :  { %7555 = vmatpush1.bf16.msra.mxu0 %v7554_v2  ;;  %7683 = vmatpush1.bf16.msra.mxu1 %v7682_v3  ;;  %v7570_v2 = vpack.c.bf16 %v1954_v56, %v1949_v55  ;;  %v7698_v3 = vpack.c.bf16 %v1956_v59, %v1951_v57  ;;  %v1986_v19 = vld [vmem:[#allocation5 + $0x1bb8] sm:$0xff]  ;;  %v1995_v48 = vld [vmem:[#allocation5 + $0x1c00] sm:$0xff]  ;;  %v1992_v49 = vld [vmem:[#allocation5 + $0x1be8] sm:$0xff] }
 0x1ff   :  { %7557 = vmatprep.subr.bf16.mxu0 %v7556_v4  ;;  %7685 = vmatprep.subr.bf16.mxu1 %v7684_v9  ;;  %v7572_v4 = vpack.c.bf16 %v1965_v62, %v1960_v61  ;;  %v7700_v9 = vpack.c.bf16 %v1967_v1, %v1962_v60  ;;  %v1990_v33 = vld [vmem:[#allocation5 + $0x1bd8] sm:$0xff]  ;;  %v1997_v50 = vld [vmem:[#allocation5 + $0x1c10] sm:$0xff]  ;;  %v1991_v57 = vld [vmem:[#allocation5 + $0x1be0] sm:$0xff] }
 0x200   :  { %2228 = vmatprep.mubr.f32.mxu0 %v9451_v16  ;;  %2382 = vmatprep.mubr.f32.mxu1 %v9451_v16  ;;  %v1989_v55 = vld [vmem:[#allocation5 + $0x1bd0] sm:$0xff]  ;;  %v1994_v56 = vld [vmem:[#allocation5 + $0x1bf8] sm:$0xff]  ;;  %v1996_v59 = vld [vmem:[#allocation5 + $0x1c08] sm:$0xff] }
 0x201   :  { %v2000_v61 = vld [vmem:[#allocation5 + $0x1c28] sm:$0xff]  ;;  %v2005_v62 = vld [vmem:[#allocation5 + $0x1c50] sm:$0xff]  ;;  %v2002_v60 = vld [vmem:[#allocation5 + $0x1c38] sm:$0xff] }
 0x202   :  { %7559 = vmatpush1.bf16.msra.mxu0 %v7558_v17  ;;  %7687 = vmatpush1.bf16.msra.mxu1 %v7686_v23  ;;  %v7574_v17 = vpack.c.bf16 %v1964_v6, %v1959_v5  ;;  %v7702_v23 = vpack.c.bf16 %v1966_v10, %v1961_v7  ;;  %v2007_v1 = vld [vmem:[#allocation5 + $0x1c60] sm:$0xff]  ;;  %v2004_v6 = vld [vmem:[#allocation5 + $0x1c48] sm:$0xff]  ;;  %v2001_v7 = vld [vmem:[#allocation5 + $0x1c30] sm:$0xff] }
 0x203   :  { %7561 = vmatprep.subr.bf16.mxu0 %v7560_v24  ;;  %7689 = vmatprep.subr.bf16.mxu1 %v7688_v28  ;;  %v7576_v24 = vpack.c.bf16 %v1975_v12, %v1970_v11  ;;  %v7704_v28 = vpack.c.bf16 %v1977_v21, %v1972_v47  ;;  %v1999_v5 = vld [vmem:[#allocation5 + $0x1c20] sm:$0xff]  ;;  %v2006_v10 = vld [vmem:[#allocation5 + $0x1c58] sm:$0xff]  ;;  %v2012_v47 = vld [vmem:[#allocation5 + $0x1c88] sm:$0xff] }
 0x204   :  { %v2010_v11 = vld [vmem:[#allocation5 + $0x1c78] sm:$0xff]  ;;  %v2015_v12 = vld [vmem:[#allocation5 + $0x1ca0] sm:$0xff]  ;;  %v2017_v21 = vld [vmem:[#allocation5 + $0x1cb0] sm:$0xff] }
 0x206   :  { %7563 = vmatpush1.bf16.msra.mxu0 %v7562_v41  ;;  %7691 = vmatpush1.bf16.msra.mxu1 %v7690_v43  ;;  %v7578_v41 = vpack.c.bf16 %v1974_v27, %v1969_v25  ;;  %v7706_v43 = vpack.c.bf16 %v1976_v37, %v1971_v30  ;;  %v2009_v25 = vld [vmem:[#allocation5 + $0x1c70] sm:$0xff]  ;;  %v2014_v27 = vld [vmem:[#allocation5 + $0x1c98] sm:$0xff]  ;;  %v2011_v30 = vld [vmem:[#allocation5 + $0x1c80] sm:$0xff] }
 0x207   :  { %7565 = vmatprep.subr.bf16.mxu0 %v7564_v42  ;;  %7693 = vmatprep.subr.bf16.mxu1 %v7692_v45  ;;  %v7580_v42 = vpack.c.bf16 %v1985_v36, %v1980_v32  ;;  %v7708_v45 = vpack.c.bf16 %v1987_v39, %v1982_v38  ;;  %v2016_v37 = vld [vmem:[#allocation5 + $0x1ca8] sm:$0xff]  ;;  %v2025_v36 = vld [vmem:[#allocation5 + $0x1cf0] sm:$0xff]  ;;  %v2022_v38 = vld [vmem:[#allocation5 + $0x1cd8] sm:$0xff] }
 0x208   :  { %v2020_v32 = vld [vmem:[#allocation5 + $0x1cc8] sm:$0xff]  ;;  %v2027_v39 = vld [vmem:[#allocation5 + $0x1d00] sm:$0xff] }
 0x20a   :  { %7567 = vmatpush1.bf16.msra.mxu0 %v7566_v52  ;;  %7695 = vmatpush1.bf16.msra.mxu1 %v7694_v54  ;;  %v7582_v52 = vpack.c.bf16 %v1984_v14, %v1979_v51  ;;  %v7710_v54 = vpack.c.bf16 %v1986_v19, %v1981_v44  ;;  %v2019_v51 = vld [vmem:[#allocation5 + $0x1cc0] sm:$0xff]  ;;  %v2024_v14 = vld [vmem:[#allocation5 + $0x1ce8] sm:$0xff]  ;;  %v2021_v44 = vld [vmem:[#allocation5 + $0x1cd0] sm:$0xff] }
 0x20b   :  { %7569 = vmatprep.subr.bf16.mxu0 %v7568_v0  ;;  %7697 = vmatprep.subr.bf16.mxu1 %v7696_v58  ;;  %v7584_v0 = vpack.c.bf16 %v1995_v48, %v1990_v33  ;;  %v7712_v58 = vpack.c.bf16 %v1997_v50, %v1992_v49  ;;  %v2026_v19 = vld [vmem:[#allocation5 + $0x1cf8] sm:$0xff]  ;;  %v2035_v48 = vld [vmem:[#allocation5 + $0x1d40] sm:$0xff]  ;;  %v2032_v49 = vld [vmem:[#allocation5 + $0x1d28] sm:$0xff] }
 0x20c   :  { %v2030_v33 = vld [vmem:[#allocation5 + $0x1d18] sm:$0xff]  ;;  %v2037_v50 = vld [vmem:[#allocation5 + $0x1d50] sm:$0xff] }
 0x20e   :  { %7571 = vmatpush1.bf16.msra.mxu0 %v7570_v2  ;;  %7699 = vmatpush1.bf16.msra.mxu1 %v7698_v3  ;;  %v7586_v2 = vpack.c.bf16 %v1994_v56, %v1989_v55  ;;  %v7714_v3 = vpack.c.bf16 %v1996_v59, %v1991_v57  ;;  %v2029_v55 = vld [vmem:[#allocation5 + $0x1d10] sm:$0xff]  ;;  %v2034_v56 = vld [vmem:[#allocation5 + $0x1d38] sm:$0xff]  ;;  %v2031_v57 = vld [vmem:[#allocation5 + $0x1d20] sm:$0xff] }
 0x20f   :  { %7573 = vmatprep.subr.bf16.mxu0 %v7572_v4  ;;  %7701 = vmatprep.subr.bf16.mxu1 %v7700_v9  ;;  %v7588_v4 = vpack.c.bf16 %v2005_v62, %v2000_v61  ;;  %v7716_v9 = vpack.c.bf16 %v2007_v1, %v2002_v60  ;;  %v2036_v59 = vld [vmem:[#allocation5 + $0x1d48] sm:$0xff]  ;;  %v2045_v62 = vld [vmem:[#allocation5 + $0x1d90] sm:$0xff]  ;;  %v2042_v60 = vld [vmem:[#allocation5 + $0x1d78] sm:$0xff] }
 0x210   :  { %v2040_v61 = vld [vmem:[#allocation5 + $0x1d68] sm:$0xff]  ;;  %v2047_v1 = vld [vmem:[#allocation5 + $0x1da0] sm:$0xff] }
 0x212   :  { %7575 = vmatpush1.bf16.msra.mxu0 %v7574_v17  ;;  %7703 = vmatpush1.bf16.msra.mxu1 %v7702_v23  ;;  %v7590_v17 = vpack.c.bf16 %v2004_v6, %v1999_v5  ;;  %v7718_v23 = vpack.c.bf16 %v2006_v10, %v2001_v7  ;;  %v2039_v5 = vld [vmem:[#allocation5 + $0x1d60] sm:$0xff]  ;;  %v2044_v6 = vld [vmem:[#allocation5 + $0x1d88] sm:$0xff]  ;;  %v2041_v7 = vld [vmem:[#allocation5 + $0x1d70] sm:$0xff] }
 0x213   :  { %7577 = vmatprep.subr.bf16.mxu0 %v7576_v24  ;;  %7705 = vmatprep.subr.bf16.mxu1 %v7704_v28  ;;  %v7592_v24 = vpack.c.bf16 %v2015_v12, %v2010_v11  ;;  %v7720_v28 = vpack.c.bf16 %v2017_v21, %v2012_v47  ;;  %v2046_v10 = vld [vmem:[#allocation5 + $0x1d98] sm:$0xff]  ;;  %v2055_v12 = vld [vmem:[#allocation5 + $0x1de0] sm:$0xff]  ;;  %v2052_v47 = vld [vmem:[#allocation5 + $0x1dc8] sm:$0xff] }
 0x214   :  { %v2050_v11 = vld [vmem:[#allocation5 + $0x1db8] sm:$0xff]  ;;  %v2057_v21 = vld [vmem:[#allocation5 + $0x1df0] sm:$0xff] }
 0x216   :  { %7579 = vmatpush1.bf16.msra.mxu0 %v7578_v41  ;;  %7707 = vmatpush1.bf16.msra.mxu1 %v7706_v43  ;;  %v7594_v41 = vpack.c.bf16 %v2014_v27, %v2009_v25  ;;  %v7722_v43 = vpack.c.bf16 %v2016_v37, %v2011_v30  ;;  %v2049_v25 = vld [vmem:[#allocation5 + $0x1db0] sm:$0xff]  ;;  %v2054_v27 = vld [vmem:[#allocation5 + $0x1dd8] sm:$0xff]  ;;  %v2051_v30 = vld [vmem:[#allocation5 + $0x1dc0] sm:$0xff] }
 0x217   :  { %7581 = vmatprep.subr.bf16.mxu0 %v7580_v42  ;;  %7709 = vmatprep.subr.bf16.mxu1 %v7708_v45  ;;  %v7596_v42 = vpack.c.bf16 %v2025_v36, %v2020_v32  ;;  %v7724_v45 = vpack.c.bf16 %v2027_v39, %v2022_v38  ;;  %v2056_v37 = vld [vmem:[#allocation5 + $0x1de8] sm:$0xff]  ;;  %v1823_v32 = vld [vmem:[#allocation5 + $0x16a0] sm:$0xff] }
 0x218   :  { %v1828_v36 = vld [vmem:[#allocation5 + $0x16c8] sm:$0xff]  ;;  %v1983_v38 = vld [vmem:[#allocation5 + $0x1ba0] sm:$0xff] }
 0x219   :  { %v1988_v39 = vld [vmem:[#allocation5 + $0x1bc8] sm:$0xff] }
 0x21a   :  { %7583 = vmatpush1.bf16.msra.mxu0 %v7582_v52  ;;  %7711 = vmatpush1.bf16.msra.mxu1 %v7710_v54  ;;  %v7598_v52 = vpack.c.bf16 %v2024_v14, %v2019_v51  ;;  %v7726_v54 = vpack.c.bf16 %v2026_v19, %v2021_v44  ;;  %v1743_v51 = vld [vmem:[#allocation5 + $0x1420] sm:$0xff]  ;;  %v1748_v14 = vld [vmem:[#allocation5 + $0x1448] sm:$0xff]  ;;  %v7772_v44 = vpack.c.bf16 %v1988_v39, %v1983_v38  ;;  %v1938_v38 = vld [vmem:[#allocation5 + $0x1a38] sm:$0xff] }
 0x21b   :  { %7585 = vmatprep.subr.bf16.mxu0 %v7584_v0  ;;  %7713 = vmatprep.subr.bf16.mxu1 %v7712_v58  ;;  %v7600_v0 = vpack.c.bf16 %v2035_v48, %v2030_v33  ;;  %v7728_v58 = vpack.c.bf16 %v2037_v50, %v2032_v49  ;;  %v1908_v19 = vld [vmem:[#allocation5 + $0x1948] sm:$0xff]  ;;  %v1833_v33 = vld [vmem:[#allocation5 + $0x16f0] sm:$0xff]  ;;  %v1838_v48 = vld [vmem:[#allocation5 + $0x1718] sm:$0xff]  ;;  %v7742_v49 = vpack.c.bf16 %v1748_v14, %v1743_v51 }
 0x21c   :  { %v1993_v50 = vld [vmem:[#allocation5 + $0x1bf0] sm:$0xff]  ;;  %v1863_v39 = vld [vmem:[#allocation5 + $0x17e0] sm:$0xff]  ;;  %v2028_v51 = vld [vmem:[#allocation5 + $0x1d08] sm:$0xff] }
 0x21e   :  { %7587 = vmatpush1.bf16.msra.mxu0 %v7586_v2  ;;  %7715 = vmatpush1.bf16.msra.mxu1 %v7714_v3  ;;  %v7602_v2 = vpack.c.bf16 %v2034_v56, %v2029_v55  ;;  %v7730_v3 = vpack.c.bf16 %v2036_v59, %v2031_v57  ;;  %v1758_v55 = vld [vmem:[#allocation5 + $0x1498] sm:$0xff]  ;;  %v1913_v56 = vld [vmem:[#allocation5 + $0x1970] sm:$0xff]  ;;  %v7744_v57 = vpack.c.bf16 %v1838_v48, %v1833_v33  ;;  %v1843_v59 = vld [vmem:[#allocation5 + $0x1740] sm:$0xff] }
 0x21f   :  { %7589 = vmatprep.subr.bf16.mxu0 %v7588_v4  ;;  %7717 = vmatprep.subr.bf16.mxu1 %v7716_v9  ;;  %v7604_v4 = vpack.c.bf16 %v2045_v62, %v2040_v61  ;;  %v7732_v9 = vpack.c.bf16 %v2047_v1, %v2042_v60  ;;  %v1848_v61 = vld [vmem:[#allocation5 + $0x1768] sm:$0xff]  ;;  %v9455_v62 = vld [vmem:[#allocation3 + $0x10] sm:$0xff]  ;;  %v2003_v1 = vld [vmem:[#allocation5 + $0x1c40] sm:$0xff] }
 0x220   :  { %v1788_v33 = vld [vmem:[#allocation5 + $0x1588] sm:$0xff]  ;;  %v1943_v48 = vld [vmem:[#allocation5 + $0x1a60] sm:$0xff] }
 0x222   :  { %7591 = vmatpush1.bf16.msra.mxu0 %v7590_v17  ;;  %7719 = vmatpush1.bf16.msra.mxu1 %v7718_v23  ;;  %v7606_v17 = vpack.c.bf16 %v2044_v6, %v2039_v5  ;;  %v7734_v23 = vpack.c.bf16 %v2046_v10, %v2041_v7  ;;  %v7748_v6 = vpack.c.bf16 %v1848_v61, %v1843_v59  ;;  %v1763_v7 = vld [vmem:[#allocation5 + $0x14c0] sm:$0xff]  ;;  %v1798_v59 = vld [vmem:[#allocation5 + $0x15d8] sm:$0xff]  ;;  %v1953_v61 = vld [vmem:[#allocation5 + $0x1ab0] sm:$0xff] }
 0x223   :  { %7593 = vmatprep.subr.bf16.mxu0 %v7592_v24  ;;  %7721 = vmatprep.subr.bf16.mxu1 %v7720_v28  ;;  %v7608_v24 = vpack.c.bf16 %v2055_v12, %v2050_v11  ;;  %v7736_v28 = vpack.c.bf16 %v2057_v21, %v2052_v47  ;;  %v1923_v10 = vld [vmem:[#allocation5 + $0x19c0] sm:$0xff]  ;;  %v1928_v12 = vld [vmem:[#allocation5 + $0x19e8] sm:$0xff]  ;;  %v1853_v47 = vld [vmem:[#allocation5 + $0x1790] sm:$0xff] }
 0x224   :  { %v1858_v21 = vld [vmem:[#allocation5 + $0x17b8] sm:$0xff] }
 0x226   :  { %7595 = vmatpush1.bf16.msra.mxu0 %v7594_v41  ;;  %7723 = vmatpush1.bf16.msra.mxu1 %v7722_v43  ;;  %v7610_v41 = vpack.c.bf16 %v2054_v27, %v2049_v25  ;;  %v7738_v43 = vpack.c.bf16 %v2056_v37, %v2051_v30  ;;  %v7782_v27 = vpack.c.bf16 %v1928_v12, %v1923_v10  ;;  %v1778_v37 = vld [vmem:[#allocation5 + $0x1538] sm:$0xff]  ;;  %v1808_v12 = vld [vmem:[#allocation5 + $0x1628] sm:$0xff] }
 0x227   :  { %7597 = vmatprep.subr.bf16.mxu0 %v7596_v42  ;;  %7725 = vmatprep.subr.bf16.mxu1 %v7724_v45  ;;  %v7740_v42 = vpack.c.bf16 %v1828_v36, %v1823_v32  ;;  %v1903_v45 = vld [vmem:[#allocation5 + $0x1920] sm:$0xff]  ;;  %v7752_v30 = vpack.c.bf16 %v1858_v21, %v1853_v47  ;;  %v1933_v32 = vld [vmem:[#allocation5 + $0x1a10] sm:$0xff] }
 0x228   :  { %v1963_v47 = vld [vmem:[#allocation5 + $0x1b00] sm:$0xff] }
 0x22a   :  { %7599 = vmatpush1.bf16.msra.mxu0 %v7598_v52  ;;  %7727 = vmatpush1.bf16.msra.mxu1 %v7726_v54  ;;  %v1998_v52 = vld [vmem:[#allocation5 + $0x1c18] sm:$0xff]  ;;  %v7774_v54 = vpack.c.bf16 %v1908_v19, %v1903_v45  ;;  %v1783_v19 = vld [vmem:[#allocation5 + $0x1560] sm:$0xff] }
 0x22b   :  { %7601 = vmatprep.subr.bf16.mxu0 %v7600_v0  ;;  %7729 = vmatprep.subr.bf16.mxu1 %v7728_v58  ;;  %v1753_v0 = vld [vmem:[#allocation5 + $0x1470] sm:$0xff]  ;;  %v1918_v58 = vld [vmem:[#allocation5 + $0x1998] sm:$0xff]  ;;  %v7776_v60 = vpack.c.bf16 %v1998_v52, %v1993_v50  ;;  %v1948_v50 = vld [vmem:[#allocation5 + $0x1a88] sm:$0xff] }
 0x22c   :  { %v7778_v5 = vpack.c.bf16 %v1918_v58, %v1913_v56  ;;  %v1873_v52 = vld [vmem:[#allocation5 + $0x1830] sm:$0xff]  ;;  %v7758_v56 = vpack.c.bf16 %v1788_v33, %v1783_v19 }
 0x22d   :  { %v1793_v58 = vld [vmem:[#allocation5 + $0x15b0] sm:$0xff] }
 0x22e   :  { %7603 = vmatpush1.bf16.msra.mxu0 %v7602_v2  ;;  %7731 = vmatpush1.bf16.msra.mxu1 %v7730_v3  ;;  %v2008_v2 = vld [vmem:[#allocation5 + $0x1c68] sm:$0xff]  ;;  %v7746_v3 = vpack.c.bf16 %v1758_v55, %v1753_v0  ;;  %v2033_v0 = vld [vmem:[#allocation5 + $0x1d30] sm:$0xff]  ;;  %v2038_v55 = vld [vmem:[#allocation5 + $0x1d58] sm:$0xff] }
 0x22f   :  { %7605 = vmatprep.subr.bf16.mxu0 %v7604_v4  ;;  %7733 = vmatprep.subr.bf16.mxu1 %v7732_v9  ;;  %v9459_v4 = vld [vmem:[#allocation3 + $0x38] sm:$0xff]  ;;  %v1768_v9 = vld [vmem:[#allocation5 + $0x14e8] sm:$0xff]  ;;  %v7780_v11 = vpack.c.bf16 %v2008_v2, %v2003_v1  ;;  %v1883_v2 = vld [vmem:[#allocation5 + $0x1880] sm:$0xff] }
 0x230   :  { %v7750_v25 = vpack.c.bf16 %v1768_v9, %v1763_v7  ;;  %v1958_v1 = vld [vmem:[#allocation5 + $0x1ad8] sm:$0xff]  ;;  %v7762_v7 = vpack.c.bf16 %v1798_v59, %v1793_v58 }
 0x231   :  { %v7794_v9 = vpack.c.bf16 %v1958_v1, %v1953_v61  ;;  %v2566_v61 = vld [vmem:[#allocation5 + $0x1e50] sm:$0xff]  ;;  %v2568_v1 = vld [vmem:[#allocation5 + $0x1e60] sm:$0xff] }
 0x232   :  { %7607 = vmatpush1.bf16.msra.mxu0 %v7606_v17  ;;  %7735 = vmatpush1.bf16.msra.mxu1 %v7734_v23  ;;  %v9463_v17 = vld [vmem:[#allocation3 + $0x30] sm:$0xff] }
 0x233   :  { %7609 = vmatprep.subr.bf16.mxu0 %v7608_v24  ;;  %7737 = vmatprep.subr.bf16.mxu1 %v7736_v28  ;;  %v2013_v23 = vld [vmem:[#allocation5 + $0x1c90] sm:$0xff]  ;;  %v2018_v24 = vld [vmem:[#allocation5 + $0x1cb8] sm:$0xff] }
 0x234   :  { %v1773_v28 = vld [vmem:[#allocation5 + $0x1510] sm:$0xff]  ;;  %v7784_v36 = vpack.c.bf16 %v2018_v24, %v2013_v23  ;;  %v1968_v23 = vld [vmem:[#allocation5 + $0x1b28] sm:$0xff] }
 0x235   :  { %v7754_v14 = vpack.c.bf16 %v1778_v37, %v1773_v28  ;;  %v1893_v24 = vld [vmem:[#allocation5 + $0x18d0] sm:$0xff]  ;;  %v7798_v37 = vpack.c.bf16 %v1968_v23, %v1963_v47  ;;  %v2581_v23 = vld [vmem:[#allocation5 + $0x1ec8] sm:$0xff] }
 0x236   :  { %7611 = vmatpush1.bf16.msra.mxu0 %v7610_v41  ;;  %7739 = vmatpush1.bf16.msra.mxu1 %v7738_v43  ;;  %v1868_v41 = vld [vmem:[#allocation5 + $0x1808] sm:$0xff] }
 0x237   :  { %7741 = vmatprep.subr.bf16.mxu0 %v7740_v42  ;;  %7773 = vmatprep.subr.bf16.mxu1 %v7772_v44  ;;  %v9467_v43 = vld [vmem:[#allocation3 + $0x8] sm:$0xff]  ;;  %v2023_v42 = vld [vmem:[#allocation5 + $0x1ce0] sm:$0xff]  ;;  %v7786_v44 = vpack.c.bf16 %v1938_v38, %v1933_v32  ;;  %v7756_v45 = vpack.c.bf16 %v1868_v41, %v1863_v39  ;;  %v1818_v38 = vld [vmem:[#allocation5 + $0x1678] sm:$0xff] }
 0x238   :  { %v1973_v39 = vld [vmem:[#allocation5 + $0x1b50] sm:$0xff] }
 0x239   :  { %2229 = vmatmul.mubr.f32.vlgmr.msra.gmra.mrb[16].mxu0 %v9455_v62  ;;  %2383 = vmatmul.mubr.f32.vlgmr.msra.gmra.mrb[16].mxu1 %v9455_v62 }
 0x23a   :  { %7743 = vmatpush3.bf16.msra.mxu0 %v7742_v49  ;;  %7775 = vmatpush3.bf16.msra.mxu1 %v7774_v54  ;;  %v7788_v49 = vpack.c.bf16 %v2028_v51, %v2023_v42  ;;  %v1878_v54 = vld [vmem:[#allocation5 + $0x1858] sm:$0xff]  ;;  %v2557_v51 = vld [vmem:[#allocation5 + $0x1e08] sm:$0xff] }
 0x23b   :  { %2234 = vmatprep.mubr.f32.mxu0 %v9459_v4  ;;  %2388 = vmatprep.mubr.f32.mxu1 %v9459_v4  ;;  %v1978_v42 = vld [vmem:[#allocation5 + $0x1b78] sm:$0xff] }
 0x23c   :  { %7745 = vmatprep.subr.bf16.mxu0 %v7744_v57  ;;  %7777 = vmatprep.subr.bf16.mxu1 %v7776_v60  ;;  %v7760_v57 = vpack.c.bf16 %v1878_v54, %v1873_v52  ;;  %v7792_v60 = vpack.c.bf16 %v2038_v55, %v2033_v0  ;;  %v7802_v33 = vpack.c.bf16 %v1978_v42, %v1973_v39  ;;  %v2558_v54 = vld [vmem:[#allocation5 + $0x1e10] sm:$0xff]  ;;  %v2563_v0 = vld [vmem:[#allocation5 + $0x1e38] sm:$0xff]  ;;  %v2588_v39 = vld [vmem:[#allocation5 + $0x1f00] sm:$0xff] }
 0x23d   :  { %2235 = vmatmul.mubr.f32.gmra.mrb[18].mxu0 %v9463_v17  ;;  %2389 = vmatmul.mubr.f32.gmra.mrb[18].mxu1 %v9463_v17  ;;  %v2567_v55 = vld [vmem:[#allocation5 + $0x1e58] sm:$0xff]  ;;  %v7934_v59 = vpack.c.bf16 %v2563_v0, %v2558_v54  ;;  %v2593_v42 = vld [vmem:[#allocation5 + $0x1f28] sm:$0xff] }
 0x23e   :  { %7747 = vmatpush3.bf16.msra.mxu0 %v7746_v3  ;;  %7779 = vmatpush3.bf16.msra.mxu1 %v7778_v5  ;;  %v1888_v3 = vld [vmem:[#allocation5 + $0x18a8] sm:$0xff]  ;;  %v2043_v5 = vld [vmem:[#allocation5 + $0x1d80] sm:$0xff]  ;;  %v2603_v54 = vld [vmem:[#allocation5 + $0x1f78] sm:$0xff] }
 0x23f   :  { %7749 = vmatprep.subr.bf16.mxu0 %v7748_v6  ;;  %7781 = vmatprep.subr.bf16.mxu1 %v7780_v11  ;;  %v2048_v6 = vld [vmem:[#allocation5 + $0x1da8] sm:$0xff]  ;;  %v7764_v10 = vpack.c.bf16 %v1888_v3, %v1883_v2  ;;  %v1803_v11 = vld [vmem:[#allocation5 + $0x1600] sm:$0xff]  ;;  %v2607_v0 = vld [vmem:[#allocation5 + $0x1f98] sm:$0xff] }
 0x240   :  { %2459 = vmatprep.mubr.f32.mxu0 %v9467_v43  ;;  %2534 = vmatprep.mubr.f32.mxu1 %v9451_v16  ;;  %v7790_v16 = vpack.c.bf16 %v1948_v50, %v1943_v48  ;;  %v7796_v21 = vpack.c.bf16 %v2048_v6, %v2043_v5  ;;  %v7766_v28 = vpack.c.bf16 %v1808_v12, %v1803_v11  ;;  %v2561_v50 = vld [vmem:[#allocation5 + $0x1e28] sm:$0xff] }
 0x241   :  { %v2573_v5 = vld [vmem:[#allocation5 + $0x1e88] sm:$0xff] }
 0x242   :  { %7751 = vmatpush3.bf16.msra.mxu0 %v7750_v25  ;;  %7783 = vmatpush3.bf16.msra.mxu1 %v7782_v27  ;;  %v1898_v25 = vld [vmem:[#allocation5 + $0x18f8] sm:$0xff]  ;;  %v2053_v27 = vld [vmem:[#allocation5 + $0x1dd0] sm:$0xff]  ;;  %v2577_v6 = vld [vmem:[#allocation5 + $0x1ea8] sm:$0xff]  ;;  %v7938_v12 = vpack.c.bf16 %v2573_v5, %v2568_v1 }
 0x243   :  { %7753 = vmatprep.subr.bf16.mxu0 %v7752_v30  ;;  %7785 = vmatprep.subr.bf16.mxu1 %v7784_v36  ;;  %v2058_v30 = vld [vmem:[#allocation5 + $0x1df8] sm:$0xff]  ;;  %v7768_v32 = vpack.c.bf16 %v1898_v25, %v1893_v24  ;;  %v1813_v36 = vld [vmem:[#allocation5 + $0x1650] sm:$0xff]  ;;  %v9045_v5 = vld [vmem:[#allocation7] sm:$0x1f] }
 0x244   :  { %v7800_v41 = vpack.c.bf16 %v2058_v30, %v2053_v27  ;;  %v7770_v19 = vpack.c.bf16 %v1818_v38, %v1813_v36  ;;  %v2578_v24 = vld [vmem:[#allocation5 + $0x1eb0] sm:$0xff]  ;;  %v2583_v27 = vld [vmem:[#allocation5 + $0x1ed8] sm:$0xff] }
 0x245   :  { %v2587_v30 = vld [vmem:[#allocation5 + $0x1ef8] sm:$0xff]  ;;  %v2586_v36 = vld [vmem:[#allocation5 + $0x1ef0] sm:$0xff] }
 0x246   :  { %7755 = vmatpush3.bf16.msra.mxu0 %v7754_v14  ;;  %7787 = vmatpush3.bf16.msra.mxu1 %v7786_v44  ;;  %v2562_v14 = vld [vmem:[#allocation5 + $0x1e30] sm:$0xff]  ;;  %v2559_v44 = vld [vmem:[#allocation5 + $0x1e18] sm:$0xff] }
 0x247   :  { %7757 = vmatprep.subr.bf16.mxu0 %v7756_v45  ;;  %7789 = vmatprep.subr.bf16.mxu1 %v7788_v49  ;;  %v2564_v45 = vld [vmem:[#allocation5 + $0x1e40] sm:$0xff]  ;;  %v7804_v48 = vpack.c.bf16 %v2562_v14, %v2557_v51  ;;  %v2591_v38 = vld [vmem:[#allocation5 + $0x1f18] sm:$0xff]  ;;  %v2597_v51 = vld [vmem:[#allocation5 + $0x1f48] sm:$0xff] }
 0x248   :  { %v2556_v49 = vld [vmem:[#allocation5 + $0x1e00] sm:$0xff]  ;;  %v7932_v52 = vpack.c.bf16 %v2564_v45, %v2559_v44  ;;  %v7946_v44 = vpack.c.bf16 %v2593_v42, %v2588_v39  ;;  %v2606_v1 = vld [vmem:[#allocation5 + $0x1f90] sm:$0xff] }
 0x249   :  { %v7806_v58 = vpack.c.bf16 %v2561_v50, %v2556_v49  ;;  %v2604_v14 = vld [vmem:[#allocation5 + $0x1f80] sm:$0xff]  ;;  %v9480_v49 = vsub.s32 0, %v9429_v40  ;;  %v9483_v50 = vsub.s32 2, %v9429_v40 }
 0x24a   :  { %7759 = vmatpush3.bf16.msra.mxu0 %v7758_v56  ;;  %7791 = vmatpush3.bf16.msra.mxu1 %v7790_v16  ;;  %v2572_v56 = vld [vmem:[#allocation5 + $0x1e80] sm:$0xff]  ;;  %v2569_v16 = vld [vmem:[#allocation5 + $0x1e68] sm:$0xff] }
 0x24b   :  { %7761 = vmatprep.subr.bf16.mxu0 %v7760_v57  ;;  %7793 = vmatprep.subr.bf16.mxu1 %v7792_v60  ;;  %v2574_v57 = vld [vmem:[#allocation5 + $0x1e90] sm:$0xff]  ;;  %v2571_v60 = vld [vmem:[#allocation5 + $0x1e78] sm:$0xff]  ;;  %v7808_v2 = vpack.c.bf16 %v2572_v56, %v2567_v55  ;;  %v9486_v55 = vsub.s32 1, %v9429_v40  ;;  %v9489_v56 = vsub.s32 3, %v9429_v40 }
 0x24c   :  { %v7936_v3 = vpack.c.bf16 %v2574_v57, %v2569_v16  ;;  %v7810_v11 = vpack.c.bf16 %v2571_v60, %v2566_v61  ;;  %v2609_v16 = vld [vmem:[#allocation5 + $0x1fa8] sm:$0xff]  ;;  %v2614_v57 = vld [vmem:[#allocation5 + $0x1fd0] sm:$0xff] }
 0x24d   :  { %v7952_v40 = vpack.c.bf16 %v2614_v57, %v2609_v16  ;;  %v2631_v16 = vld [vmem:[#allocation5 + $0x2058] sm:$0xff]  ;;  %v2628_v57 = vld [vmem:[#allocation5 + $0x2040] sm:$0xff] }
 0x24e   :  { %7763 = vmatpush3.bf16.msra.mxu0 %v7762_v7  ;;  %7795 = vmatpush3.bf16.msra.mxu1 %v7794_v9  ;;  %v2582_v7 = vld [vmem:[#allocation5 + $0x1ed0] sm:$0xff]  ;;  %v2579_v9 = vld [vmem:[#allocation5 + $0x1eb8] sm:$0xff] }
 0x24f   :  { %7765 = vmatprep.subr.bf16.mxu0 %v7764_v10  ;;  %7797 = vmatprep.subr.bf16.mxu1 %v7796_v21  ;;  %v2584_v10 = vld [vmem:[#allocation5 + $0x1ee0] sm:$0xff]  ;;  %v7812_v47 = vpack.c.bf16 %v2582_v7, %v2577_v6  ;;  %v441_v6 = vrot.slane %v9045_v5, %v9480_v49  ;;  %v449_v7 = vrot.slane %v9045_v5, %v9483_v50 }
 0x250   :  { %v2576_v21 = vld [vmem:[#allocation5 + $0x1ea0] sm:$0xff]  ;;  %v7940_v25 = vpack.c.bf16 %v2584_v10, %v2579_v9  ;;  %v2613_v9 = vld [vmem:[#allocation5 + $0x1fc8] sm:$0xff] }
 0x251   :  { %v2617_v10 = vld [vmem:[#allocation5 + $0x1fe8] sm:$0xff]  ;;  %v9509_v39 = vadd.f32 %v9415_v13, %v449_v7 }
 0x252   :  { %7767 = vmatpush3.bf16.msra.mxu0 %v7766_v28  ;;  %7799 = vmatpush3.bf16.msra.mxu1 %v7798_v37  ;;  %v2594_v28 = vld [vmem:[#allocation5 + $0x1f30] sm:$0xff]  ;;  %v7942_v37 = vpack.c.bf16 %v2583_v27, %v2578_v24  ;;  %v2624_v24 = vld [vmem:[#allocation5 + $0x2020] sm:$0xff]  ;;  %v2629_v13 = vld [vmem:[#allocation5 + $0x2048] sm:$0xff] }
 0x253   :  { %7769 = vmatprep.subr.bf16.mxu0 %v7768_v32  ;;  %7801 = vmatprep.subr.bf16.mxu1 %v7800_v41 }
 0x256   :  { %7771 = vmatpush3.bf16.msra.mxu0 %v7770_v19  ;;  %7803 = vmatpush3.bf16.msra.mxu1 %v7802_v33  ;;  %v2596_v19 = vld [vmem:[#allocation5 + $0x1f40] sm:$0xff]  ;;  %v2601_v33 = vld [vmem:[#allocation5 + $0x1f68] sm:$0xff] }
 0x257   :  { %7805 = vmatprep.subr.bf16.mxu0 %v7804_v48  ;;  %7933 = vmatprep.subr.bf16.mxu1 %v7932_v52  ;;  %v2598_v48 = vld [vmem:[#allocation5 + $0x1f50] sm:$0xff] }
 0x258   :  { %v7950_v61 = vpack.c.bf16 %v2603_v54, %v2598_v48 }
 0x259   :  { %2460 = vmatmul.mubr.f32.vlgmr.msra.gmra.mrb[20].mxu0 %v9439_v63  ;;  %2535 = vmatmul.mubr.f32.vlgmr.msra.gmra.mrb[20].mxu1 %v9455_v62  ;;  %v2592_v63 = vld [vmem:[#allocation5 + $0x1f20] sm:$0xff]  ;;  %v2589_v62 = vld [vmem:[#allocation5 + $0x1f08] sm:$0xff] }
 0x25a   :  { %7807 = vmatpush1.bf16.msra.mxu0 %v7806_v58  ;;  %7935 = vmatpush1.bf16.msra.mxu1 %v7934_v59  ;;  %v7816_v32 = vpack.c.bf16 %v2592_v63, %v2587_v30  ;;  %v7944_v41 = vpack.c.bf16 %v2594_v28, %v2589_v62  ;;  %v7822_v58 = vpack.c.bf16 %v2601_v33, %v2596_v19  ;;  %v9491_v59 = vld [vmem:[#allocation7 + $0x5] sm:$0x1f]  ;;  %v2634_v19 = vld [vmem:[#allocation5 + $0x2070] sm:$0xff] }
 0x25b   :  { %2464 = vmatprep.mubr.f32.mxu0 %v9443_v18  ;;  %7809 = vmatprep.subr.bf16.mxu0 %v7808_v2  ;;  %v7814_v18 = vpack.c.bf16 %v2581_v23, %v2576_v21  ;;  %v2611_v2 = vld [vmem:[#allocation5 + $0x1fb8] sm:$0xff]  ;;  %v1248_v21 = vrot.slane %v9491_v59, %v9480_v49  ;;  %v1252_v27 = vrot.slane %v9491_v59, %v9486_v55  ;;  %v2616_v63 = vld [vmem:[#allocation5 + $0x1fe0] sm:$0xff] }
 0x25c   :  { %7937 = vmatprep.subr.bf16.mxu1 %v7936_v3  ;;  %2539 = vmatprep.mubr.f32.mxu1 %v9459_v4  ;;  %v2599_v4 = vld [vmem:[#allocation5 + $0x1f58] sm:$0xff]  ;;  %v2608_v3 = vld [vmem:[#allocation5 + $0x1fa0] sm:$0xff]  ;;  %v7826_v30 = vpack.c.bf16 %v2611_v2, %v2606_v1  ;;  %v1260_v62 = vrot.slane %v9491_v59, %v9489_v56 }
 0x25d   :  { %2465 = vmatmul.mubr.f32.gmra.mrb[22].mxu0 %v9447_v22  ;;  %2540 = vmatmul.mubr.f32.gmra.mrb[22].mxu1 %v9463_v17  ;;  %v2602_v22 = vld [vmem:[#allocation5 + $0x1f70] sm:$0xff]  ;;  %v7818_v17 = vpack.c.bf16 %v2591_v38, %v2586_v36  ;;  %v7948_v52 = vpack.c.bf16 %v2604_v14, %v2599_v4  ;;  %v2619_v23 = vld [vmem:[#allocation5 + $0x1ff8] sm:$0xff]  ;;  %v7954_v28 = vpack.c.bf16 %v2613_v9, %v2608_v3 }
 0x25e   :  { %7811 = vmatpush1.bf16.msra.mxu0 %v7810_v11  ;;  %7939 = vmatpush1.bf16.msra.mxu1 %v7938_v12  ;;  %v7820_v45 = vpack.c.bf16 %v2602_v22, %v2597_v51  ;;  %v2622_v11 = vld [vmem:[#allocation5 + $0x2010] sm:$0xff]  ;;  %v445_v12 = vrot.slane %v9045_v5, %v9486_v55  ;;  %v2623_v36 = vld [vmem:[#allocation5 + $0x2018] sm:$0xff]  ;;  %v9506_v38 = vadd.f32 %v9413_v8, %v441_v6  ;;  %v2632_v22 = vld [vmem:[#allocation5 + $0x2060] sm:$0xff] }
 0x25f   :  { %7813 = vmatprep.subr.bf16.mxu0 %v7812_v47  ;;  %7941 = vmatprep.subr.bf16.mxu1 %v7940_v25  ;;  %v453_v47 = vrot.slane %v9045_v5, %v9489_v56  ;;  %v1256_v25 = vrot.slane %v9491_v59, %v9483_v50  ;;  %v7956_v42 = vpack.c.bf16 %v2624_v24, %v2619_v23  ;;  %v2627_v51 = vld [vmem:[#allocation5 + $0x2038] sm:$0xff]  ;;  %v2637_v5 = vld [vmem:[#allocation5 + $0x2088] sm:$0xff]  ;;  %v2644_v24 = vld [vmem:[#allocation5 + $0x20c0] sm:$0xff] }
 0x260   :  { %2968 = vmatprep.mubr.f32.mxu0 %v9467_v43  ;;  %3122 = vmatprep.mubr.f32.mxu1 %v9467_v43  ;;  %v2612_v43 = vld [vmem:[#allocation5 + $0x1fc0] sm:$0xff]  ;;  %v9512_v4 = vadd.f32 %v9417_v15, %v445_v12  ;;  %v7960_v3 = vpack.c.bf16 %v2634_v19, %v2629_v13  ;;  %v2639_v23 = vld [vmem:[#allocation5 + $0x2098] sm:$0xff] }
 0x261   :  { %v7824_v60 = vpack.c.bf16 %v2612_v43, %v2607_v0  ;;  %v9515_v14 = vadd.f32 %v9419_v20, %v453_v47  ;;  %v2626_v0 = vld [vmem:[#allocation5 + $0x2030] sm:$0xff]  ;;  %v7832_v43 = vpack.c.bf16 %v2632_v22, %v2627_v51  ;;  %v9541_v9 = vadd.f32 %v9427_v35, %v453_v47  ;;  %v2652_v51 = vld [vmem:[#allocation5 + $0x2100] sm:$0xff]  ;;  %v2649_v22 = vld [vmem:[#allocation5 + $0x20e8] sm:$0xff] }
 0x262   :  { %7815 = vmatpush1.bf16.msra.mxu0 %v7814_v18  ;;  %7943 = vmatpush1.bf16.msra.mxu1 %v7942_v37  ;;  %v7828_v18 = vpack.c.bf16 %v2622_v11, %v2617_v10  ;;  %v2621_v37 = vld [vmem:[#allocation5 + $0x2008] sm:$0xff] }
 0x263   :  { %7817 = vmatprep.subr.bf16.mxu0 %v7816_v32  ;;  %7945 = vmatprep.subr.bf16.mxu1 %v7944_v41  ;;  %v2618_v32 = vld [vmem:[#allocation5 + $0x1ff0] sm:$0xff]  ;;  %v7830_v15 = vpack.c.bf16 %v2621_v37, %v2616_v63  ;;  %v2641_v37 = vld [vmem:[#allocation5 + $0x20a8] sm:$0xff] }
 0x264   :  { %v7958_v54 = vpack.c.bf16 %v2623_v36, %v2618_v32  ;;  %v2638_v32 = vld [vmem:[#allocation5 + $0x2090] sm:$0xff]  ;;  %v7964_v36 = vpack.c.bf16 %v2644_v24, %v2639_v23 }
 0x265   :  { %v2658_v23 = vld [vmem:[#allocation5 + $0x2130] sm:$0xff] }
 0x266   :  { %7819 = vmatpush1.bf16.msra.mxu0 %v7818_v17  ;;  %7947 = vmatpush1.bf16.msra.mxu1 %v7946_v44  ;;  %v9518_v17 = vadd.f32 %v9421_v26, %v441_v6  ;;  %v2642_v6 = vld [vmem:[#allocation5 + $0x20b0] sm:$0xff] }
 0x267   :  { %7821 = vmatprep.subr.bf16.mxu0 %v7820_v45  ;;  %7949 = vmatprep.subr.bf16.mxu1 %v7948_v52 }
 0x26a   :  { %7823 = vmatpush1.bf16.msra.mxu0 %v7822_v58  ;;  %7951 = vmatpush1.bf16.msra.mxu1 %v7950_v61  ;;  %v2633_v58 = vld [vmem:[#allocation5 + $0x2068] sm:$0xff]  ;;  %v9531_v61 = vadd.f32 %v9423_v31, %v449_v7 }
 0x26b   :  { %7825 = vmatprep.subr.bf16.mxu0 %v7824_v60  ;;  %7953 = vmatprep.subr.bf16.mxu1 %v7952_v40  ;;  %v9538_v40 = vadd.f32 %v9425_v29, %v445_v12  ;;  %v7834_v29 = vpack.c.bf16 %v2631_v16, %v2626_v0  ;;  %v7962_v12 = vpack.c.bf16 %v2633_v58, %v2628_v57  ;;  %v2657_v16 = vld [vmem:[#allocation5 + $0x2128] sm:$0xff]  ;;  %v2662_v57 = vld [vmem:[#allocation5 + $0x2150] sm:$0xff]  ;;  %v2659_v58 = vld [vmem:[#allocation5 + $0x2138] sm:$0xff] }
 0x26c   :  { %v1413_v41 = vpop.f32.mrb[8].mxu0  ;;  %v1567_v8 = vpop.f32.mrb[8].mxu1 }
 0x26d   :  { %v9520_v44 = vadd.f32 %v1413_v41, %v1248_v21  ;;  %v1415_v45 = vpop.f32.mrb[9].mxu0  ;;  %v9522_v33 = vadd.f32 %v1567_v8, %v1256_v25  ;;  %v1569_v52 = vpop.f32.mrb[9].mxu1  ;;  %v2643_v41 = vld [vmem:[#allocation5 + $0x20b8] sm:$0xff]  ;;  %v2654_v8 = vld [vmem:[#allocation5 + $0x2110] sm:$0xff] }
 0x26e   :  { %v9524_v48 = vadd.f32 %v1415_v45, %v1252_v27  ;;  %7827 = vmatpush1.bf16.msra.mxu0 %v7826_v30  ;;  %v9528_v26 = vadd.f32 %v1569_v52, %v1260_v62  ;;  %7955 = vmatpush1.bf16.msra.mxu1 %v7954_v28  ;;  %v7966_v13 = vpack.c.bf16 %v2643_v41, %v2638_v32  ;;  %v2646_v52 = vld [vmem:[#allocation5 + $0x20d0] sm:$0xff] }
 0x26f   :  { %v1728_v20 = vmax.f32 %v9506_v38, %v9520_v44  ;;  %7829 = vmatprep.subr.bf16.mxu0 %v7828_v18  ;;  %v1730_v60 = vmax.f32 %v9509_v39, %v9522_v33  ;;  %7957 = vmatprep.subr.bf16.mxu1 %v7956_v42  ;;  %v2636_v18 = vld [vmem:[#allocation5 + $0x2080] sm:$0xff]  ;;  %v2647_v42 = vld [vmem:[#allocation5 + $0x20d8] sm:$0xff]  ;;  %v7968_v0 = vpack.c.bf16 %v2654_v8, %v2649_v22  ;;  %v2666_v41 = vld [vmem:[#allocation5 + $0x2170] sm:$0xff] }
 0x270   :  { %v1729_v1 = vmax.f32 %v9512_v4, %v9524_v48  ;;  %v1419_v2 = vpop.f32.mrb[10].mxu0  ;;  %v1731_v31 = vmax.f32 %v9515_v14, %v9528_v26  ;;  %v1573_v10 = vpop.f32.mrb[10].mxu1  ;;  %v7838_v45 = vpack.c.bf16 %v2641_v37, %v2636_v18  ;;  %v7840_v19 = vpack.c.bf16 %v2652_v51, %v2647_v42  ;;  %v2674_v18 = vld [vmem:[#allocation5 + $0x21b0] sm:$0xff]  ;;  %v2671_v42 = vld [vmem:[#allocation5 + $0x2198] sm:$0xff]  ;;  %v2668_v51 = vld [vmem:[#allocation5 + $0x2180] sm:$0xff] }
 0x271   :  { %v9545_v7 = vadd.f32 %v1419_v2, %v1248_v21  ;;  %v1421_v11 = vpop.f32.mrb[11].mxu0  ;;  %v9547_v30 = vadd.f32 %v1573_v10, %v1256_v25  ;;  %v1575_v28 = vpop.f32.mrb[11].mxu1  ;;  %v7836_v21 = vpack.c.bf16 %v2642_v6, %v2637_v5  ;;  %v2664_v2 = vld [vmem:[#allocation5 + $0x2160] sm:$0xff]  ;;  %v7844_v6 = vpack.c.bf16 %v2662_v57, %v2657_v16  ;;  %v2673_v8 = vld [vmem:[#allocation5 + $0x21a8] sm:$0xff]  ;;  %v2678_v57 = vld [vmem:[#allocation5 + $0x21d0] sm:$0xff] }
 0x272   :  { %v9549_v63 = vadd.f32 %v1421_v11, %v1252_v27  ;;  %7831 = vmatpush1.bf16.msra.mxu0 %v7830_v15  ;;  %v9553_v47 = vadd.f32 %v1575_v28, %v1260_v62  ;;  %7959 = vmatpush1.bf16.msra.mxu1 %v7958_v54  ;;  %v2651_v15 = vld [vmem:[#allocation5 + $0x20f8] sm:$0xff]  ;;  %v2648_v54 = vld [vmem:[#allocation5 + $0x20e0] sm:$0xff]  ;;  %v2661_v11 = vld [vmem:[#allocation5 + $0x2148] sm:$0xff]  ;;  %v7972_v24 = vpack.c.bf16 %v2664_v2, %v2659_v58 }
 0x273   :  { %v1733_v35 = vmax.f32 %v9518_v17, %v9545_v7  ;;  %7833 = vmatprep.subr.bf16.mxu0 %v7832_v43  ;;  %v1735_v25 = vmax.f32 %v9531_v61, %v9547_v30  ;;  %7961 = vmatprep.subr.bf16.mxu1 %v7960_v3  ;;  %v2653_v43 = vld [vmem:[#allocation5 + $0x2108] sm:$0xff]  ;;  %v7842_v3 = vpack.c.bf16 %v2651_v15, %v2646_v52  ;;  %v2656_v10 = vld [vmem:[#allocation5 + $0x2120] sm:$0xff]  ;;  %v2663_v28 = vld [vmem:[#allocation5 + $0x2158] sm:$0xff] }
 0x274   :  { %v7970_v5 = vpack.c.bf16 %v2653_v43, %v2648_v54  ;;  %v7846_v37 = vpack.c.bf16 %v2661_v11, %v2656_v10  ;;  %v7974_v32 = vpack.c.bf16 %v2663_v28, %v2658_v23  ;;  %v2684_v52 = vld [vmem:[#allocation5 + $0x2200] sm:$0xff]  ;;  %v7850_v15 = vpack.c.bf16 %v2671_v42, %v2666_v41  ;;  %v2681_v16 = vld [vmem:[#allocation5 + $0x21e8] sm:$0xff]  ;;  %v2683_v2 = vld [vmem:[#allocation5 + $0x21f8] sm:$0xff] }
 0x275   :  { %v7978_v54 = vpack.c.bf16 %v2673_v8, %v2668_v51  ;;  %v2676_v43 = vld [vmem:[#allocation5 + $0x21c0] sm:$0xff]  ;;  %v2694_v10 = vld [vmem:[#allocation5 + $0x2250] sm:$0xff]  ;;  %v7982_v23 = vpack.c.bf16 %v2683_v2, %v2678_v57  ;;  %v2845_v62 = vld [vmem:[#allocation5 + $0x2708] sm:$0xff] }
 0x276   :  { %7835 = vmatpush1.bf16.msra.mxu0 %v7834_v29  ;;  %7963 = vmatpush1.bf16.msra.mxu1 %v7962_v12  ;;  %v2667_v29 = vld [vmem:[#allocation5 + $0x2178] sm:$0xff]  ;;  %v2672_v12 = vld [vmem:[#allocation5 + $0x21a0] sm:$0xff]  ;;  %v7854_v11 = vpack.c.bf16 %v2681_v16, %v2676_v43  ;;  %v2686_v28 = vld [vmem:[#allocation5 + $0x2210] sm:$0xff] }
 0x277   :  { %7837 = vmatprep.subr.bf16.mxu0 %v7836_v21  ;;  %7965 = vmatprep.subr.bf16.mxu1 %v7964_v36  ;;  %v2669_v21 = vld [vmem:[#allocation5 + $0x2188] sm:$0xff]  ;;  %v7848_v36 = vpack.c.bf16 %v2672_v12, %v2667_v29  ;;  %v2691_v29 = vld [vmem:[#allocation5 + $0x2238] sm:$0xff]  ;;  %v2688_v12 = vld [vmem:[#allocation5 + $0x2220] sm:$0xff] }
 0x278   :  { %v7976_v22 = vpack.c.bf16 %v2674_v18, %v2669_v21  ;;  %v2693_v18 = vld [vmem:[#allocation5 + $0x2248] sm:$0xff]  ;;  %v2704_v41 = vld [vmem:[#allocation5 + $0x22a0] sm:$0xff]  ;;  %v7858_v42 = vpack.c.bf16 %v2691_v29, %v2686_v28  ;;  %v2714_v2 = vld [vmem:[#allocation5 + $0x22f0] sm:$0xff] }
 0x279   :  { %v7986_v51 = vpack.c.bf16 %v2693_v18, %v2688_v12  ;;  %v2696_v8 = vld [vmem:[#allocation5 + $0x2260] sm:$0xff]  ;;  %v2713_v18 = vld [vmem:[#allocation5 + $0x22e8] sm:$0xff]  ;;  %v3456_v33 = vld [vmem:[#allocation5 + $0x2a98] sm:$0xff] }
 0x27a   :  { %7839 = vmatpush1.bf16.msra.mxu0 %v7838_v45  ;;  %7967 = vmatpush1.bf16.msra.mxu1 %v7966_v13  ;;  %v2677_v45 = vld [vmem:[#allocation5 + $0x21c8] sm:$0xff]  ;;  %v2682_v13 = vld [vmem:[#allocation5 + $0x21f0] sm:$0xff]  ;;  %v2712_v43 = vld [vmem:[#allocation5 + $0x22e0] sm:$0xff] }
 0x27b   :  { %7841 = vmatprep.subr.bf16.mxu0 %v7840_v19  ;;  %7969 = vmatprep.subr.bf16.mxu1 %v7968_v0  ;;  %v2679_v19 = vld [vmem:[#allocation5 + $0x21d8] sm:$0xff]  ;;  %v7852_v0 = vpack.c.bf16 %v2682_v13, %v2677_v45  ;;  %v2701_v45 = vld [vmem:[#allocation5 + $0x2288] sm:$0xff]  ;;  %v2698_v13 = vld [vmem:[#allocation5 + $0x2270] sm:$0xff] }
 0x27c   :  { %v7980_v58 = vpack.c.bf16 %v2684_v52, %v2679_v19  ;;  %v1264_v52 = vrot.slane %v9491_v59, %v9432_v46  ;;  %v2711_v59 = vld [vmem:[#allocation5 + $0x22d8] sm:$0xff]  ;;  %v2708_v28 = vld [vmem:[#allocation5 + $0x22c0] sm:$0xff] }
 0x27d   :  { %v3453_v26 = vld [vmem:[#allocation5 + $0x2a80] sm:$0xff]  ;;  %v3460_v7 = vld [vmem:[#allocation5 + $0x2ab8] sm:$0xff] }
 0x27e   :  { %7843 = vmatpush1.bf16.msra.mxu0 %v7842_v3  ;;  %7971 = vmatpush1.bf16.msra.mxu1 %v7970_v5  ;;  %v2687_v3 = vld [vmem:[#allocation5 + $0x2218] sm:$0xff]  ;;  %v2692_v5 = vld [vmem:[#allocation5 + $0x2240] sm:$0xff] }
 0x27f   :  { %7845 = vmatprep.subr.bf16.mxu0 %v7844_v6  ;;  %7973 = vmatprep.subr.bf16.mxu1 %v7972_v24  ;;  %v2689_v6 = vld [vmem:[#allocation5 + $0x2228] sm:$0xff]  ;;  %v7856_v24 = vpack.c.bf16 %v2692_v5, %v2687_v3 }
 0x280   :  { %v7984_v21 = vpack.c.bf16 %v2694_v10, %v2689_v6  ;;  %v7862_v6 = vpack.c.bf16 %v2701_v45, %v2696_v8 }
 0x282   :  { %7847 = vmatpush1.bf16.msra.mxu0 %v7846_v37  ;;  %7975 = vmatpush1.bf16.msra.mxu1 %v7974_v32  ;;  %v2697_v37 = vld [vmem:[#allocation5 + $0x2268] sm:$0xff]  ;;  %v2702_v32 = vld [vmem:[#allocation5 + $0x2290] sm:$0xff] }
 0x283   :  { %7849 = vmatprep.subr.bf16.mxu0 %v7848_v36  ;;  %7977 = vmatprep.subr.bf16.mxu1 %v7976_v22  ;;  %v2699_v36 = vld [vmem:[#allocation5 + $0x2278] sm:$0xff]  ;;  %v7860_v22 = vpack.c.bf16 %v2702_v32, %v2697_v37  ;;  %v2717_v37 = vld [vmem:[#allocation5 + $0x2308] sm:$0xff]  ;;  %v2722_v32 = vld [vmem:[#allocation5 + $0x2330] sm:$0xff] }
 0x286   :  { %7851 = vmatpush1.bf16.msra.mxu0 %v7850_v15  ;;  %7979 = vmatpush1.bf16.msra.mxu1 %v7978_v54  ;;  %v7988_v15 = vpack.c.bf16 %v2704_v41, %v2699_v36  ;;  %v2703_v54 = vld [vmem:[#allocation5 + $0x2298] sm:$0xff] }
 0x287   :  { %7853 = vmatprep.subr.bf16.mxu0 %v7852_v0  ;;  %7981 = vmatprep.subr.bf16.mxu1 %v7980_v58  ;;  %v2707_v0 = vld [vmem:[#allocation5 + $0x22b8] sm:$0xff]  ;;  %v2709_v58 = vld [vmem:[#allocation5 + $0x22c8] sm:$0xff] }
 0x28a   :  { %7855 = vmatpush1.bf16.msra.mxu0 %v7854_v11  ;;  %7983 = vmatpush1.bf16.msra.mxu1 %v7982_v23  ;;  %v7990_v11 = vpack.c.bf16 %v2703_v54, %v2698_v13  ;;  %v7864_v23 = vpack.c.bf16 %v2712_v43, %v2707_v0  ;;  %v7994_v54 = vpack.c.bf16 %v2713_v18, %v2708_v28  ;;  %v2721_v43 = vld [vmem:[#allocation5 + $0x2328] sm:$0xff]  ;;  %v2726_v28 = vld [vmem:[#allocation5 + $0x2350] sm:$0xff]  ;;  %v2728_v18 = vld [vmem:[#allocation5 + $0x2360] sm:$0xff] }
 0x28b   :  { %7857 = vmatprep.subr.bf16.mxu0 %v7856_v24  ;;  %7985 = vmatprep.subr.bf16.mxu1 %v7984_v21  ;;  %v2706_v24 = vld [vmem:[#allocation5 + $0x22b0] sm:$0xff]  ;;  %v7992_v21 = vpack.c.bf16 %v2714_v2, %v2709_v58  ;;  %v7868_v0 = vpack.c.bf16 %v2722_v32, %v2717_v37  ;;  %v2733_v37 = vld [vmem:[#allocation5 + $0x2388] sm:$0xff] }
 0x28c   :  { %v5927_v19 = vpop.f32.mrb[12].mxu0  ;;  %v5965_v57 = vpop.f32.mrb[12].mxu1  ;;  %v7866_v45 = vpack.c.bf16 %v2711_v59, %v2706_v24  ;;  %v2737_v32 = vld [vmem:[#allocation5 + $0x23a8] sm:$0xff] }
 0x28d   :  { %v5928_v16 = vpop.f32.mrb[13].mxu0  ;;  %v5966_v5 = vpop.f32.mrb[13].mxu1 }
 0x28e   :  { %v5929_v3 = vadd.f32 %v5928_v16, %v5927_v19  ;;  %7859 = vmatpush1.bf16.msra.mxu0 %v7858_v42  ;;  %7987 = vmatpush1.bf16.msra.mxu1 %v7986_v51  ;;  %v5967_v10 = vadd.f32 %v5966_v5, %v5965_v57  ;;  %v2719_v42 = vld [vmem:[#allocation5 + $0x2318] sm:$0xff]  ;;  %v2724_v19 = vld [vmem:[#allocation5 + $0x2340] sm:$0xff]  ;;  %v2718_v16 = vld [vmem:[#allocation5 + $0x2310] sm:$0xff] }
 0x28f   :  { %7861 = vmatprep.subr.bf16.mxu0 %v7860_v22  ;;  %7989 = vmatprep.subr.bf16.mxu1 %v7988_v15  ;;  %v2716_v15 = vld [vmem:[#allocation5 + $0x2300] sm:$0xff]  ;;  %v7996_v2 = vpack.c.bf16 %v2724_v19, %v2719_v42  ;;  %v2727_v5 = vld [vmem:[#allocation5 + $0x2358] sm:$0xff]  ;;  %v9599_v57 = vld [vmem:[#allocation3 + $0x8] sm:$0xff] }
 0x290   :  { %v1645_v29 = vadd.f32 %v5929_v3, %v1264_v52  ;;  %v5930_v12 = vpop.f32.mrb[14].mxu0  ;;  %v5968_v41 = vpop.f32.mrb[14].mxu1  ;;  %v2723_v3 = vld [vmem:[#allocation5 + $0x2338] sm:$0xff]  ;;  %v2744_v19 = vld [vmem:[#allocation5 + $0x23e0] sm:$0xff] }
 0x291   :  { %v5931_v36 = vpop.f32.mrb[15].mxu0  ;;  %v5969_v22 = vpop.f32.mrb[15].mxu1  ;;  %v2739_v42 = vld [vmem:[#allocation5 + $0x23b8] sm:$0xff] }
 0x292   :  { %v9563_v8 = vadd.f32 %v5967_v10, %v1645_v29  ;;  %v5932_v51 = vadd.f32 %v5931_v36, %v5930_v12  ;;  %7863 = vmatpush1.bf16.msra.mxu0 %v7862_v6  ;;  %7991 = vmatpush1.bf16.msra.mxu1 %v7990_v11  ;;  %v5970_v13 = vadd.f32 %v5969_v22, %v5968_v41  ;;  %v2732_v10 = vld [vmem:[#allocation5 + $0x2380] sm:$0xff]  ;;  %v2729_v6 = vld [vmem:[#allocation5 + $0x2368] sm:$0xff]  ;;  %v2734_v29 = vld [vmem:[#allocation5 + $0x2390] sm:$0xff] }
 0x293   :  { %7865 = vmatprep.subr.bf16.mxu0 %v7864_v23  ;;  %7993 = vmatprep.subr.bf16.mxu1 %v7992_v21  ;;  %v7870_v11 = vpack.c.bf16 %v2721_v43, %v2716_v15  ;;  %v7998_v23 = vpack.c.bf16 %v2723_v3, %v2718_v16  ;;  %v7872_v59 = vpack.c.bf16 %v2732_v10, %v2727_v5  ;;  %v2731_v12 = vld [vmem:[#allocation5 + $0x2378] sm:$0xff]  ;;  %v2742_v36 = vld [vmem:[#allocation5 + $0x23d0] sm:$0xff]  ;;  %v9571_v41 = vld [vmem:[#allocation3] sm:$0xff] }
 0x294   :  { %v1650_v58 = vadd.f32 %v5932_v51, %v1264_v52  ;;  %v8000_v21 = vpack.c.bf16 %v2734_v29, %v2729_v6  ;;  %v7874_v51 = vpack.c.bf16 %v2731_v12, %v2726_v28  ;;  %v8002_v22 = vpack.c.bf16 %v2733_v37, %v2728_v18  ;;  %v2743_v43 = vld [vmem:[#allocation5 + $0x23d8] sm:$0xff]  ;;  %v2749_v3 = vld [vmem:[#allocation5 + $0x2408] sm:$0xff]  ;;  %v2754_v5 = vld [vmem:[#allocation5 + $0x2430] sm:$0xff] }
 0x295   :  { %v8004_v15 = vpack.c.bf16 %v2744_v19, %v2739_v42  ;;  %v2747_v16 = vld [vmem:[#allocation5 + $0x23f8] sm:$0xff]  ;;  %v9579_v10 = vld [vmem:[#allocation3 + $0x20] sm:$0xff]  ;;  %v8008_v12 = vpack.c.bf16 %v2754_v5, %v2749_v3  ;;  %v2753_v18 = vld [vmem:[#allocation5 + $0x2428] sm:$0xff] }
 0x296   :  { %v9567_v24 = vadd.f32 %v5970_v13, %v1650_v58  ;;  %7867 = vmatpush1.bf16.msra.mxu0 %v7866_v45  ;;  %7995 = vmatpush1.bf16.msra.mxu1 %v7994_v54  ;;  %v7876_v45 = vpack.c.bf16 %v2742_v36, %v2737_v32  ;;  %v2736_v13 = vld [vmem:[#allocation5 + $0x23a0] sm:$0xff]  ;;  %v2741_v54 = vld [vmem:[#allocation5 + $0x23c8] sm:$0xff]  ;;  %v2762_v37 = vld [vmem:[#allocation5 + $0x2470] sm:$0xff] }
 0x297   :  { %7869 = vmatprep.subr.bf16.mxu0 %v7868_v0  ;;  %7997 = vmatprep.subr.bf16.mxu1 %v7996_v2  ;;  %v2738_v0 = vld [vmem:[#allocation5 + $0x23b0] sm:$0xff]  ;;  %v2752_v58 = vld [vmem:[#allocation5 + $0x2420] sm:$0xff]  ;;  %v9575_v2 = vld [vmem:[#allocation3 + $0x28] sm:$0xff]  ;;  %v7878_v6 = vpack.c.bf16 %v2741_v54, %v2736_v13 }
 0x298   :  { %v8006_v29 = vpack.c.bf16 %v2743_v43, %v2738_v0  ;;  %v2748_v28 = vld [vmem:[#allocation5 + $0x2400] sm:$0xff]  ;;  %v9583_v32 = vld [vmem:[#allocation3 + $0x18] sm:$0xff]  ;;  %v2761_v13 = vld [vmem:[#allocation5 + $0x2468] sm:$0xff] }
 0x299   :  { %2969 = vmatmul.mubr.f32.vlgmr.msra.gmra.mrb[24].mxu0 %v9571_v41  ;;  %3123 = vmatmul.mubr.f32.vlgmr.msra.gmra.mrb[24].mxu1 %v9571_v41  ;;  %v2759_v36 = vld [vmem:[#allocation5 + $0x2458] sm:$0xff]  ;;  %v2764_v42 = vld [vmem:[#allocation5 + $0x2480] sm:$0xff]  ;;  %v2758_v54 = vld [vmem:[#allocation5 + $0x2450] sm:$0xff] }
 0x29a   :  { %7871 = vmatpush1.bf16.msra.mxu0 %v7870_v11  ;;  %7999 = vmatpush1.bf16.msra.mxu1 %v7998_v23  ;;  %v7880_v11 = vpack.c.bf16 %v2752_v58, %v2747_v16  ;;  %v2746_v23 = vld [vmem:[#allocation5 + $0x23f0] sm:$0xff]  ;;  %v8012_v0 = vpack.c.bf16 %v2764_v42, %v2759_v36  ;;  %v2767_v43 = vld [vmem:[#allocation5 + $0x2498] sm:$0xff]  ;;  %v2772_v16 = vld [vmem:[#allocation5 + $0x24c0] sm:$0xff] }
 0x29b   :  { %7873 = vmatprep.subr.bf16.mxu0 %v7872_v59  ;;  %8001 = vmatprep.subr.bf16.mxu1 %v8000_v21  ;;  %v2751_v59 = vld [vmem:[#allocation5 + $0x2418] sm:$0xff]  ;;  %v2757_v21 = vld [vmem:[#allocation5 + $0x2448] sm:$0xff]  ;;  %v2774_v3 = vld [vmem:[#allocation5 + $0x24d0] sm:$0xff] }
 0x29c   :  { %2974 = vmatprep.mubr.f32.mxu0 %v9575_v2  ;;  %3128 = vmatprep.mubr.f32.mxu1 %v9575_v2  ;;  %v7882_v19 = vpack.c.bf16 %v2751_v59, %v2746_v23  ;;  %v2769_v58 = vld [vmem:[#allocation5 + $0x24a8] sm:$0xff]  ;;  %v7888_v23 = vpack.c.bf16 %v2772_v16, %v2767_v43  ;;  %v2768_v59 = vld [vmem:[#allocation5 + $0x24a0] sm:$0xff]  ;;  %v2787_v43 = vld [vmem:[#allocation5 + $0x2538] sm:$0xff] }
 0x29d   :  { %2975 = vmatmul.mubr.f32.gmra.mrb[26].mxu0 %v9579_v10  ;;  %3129 = vmatmul.mubr.f32.gmra.mrb[26].mxu1 %v9579_v10  ;;  %v2784_v36 = vld [vmem:[#allocation5 + $0x2520] sm:$0xff]  ;;  %v2789_v16 = vld [vmem:[#allocation5 + $0x2548] sm:$0xff] }
 0x29e   :  { %7875 = vmatpush1.bf16.msra.mxu0 %v7874_v51  ;;  %8003 = vmatpush1.bf16.msra.mxu1 %v8002_v22  ;;  %v8010_v51 = vpack.c.bf16 %v2753_v18, %v2748_v28  ;;  %v7884_v22 = vpack.c.bf16 %v2762_v37, %v2757_v21  ;;  %v8016_v28 = vpack.c.bf16 %v2774_v3, %v2769_v58  ;;  %v2773_v18 = vld [vmem:[#allocation5 + $0x24c8] sm:$0xff]  ;;  %v2779_v37 = vld [vmem:[#allocation5 + $0x24f8] sm:$0xff]  ;;  %v2794_v58 = vld [vmem:[#allocation5 + $0x2570] sm:$0xff] }
 0x29f   :  { %7877 = vmatprep.subr.bf16.mxu0 %v7876_v45  ;;  %8005 = vmatprep.subr.bf16.mxu1 %v8004_v15  ;;  %v2756_v45 = vld [vmem:[#allocation5 + $0x2440] sm:$0xff]  ;;  %v2763_v15 = vld [vmem:[#allocation5 + $0x2478] sm:$0xff]  ;;  %v2777_v21 = vld [vmem:[#allocation5 + $0x24e8] sm:$0xff] }
 0x2a0   :  { %3045 = vmatprep.mubr.f32.mxu0 %v9583_v32  ;;  %3199 = vmatprep.mubr.f32.mxu1 %v9583_v32  ;;  %v7886_v5 = vpack.c.bf16 %v2761_v13, %v2756_v45  ;;  %v2778_v13 = vld [vmem:[#allocation5 + $0x24f0] sm:$0xff]  ;;  %v2685_v52 = vld [vmem:[#allocation5 + $0x2208] sm:$0xff] }
 0x2a2   :  { %7879 = vmatpush1.bf16.msra.mxu0 %v7878_v6  ;;  %8007 = vmatpush1.bf16.msra.mxu1 %v8006_v29  ;;  %v8014_v6 = vpack.c.bf16 %v2763_v15, %v2758_v54  ;;  %v2766_v29 = vld [vmem:[#allocation5 + $0x2490] sm:$0xff]  ;;  %v8020_v54 = vpack.c.bf16 %v2784_v36, %v2779_v37  ;;  %v2783_v15 = vld [vmem:[#allocation5 + $0x2518] sm:$0xff]  ;;  %v2804_v37 = vld [vmem:[#allocation5 + $0x25c0] sm:$0xff] }
 0x2a3   :  { %7881 = vmatprep.subr.bf16.mxu0 %v7880_v11  ;;  %8009 = vmatprep.subr.bf16.mxu1 %v8008_v12  ;;  %v2771_v11 = vld [vmem:[#allocation5 + $0x24b8] sm:$0xff]  ;;  %v2782_v12 = vld [vmem:[#allocation5 + $0x2510] sm:$0xff] }
 0x2a4   :  { %v7890_v42 = vpack.c.bf16 %v2771_v11, %v2766_v29  ;;  %v7892_v45 = vpack.c.bf16 %v2782_v12, %v2777_v21  ;;  %v2788_v11 = vld [vmem:[#allocation5 + $0x2540] sm:$0xff]  ;;  %v2797_v21 = vld [vmem:[#allocation5 + $0x2588] sm:$0xff]  ;;  %v2799_v12 = vld [vmem:[#allocation5 + $0x2598] sm:$0xff] }
 0x2a6   :  { %7883 = vmatpush1.bf16.msra.mxu0 %v7882_v19  ;;  %8011 = vmatpush1.bf16.msra.mxu1 %v8010_v51  ;;  %v8018_v19 = vpack.c.bf16 %v2773_v18, %v2768_v59  ;;  %v2776_v51 = vld [vmem:[#allocation5 + $0x24e0] sm:$0xff]  ;;  %v8024_v59 = vpack.c.bf16 %v2794_v58, %v2789_v16  ;;  %v2793_v18 = vld [vmem:[#allocation5 + $0x2568] sm:$0xff]  ;;  %v2814_v16 = vld [vmem:[#allocation5 + $0x2610] sm:$0xff] }
 0x2a7   :  { %7885 = vmatprep.subr.bf16.mxu0 %v7884_v22  ;;  %8013 = vmatprep.subr.bf16.mxu1 %v8012_v0  ;;  %v2781_v22 = vld [vmem:[#allocation5 + $0x2508] sm:$0xff]  ;;  %v2792_v0 = vld [vmem:[#allocation5 + $0x2560] sm:$0xff] }
 0x2a8   :  { %v7894_v3 = vpack.c.bf16 %v2781_v22, %v2776_v51  ;;  %v7896_v29 = vpack.c.bf16 %v2792_v0, %v2787_v43  ;;  %v2798_v22 = vld [vmem:[#allocation5 + $0x2590] sm:$0xff]  ;;  %v2807_v43 = vld [vmem:[#allocation5 + $0x25d8] sm:$0xff]  ;;  %v2809_v0 = vld [vmem:[#allocation5 + $0x25e8] sm:$0xff] }
 0x2aa   :  { %7887 = vmatpush1.bf16.msra.mxu0 %v7886_v5  ;;  %8015 = vmatpush1.bf16.msra.mxu1 %v8014_v6  ;;  %v8022_v5 = vpack.c.bf16 %v2783_v15, %v2778_v13  ;;  %v2786_v6 = vld [vmem:[#allocation5 + $0x2530] sm:$0xff]  ;;  %v8028_v13 = vpack.c.bf16 %v2804_v37, %v2799_v12  ;;  %v2803_v15 = vld [vmem:[#allocation5 + $0x25b8] sm:$0xff]  ;;  %v2824_v12 = vld [vmem:[#allocation5 + $0x2660] sm:$0xff] }
 0x2ab   :  { %7889 = vmatprep.subr.bf16.mxu0 %v7888_v23  ;;  %8017 = vmatprep.subr.bf16.mxu1 %v8016_v28  ;;  %v2791_v23 = vld [vmem:[#allocation5 + $0x2558] sm:$0xff]  ;;  %v2802_v28 = vld [vmem:[#allocation5 + $0x25b0] sm:$0xff] }
 0x2ac   :  { %v7898_v36 = vpack.c.bf16 %v2791_v23, %v2786_v6  ;;  %v7900_v51 = vpack.c.bf16 %v2802_v28, %v2797_v21  ;;  %v2808_v23 = vld [vmem:[#allocation5 + $0x25e0] sm:$0xff]  ;;  %v2817_v21 = vld [vmem:[#allocation5 + $0x2628] sm:$0xff]  ;;  %v2819_v28 = vld [vmem:[#allocation5 + $0x2638] sm:$0xff] }
 0x2ae   :  { %7891 = vmatpush1.bf16.msra.mxu0 %v7890_v42  ;;  %8019 = vmatpush1.bf16.msra.mxu1 %v8018_v19  ;;  %v8026_v42 = vpack.c.bf16 %v2793_v18, %v2788_v11  ;;  %v2796_v19 = vld [vmem:[#allocation5 + $0x2580] sm:$0xff]  ;;  %v8032_v11 = vpack.c.bf16 %v2814_v16, %v2809_v0  ;;  %v2813_v18 = vld [vmem:[#allocation5 + $0x2608] sm:$0xff]  ;;  %v2834_v0 = vld [vmem:[#allocation5 + $0x26b0] sm:$0xff] }
 0x2af   :  { %7893 = vmatprep.subr.bf16.mxu0 %v7892_v45  ;;  %8021 = vmatprep.subr.bf16.mxu1 %v8020_v54  ;;  %v2801_v45 = vld [vmem:[#allocation5 + $0x25a8] sm:$0xff]  ;;  %v2812_v54 = vld [vmem:[#allocation5 + $0x2600] sm:$0xff] }
 0x2b0   :  { %v7902_v58 = vpack.c.bf16 %v2801_v45, %v2796_v19  ;;  %v7904_v6 = vpack.c.bf16 %v2812_v54, %v2807_v43  ;;  %v2818_v45 = vld [vmem:[#allocation5 + $0x2630] sm:$0xff]  ;;  %v2827_v43 = vld [vmem:[#allocation5 + $0x2678] sm:$0xff]  ;;  %v2829_v54 = vld [vmem:[#allocation5 + $0x2688] sm:$0xff] }
 0x2b2   :  { %7895 = vmatpush1.bf16.msra.mxu0 %v7894_v3  ;;  %8023 = vmatpush1.bf16.msra.mxu1 %v8022_v5  ;;  %v8030_v3 = vpack.c.bf16 %v2803_v15, %v2798_v22  ;;  %v2806_v5 = vld [vmem:[#allocation5 + $0x25d0] sm:$0xff]  ;;  %v8036_v22 = vpack.c.bf16 %v2824_v12, %v2819_v28  ;;  %v2823_v15 = vld [vmem:[#allocation5 + $0x2658] sm:$0xff]  ;;  %v2844_v28 = vld [vmem:[#allocation5 + $0x2700] sm:$0xff] }
 0x2b3   :  { %7897 = vmatprep.subr.bf16.mxu0 %v7896_v29  ;;  %8025 = vmatprep.subr.bf16.mxu1 %v8024_v59  ;;  %v2811_v29 = vld [vmem:[#allocation5 + $0x25f8] sm:$0xff]  ;;  %v2822_v59 = vld [vmem:[#allocation5 + $0x2650] sm:$0xff] }
 0x2b4   :  { %v7906_v37 = vpack.c.bf16 %v2811_v29, %v2806_v5  ;;  %v7908_v19 = vpack.c.bf16 %v2822_v59, %v2817_v21  ;;  %v2828_v29 = vld [vmem:[#allocation5 + $0x2680] sm:$0xff]  ;;  %v2837_v21 = vld [vmem:[#allocation5 + $0x26c8] sm:$0xff]  ;;  %v2839_v59 = vld [vmem:[#allocation5 + $0x26d8] sm:$0xff] }
 0x2b6   :  { %7899 = vmatpush1.bf16.msra.mxu0 %v7898_v36  ;;  %8027 = vmatpush1.bf16.msra.mxu1 %v8026_v42  ;;  %v8034_v36 = vpack.c.bf16 %v2813_v18, %v2808_v23  ;;  %v2816_v42 = vld [vmem:[#allocation5 + $0x2620] sm:$0xff]  ;;  %v8040_v23 = vpack.c.bf16 %v2834_v0, %v2829_v54  ;;  %v2833_v18 = vld [vmem:[#allocation5 + $0x26a8] sm:$0xff]  ;;  %v2854_v54 = vld [vmem:[#allocation5 + $0x2750] sm:$0xff] }
 0x2b7   :  { %7901 = vmatprep.subr.bf16.mxu0 %v7900_v51  ;;  %8029 = vmatprep.subr.bf16.mxu1 %v8028_v13  ;;  %v2821_v51 = vld [vmem:[#allocation5 + $0x2648] sm:$0xff]  ;;  %v2832_v13 = vld [vmem:[#allocation5 + $0x26a0] sm:$0xff] }
 0x2b8   :  { %v7910_v16 = vpack.c.bf16 %v2821_v51, %v2816_v42  ;;  %v7912_v5 = vpack.c.bf16 %v2832_v13, %v2827_v43  ;;  %v2838_v51 = vld [vmem:[#allocation5 + $0x26d0] sm:$0xff]  ;;  %v2847_v43 = vld [vmem:[#allocation5 + $0x2718] sm:$0xff]  ;;  %v2849_v13 = vld [vmem:[#allocation5 + $0x2728] sm:$0xff] }
 0x2ba   :  { %7903 = vmatpush1.bf16.msra.mxu0 %v7902_v58  ;;  %8031 = vmatpush1.bf16.msra.mxu1 %v8030_v3  ;;  %v8038_v58 = vpack.c.bf16 %v2823_v15, %v2818_v45  ;;  %v2826_v3 = vld [vmem:[#allocation5 + $0x2670] sm:$0xff]  ;;  %v8044_v45 = vpack.c.bf16 %v2844_v28, %v2839_v59  ;;  %v2843_v15 = vld [vmem:[#allocation5 + $0x26f8] sm:$0xff]  ;;  %v2864_v59 = vld [vmem:[#allocation5 + $0x27a0] sm:$0xff] }
 0x2bb   :  { %7905 = vmatprep.subr.bf16.mxu0 %v7904_v6  ;;  %8033 = vmatprep.subr.bf16.mxu1 %v8032_v11  ;;  %v2831_v6 = vld [vmem:[#allocation5 + $0x2698] sm:$0xff]  ;;  %v2842_v11 = vld [vmem:[#allocation5 + $0x26f0] sm:$0xff] }
 0x2bc   :  { %v7914_v12 = vpack.c.bf16 %v2831_v6, %v2826_v3  ;;  %v7916_v42 = vpack.c.bf16 %v2842_v11, %v2837_v21  ;;  %v2848_v6 = vld [vmem:[#allocation5 + $0x2720] sm:$0xff]  ;;  %v2857_v21 = vld [vmem:[#allocation5 + $0x2768] sm:$0xff]  ;;  %v2859_v11 = vld [vmem:[#allocation5 + $0x2778] sm:$0xff] }
 0x2be   :  { %7907 = vmatpush1.bf16.msra.mxu0 %v7906_v37  ;;  %8035 = vmatpush1.bf16.msra.mxu1 %v8034_v36  ;;  %v8042_v37 = vpack.c.bf16 %v2833_v18, %v2828_v29  ;;  %v2836_v36 = vld [vmem:[#allocation5 + $0x26c0] sm:$0xff]  ;;  %v8048_v29 = vpack.c.bf16 %v2854_v54, %v2849_v13  ;;  %v2853_v18 = vld [vmem:[#allocation5 + $0x2748] sm:$0xff]  ;;  %v2874_v13 = vld [vmem:[#allocation5 + $0x27f0] sm:$0xff] }
 0x2bf   :  { %7909 = vmatprep.subr.bf16.mxu0 %v7908_v19  ;;  %8037 = vmatprep.subr.bf16.mxu1 %v8036_v22  ;;  %v2841_v19 = vld [vmem:[#allocation5 + $0x26e8] sm:$0xff]  ;;  %v2852_v22 = vld [vmem:[#allocation5 + $0x2740] sm:$0xff] }
 0x2c0   :  { %v7918_v0 = vpack.c.bf16 %v2841_v19, %v2836_v36  ;;  %v7920_v3 = vpack.c.bf16 %v2852_v22, %v2847_v43  ;;  %v2858_v19 = vld [vmem:[#allocation5 + $0x2770] sm:$0xff]  ;;  %v2867_v43 = vld [vmem:[#allocation5 + $0x27b8] sm:$0xff]  ;;  %v2869_v22 = vld [vmem:[#allocation5 + $0x27c8] sm:$0xff] }
 0x2c2   :  { %7911 = vmatpush1.bf16.msra.mxu0 %v7910_v16  ;;  %8039 = vmatpush1.bf16.msra.mxu1 %v8038_v58  ;;  %v8046_v16 = vpack.c.bf16 %v2843_v15, %v2838_v51  ;;  %v2846_v58 = vld [vmem:[#allocation5 + $0x2710] sm:$0xff]  ;;  %v8052_v51 = vpack.c.bf16 %v2864_v59, %v2859_v11  ;;  %v2863_v15 = vld [vmem:[#allocation5 + $0x2798] sm:$0xff]  ;;  %v2805_v11 = vld [vmem:[#allocation5 + $0x25c8] sm:$0xff] }
 0x2c3   :  { %7913 = vmatprep.subr.bf16.mxu0 %v7912_v5  ;;  %8041 = vmatprep.subr.bf16.mxu1 %v8040_v23  ;;  %v2851_v5 = vld [vmem:[#allocation5 + $0x2738] sm:$0xff]  ;;  %v2862_v23 = vld [vmem:[#allocation5 + $0x2790] sm:$0xff] }
 0x2c4   :  { %v7922_v28 = vpack.c.bf16 %v2851_v5, %v2846_v58  ;;  %v7924_v36 = vpack.c.bf16 %v2862_v23, %v2857_v21  ;;  %v2868_v5 = vld [vmem:[#allocation5 + $0x27c0] sm:$0xff] }
 0x2c5   :  { %v2640_v21 = vld [vmem:[#allocation5 + $0x20a0] sm:$0xff] }
 0x2c6   :  { %7915 = vmatpush1.bf16.msra.mxu0 %v7914_v12  ;;  %8043 = vmatpush1.bf16.msra.mxu1 %v8042_v37  ;;  %v8050_v12 = vpack.c.bf16 %v2853_v18, %v2848_v6  ;;  %v2856_v37 = vld [vmem:[#allocation5 + $0x2760] sm:$0xff]  ;;  %v8056_v6 = vpack.c.bf16 %v2874_v13, %v2869_v22  ;;  %v2873_v18 = vld [vmem:[#allocation5 + $0x27e8] sm:$0xff]  ;;  %v2810_v22 = vld [vmem:[#allocation5 + $0x25f0] sm:$0xff] }
 0x2c7   :  { %7917 = vmatprep.subr.bf16.mxu0 %v7916_v42  ;;  %8045 = vmatprep.subr.bf16.mxu1 %v8044_v45  ;;  %v2861_v42 = vld [vmem:[#allocation5 + $0x2788] sm:$0xff]  ;;  %v2872_v45 = vld [vmem:[#allocation5 + $0x27e0] sm:$0xff]  ;;  %v2815_v13 = vld [vmem:[#allocation5 + $0x2618] sm:$0xff] }
 0x2c8   :  { %v7926_v54 = vpack.c.bf16 %v2861_v42, %v2856_v37  ;;  %v7928_v58 = vpack.c.bf16 %v2872_v45, %v2867_v43  ;;  %v2800_v23 = vld [vmem:[#allocation5 + $0x25a0] sm:$0xff]  ;;  %v2650_v43 = vld [vmem:[#allocation5 + $0x20f0] sm:$0xff] }
 0x2c9   :  { %v8092_v42 = vpack.c.bf16 %v2805_v11, %v2800_v23  ;;  %v2820_v23 = vld [vmem:[#allocation5 + $0x2640] sm:$0xff]  ;;  %v2825_v11 = vld [vmem:[#allocation5 + $0x2668] sm:$0xff] }
 0x2ca   :  { %7919 = vmatpush1.bf16.msra.mxu0 %v7918_v0  ;;  %8047 = vmatpush1.bf16.msra.mxu1 %v8046_v16  ;;  %v8054_v0 = vpack.c.bf16 %v2863_v15, %v2858_v19  ;;  %v2866_v16 = vld [vmem:[#allocation5 + $0x27b0] sm:$0xff]  ;;  %v2720_v19 = vld [vmem:[#allocation5 + $0x2320] sm:$0xff]  ;;  %v2725_v15 = vld [vmem:[#allocation5 + $0x2348] sm:$0xff] }
 0x2cb   :  { %7921 = vmatprep.subr.bf16.mxu0 %v7920_v3  ;;  %8049 = vmatprep.subr.bf16.mxu1 %v8048_v29  ;;  %v2871_v3 = vld [vmem:[#allocation5 + $0x27d8] sm:$0xff]  ;;  %v2645_v29 = vld [vmem:[#allocation5 + $0x20c8] sm:$0xff] }
 0x2cc   :  { %v7930_v59 = vpack.c.bf16 %v2871_v3, %v2866_v16  ;;  %v8060_v37 = vpack.c.bf16 %v2645_v29, %v2640_v21  ;;  %v2570_v16 = vld [vmem:[#allocation5 + $0x1e70] sm:$0xff]  ;;  %v8096_v29 = vpack.c.bf16 %v2815_v13, %v2810_v22  ;;  %v2675_v22 = vld [vmem:[#allocation5 + $0x21b8] sm:$0xff] }
 0x2cd   :  { %v9587_v21 = vld [vmem:[#allocation3 + $0x10] sm:$0xff] }
 0x2ce   :  { %7923 = vmatpush1.bf16.msra.mxu0 %v7922_v28  ;;  %8051 = vmatpush1.bf16.msra.mxu1 %v8050_v12  ;;  %v8058_v28 = vpack.c.bf16 %v2873_v18, %v2868_v5  ;;  %v2560_v12 = vld [vmem:[#allocation5 + $0x1e20] sm:$0xff]  ;;  %v2735_v5 = vld [vmem:[#allocation5 + $0x2398] sm:$0xff]  ;;  %v9595_v13 = vld [vmem:[#allocation3 + $0x30] sm:$0xff] }
 0x2cf   :  { %7925 = vmatprep.subr.bf16.mxu0 %v7924_v36  ;;  %8053 = vmatprep.subr.bf16.mxu1 %v8052_v51  ;;  %v2565_v36 = vld [vmem:[#allocation5 + $0x1e48] sm:$0xff]  ;;  %v2655_v51 = vld [vmem:[#allocation5 + $0x2118] sm:$0xff]  ;;  %v2660_v18 = vld [vmem:[#allocation5 + $0x2140] sm:$0xff] }
 0x2d0   :  { %v8062_v45 = vpack.c.bf16 %v2565_v36, %v2560_v12  ;;  %v8064_v3 = vpack.c.bf16 %v2655_v51, %v2650_v43  ;;  %v2580_v36 = vld [vmem:[#allocation5 + $0x1ec0] sm:$0xff]  ;;  %v2745_v43 = vld [vmem:[#allocation5 + $0x23e8] sm:$0xff]  ;;  %v2670_v51 = vld [vmem:[#allocation5 + $0x2190] sm:$0xff] }
 0x2d2   :  { %7927 = vmatpush1.bf16.msra.mxu0 %v7926_v54  ;;  %8055 = vmatpush1.bf16.msra.mxu1 %v8054_v0  ;;  %v8094_v54 = vpack.c.bf16 %v2725_v15, %v2720_v19  ;;  %v2575_v0 = vld [vmem:[#allocation5 + $0x1e98] sm:$0xff]  ;;  %v2740_v19 = vld [vmem:[#allocation5 + $0x23c0] sm:$0xff]  ;;  %v8100_v15 = vpack.c.bf16 %v2825_v11, %v2820_v23 }
 0x2d3   :  { %7929 = vmatprep.subr.bf16.mxu0 %v7928_v58  ;;  %8057 = vmatprep.subr.bf16.mxu1 %v8056_v6  ;;  %v2730_v58 = vld [vmem:[#allocation5 + $0x2370] sm:$0xff]  ;;  %v2665_v6 = vld [vmem:[#allocation5 + $0x2168] sm:$0xff]  ;;  %v2755_v23 = vld [vmem:[#allocation5 + $0x2438] sm:$0xff] }
 0x2d4   :  { %v8068_v12 = vpack.c.bf16 %v2665_v6, %v2660_v18  ;;  %v2750_v18 = vld [vmem:[#allocation5 + $0x2410] sm:$0xff]  ;;  %v2680_v11 = vld [vmem:[#allocation5 + $0x21e0] sm:$0xff] }
 0x2d6   :  { %7931 = vmatpush1.bf16.msra.mxu0 %v7930_v59  ;;  %8059 = vmatpush1.bf16.msra.mxu1 %v8058_v28  ;;  %v8066_v59 = vpack.c.bf16 %v2575_v0, %v2570_v16  ;;  %v9591_v28 = vld [vmem:[#allocation3 + $0x38] sm:$0xff]  ;;  %v8102_v0 = vpack.c.bf16 %v2745_v43, %v2740_v19  ;;  %v2760_v19 = vld [vmem:[#allocation5 + $0x2460] sm:$0xff]  ;;  %v2765_v43 = vld [vmem:[#allocation5 + $0x2488] sm:$0xff] }
 0x2d7   :  { %8061 = vmatprep.subr.bf16.mxu0 %v8060_v37  ;;  %8093 = vmatprep.subr.bf16.mxu1 %v8092_v42  ;;  %v8098_v37 = vpack.c.bf16 %v2735_v5, %v2730_v58  ;;  %v2585_v42 = vld [vmem:[#allocation5 + $0x1ee8] sm:$0xff]  ;;  %v8072_v58 = vpack.c.bf16 %v2675_v22, %v2670_v51  ;;  %v2595_v5 = vld [vmem:[#allocation5 + $0x1f38] sm:$0xff]  ;;  %v2690_v51 = vld [vmem:[#allocation5 + $0x2230] sm:$0xff] }
 0x2d8   :  { %v8070_v16 = vpack.c.bf16 %v2585_v42, %v2580_v36  ;;  %v2600_v36 = vld [vmem:[#allocation5 + $0x1f60] sm:$0xff]  ;;  %v2605_v42 = vld [vmem:[#allocation5 + $0x1f88] sm:$0xff]  ;;  %v2695_v22 = vld [vmem:[#allocation5 + $0x2258] sm:$0xff] }
 0x2d9   :  { %3046 = vmatmul.mubr.f32.vlgmr.msra.gmra.mrb[24].mxu0 %v9587_v21  ;;  %3200 = vmatmul.mubr.f32.vlgmr.msra.gmra.mrb[24].mxu1 %v9587_v21  ;;  %v8078_v27 = vpack.c.bf16 %v2605_v42, %v2600_v36  ;;  %v2780_v36 = vld [vmem:[#allocation5 + $0x2500] sm:$0xff] }
 0x2da   :  { %8063 = vmatpush3.bf16.msra.mxu0 %v8062_v45  ;;  %8095 = vmatpush3.bf16.msra.mxu1 %v8094_v54  ;;  %v2830_v45 = vld [vmem:[#allocation5 + $0x2690] sm:$0xff]  ;;  %v2835_v54 = vld [vmem:[#allocation5 + $0x26b8] sm:$0xff] }
 0x2db   :  { %3051 = vmatprep.mubr.f32.mxu0 %v9591_v28  ;;  %3205 = vmatprep.mubr.f32.mxu1 %v9591_v28  ;;  %v8104_v6 = vpack.c.bf16 %v2835_v54, %v2830_v45  ;;  %v2850_v45 = vld [vmem:[#allocation5 + $0x2730] sm:$0xff]  ;;  %v2855_v54 = vld [vmem:[#allocation5 + $0x2758] sm:$0xff] }
 0x2dc   :  { %8065 = vmatprep.subr.bf16.mxu0 %v8064_v3  ;;  %8097 = vmatprep.subr.bf16.mxu1 %v8096_v29  ;;  %v2590_v3 = vld [vmem:[#allocation5 + $0x1f10] sm:$0xff]  ;;  %v2840_v29 = vld [vmem:[#allocation5 + $0x26e0] sm:$0xff] }
 0x2dd   :  { %3052 = vmatmul.mubr.f32.gmra.mrb[26].mxu0 %v9595_v13  ;;  %3206 = vmatmul.mubr.f32.gmra.mrb[26].mxu1 %v9595_v13 }
 0x2de   :  { %8067 = vmatpush3.bf16.msra.mxu0 %v8066_v59  ;;  %8099 = vmatpush3.bf16.msra.mxu1 %v8098_v37  ;;  %v8074_v59 = vpack.c.bf16 %v2595_v5, %v2590_v3  ;;  %v8106_v37 = vpack.c.bf16 %v2755_v23, %v2750_v18  ;;  %v2770_v3 = vld [vmem:[#allocation5 + $0x24b0] sm:$0xff]  ;;  %v2775_v5 = vld [vmem:[#allocation5 + $0x24d8] sm:$0xff]  ;;  %v2700_v18 = vld [vmem:[#allocation5 + $0x2280] sm:$0xff] }
 0x2df   :  { %8069 = vmatprep.subr.bf16.mxu0 %v8068_v12  ;;  %8101 = vmatprep.subr.bf16.mxu1 %v8100_v15  ;;  %v8076_v12 = vpack.c.bf16 %v2685_v52, %v2680_v11  ;;  %v8108_v15 = vpack.c.bf16 %v2845_v62, %v2840_v29  ;;  %v8112_v52 = vpack.c.bf16 %v2855_v54, %v2850_v45  ;;  %v2860_v62 = vld [vmem:[#allocation5 + $0x2780] sm:$0xff]  ;;  %v2865_v23 = vld [vmem:[#allocation5 + $0x27a8] sm:$0xff] }
 0x2e0   :  { %3276 = vmatprep.mubr.f32.mxu0 %v9599_v57  ;;  %3351 = vmatprep.mubr.f32.mxu1 %v9583_v32  ;;  %v8110_v32 = vpack.c.bf16 %v2765_v43, %v2760_v19  ;;  %v8114_v29 = vpack.c.bf16 %v2775_v5, %v2770_v3  ;;  %v8116_v42 = vpack.c.bf16 %v2865_v23, %v2860_v62  ;;  %v2785_v19 = vld [vmem:[#allocation5 + $0x2528] sm:$0xff]  ;;  %v2710_v43 = vld [vmem:[#allocation5 + $0x22d0] sm:$0xff]  ;;  %v2795_v3 = vld [vmem:[#allocation5 + $0x2578] sm:$0xff] }
 0x2e1   :  { %v3374_v5 = vld [vmem:[#allocation5 + $0x2808] sm:$0xff] }
 0x2e2   :  { %8071 = vmatpush3.bf16.msra.mxu0 %v8070_v16  ;;  %8103 = vmatpush3.bf16.msra.mxu1 %v8102_v0  ;;  %v8080_v16 = vpack.c.bf16 %v2695_v22, %v2690_v51  ;;  %v2610_v0 = vld [vmem:[#allocation5 + $0x1fb0] sm:$0xff]  ;;  %v2875_v22 = vld [vmem:[#allocation5 + $0x27f8] sm:$0xff] }
 0x2e3   :  { %8073 = vmatprep.subr.bf16.mxu0 %v8072_v58  ;;  %8105 = vmatprep.subr.bf16.mxu1 %v8104_v6  ;;  %v2615_v58 = vld [vmem:[#allocation5 + $0x1fd8] sm:$0xff]  ;;  %v2705_v6 = vld [vmem:[#allocation5 + $0x22a8] sm:$0xff]  ;;  %v2870_v51 = vld [vmem:[#allocation5 + $0x27d0] sm:$0xff] }
 0x2e4   :  { %v8082_v11 = vpack.c.bf16 %v2615_v58, %v2610_v0  ;;  %v2790_v0 = vld [vmem:[#allocation5 + $0x2550] sm:$0xff]  ;;  %v8120_v58 = vpack.c.bf16 %v2875_v22, %v2870_v51 }
 0x2e5   :  { %v8122_v23 = vpack.c.bf16 %v2795_v3, %v2790_v0  ;;  %v3390_v0 = vld [vmem:[#allocation5 + $0x2888] sm:$0xff]  ;;  %v3399_v3 = vld [vmem:[#allocation5 + $0x28d0] sm:$0xff] }
 0x2e6   :  { %8075 = vmatpush3.bf16.msra.mxu0 %v8074_v59  ;;  %8107 = vmatpush3.bf16.msra.mxu1 %v8106_v37  ;;  %v8084_v59 = vpack.c.bf16 %v2705_v6, %v2700_v18  ;;  %v2620_v37 = vld [vmem:[#allocation5 + $0x2000] sm:$0xff]  ;;  %v3376_v18 = vld [vmem:[#allocation5 + $0x2818] sm:$0xff] }
 0x2e7   :  { %8077 = vmatprep.subr.bf16.mxu0 %v8076_v12  ;;  %8109 = vmatprep.subr.bf16.mxu1 %v8108_v15  ;;  %v2625_v12 = vld [vmem:[#allocation5 + $0x2028] sm:$0xff]  ;;  %v2715_v15 = vld [vmem:[#allocation5 + $0x22f8] sm:$0xff]  ;;  %v3381_v6 = vld [vmem:[#allocation5 + $0x2840] sm:$0xff] }
 0x2e8   :  { %v8086_v45 = vpack.c.bf16 %v2625_v12, %v2620_v37  ;;  %v8088_v54 = vpack.c.bf16 %v2715_v15, %v2710_v43  ;;  %v8252_v37 = vpack.c.bf16 %v3381_v6, %v3376_v18  ;;  %v3375_v12 = vld [vmem:[#allocation5 + $0x2810] sm:$0xff]  ;;  %v3386_v43 = vld [vmem:[#allocation5 + $0x2868] sm:$0xff] }
 0x2e9   :  { %v3391_v15 = vld [vmem:[#allocation5 + $0x2890] sm:$0xff] }
 0x2ea   :  { %8079 = vmatpush3.bf16.msra.mxu0 %v8078_v27  ;;  %8111 = vmatpush3.bf16.msra.mxu1 %v8110_v32  ;;  %v8118_v27 = vpack.c.bf16 %v2785_v19, %v2780_v36  ;;  %v2630_v32 = vld [vmem:[#allocation5 + $0x2050] sm:$0xff]  ;;  %v3380_v36 = vld [vmem:[#allocation5 + $0x2838] sm:$0xff] }
 0x2eb   :  { %8081 = vmatprep.subr.bf16.mxu0 %v8080_v16  ;;  %8113 = vmatprep.subr.bf16.mxu1 %v8112_v52  ;;  %v2635_v16 = vld [vmem:[#allocation5 + $0x2078] sm:$0xff]  ;;  %v3379_v52 = vld [vmem:[#allocation5 + $0x2830] sm:$0xff]  ;;  %v8254_v22 = vpack.c.bf16 %v3380_v36, %v3375_v12 }
 0x2ec   :  { %v8090_v62 = vpack.c.bf16 %v2635_v16, %v2630_v32  ;;  %v3384_v19 = vld [vmem:[#allocation5 + $0x2858] sm:$0xff]  ;;  %v8256_v16 = vpack.c.bf16 %v3391_v15, %v3386_v43  ;;  %v3411_v36 = vld [vmem:[#allocation5 + $0x2930] sm:$0xff] }
 0x2ed   :  { %v3404_v12 = vld [vmem:[#allocation5 + $0x28f8] sm:$0xff]  ;;  %v3403_v43 = vld [vmem:[#allocation5 + $0x28f0] sm:$0xff] }
 0x2ee   :  { %8083 = vmatpush3.bf16.msra.mxu0 %v8082_v11  ;;  %8115 = vmatpush3.bf16.msra.mxu1 %v8114_v29  ;;  %v8124_v11 = vpack.c.bf16 %v3379_v52, %v3374_v5  ;;  %v3373_v29 = vld [vmem:[#allocation5 + $0x2800] sm:$0xff]  ;;  %v3396_v5 = vld [vmem:[#allocation5 + $0x28b8] sm:$0xff] }
 0x2ef   :  { %8085 = vmatprep.subr.bf16.mxu0 %v8084_v59  ;;  %8117 = vmatprep.subr.bf16.mxu1 %v8116_v42  ;;  %v3378_v59 = vld [vmem:[#allocation5 + $0x2828] sm:$0xff]  ;;  %v3389_v42 = vld [vmem:[#allocation5 + $0x2880] sm:$0xff]  ;;  %v3408_v15 = vld [vmem:[#allocation5 + $0x2918] sm:$0xff] }
 0x2f0   :  { %v8126_v51 = vpack.c.bf16 %v3378_v59, %v3373_v29  ;;  %v8128_v32 = vpack.c.bf16 %v3389_v42, %v3384_v19  ;;  %v3401_v52 = vld [vmem:[#allocation5 + $0x28e0] sm:$0xff]  ;;  %v3395_v29 = vld [vmem:[#allocation5 + $0x28b0] sm:$0xff] }
 0x2f1   :  { %v8260_v59 = vpack.c.bf16 %v3401_v52, %v3396_v5  ;;  %v3420_v52 = vld [vmem:[#allocation5 + $0x2978] sm:$0xff] }
 0x2f2   :  { %8087 = vmatpush3.bf16.msra.mxu0 %v8086_v45  ;;  %8119 = vmatpush3.bf16.msra.mxu1 %v8118_v27  ;;  %v3383_v45 = vld [vmem:[#allocation5 + $0x2850] sm:$0xff]  ;;  %v3388_v27 = vld [vmem:[#allocation5 + $0x2878] sm:$0xff] }
 0x2f3   :  { %8089 = vmatprep.subr.bf16.mxu0 %v8088_v54  ;;  %8121 = vmatprep.subr.bf16.mxu1 %v8120_v58  ;;  %v3385_v54 = vld [vmem:[#allocation5 + $0x2860] sm:$0xff]  ;;  %v3394_v58 = vld [vmem:[#allocation5 + $0x28a8] sm:$0xff]  ;;  %v8130_v18 = vpack.c.bf16 %v3388_v27, %v3383_v45 }
 0x2f4   :  { %v8258_v6 = vpack.c.bf16 %v3390_v0, %v3385_v54  ;;  %v3410_v45 = vld [vmem:[#allocation5 + $0x2928] sm:$0xff]  ;;  %v3421_v54 = vld [vmem:[#allocation5 + $0x2980] sm:$0xff] }
 0x2f5   :  { %v3414_v27 = vld [vmem:[#allocation5 + $0x2948] sm:$0xff]  ;;  %v3413_v0 = vld [vmem:[#allocation5 + $0x2940] sm:$0xff] }
 0x2f6   :  { %8091 = vmatpush3.bf16.msra.mxu0 %v8090_v62  ;;  %8123 = vmatpush3.bf16.msra.mxu1 %v8122_v23  ;;  %v8132_v62 = vpack.c.bf16 %v3399_v3, %v3394_v58  ;;  %v3393_v23 = vld [vmem:[#allocation5 + $0x28a0] sm:$0xff]  ;;  %v3418_v58 = vld [vmem:[#allocation5 + $0x2968] sm:$0xff]  ;;  %v3415_v3 = vld [vmem:[#allocation5 + $0x2950] sm:$0xff] }
 0x2f7   :  { %8125 = vmatprep.subr.bf16.mxu0 %v8124_v11  ;;  %8253 = vmatprep.subr.bf16.mxu1 %v8252_v37  ;;  %v3398_v11 = vld [vmem:[#allocation5 + $0x28c8] sm:$0xff]  ;;  %v3400_v37 = vld [vmem:[#allocation5 + $0x28d8] sm:$0xff] }
 0x2f8   :  { %v8262_v19 = vpack.c.bf16 %v3400_v37, %v3395_v29  ;;  %v9611_v29 = vld [vmem:[#allocation7 + $0xa] sm:$0x1f]  ;;  %v3423_v37 = vld [vmem:[#allocation5 + $0x2990] sm:$0xff] }
 0x2f9   :  { %3277 = vmatmul.mubr.f32.vlgmr.msra.gmra.mrb[28].mxu0 %v9571_v41  ;;  %3352 = vmatmul.mubr.f32.vlgmr.msra.gmra.mrb[28].mxu1 %v9587_v21  ;;  %v3409_v41 = vld [vmem:[#allocation5 + $0x2920] sm:$0xff]  ;;  %v3406_v21 = vld [vmem:[#allocation5 + $0x2908] sm:$0xff] }
 0x2fa   :  { %8127 = vmatpush1.bf16.msra.mxu0 %v8126_v51  ;;  %8255 = vmatpush1.bf16.msra.mxu1 %v8254_v22  ;;  %v8136_v42 = vpack.c.bf16 %v3409_v41, %v3404_v12  ;;  %v3405_v51 = vld [vmem:[#allocation5 + $0x2900] sm:$0xff]  ;;  %v8264_v22 = vpack.c.bf16 %v3411_v36, %v3406_v21  ;;  %v3428_v12 = vld [vmem:[#allocation5 + $0x29b8] sm:$0xff]  ;;  %v3430_v36 = vld [vmem:[#allocation5 + $0x29c8] sm:$0xff] }
 0x2fb   :  { %3281 = vmatprep.mubr.f32.mxu0 %v9575_v2  ;;  %8129 = vmatprep.subr.bf16.mxu0 %v8128_v32  ;;  %v8134_v2 = vpack.c.bf16 %v3398_v11, %v3393_v23  ;;  %v8266_v32 = vpack.c.bf16 %v3410_v45, %v3405_v51  ;;  %v3431_v23 = vld [vmem:[#allocation5 + $0x29d0] sm:$0xff]  ;;  %v8142_v11 = vpack.c.bf16 %v3418_v58, %v3413_v0  ;;  %v3425_v41 = vld [vmem:[#allocation5 + $0x29a0] sm:$0xff] }
 0x2fc   :  { %8257 = vmatprep.subr.bf16.mxu1 %v8256_v16  ;;  %3356 = vmatprep.mubr.f32.mxu1 %v9591_v28  ;;  %v3416_v28 = vld [vmem:[#allocation5 + $0x2958] sm:$0xff]  ;;  %v2073_v51 = vrot.slane %v9611_v29, %v9483_v50  ;;  %v8146_v45 = vpack.c.bf16 %v3428_v12, %v3423_v37 }
 0x2fd   :  { %3282 = vmatmul.mubr.f32.gmra.mrb[30].mxu0 %v9579_v10  ;;  %3357 = vmatmul.mubr.f32.gmra.mrb[30].mxu1 %v9595_v13  ;;  %v3419_v10 = vld [vmem:[#allocation5 + $0x2970] sm:$0xff]  ;;  %v8138_v13 = vpack.c.bf16 %v3408_v15, %v3403_v43  ;;  %v8268_v5 = vpack.c.bf16 %v3421_v54, %v3416_v28  ;;  %v3436_v43 = vld [vmem:[#allocation5 + $0x29f8] sm:$0xff]  ;;  %v3441_v15 = vld [vmem:[#allocation5 + $0x2a20] sm:$0xff]  ;;  %v8274_v28 = vpack.c.bf16 %v3430_v36, %v3425_v41 }
 0x2fe   :  { %8131 = vmatpush1.bf16.msra.mxu0 %v8130_v18  ;;  %8259 = vmatpush1.bf16.msra.mxu1 %v8258_v6  ;;  %v8140_v16 = vpack.c.bf16 %v3419_v10, %v3414_v27  ;;  %v3424_v18 = vld [vmem:[#allocation5 + $0x2998] sm:$0xff]  ;;  %v3429_v6 = vld [vmem:[#allocation5 + $0x29c0] sm:$0xff]  ;;  %v2077_v10 = vrot.slane %v9611_v29, %v9489_v56  ;;  %v8276_v58 = vpack.c.bf16 %v3441_v15, %v3436_v43  ;;  %v3443_v41 = vld [vmem:[#allocation5 + $0x2a30] sm:$0xff] }
 0x2ff   :  { %8133 = vmatprep.subr.bf16.mxu0 %v8132_v62  ;;  %8261 = vmatprep.subr.bf16.mxu1 %v8260_v59  ;;  %v3426_v62 = vld [vmem:[#allocation5 + $0x29a8] sm:$0xff]  ;;  %v8144_v59 = vpack.c.bf16 %v3429_v6, %v3424_v18  ;;  %v3433_v27 = vld [vmem:[#allocation5 + $0x29e0] sm:$0xff] }
 0x300   :  { %3785 = vmatprep.mubr.f32.mxu0 %v9599_v57  ;;  %3939 = vmatprep.mubr.f32.mxu1 %v9599_v57  ;;  %v8270_v57 = vpack.c.bf16 %v3420_v52, %v3415_v3  ;;  %v8272_v21 = vpack.c.bf16 %v3431_v23, %v3426_v62  ;;  %v3444_v3 = vld [vmem:[#allocation5 + $0x2a38] sm:$0xff]  ;;  %v3446_v62 = vld [vmem:[#allocation5 + $0x2a48] sm:$0xff]  ;;  %v3451_v23 = vld [vmem:[#allocation5 + $0x2a70] sm:$0xff] }
 0x301   :  { %v3445_v43 = vld [vmem:[#allocation5 + $0x2a40] sm:$0xff]  ;;  %v3450_v15 = vld [vmem:[#allocation5 + $0x2a68] sm:$0xff]  ;;  %v8280_v44 = vpack.c.bf16 %v3451_v23, %v3446_v62  ;;  %v3471_v62 = vld [vmem:[#allocation5 + $0x2b10] sm:$0xff] }
 0x302   :  { %8135 = vmatpush1.bf16.msra.mxu0 %v8134_v2  ;;  %8263 = vmatpush1.bf16.msra.mxu1 %v8262_v19  ;;  %v3434_v2 = vld [vmem:[#allocation5 + $0x29e8] sm:$0xff]  ;;  %v3439_v19 = vld [vmem:[#allocation5 + $0x2a10] sm:$0xff]  ;;  %v3465_v23 = vld [vmem:[#allocation5 + $0x2ae0] sm:$0xff] }
 0x303   :  { %8137 = vmatprep.subr.bf16.mxu0 %v8136_v42  ;;  %8265 = vmatprep.subr.bf16.mxu1 %v8264_v22  ;;  %v2065_v42 = vrot.slane %v9611_v29, %v9480_v49  ;;  %v2069_v22 = vrot.slane %v9611_v29, %v9486_v55  ;;  %v8148_v54 = vpack.c.bf16 %v3439_v19, %v3434_v2  ;;  %v3448_v19 = vld [vmem:[#allocation5 + $0x2a58] sm:$0xff] }
 0x304   :  { %v8154_v48 = vpack.c.bf16 %v3448_v19, %v3443_v41  ;;  %v3478_v19 = vld [vmem:[#allocation5 + $0x2b48] sm:$0xff] }
 0x306   :  { %8139 = vmatpush1.bf16.msra.mxu0 %v8138_v13  ;;  %8267 = vmatpush1.bf16.msra.mxu1 %v8266_v32  ;;  %v3438_v13 = vld [vmem:[#allocation5 + $0x2a08] sm:$0xff]  ;;  %v3435_v32 = vld [vmem:[#allocation5 + $0x29f0] sm:$0xff] }
 0x307   :  { %8141 = vmatprep.subr.bf16.mxu0 %v8140_v16  ;;  %8269 = vmatprep.subr.bf16.mxu1 %v8268_v5  ;;  %v3440_v16 = vld [vmem:[#allocation5 + $0x2a18] sm:$0xff]  ;;  %v3449_v5 = vld [vmem:[#allocation5 + $0x2a60] sm:$0xff] }
 0x308   :  { %v8278_v12 = vpack.c.bf16 %v3440_v16, %v3435_v32  ;;  %v8152_v2 = vpack.c.bf16 %v3449_v5, %v3444_v3 }
 0x30a   :  { %8143 = vmatpush1.bf16.msra.mxu0 %v8142_v11  ;;  %8271 = vmatpush1.bf16.msra.mxu1 %v8270_v57 }
 0x30b   :  { %8145 = vmatprep.subr.bf16.mxu0 %v8144_v59  ;;  %8273 = vmatprep.subr.bf16.mxu1 %v8272_v21  ;;  %v8150_v59 = vpack.c.bf16 %v3438_v13, %v3433_v27  ;;  %v3459_v27 = vld [vmem:[#allocation5 + $0x2ab0] sm:$0xff] }
 0x30c   :  { %v2230_v0 = vpop.f32.mrb[16].mxu0  ;;  %v2384_v18 = vpop.f32.mrb[16].mxu1 }
 0x30d   :  { %v8940_v52 = vadd.f32 %v2230_v0, %v2065_v42  ;;  %v2232_v6 = vpop.f32.mrb[17].mxu0  ;;  %v8944_v11 = vadd.f32 %v2384_v18, %v2073_v51  ;;  %v2386_v37 = vpop.f32.mrb[17].mxu1 }
 0x30e   :  { %v8941_v57 = vadd.f32 %v2232_v6, %v2069_v22  ;;  %8147 = vmatpush1.bf16.msra.mxu0 %v8146_v45  ;;  %v8945_v21 = vadd.f32 %v2386_v37, %v2077_v10  ;;  %8275 = vmatpush1.bf16.msra.mxu1 %v8274_v28  ;;  %v3466_v6 = vld [vmem:[#allocation5 + $0x2ae8] sm:$0xff] }
 0x30f   :  { %v9624_v36 = vmax.f32 %v1728_v20, %v8940_v52  ;;  %8149 = vmatprep.subr.bf16.mxu0 %v8148_v54  ;;  %v9629_v0 = vmax.f32 %v1730_v60, %v8944_v11  ;;  %8277 = vmatprep.subr.bf16.mxu1 %v8276_v58  ;;  %v3454_v20 = vld [vmem:[#allocation5 + $0x2a88] sm:$0xff]  ;;  %v3461_v60 = vld [vmem:[#allocation5 + $0x2ac0] sm:$0xff]  ;;  %v9887_v52 = vmax.f32 %v9541_v9, %v9553_v47 }
 0x310   :  { %v9634_v45 = vmax.f32 %v1729_v1, %v8941_v57  ;;  %v2236_v38 = vpop.f32.mrb[18].mxu0  ;;  %v9639_v28 = vmax.f32 %v1731_v31, %v8945_v21  ;;  %v2390_v13 = vpop.f32.mrb[18].mxu1  ;;  %v8282_v1 = vpack.c.bf16 %v3450_v15, %v3445_v43  ;;  %v8156_v14 = vpack.c.bf16 %v3459_v27, %v3454_v20  ;;  %v3458_v31 = vld [vmem:[#allocation5 + $0x2aa8] sm:$0xff]  ;;  %v3481_v9 = vld [vmem:[#allocation5 + $0x2b60] sm:$0xff]  ;;  %v3475_v43 = vld [vmem:[#allocation5 + $0x2b30] sm:$0xff] }
 0x311   :  { %v8942_v54 = vadd.f32 %v2236_v38, %v2065_v42  ;;  %v2238_v39 = vpop.f32.mrb[19].mxu0  ;;  %v8946_v32 = vadd.f32 %v2390_v13, %v2073_v51  ;;  %v2392_v4 = vpop.f32.mrb[19].mxu1  ;;  %v3455_v42 = vld [vmem:[#allocation5 + $0x2a90] sm:$0xff]  ;;  %v8284_v17 = vpack.c.bf16 %v3461_v60, %v3456_v33  ;;  %v8158_v61 = vpack.c.bf16 %v3458_v31, %v3453_v26  ;;  %v3470_v57 = vld [vmem:[#allocation5 + $0x2b08] sm:$0xff]  ;;  %v3480_v38 = vld [vmem:[#allocation5 + $0x2b58] sm:$0xff] }
 0x312   :  { %v8943_v16 = vadd.f32 %v2238_v39, %v2069_v22  ;;  %8151 = vmatpush1.bf16.msra.mxu0 %v8150_v59  ;;  %v8947_v3 = vadd.f32 %v2392_v4, %v2077_v10  ;;  %8279 = vmatpush1.bf16.msra.mxu1 %v8278_v12  ;;  %v9886_v22 = vmax.f32 %v9538_v40, %v9549_v63  ;;  %v3469_v10 = vld [vmem:[#allocation5 + $0x2b00] sm:$0xff]  ;;  %v3463_v63 = vld [vmem:[#allocation5 + $0x2ad0] sm:$0xff]  ;;  %v3474_v37 = vld [vmem:[#allocation5 + $0x2b28] sm:$0xff] }
 0x313   :  { %v9644_v58 = vmax.f32 %v1733_v35, %v8942_v54  ;;  %8153 = vmatprep.subr.bf16.mxu0 %v8152_v2  ;;  %v9649_v51 = vmax.f32 %v1735_v25, %v8946_v32  ;;  %8281 = vmatprep.subr.bf16.mxu1 %v8280_v44  ;;  %v3464_v35 = vld [vmem:[#allocation5 + $0x2ad8] sm:$0xff]  ;;  %v8286_v30 = vpack.c.bf16 %v3460_v7, %v3455_v42  ;;  %v3479_v59 = vld [vmem:[#allocation5 + $0x2b50] sm:$0xff]  ;;  %v3473_v2 = vld [vmem:[#allocation5 + $0x2b20] sm:$0xff] }
 0x314   :  { %v9654_v5 = vmax.f32 %v9886_v22, %v8943_v16  ;;  %v9659_v18 = vmax.f32 %v9887_v52, %v8947_v3  ;;  %v8160_v40 = vpack.c.bf16 %v3469_v10, %v3464_v35  ;;  %v3468_v25 = vld [vmem:[#allocation5 + $0x2af8] sm:$0xff]  ;;  %v8288_v11 = vpack.c.bf16 %v3471_v62, %v3466_v6  ;;  %v3489_v20 = vld [vmem:[#allocation5 + $0x2ba0] sm:$0xff]  ;;  %v3486_v27 = vld [vmem:[#allocation5 + $0x2b88] sm:$0xff] }
 0x315   :  { %v3476_v12 = vld [vmem:[#allocation5 + $0x2b38] sm:$0xff]  ;;  %v8162_v47 = vpack.c.bf16 %v3468_v25, %v3463_v63  ;;  %v8290_v41 = vpack.c.bf16 %v3470_v57, %v3465_v23  ;;  %v8164_v21 = vpack.c.bf16 %v3479_v59, %v3474_v37  ;;  %v3491_v54 = vld [vmem:[#allocation5 + $0x2bb0] sm:$0xff]  ;;  %v8166_v13 = vpack.c.bf16 %v3478_v19, %v3473_v2  ;;  %v3485_v16 = vld [vmem:[#allocation5 + $0x2b80] sm:$0xff] }
 0x316   :  { %8155 = vmatpush1.bf16.msra.mxu0 %v8154_v48  ;;  %8283 = vmatpush1.bf16.msra.mxu1 %v8282_v1  ;;  %v8292_v15 = vpack.c.bf16 %v3481_v9, %v3476_v12  ;;  %v3484_v44 = vld [vmem:[#allocation5 + $0x2b78] sm:$0xff]  ;;  %v8294_v39 = vpack.c.bf16 %v3480_v38, %v3475_v43  ;;  %v3483_v60 = vld [vmem:[#allocation5 + $0x2b70] sm:$0xff]  ;;  %v8296_v4 = vpack.c.bf16 %v3491_v54, %v3486_v27  ;;  %v3490_v48 = vld [vmem:[#allocation5 + $0x2ba8] sm:$0xff] }
 0x317   :  { %8157 = vmatprep.subr.bf16.mxu0 %v8156_v14  ;;  %8285 = vmatprep.subr.bf16.mxu1 %v8284_v17  ;;  %v8168_v33 = vpack.c.bf16 %v3489_v20, %v3484_v44  ;;  %v3488_v32 = vld [vmem:[#allocation5 + $0x2b98] sm:$0xff]  ;;  %v3494_v1 = vld [vmem:[#allocation5 + $0x2bc8] sm:$0xff]  ;;  %v3499_v3 = vld [vmem:[#allocation5 + $0x2bf0] sm:$0xff]  ;;  %v8298_v42 = vpack.c.bf16 %v3490_v48, %v3485_v16  ;;  %v2081_v20 = vrot.slane %v9611_v29, %v9432_v46 }
 0x318   :  { %v3496_v14 = vld [vmem:[#allocation5 + $0x2bd8] sm:$0xff]  ;;  %v3501_v26 = vld [vmem:[#allocation5 + $0x2c00] sm:$0xff]  ;;  %v8170_v31 = vpack.c.bf16 %v3488_v32, %v3483_v60  ;;  %v8172_v22 = vpack.c.bf16 %v3499_v3, %v3494_v1  ;;  %v3498_v7 = vld [vmem:[#allocation5 + $0x2be8] sm:$0xff] }
 0x319   :  { %v3493_v17 = vld [vmem:[#allocation5 + $0x2bc0] sm:$0xff]  ;;  %v3495_v35 = vld [vmem:[#allocation5 + $0x2bd0] sm:$0xff]  ;;  %v8300_v10 = vpack.c.bf16 %v3501_v26, %v3496_v14  ;;  %v3500_v52 = vld [vmem:[#allocation5 + $0x2bf8] sm:$0xff] }
 0x31a   :  { %8159 = vmatpush1.bf16.msra.mxu0 %v8158_v61  ;;  %8287 = vmatpush1.bf16.msra.mxu1 %v8286_v30  ;;  %v3504_v6 = vld [vmem:[#allocation5 + $0x2c18] sm:$0xff]  ;;  %v3509_v62 = vld [vmem:[#allocation5 + $0x2c40] sm:$0xff]  ;;  %v3506_v61 = vld [vmem:[#allocation5 + $0x2c28] sm:$0xff]  ;;  %v8302_v63 = vpack.c.bf16 %v3500_v52, %v3495_v35 }
 0x31b   :  { %8161 = vmatprep.subr.bf16.mxu0 %v8160_v40  ;;  %8289 = vmatprep.subr.bf16.mxu1 %v8288_v11  ;;  %v3511_v30 = vld [vmem:[#allocation5 + $0x2c50] sm:$0xff]  ;;  %v8174_v40 = vpack.c.bf16 %v3498_v7, %v3493_v17  ;;  %v8176_v25 = vpack.c.bf16 %v3509_v62, %v3504_v6  ;;  %v3508_v11 = vld [vmem:[#allocation5 + $0x2c38] sm:$0xff]  ;;  %v3505_v57 = vld [vmem:[#allocation5 + $0x2c20] sm:$0xff] }
 0x31c   :  { %v3503_v23 = vld [vmem:[#allocation5 + $0x2c10] sm:$0xff]  ;;  %v8304_v37 = vpack.c.bf16 %v3511_v30, %v3506_v61  ;;  %v3510_v59 = vld [vmem:[#allocation5 + $0x2c48] sm:$0xff]  ;;  %v3513_v43 = vld [vmem:[#allocation5 + $0x2c60] sm:$0xff] }
 0x31d   :  { %v3514_v12 = vld [vmem:[#allocation5 + $0x2c68] sm:$0xff]  ;;  %v3519_v9 = vld [vmem:[#allocation5 + $0x2c90] sm:$0xff]  ;;  %v8306_v2 = vpack.c.bf16 %v3510_v59, %v3505_v57  ;;  %v3520_v54 = vld [vmem:[#allocation5 + $0x2c98] sm:$0xff] }
 0x31e   :  { %8163 = vmatpush1.bf16.msra.mxu0 %v8162_v47  ;;  %8291 = vmatpush1.bf16.msra.mxu1 %v8290_v41  ;;  %v3516_v47 = vld [vmem:[#allocation5 + $0x2c78] sm:$0xff]  ;;  %v3521_v41 = vld [vmem:[#allocation5 + $0x2ca0] sm:$0xff]  ;;  %v8180_v19 = vpack.c.bf16 %v3519_v9, %v3514_v12  ;;  %v3515_v38 = vld [vmem:[#allocation5 + $0x2c70] sm:$0xff] }
 0x31f   :  { %8165 = vmatprep.subr.bf16.mxu0 %v8164_v21  ;;  %8293 = vmatprep.subr.bf16.mxu1 %v8292_v15  ;;  %v8178_v21 = vpack.c.bf16 %v3508_v11, %v3503_v23  ;;  %v3518_v15 = vld [vmem:[#allocation5 + $0x2c88] sm:$0xff]  ;;  %v8308_v27 = vpack.c.bf16 %v3521_v41, %v3516_v47  ;;  %v3531_v16 = vld [vmem:[#allocation5 + $0x2cf0] sm:$0xff]  ;;  %v8310_v14 = vpack.c.bf16 %v3520_v54, %v3515_v38  ;;  %v3528_v29 = vld [vmem:[#allocation5 + $0x2cd8] sm:$0xff] }
 0x320   :  { %v3526_v32 = vld [vmem:[#allocation5 + $0x2cc8] sm:$0xff]  ;;  %v8182_v1 = vpack.c.bf16 %v3518_v15, %v3513_v43  ;;  %v3539_v52 = vld [vmem:[#allocation5 + $0x2d30] sm:$0xff]  ;;  %v3536_v61 = vld [vmem:[#allocation5 + $0x2d18] sm:$0xff]  ;;  %v9888_v47 = vmax.f32 %v9435_v34, %v9563_v8  ;;  %v9889_v8 = vmax.f32 %v9437_v53, %v9567_v24 }
 0x321   :  { %v8312_v7 = vpack.c.bf16 %v3531_v16, %v3526_v32  ;;  %v3530_v35 = vld [vmem:[#allocation5 + $0x2ce8] sm:$0xff]  ;;  %v3541_v30 = vld [vmem:[#allocation5 + $0x2d40] sm:$0xff]  ;;  %v3535_v9 = vld [vmem:[#allocation5 + $0x2d10] sm:$0xff] }
 0x322   :  { %8167 = vmatpush1.bf16.msra.mxu0 %v8166_v13  ;;  %8295 = vmatpush1.bf16.msra.mxu1 %v8294_v39  ;;  %v3524_v13 = vld [vmem:[#allocation5 + $0x2cb8] sm:$0xff]  ;;  %v3529_v39 = vld [vmem:[#allocation5 + $0x2ce0] sm:$0xff]  ;;  %v3538_v12 = vld [vmem:[#allocation5 + $0x2d28] sm:$0xff] }
 0x323   :  { %8169 = vmatprep.subr.bf16.mxu0 %v8168_v33  ;;  %8297 = vmatprep.subr.bf16.mxu1 %v8296_v4  ;;  %v8184_v26 = vpack.c.bf16 %v3529_v39, %v3524_v13  ;;  %v3533_v59 = vld [vmem:[#allocation5 + $0x2d00] sm:$0xff]  ;;  %v3544_v43 = vld [vmem:[#allocation5 + $0x2d58] sm:$0xff]  ;;  %v3546_v38 = vld [vmem:[#allocation5 + $0x2d68] sm:$0xff] }
 0x324   :  { %v3549_v15 = vld [vmem:[#allocation5 + $0x2d80] sm:$0xff]  ;;  %v8190_v54 = vpack.c.bf16 %v3538_v12, %v3533_v59  ;;  %v3550_v16 = vld [vmem:[#allocation5 + $0x2d88] sm:$0xff]  ;;  %v3579_v59 = vld [vmem:[#allocation5 + $0x2e70] sm:$0xff] }
 0x325   :  { %v8192_v39 = vpack.c.bf16 %v3549_v15, %v3544_v43  ;;  %v3545_v34 = vld [vmem:[#allocation5 + $0x2d60] sm:$0xff]  ;;  %v9685_v12 = vld [vmem:[#allocation3 + $0x18] sm:$0xff]  ;;  %v3578_v15 = vld [vmem:[#allocation5 + $0x2e68] sm:$0xff] }
 0x326   :  { %8171 = vmatpush1.bf16.msra.mxu0 %v8170_v31  ;;  %8299 = vmatpush1.bf16.msra.mxu1 %v8298_v42  ;;  %v3523_v31 = vld [vmem:[#allocation5 + $0x2cb0] sm:$0xff]  ;;  %v3525_v42 = vld [vmem:[#allocation5 + $0x2cc0] sm:$0xff]  ;;  %v8322_v53 = vpack.c.bf16 %v3550_v16, %v3545_v34  ;;  %v3588_v16 = vld [vmem:[#allocation5 + $0x2eb8] sm:$0xff] }
 0x327   :  { %8173 = vmatprep.subr.bf16.mxu0 %v8172_v22  ;;  %8301 = vmatprep.subr.bf16.mxu1 %v8300_v10  ;;  %v3534_v10 = vld [vmem:[#allocation5 + $0x2d08] sm:$0xff]  ;;  %v8186_v23 = vpack.c.bf16 %v3528_v29, %v3523_v31  ;;  %v8314_v57 = vpack.c.bf16 %v3530_v35, %v3525_v42  ;;  %v3553_v31 = vld [vmem:[#allocation5 + $0x2da0] sm:$0xff]  ;;  %v3555_v42 = vld [vmem:[#allocation5 + $0x2db0] sm:$0xff] }
 0x328   :  { %v3558_v29 = vld [vmem:[#allocation5 + $0x2dc8] sm:$0xff]  ;;  %v3569_v35 = vld [vmem:[#allocation5 + $0x2e20] sm:$0xff] }
 0x329   :  { %v3573_v43 = vld [vmem:[#allocation5 + $0x2e40] sm:$0xff] }
 0x32a   :  { %8175 = vmatpush1.bf16.msra.mxu0 %v8174_v40  ;;  %8303 = vmatpush1.bf16.msra.mxu1 %v8302_v63 }
 0x32b   :  { %8177 = vmatprep.subr.bf16.mxu0 %v8176_v25  ;;  %8305 = vmatprep.subr.bf16.mxu1 %v8304_v37  ;;  %v8188_v37 = vpack.c.bf16 %v3539_v52, %v3534_v10  ;;  %v9677_v10 = vld [vmem:[#allocation3 + $0x28] sm:$0xff] }
 0x32c   :  { %v6003_v44 = vpop.f32.mrb[20].mxu0  ;;  %v6041_v60 = vpop.f32.mrb[20].mxu1  ;;  %v3566_v52 = vld [vmem:[#allocation5 + $0x2e08] sm:$0xff] }
 0x32d   :  { %v6004_v33 = vpop.f32.mrb[21].mxu0  ;;  %v6042_v48 = vpop.f32.mrb[21].mxu1 }
 0x32e   :  { %v6005_v4 = vadd.f32 %v6004_v33, %v6003_v44  ;;  %8179 = vmatpush1.bf16.msra.mxu0 %v8178_v21  ;;  %8307 = vmatpush1.bf16.msra.mxu1 %v8306_v2  ;;  %v6043_v3 = vadd.f32 %v6042_v48, %v6041_v60  ;;  %v8316_v2 = vpack.c.bf16 %v3541_v30, %v3536_v61  ;;  %v3551_v44 = vld [vmem:[#allocation5 + $0x2d90] sm:$0xff]  ;;  %v3548_v60 = vld [vmem:[#allocation5 + $0x2d78] sm:$0xff] }
 0x32f   :  { %8181 = vmatprep.subr.bf16.mxu0 %v8180_v19  ;;  %8309 = vmatprep.subr.bf16.mxu1 %v8308_v27  ;;  %v3540_v19 = vld [vmem:[#allocation5 + $0x2d38] sm:$0xff]  ;;  %v3543_v33 = vld [vmem:[#allocation5 + $0x2d50] sm:$0xff]  ;;  %v8320_v32 = vpack.c.bf16 %v3551_v44, %v3546_v38  ;;  %v8198_v61 = vpack.c.bf16 %v3558_v29, %v3553_v31 }
 0x330   :  { %v2462_v22 = vadd.f32 %v6005_v4, %v2081_v20  ;;  %v6006_v17 = vpop.f32.mrb[22].mxu0  ;;  %v6044_v62 = vpop.f32.mrb[22].mxu1  ;;  %v8318_v13 = vpack.c.bf16 %v3540_v19, %v3535_v9  ;;  %v3554_v4 = vld [vmem:[#allocation5 + $0x2da8] sm:$0xff]  ;;  %v3559_v48 = vld [vmem:[#allocation5 + $0x2dd0] sm:$0xff]  ;;  %v3576_v9 = vld [vmem:[#allocation5 + $0x2e58] sm:$0xff] }
 0x331   :  { %v6007_v6 = vpop.f32.mrb[23].mxu0  ;;  %v6045_v25 = vpop.f32.mrb[23].mxu1  ;;  %v8196_v24 = vpack.c.bf16 %v3559_v48, %v3554_v4  ;;  %v3575_v38 = vld [vmem:[#allocation5 + $0x2e50] sm:$0xff]  ;;  %v3585_v4 = vld [vmem:[#allocation5 + $0x2ea0] sm:$0xff] }
 0x332   :  { %v2537_v40 = vadd.f32 %v6043_v3, %v2462_v22  ;;  %v6008_v63 = vadd.f32 %v6007_v6, %v6006_v17  ;;  %8183 = vmatpush1.bf16.msra.mxu0 %v8182_v1  ;;  %8311 = vmatpush1.bf16.msra.mxu1 %v8310_v14  ;;  %v6046_v11 = vadd.f32 %v6045_v25, %v6044_v62  ;;  %v9673_v1 = vld [vmem:[#allocation3] sm:$0xff]  ;;  %v3556_v3 = vld [vmem:[#allocation5 + $0x2db8] sm:$0xff]  ;;  %v3571_v6 = vld [vmem:[#allocation5 + $0x2e30] sm:$0xff] }
 0x333   :  { %8185 = vmatprep.subr.bf16.mxu0 %v8184_v26  ;;  %8313 = vmatprep.subr.bf16.mxu1 %v8312_v7  ;;  %v3561_v14 = vld [vmem:[#allocation5 + $0x2de0] sm:$0xff]  ;;  %v8194_v26 = vpack.c.bf16 %v3548_v60, %v3543_v33  ;;  %v3560_v17 = vld [vmem:[#allocation5 + $0x2dd8] sm:$0xff]  ;;  %v3591_v33 = vld [vmem:[#allocation5 + $0x2ed0] sm:$0xff]  ;;  %v8206_v60 = vpack.c.bf16 %v3578_v15, %v3573_v43 }
 0x334   :  { %v9666_v41 = vmax.f32 %v9888_v47, %v2537_v40  ;;  %v2467_v21 = vadd.f32 %v6008_v63, %v2081_v20  ;;  %v8324_v22 = vpack.c.bf16 %v3561_v14, %v3556_v3  ;;  %v3564_v7 = vld [vmem:[#allocation5 + $0x2df8] sm:$0xff]  ;;  %v9681_v62 = vld [vmem:[#allocation3 + $0x20] sm:$0xff]  ;;  %v8326_v30 = vpack.c.bf16 %v3560_v17, %v3555_v42  ;;  %v3563_v63 = vld [vmem:[#allocation5 + $0x2df0] sm:$0xff] }
 0x335   :  { %v8200_v40 = vpack.c.bf16 %v3569_v35, %v3564_v7  ;;  %v3568_v25 = vld [vmem:[#allocation5 + $0x2e18] sm:$0xff]  ;;  %v3581_v47 = vld [vmem:[#allocation5 + $0x2e80] sm:$0xff]  ;;  %v3590_v3 = vld [vmem:[#allocation5 + $0x2ec8] sm:$0xff] }
 0x336   :  { %v2542_v27 = vadd.f32 %v6046_v11, %v2467_v21  ;;  %8187 = vmatpush1.bf16.msra.mxu0 %v8186_v23  ;;  %8315 = vmatpush1.bf16.msra.mxu1 %v8314_v57  ;;  %v3565_v23 = vld [vmem:[#allocation5 + $0x2e00] sm:$0xff]  ;;  %v8328_v11 = vpack.c.bf16 %v3571_v6, %v3566_v52  ;;  %v3570_v57 = vld [vmem:[#allocation5 + $0x2e28] sm:$0xff]  ;;  %v8202_v21 = vpack.c.bf16 %v3568_v25, %v3563_v63  ;;  %v3595_v7 = vld [vmem:[#allocation5 + $0x2ef0] sm:$0xff] }
 0x337   :  { %8189 = vmatprep.subr.bf16.mxu0 %v8188_v37  ;;  %8317 = vmatprep.subr.bf16.mxu1 %v8316_v2  ;;  %v3574_v37 = vld [vmem:[#allocation5 + $0x2e48] sm:$0xff]  ;;  %v8330_v2 = vpack.c.bf16 %v3570_v57, %v3565_v23  ;;  %v8332_v44 = vpack.c.bf16 %v3581_v47, %v3576_v9  ;;  %v8338_v29 = vpack.c.bf16 %v3590_v3, %v3585_v4  ;;  %v3600_v52 = vld [vmem:[#allocation5 + $0x2f18] sm:$0xff] }
 0x338   :  { %v9671_v20 = vmax.f32 %v9889_v8, %v2542_v27  ;;  %v8204_v19 = vpack.c.bf16 %v3579_v59, %v3574_v37  ;;  %v3580_v27 = vld [vmem:[#allocation5 + $0x2e78] sm:$0xff]  ;;  %v3594_v14 = vld [vmem:[#allocation5 + $0x2ee8] sm:$0xff]  ;;  %v8342_v25 = vpack.c.bf16 %v3600_v52, %v3595_v7  ;;  %v3605_v37 = vld [vmem:[#allocation5 + $0x2f40] sm:$0xff] }
 0x339   :  { %3786 = vmatmul.mubr.f32.vlgmr.msra.gmra.mrb[32].mxu0 %v9673_v1  ;;  %3940 = vmatmul.mubr.f32.vlgmr.msra.gmra.mrb[32].mxu1 %v9673_v1  ;;  %v8334_v34 = vpack.c.bf16 %v3580_v27, %v3575_v38  ;;  %v3598_v17 = vld [vmem:[#allocation5 + $0x2f08] sm:$0xff]  ;;  %v3604_v6 = vld [vmem:[#allocation5 + $0x2f38] sm:$0xff] }
 0x33a   :  { %8191 = vmatpush1.bf16.msra.mxu0 %v8190_v54  ;;  %8319 = vmatpush1.bf16.msra.mxu1 %v8318_v13  ;;  %v3584_v54 = vld [vmem:[#allocation5 + $0x2e98] sm:$0xff]  ;;  %v3589_v13 = vld [vmem:[#allocation5 + $0x2ec0] sm:$0xff]  ;;  %v3610_v9 = vld [vmem:[#allocation5 + $0x2f68] sm:$0xff] }
 0x33b   :  { %8193 = vmatprep.subr.bf16.mxu0 %v8192_v39  ;;  %8321 = vmatprep.subr.bf16.mxu1 %v8320_v32  ;;  %v3586_v39 = vld [vmem:[#allocation5 + $0x2ea8] sm:$0xff]  ;;  %v8208_v8 = vpack.c.bf16 %v3589_v13, %v3584_v54  ;;  %v3583_v32 = vld [vmem:[#allocation5 + $0x2e90] sm:$0xff]  ;;  %v3608_v57 = vld [vmem:[#allocation5 + $0x2f58] sm:$0xff]  ;;  %v8346_v15 = vpack.c.bf16 %v3610_v9, %v3605_v37 }
 0x33c   :  { %3791 = vmatprep.mubr.f32.mxu0 %v9677_v10  ;;  %3945 = vmatprep.mubr.f32.mxu1 %v9677_v10  ;;  %v8336_v48 = vpack.c.bf16 %v3591_v33, %v3586_v39  ;;  %v8210_v31 = vpack.c.bf16 %v3588_v16, %v3583_v32  ;;  %v3614_v47 = vld [vmem:[#allocation5 + $0x2f88] sm:$0xff]  ;;  %v3615_v54 = vld [vmem:[#allocation5 + $0x2f90] sm:$0xff]  ;;  %v3620_v39 = vld [vmem:[#allocation5 + $0x2fb8] sm:$0xff] }
 0x33d   :  { %3792 = vmatmul.mubr.f32.gmra.mrb[34].mxu0 %v9681_v62  ;;  %3946 = vmatmul.mubr.f32.gmra.mrb[34].mxu1 %v9681_v62  ;;  %v3618_v27 = vld [vmem:[#allocation5 + $0x2fa8] sm:$0xff]  ;;  %v3624_v33 = vld [vmem:[#allocation5 + $0x2fd8] sm:$0xff]  ;;  %v8350_v16 = vpack.c.bf16 %v3620_v39, %v3615_v54 }
 0x33e   :  { %8195 = vmatpush1.bf16.msra.mxu0 %v8194_v26  ;;  %8323 = vmatpush1.bf16.msra.mxu1 %v8322_v53  ;;  %v3599_v26 = vld [vmem:[#allocation5 + $0x2f10] sm:$0xff]  ;;  %v3596_v53 = vld [vmem:[#allocation5 + $0x2ef8] sm:$0xff]  ;;  %v3638_v52 = vld [vmem:[#allocation5 + $0x3048] sm:$0xff] }
 0x33f   :  { %8197 = vmatprep.subr.bf16.mxu0 %v8196_v24  ;;  %8325 = vmatprep.subr.bf16.mxu1 %v8324_v22  ;;  %v3601_v24 = vld [vmem:[#allocation5 + $0x2f20] sm:$0xff]  ;;  %v8212_v42 = vpack.c.bf16 %v3599_v26, %v3594_v14  ;;  %v3628_v3 = vld [vmem:[#allocation5 + $0x2ff8] sm:$0xff]  ;;  %v3658_v39 = vld [vmem:[#allocation5 + $0x30e8] sm:$0xff] }
 0x340   :  { %3862 = vmatprep.mubr.f32.mxu0 %v9685_v12  ;;  %4016 = vmatprep.mubr.f32.mxu1 %v9685_v12  ;;  %v3593_v22 = vld [vmem:[#allocation5 + $0x2ee0] sm:$0xff]  ;;  %v8340_v35 = vpack.c.bf16 %v3601_v24, %v3596_v53  ;;  %v3630_v53 = vld [vmem:[#allocation5 + $0x3008] sm:$0xff]  ;;  %v3648_v9 = vld [vmem:[#allocation5 + $0x3098] sm:$0xff] }
 0x341   :  { %v8214_v63 = vpack.c.bf16 %v3598_v17, %v3593_v22  ;;  %v3625_v14 = vld [vmem:[#allocation5 + $0x2fe0] sm:$0xff]  ;;  %v3634_v24 = vld [vmem:[#allocation5 + $0x3028] sm:$0xff] }
 0x342   :  { %8199 = vmatpush1.bf16.msra.mxu0 %v8198_v61  ;;  %8327 = vmatpush1.bf16.msra.mxu1 %v8326_v30  ;;  %v3609_v61 = vld [vmem:[#allocation5 + $0x2f60] sm:$0xff]  ;;  %v3606_v30 = vld [vmem:[#allocation5 + $0x2f48] sm:$0xff]  ;;  %v8354_v17 = vpack.c.bf16 %v3630_v53, %v3625_v14  ;;  %v3668_v53 = vld [vmem:[#allocation5 + $0x3138] sm:$0xff] }
 0x343   :  { %8201 = vmatprep.subr.bf16.mxu0 %v8200_v40  ;;  %8329 = vmatprep.subr.bf16.mxu1 %v8328_v11  ;;  %v3611_v40 = vld [vmem:[#allocation5 + $0x2f70] sm:$0xff]  ;;  %v8216_v23 = vpack.c.bf16 %v3609_v61, %v3604_v6 }
 0x344   :  { %v3603_v11 = vld [vmem:[#allocation5 + $0x2f30] sm:$0xff]  ;;  %v8344_v59 = vpack.c.bf16 %v3611_v40, %v3606_v30  ;;  %v3640_v30 = vld [vmem:[#allocation5 + $0x3058] sm:$0xff] }
 0x345   :  { %v8218_v43 = vpack.c.bf16 %v3608_v57, %v3603_v11  ;;  %v3635_v6 = vld [vmem:[#allocation5 + $0x3030] sm:$0xff]  ;;  %v3644_v40 = vld [vmem:[#allocation5 + $0x3078] sm:$0xff] }
 0x346   :  { %8203 = vmatpush1.bf16.msra.mxu0 %v8202_v21  ;;  %8331 = vmatpush1.bf16.msra.mxu1 %v8330_v2  ;;  %v3619_v21 = vld [vmem:[#allocation5 + $0x2fb0] sm:$0xff]  ;;  %v3616_v2 = vld [vmem:[#allocation5 + $0x2f98] sm:$0xff]  ;;  %v8358_v57 = vpack.c.bf16 %v3640_v30, %v3635_v6  ;;  %v3678_v30 = vld [vmem:[#allocation5 + $0x3188] sm:$0xff] }
 0x347   :  { %8205 = vmatprep.subr.bf16.mxu0 %v8204_v19  ;;  %8333 = vmatprep.subr.bf16.mxu1 %v8332_v44  ;;  %v3621_v19 = vld [vmem:[#allocation5 + $0x2fc0] sm:$0xff]  ;;  %v8220_v38 = vpack.c.bf16 %v3619_v21, %v3614_v47 }
 0x348   :  { %v3613_v44 = vld [vmem:[#allocation5 + $0x2f80] sm:$0xff]  ;;  %v8348_v13 = vpack.c.bf16 %v3621_v19, %v3616_v2  ;;  %v3650_v2 = vld [vmem:[#allocation5 + $0x30a8] sm:$0xff] }
 0x349   :  { %v8222_v32 = vpack.c.bf16 %v3618_v27, %v3613_v44  ;;  %v3645_v47 = vld [vmem:[#allocation5 + $0x3080] sm:$0xff]  ;;  %v3654_v19 = vld [vmem:[#allocation5 + $0x30c8] sm:$0xff] }
 0x34a   :  { %8207 = vmatpush1.bf16.msra.mxu0 %v8206_v60  ;;  %8335 = vmatpush1.bf16.msra.mxu1 %v8334_v34  ;;  %v3629_v60 = vld [vmem:[#allocation5 + $0x3000] sm:$0xff]  ;;  %v3626_v34 = vld [vmem:[#allocation5 + $0x2fe8] sm:$0xff]  ;;  %v8362_v27 = vpack.c.bf16 %v3650_v2, %v3645_v47  ;;  %v3688_v2 = vld [vmem:[#allocation5 + $0x31d8] sm:$0xff] }
 0x34b   :  { %8209 = vmatprep.subr.bf16.mxu0 %v8208_v8  ;;  %8337 = vmatprep.subr.bf16.mxu1 %v8336_v48  ;;  %v3631_v8 = vld [vmem:[#allocation5 + $0x3010] sm:$0xff]  ;;  %v8224_v4 = vpack.c.bf16 %v3629_v60, %v3624_v33 }
 0x34c   :  { %v3623_v48 = vld [vmem:[#allocation5 + $0x2fd0] sm:$0xff]  ;;  %v8352_v26 = vpack.c.bf16 %v3631_v8, %v3626_v34  ;;  %v3660_v34 = vld [vmem:[#allocation5 + $0x30f8] sm:$0xff] }
 0x34d   :  { %v8226_v22 = vpack.c.bf16 %v3628_v3, %v3623_v48  ;;  %v3655_v33 = vld [vmem:[#allocation5 + $0x30d0] sm:$0xff]  ;;  %v3664_v8 = vld [vmem:[#allocation5 + $0x3118] sm:$0xff] }
 0x34e   :  { %8211 = vmatpush1.bf16.msra.mxu0 %v8210_v31  ;;  %8339 = vmatpush1.bf16.msra.mxu1 %v8338_v29  ;;  %v3639_v31 = vld [vmem:[#allocation5 + $0x3050] sm:$0xff]  ;;  %v3636_v29 = vld [vmem:[#allocation5 + $0x3038] sm:$0xff]  ;;  %v8366_v3 = vpack.c.bf16 %v3660_v34, %v3655_v33  ;;  %v3382_v34 = vld [vmem:[#allocation5 + $0x2848] sm:$0xff] }
 0x34f   :  { %8213 = vmatprep.subr.bf16.mxu0 %v8212_v42  ;;  %8341 = vmatprep.subr.bf16.mxu1 %v8340_v35  ;;  %v3641_v42 = vld [vmem:[#allocation5 + $0x3060] sm:$0xff]  ;;  %v8228_v7 = vpack.c.bf16 %v3639_v31, %v3634_v24 }
 0x350   :  { %v3633_v35 = vld [vmem:[#allocation5 + $0x3020] sm:$0xff]  ;;  %v8356_v61 = vpack.c.bf16 %v3641_v42, %v3636_v29  ;;  %v3670_v29 = vld [vmem:[#allocation5 + $0x3148] sm:$0xff] }
 0x351   :  { %v8230_v11 = vpack.c.bf16 %v3638_v52, %v3633_v35  ;;  %v3665_v24 = vld [vmem:[#allocation5 + $0x3120] sm:$0xff]  ;;  %v3674_v42 = vld [vmem:[#allocation5 + $0x3168] sm:$0xff] }
 0x352   :  { %8215 = vmatpush1.bf16.msra.mxu0 %v8214_v63  ;;  %8343 = vmatpush1.bf16.msra.mxu1 %v8342_v25  ;;  %v3649_v63 = vld [vmem:[#allocation5 + $0x30a0] sm:$0xff]  ;;  %v3646_v25 = vld [vmem:[#allocation5 + $0x3088] sm:$0xff]  ;;  %v8370_v52 = vpack.c.bf16 %v3670_v29, %v3665_v24  ;;  %v3387_v24 = vld [vmem:[#allocation5 + $0x2870] sm:$0xff] }
 0x353   :  { %8217 = vmatprep.subr.bf16.mxu0 %v8216_v23  ;;  %8345 = vmatprep.subr.bf16.mxu1 %v8344_v59  ;;  %v3651_v23 = vld [vmem:[#allocation5 + $0x30b0] sm:$0xff]  ;;  %v8232_v37 = vpack.c.bf16 %v3649_v63, %v3644_v40 }
 0x354   :  { %v3643_v59 = vld [vmem:[#allocation5 + $0x3070] sm:$0xff]  ;;  %v8360_v21 = vpack.c.bf16 %v3651_v23, %v3646_v25  ;;  %v3680_v25 = vld [vmem:[#allocation5 + $0x3198] sm:$0xff] }
 0x355   :  { %v8234_v44 = vpack.c.bf16 %v3648_v9, %v3643_v59  ;;  %v3675_v40 = vld [vmem:[#allocation5 + $0x3170] sm:$0xff]  ;;  %v3684_v23 = vld [vmem:[#allocation5 + $0x31b8] sm:$0xff] }
 0x356   :  { %8219 = vmatpush1.bf16.msra.mxu0 %v8218_v43  ;;  %8347 = vmatpush1.bf16.msra.mxu1 %v8346_v15  ;;  %v3659_v43 = vld [vmem:[#allocation5 + $0x30f0] sm:$0xff]  ;;  %v3656_v15 = vld [vmem:[#allocation5 + $0x30d8] sm:$0xff]  ;;  %v8374_v9 = vpack.c.bf16 %v3680_v25, %v3675_v40 }
 0x357   :  { %8221 = vmatprep.subr.bf16.mxu0 %v8220_v38  ;;  %8349 = vmatprep.subr.bf16.mxu1 %v8348_v13  ;;  %v3661_v38 = vld [vmem:[#allocation5 + $0x3100] sm:$0xff]  ;;  %v8236_v54 = vpack.c.bf16 %v3659_v43, %v3654_v19  ;;  %v3547_v29 = vld [vmem:[#allocation5 + $0x2d70] sm:$0xff]  ;;  %v9693_v40 = vld [vmem:[#allocation3 + $0x38] sm:$0xff] }
 0x358   :  { %v3653_v13 = vld [vmem:[#allocation5 + $0x30c0] sm:$0xff]  ;;  %v8364_v60 = vpack.c.bf16 %v3661_v38, %v3656_v15  ;;  %v3690_v15 = vld [vmem:[#allocation5 + $0x31e8] sm:$0xff] }
 0x359   :  { %v8238_v48 = vpack.c.bf16 %v3658_v39, %v3653_v13  ;;  %v3685_v19 = vld [vmem:[#allocation5 + $0x31c0] sm:$0xff] }
 0x35a   :  { %8223 = vmatpush1.bf16.msra.mxu0 %v8222_v32  ;;  %8351 = vmatpush1.bf16.msra.mxu1 %v8350_v16  ;;  %v3669_v32 = vld [vmem:[#allocation5 + $0x3140] sm:$0xff]  ;;  %v3666_v16 = vld [vmem:[#allocation5 + $0x3128] sm:$0xff]  ;;  %v8378_v39 = vpack.c.bf16 %v3690_v15, %v3685_v19  ;;  %v3652_v19 = vld [vmem:[#allocation5 + $0x30b8] sm:$0xff] }
 0x35b   :  { %8225 = vmatprep.subr.bf16.mxu0 %v8224_v4  ;;  %8353 = vmatprep.subr.bf16.mxu1 %v8352_v26  ;;  %v3671_v4 = vld [vmem:[#allocation5 + $0x3150] sm:$0xff]  ;;  %v8240_v14 = vpack.c.bf16 %v3669_v32, %v3664_v8  ;;  %v3457_v38 = vld [vmem:[#allocation5 + $0x2aa0] sm:$0xff] }
 0x35c   :  { %v3663_v26 = vld [vmem:[#allocation5 + $0x3110] sm:$0xff]  ;;  %v8368_v31 = vpack.c.bf16 %v3671_v4, %v3666_v16  ;;  %v3537_v32 = vld [vmem:[#allocation5 + $0x2d20] sm:$0xff]  ;;  %v3542_v16 = vld [vmem:[#allocation5 + $0x2d48] sm:$0xff] }
 0x35d   :  { %v8242_v35 = vpack.c.bf16 %v3668_v53, %v3663_v26  ;;  %v3467_v4 = vld [vmem:[#allocation5 + $0x2af0] sm:$0xff]  ;;  %v3632_v26 = vld [vmem:[#allocation5 + $0x3018] sm:$0xff]  ;;  %v8414_v53 = vpack.c.bf16 %v3542_v16, %v3537_v32  ;;  %v3662_v32 = vld [vmem:[#allocation5 + $0x3108] sm:$0xff] }
 0x35e   :  { %8227 = vmatpush1.bf16.msra.mxu0 %v8226_v22  ;;  %8355 = vmatpush1.bf16.msra.mxu1 %v8354_v17  ;;  %v3679_v22 = vld [vmem:[#allocation5 + $0x3190] sm:$0xff]  ;;  %v3676_v17 = vld [vmem:[#allocation5 + $0x3178] sm:$0xff] }
 0x35f   :  { %8229 = vmatprep.subr.bf16.mxu0 %v8228_v7  ;;  %8357 = vmatprep.subr.bf16.mxu1 %v8356_v61  ;;  %v3681_v7 = vld [vmem:[#allocation5 + $0x31a0] sm:$0xff]  ;;  %v8244_v6 = vpack.c.bf16 %v3679_v22, %v3674_v42  ;;  %v3552_v22 = vld [vmem:[#allocation5 + $0x2d98] sm:$0xff] }
 0x360   :  { %v3673_v61 = vld [vmem:[#allocation5 + $0x3160] sm:$0xff]  ;;  %v8372_v63 = vpack.c.bf16 %v3681_v7, %v3676_v17  ;;  %v3482_v7 = vld [vmem:[#allocation5 + $0x2b68] sm:$0xff] }
 0x361   :  { %v8246_v59 = vpack.c.bf16 %v3678_v30, %v3673_v61  ;;  %v3477_v17 = vld [vmem:[#allocation5 + $0x2b40] sm:$0xff]  ;;  %v3642_v61 = vld [vmem:[#allocation5 + $0x3068] sm:$0xff] }
 0x362   :  { %8231 = vmatpush1.bf16.msra.mxu0 %v8230_v11  ;;  %8359 = vmatpush1.bf16.msra.mxu1 %v8358_v57  ;;  %v3689_v11 = vld [vmem:[#allocation5 + $0x31e0] sm:$0xff]  ;;  %v3686_v57 = vld [vmem:[#allocation5 + $0x31c8] sm:$0xff]  ;;  %v8388_v25 = vpack.c.bf16 %v3482_v7, %v3477_v17 }
 0x363   :  { %8233 = vmatprep.subr.bf16.mxu0 %v8232_v37  ;;  %8361 = vmatprep.subr.bf16.mxu1 %v8360_v21  ;;  %v3691_v37 = vld [vmem:[#allocation5 + $0x31f0] sm:$0xff]  ;;  %v8248_v47 = vpack.c.bf16 %v3689_v11, %v3684_v23  ;;  %v3397_v23 = vld [vmem:[#allocation5 + $0x28c0] sm:$0xff]  ;;  %v3402_v11 = vld [vmem:[#allocation5 + $0x28e8] sm:$0xff] }
 0x364   :  { %v3683_v21 = vld [vmem:[#allocation5 + $0x31b0] sm:$0xff]  ;;  %v8376_v43 = vpack.c.bf16 %v3691_v37, %v3686_v57  ;;  %v3557_v57 = vld [vmem:[#allocation5 + $0x2dc0] sm:$0xff] }
 0x365   :  { %v8250_v13 = vpack.c.bf16 %v3688_v2, %v3683_v21  ;;  %v9697_v21 = vld [vmem:[#allocation3 + $0x30] sm:$0xff] }
 0x366   :  { %8235 = vmatpush1.bf16.msra.mxu0 %v8234_v44  ;;  %8363 = vmatpush1.bf16.msra.mxu1 %v8362_v27  ;;  %v3462_v44 = vld [vmem:[#allocation5 + $0x2ac8] sm:$0xff]  ;;  %v3617_v27 = vld [vmem:[#allocation5 + $0x2fa0] sm:$0xff]  ;;  %v3647_v2 = vld [vmem:[#allocation5 + $0x3090] sm:$0xff] }
 0x367   :  { %8237 = vmatprep.subr.bf16.mxu0 %v8236_v54  ;;  %8365 = vmatprep.subr.bf16.mxu1 %v8364_v60  ;;  %v3622_v54 = vld [vmem:[#allocation5 + $0x2fc8] sm:$0xff]  ;;  %v8380_v33 = vpack.c.bf16 %v3462_v44, %v3457_v38  ;;  %v3377_v60 = vld [vmem:[#allocation5 + $0x2820] sm:$0xff]  ;;  %v3407_v44 = vld [vmem:[#allocation5 + $0x2910] sm:$0xff] }
 0x368   :  { %v8412_v8 = vpack.c.bf16 %v3622_v54, %v3617_v27  ;;  %v3412_v27 = vld [vmem:[#allocation5 + $0x2938] sm:$0xff]  ;;  %v3567_v54 = vld [vmem:[#allocation5 + $0x2e10] sm:$0xff] }
 0x369   :  { %v8394_v16 = vpack.c.bf16 %v3412_v27, %v3407_v44  ;;  %v3532_v44 = vld [vmem:[#allocation5 + $0x2cf8] sm:$0xff]  ;;  %v3687_v27 = vld [vmem:[#allocation5 + $0x31d0] sm:$0xff] }
 0x36a   :  { %8239 = vmatpush1.bf16.msra.mxu0 %v8238_v48  ;;  %8367 = vmatpush1.bf16.msra.mxu1 %v8366_v3  ;;  %v3472_v48 = vld [vmem:[#allocation5 + $0x2b18] sm:$0xff]  ;;  %v8382_v3 = vpack.c.bf16 %v3382_v34, %v3377_v60  ;;  %v3502_v60 = vld [vmem:[#allocation5 + $0x2c08] sm:$0xff] }
 0x36b   :  { %8241 = vmatprep.subr.bf16.mxu0 %v8240_v14  ;;  %8369 = vmatprep.subr.bf16.mxu1 %v8368_v31  ;;  %v3627_v14 = vld [vmem:[#allocation5 + $0x2ff0] sm:$0xff]  ;;  %v3392_v31 = vld [vmem:[#allocation5 + $0x2898] sm:$0xff]  ;;  %v8384_v42 = vpack.c.bf16 %v3472_v48, %v3467_v4  ;;  %v9061_v34 = vld [vmem:[#allocation3 + $0x8] sm:$0xff] }
 0x36c   :  { %v8386_v30 = vpack.c.bf16 %v3392_v31, %v3387_v24  ;;  %v3582_v24 = vld [vmem:[#allocation5 + $0x2e88] sm:$0xff]  ;;  %v3507_v31 = vld [vmem:[#allocation5 + $0x2c30] sm:$0xff] }
 0x36e   :  { %8243 = vmatpush1.bf16.msra.mxu0 %v8242_v35  ;;  %8371 = vmatpush1.bf16.msra.mxu1 %v8370_v52  ;;  %v9689_v35 = vld [vmem:[#allocation3 + $0x10] sm:$0xff]  ;;  %v8416_v52 = vpack.c.bf16 %v3632_v26, %v3627_v14  ;;  %v3422_v14 = vld [vmem:[#allocation5 + $0x2988] sm:$0xff]  ;;  %v3577_v26 = vld [vmem:[#allocation5 + $0x2e60] sm:$0xff] }
 0x36f   :  { %8245 = vmatprep.subr.bf16.mxu0 %v8244_v6  ;;  %8373 = vmatprep.subr.bf16.mxu1 %v8372_v63  ;;  %v3637_v6 = vld [vmem:[#allocation5 + $0x3040] sm:$0xff]  ;;  %v8418_v63 = vpack.c.bf16 %v3552_v22, %v3547_v29  ;;  %v3512_v29 = vld [vmem:[#allocation5 + $0x2c58] sm:$0xff] }
 0x370   :  { %v8420_v37 = vpack.c.bf16 %v3642_v61, %v3637_v6  ;;  %v3672_v22 = vld [vmem:[#allocation5 + $0x3158] sm:$0xff]  ;;  %v8400_v7 = vpack.c.bf16 %v3512_v29, %v3507_v31  ;;  %v3587_v61 = vld [vmem:[#allocation5 + $0x2eb0] sm:$0xff] }
 0x371   :  { %v3432_v6 = vld [vmem:[#allocation5 + $0x29d8] sm:$0xff] }
 0x372   :  { %8247 = vmatpush1.bf16.msra.mxu0 %v8246_v59  ;;  %8375 = vmatpush1.bf16.msra.mxu1 %v8374_v9  ;;  %v3562_v59 = vld [vmem:[#allocation5 + $0x2de8] sm:$0xff]  ;;  %v3487_v9 = vld [vmem:[#allocation5 + $0x2b90] sm:$0xff]  ;;  %v4221_v29 = vld [vmem:[#allocation8 + $0x100] sm:$0xff] }
 0x373   :  { %8249 = vmatprep.subr.bf16.mxu0 %v8248_v47  ;;  %8377 = vmatprep.subr.bf16.mxu1 %v8376_v43  ;;  %v3492_v47 = vld [vmem:[#allocation5 + $0x2bb8] sm:$0xff]  ;;  %v8390_v43 = vpack.c.bf16 %v3402_v11, %v3397_v23  ;;  %v8422_v15 = vpack.c.bf16 %v3562_v59, %v3557_v57  ;;  %v3522_v23 = vld [vmem:[#allocation5 + $0x2ca8] sm:$0xff]  ;;  %v3677_v11 = vld [vmem:[#allocation5 + $0x3180] sm:$0xff] }
 0x374   :  { %v8392_v38 = vpack.c.bf16 %v3492_v47, %v3487_v9  ;;  %v3682_v57 = vld [vmem:[#allocation5 + $0x31a8] sm:$0xff]  ;;  %v3437_v47 = vld [vmem:[#allocation5 + $0x2a00] sm:$0xff] }
 0x376   :  { %8251 = vmatpush1.bf16.msra.mxu0 %v8250_v13  ;;  %8379 = vmatpush1.bf16.msra.mxu1 %v8378_v39  ;;  %v8424_v13 = vpack.c.bf16 %v3652_v19, %v3647_v2  ;;  %v3572_v39 = vld [vmem:[#allocation5 + $0x2e38] sm:$0xff]  ;;  %v3442_v2 = vld [vmem:[#allocation5 + $0x2a28] sm:$0xff]  ;;  %v3597_v19 = vld [vmem:[#allocation5 + $0x2f00] sm:$0xff] }
 0x377   :  { %8381 = vmatprep.subr.bf16.mxu0 %v8380_v33  ;;  %8413 = vmatprep.subr.bf16.mxu1 %v8412_v8  ;;  %v3497_v33 = vld [vmem:[#allocation5 + $0x2be0] sm:$0xff]  ;;  %v8426_v4 = vpack.c.bf16 %v3572_v39, %v3567_v54  ;;  %v3692_v54 = vld [vmem:[#allocation5 + $0x31f8] sm:$0xff] }
 0x378   :  { %v3657_v8 = vld [vmem:[#allocation5 + $0x30e0] sm:$0xff]  ;;  %v8396_v48 = vpack.c.bf16 %v3502_v60, %v3497_v33  ;;  %v3447_v60 = vld [vmem:[#allocation5 + $0x2a50] sm:$0xff] }
 0x379   :  { %3863 = vmatmul.mubr.f32.vlgmr.msra.gmra.mrb[32].mxu0 %v9689_v35  ;;  %4017 = vmatmul.mubr.f32.vlgmr.msra.gmra.mrb[32].mxu1 %v9689_v35 }
 0x37a   :  { %8383 = vmatpush3.bf16.msra.mxu0 %v8382_v3  ;;  %8415 = vmatpush3.bf16.msra.mxu1 %v8414_v53  ;;  %v3417_v3 = vld [vmem:[#allocation5 + $0x2960] sm:$0xff]  ;;  %v8428_v53 = vpack.c.bf16 %v3662_v32, %v3657_v8  ;;  %v3607_v8 = vld [vmem:[#allocation5 + $0x2f50] sm:$0xff]  ;;  %v8440_v32 = vpack.c.bf16 %v3692_v54, %v3687_v27 }
 0x37b   :  { %3868 = vmatprep.mubr.f32.mxu0 %v9693_v40  ;;  %4022 = vmatprep.mubr.f32.mxu1 %v9693_v40  ;;  %v8398_v17 = vpack.c.bf16 %v3422_v14, %v3417_v3  ;;  %v4237_v3 = vld [vmem:[#allocation8 + $0x180] sm:$0xff]  ;;  %v4238_v14 = vld [vmem:[#allocation8 + $0x188] sm:$0xff]  ;;  %v4243_v54 = vld [vmem:[#allocation8 + $0x1b0] sm:$0xff] }
 0x37c   :  { %8385 = vmatprep.subr.bf16.mxu0 %v8384_v42  ;;  %8417 = vmatprep.subr.bf16.mxu1 %v8416_v52  ;;  %v3667_v42 = vld [vmem:[#allocation5 + $0x3130] sm:$0xff]  ;;  %v8476_v31 = vpack.c.bf16 %v4238_v14, %v4237_v3  ;;  %v4213_v3 = vld [vmem:[#allocation8 + $0xc0] sm:$0xff]  ;;  %v4214_v14 = vld [vmem:[#allocation8 + $0xc8] sm:$0xff] }
 0x37d   :  { %3869 = vmatmul.mubr.f32.gmra.mrb[34].mxu0 %v9697_v21  ;;  %4023 = vmatmul.mubr.f32.gmra.mrb[34].mxu1 %v9697_v21  ;;  %v3427_v52 = vld [vmem:[#allocation5 + $0x29b0] sm:$0xff] }
 0x37e   :  { %8387 = vmatpush3.bf16.msra.mxu0 %v8386_v30  ;;  %8419 = vmatpush3.bf16.msra.mxu1 %v8418_v63  ;;  %v8432_v30 = vpack.c.bf16 %v3672_v22, %v3667_v42  ;;  %v3592_v63 = vld [vmem:[#allocation5 + $0x2ed8] sm:$0xff]  ;;  %v4222_v42 = vld [vmem:[#allocation8 + $0x108] sm:$0xff] }
 0x37f   :  { %8389 = vmatprep.subr.bf16.mxu0 %v8388_v25  ;;  %8421 = vmatprep.subr.bf16.mxu1 %v8420_v37  ;;  %v3517_v25 = vld [vmem:[#allocation5 + $0x2c80] sm:$0xff]  ;;  %v8402_v37 = vpack.c.bf16 %v3432_v6, %v3427_v52  ;;  %v8434_v59 = vpack.c.bf16 %v3592_v63, %v3587_v61  ;;  %v4207_v52 = vld [vmem:[#allocation8 + $0x90] sm:$0xff]  ;;  %v4208_v6 = vld [vmem:[#allocation8 + $0x98] sm:$0xff]  ;;  %v8478_v61 = vpack.c.bf16 %v4222_v42, %v4221_v29 }
 0x380   :  { %4093 = vmatprep.mubr.f32.mxu0 %v9061_v34  ;;  %4168 = vmatprep.mubr.f32.mxu1 %v9685_v12  ;;  %v8430_v12 = vpack.c.bf16 %v3582_v24, %v3577_v26  ;;  %v8404_v9 = vpack.c.bf16 %v3522_v23, %v3517_v25  ;;  %v3452_v34 = vld [vmem:[#allocation5 + $0x2a78] sm:$0xff]  ;;  %v4223_v25 = vld [vmem:[#allocation8 + $0x110] sm:$0xff]  ;;  %v8460_v42 = vpack.c.bf16 %v4214_v14, %v4213_v3 }
 0x381   :  { %v8410_v26 = vpack.c.bf16 %v3452_v34, %v3447_v60  ;;  %v4189_v22 = vld [vmem:[#allocation8] sm:$0xff]  ;;  %v4224_v23 = vld [vmem:[#allocation8 + $0x118] sm:$0xff]  ;;  %v4227_v34 = vld [vmem:[#allocation8 + $0x130] sm:$0xff] }
 0x382   :  { %8391 = vmatpush3.bf16.msra.mxu0 %v8390_v43  ;;  %8423 = vmatpush3.bf16.msra.mxu1 %v8422_v15  ;;  %v8436_v43 = vpack.c.bf16 %v3682_v57, %v3677_v11  ;;  %v3602_v15 = vld [vmem:[#allocation5 + $0x2f28] sm:$0xff]  ;;  %v8448_v57 = vpack.c.bf16 %v4208_v6, %v4207_v52  ;;  %v4197_v29 = vld [vmem:[#allocation8 + $0x40] sm:$0xff]  ;;  %v4216_v6 = vld [vmem:[#allocation8 + $0xd8] sm:$0xff] }
 0x383   :  { %8393 = vmatprep.subr.bf16.mxu0 %v8392_v38  ;;  %8425 = vmatprep.subr.bf16.mxu1 %v8424_v13  ;;  %v3527_v38 = vld [vmem:[#allocation5 + $0x2cd0] sm:$0xff]  ;;  %v8406_v13 = vpack.c.bf16 %v3442_v2, %v3437_v47  ;;  %v8438_v39 = vpack.c.bf16 %v3602_v15, %v3597_v19  ;;  %v4209_v47 = vld [vmem:[#allocation8 + $0xa0] sm:$0xff]  ;;  %v4210_v2 = vld [vmem:[#allocation8 + $0xa8] sm:$0xff]  ;;  %v8482_v19 = vpack.c.bf16 %v4224_v23, %v4223_v25 }
 0x384   :  { %v8408_v33 = vpack.c.bf16 %v3532_v44, %v3527_v38  ;;  %v4191_v11 = vld [vmem:[#allocation8 + $0x10] sm:$0xff]  ;;  %v4225_v38 = vld [vmem:[#allocation8 + $0x120] sm:$0xff]  ;;  %v8452_v27 = vpack.c.bf16 %v4210_v2, %v4209_v47  ;;  %v4232_v23 = vld [vmem:[#allocation8 + $0x158] sm:$0xff] }
 0x385   :  { %v4193_v44 = vld [vmem:[#allocation8 + $0x20] sm:$0xff]  ;;  %v4215_v52 = vld [vmem:[#allocation8 + $0xd0] sm:$0xff]  ;;  %v4250_v47 = vld [vmem:[#allocation8 + $0x1e8] sm:$0xff] }
 0x386   :  { %8395 = vmatpush3.bf16.msra.mxu0 %v8394_v16  ;;  %8427 = vmatpush3.bf16.msra.mxu1 %v8426_v4  ;;  %v3612_v16 = vld [vmem:[#allocation5 + $0x2f78] sm:$0xff]  ;;  %v4231_v25 = vld [vmem:[#allocation8 + $0x150] sm:$0xff] }
 0x387   :  { %8397 = vmatprep.subr.bf16.mxu0 %v8396_v48  ;;  %8429 = vmatprep.subr.bf16.mxu1 %v8428_v53  ;;  %v4205_v4 = vld [vmem:[#allocation8 + $0x80] sm:$0xff]  ;;  %v4206_v48 = vld [vmem:[#allocation8 + $0x88] sm:$0xff]  ;;  %v8442_v53 = vpack.c.bf16 %v3612_v16, %v3607_v8  ;;  %v4228_v8 = vld [vmem:[#allocation8 + $0x138] sm:$0xff] }
 0x388   :  { %v8444_v24 = vpack.c.bf16 %v4206_v48, %v4205_v4  ;;  %v4196_v16 = vld [vmem:[#allocation8 + $0x38] sm:$0xff]  ;;  %v4245_v4 = vld [vmem:[#allocation8 + $0x1c0] sm:$0xff]  ;;  %v4246_v48 = vld [vmem:[#allocation8 + $0x1c8] sm:$0xff] }
 0x38a   :  { %8399 = vmatpush3.bf16.msra.mxu0 %v8398_v17  ;;  %8431 = vmatpush3.bf16.msra.mxu1 %v8430_v12  ;;  %v4190_v17 = vld [vmem:[#allocation8 + $0x8] sm:$0xff]  ;;  %v4239_v12 = vld [vmem:[#allocation8 + $0x190] sm:$0xff] }
 0x38b   :  { %8401 = vmatprep.subr.bf16.mxu0 %v8400_v7  ;;  %8433 = vmatprep.subr.bf16.mxu1 %v8432_v30  ;;  %v4240_v7 = vld [vmem:[#allocation8 + $0x198] sm:$0xff]  ;;  %v8446_v30 = vpack.c.bf16 %v4190_v17, %v4189_v22  ;;  %v4198_v22 = vld [vmem:[#allocation8 + $0x48] sm:$0xff]  ;;  %v4247_v17 = vld [vmem:[#allocation8 + $0x1d0] sm:$0xff] }
 0x38c   :  { %v8480_v63 = vpack.c.bf16 %v4240_v7, %v4239_v12  ;;  %v4248_v12 = vld [vmem:[#allocation8 + $0x1d8] sm:$0xff] }
 0x38d   :  { %v9708_v7 = vld [vmem:[#allocation7 + $0xf] sm:$0x1f] }
 0x38e   :  { %8403 = vmatpush3.bf16.msra.mxu0 %v8402_v37  ;;  %8435 = vmatpush3.bf16.msra.mxu1 %v8434_v59  ;;  %v4192_v37 = vld [vmem:[#allocation8 + $0x18] sm:$0xff]  ;;  %v4241_v59 = vld [vmem:[#allocation8 + $0x1a0] sm:$0xff]  ;;  %v2890_v2 = vrot.slane %v9708_v7, %v9483_v50 }
 0x38f   :  { %8405 = vmatprep.subr.bf16.mxu0 %v8404_v9  ;;  %8437 = vmatprep.subr.bf16.mxu1 %v8436_v43  ;;  %v4242_v9 = vld [vmem:[#allocation8 + $0x1a8] sm:$0xff]  ;;  %v8450_v43 = vpack.c.bf16 %v4192_v37, %v4191_v11  ;;  %v4199_v11 = vld [vmem:[#allocation8 + $0x50] sm:$0xff]  ;;  %v8464_v37 = vpack.c.bf16 %v4216_v6, %v4215_v52  ;;  %v4201_v6 = vld [vmem:[#allocation8 + $0x60] sm:$0xff] }
 0x390   :  { %v8484_v15 = vpack.c.bf16 %v4242_v9, %v4241_v59  ;;  %v4200_v59 = vld [vmem:[#allocation8 + $0x58] sm:$0xff]  ;;  %v4249_v9 = vld [vmem:[#allocation8 + $0x1e0] sm:$0xff] }
 0x392   :  { %8407 = vmatpush3.bf16.msra.mxu0 %v8406_v13  ;;  %8439 = vmatpush3.bf16.msra.mxu1 %v8438_v39  ;;  %v4211_v13 = vld [vmem:[#allocation8 + $0xb0] sm:$0xff] }
 0x393   :  { %8409 = vmatprep.subr.bf16.mxu0 %v8408_v33  ;;  %8441 = vmatprep.subr.bf16.mxu1 %v8440_v32  ;;  %v4195_v32 = vld [vmem:[#allocation8 + $0x30] sm:$0xff] }
 0x396   :  { %8411 = vmatpush3.bf16.msra.mxu0 %v8410_v26  ;;  %8443 = vmatpush3.bf16.msra.mxu1 %v8442_v53  ;;  %v8458_v26 = vpack.c.bf16 %v4196_v16, %v4195_v32  ;;  %v8492_v53 = vpack.c.bf16 %v4246_v48, %v4245_v4 }
 0x397   :  { %8445 = vmatprep.subr.bf16.mxu0 %v8444_v24  ;;  %8477 = vmatprep.subr.bf16.mxu1 %v8476_v31  ;;  %v4229_v24 = vld [vmem:[#allocation8 + $0x140] sm:$0xff]  ;;  %v4230_v31 = vld [vmem:[#allocation8 + $0x148] sm:$0xff] }
 0x399   :  { %4094 = vmatmul.mubr.f32.vlgmr.msra.gmra.mrb[36].mxu0 %v9673_v1  ;;  %4169 = vmatmul.mubr.f32.vlgmr.msra.gmra.mrb[36].mxu1 %v9689_v35  ;;  %v4226_v1 = vld [vmem:[#allocation8 + $0x128] sm:$0xff] }
 0x39a   :  { %4098 = vmatprep.mubr.f32.mxu0 %v9677_v10  ;;  %4173 = vmatprep.mubr.f32.mxu1 %v9693_v40  ;;  %v4194_v35 = vld [vmem:[#allocation8 + $0x28] sm:$0xff]  ;;  %v4244_v10 = vld [vmem:[#allocation8 + $0x1b8] sm:$0xff]  ;;  %v8486_v39 = vpack.c.bf16 %v4226_v1, %v4225_v38  ;;  %v2894_v38 = vrot.slane %v9708_v7, %v9489_v56  ;;  %v8498_v1 = vpack.c.bf16 %v4232_v23, %v4231_v25  ;;  %v4251_v23 = vld [vmem:[#allocation8 + $0x1f0] sm:$0xff] }
 0x39b   :  { %8479 = vmatpush3.bf16.msra.mxu1 %v8478_v61  ;;  %8447 = vmatpush3.bf16.msra.mxu0 %v8446_v30  ;;  %v4212_v40 = vld [vmem:[#allocation8 + $0xb8] sm:$0xff]  ;;  %v8454_v33 = vpack.c.bf16 %v4194_v35, %v4193_v44  ;;  %v8488_v60 = vpack.c.bf16 %v4244_v10, %v4243_v54  ;;  %v8494_v61 = vpack.c.bf16 %v4230_v31, %v4229_v24  ;;  %v4233_v54 = vld [vmem:[#allocation8 + $0x160] sm:$0xff]  ;;  %v4234_v10 = vld [vmem:[#allocation8 + $0x168] sm:$0xff] }
 0x39c   :  { %8481 = vmatprep.subr.bf16.mxu1 %v8480_v63  ;;  %8449 = vmatprep.subr.bf16.mxu0 %v8448_v57  ;;  %v8462_v30 = vpack.c.bf16 %v4198_v22, %v4197_v29  ;;  %v8496_v63 = vpack.c.bf16 %v4248_v12, %v4247_v17  ;;  %v2882_v57 = vrot.slane %v9708_v7, %v9480_v49 }
 0x39d   :  { %4099 = vmatmul.mubr.f32.gmra.mrb[38].mxu0 %v9681_v62  ;;  %4174 = vmatmul.mubr.f32.gmra.mrb[38].mxu1 %v9697_v21  ;;  %v8456_v62 = vpack.c.bf16 %v4212_v40, %v4211_v13  ;;  %v8490_v21 = vpack.c.bf16 %v4228_v8, %v4227_v34  ;;  %v8500_v35 = vpack.c.bf16 %v4250_v47, %v4249_v9  ;;  %v4219_v9 = vld [vmem:[#allocation8 + $0xf0] sm:$0xff]  ;;  %v4220_v47 = vld [vmem:[#allocation8 + $0xf8] sm:$0xff] }
 0x39e   :  { %v8502_v16 = vpack.c.bf16 %v4234_v10, %v4233_v54  ;;  %v2898_v25 = vrot.slane %v9708_v7, %v9432_v46 }
 0x39f   :  { %8483 = vmatpush3.bf16.msra.mxu1 %v8482_v19  ;;  %8451 = vmatpush3.bf16.msra.mxu0 %v8450_v43  ;;  %v2886_v19 = vrot.slane %v9708_v7, %v9486_v55  ;;  %v4217_v43 = vld [vmem:[#allocation8 + $0xe0] sm:$0xff] }
 0x3a0   :  { %8485 = vmatprep.subr.bf16.mxu1 %v8484_v15  ;;  %8453 = vmatprep.subr.bf16.mxu0 %v8452_v27  ;;  %v4218_v15 = vld [vmem:[#allocation8 + $0xe8] sm:$0xff]  ;;  %v8466_v27 = vpack.c.bf16 %v4200_v59, %v4199_v11  ;;  %v4252_v11 = vld [vmem:[#allocation8 + $0x1f8] sm:$0xff] }
 0x3a1   :  { %v8504_v59 = vpack.c.bf16 %v4252_v11, %v4251_v23  ;;  %v4253_v23 = vld [vmem:[#allocation8 + $0x200] sm:$0xff]  ;;  %v4254_v11 = vld [vmem:[#allocation8 + $0x208] sm:$0xff] }
 0x3a3   :  { %8487 = vmatpush3.bf16.msra.mxu1 %v8486_v39  ;;  %8455 = vmatpush3.bf16.msra.mxu0 %v8454_v33  ;;  %v8468_v33 = vpack.c.bf16 %v4218_v15, %v4217_v43  ;;  %v8472_v15 = vpack.c.bf16 %v4220_v47, %v4219_v9 }
 0x3a4   :  { %8489 = vmatprep.subr.bf16.mxu1 %v8488_v60  ;;  %8457 = vmatprep.subr.bf16.mxu0 %v8456_v62 }
 0x3a7   :  { %8491 = vmatpush3.bf16.msra.mxu1 %v8490_v21  ;;  %8459 = vmatpush3.bf16.msra.mxu0 %v8458_v26 }
 0x3a8   :  { %8493 = vmatprep.subr.bf16.mxu1 %v8492_v53  ;;  %8461 = vmatprep.subr.bf16.mxu0 %v8460_v42 }
 0x3ab   :  { %8495 = vmatpush3.bf16.msra.mxu1 %v8494_v61  ;;  %8463 = vmatpush3.bf16.msra.mxu0 %v8462_v30  ;;  %v4202_v61 = vld [vmem:[#allocation8 + $0x68] sm:$0xff] }
 0x3ac   :  { %v3047_v44 = vpop.f32.mrb[24].mxu0  ;;  %8497 = vmatprep.subr.bf16.mxu1 %v8496_v63  ;;  %v3201_v40 = vpop.f32.mrb[24].mxu1  ;;  %8465 = vmatprep.subr.bf16.mxu0 %v8464_v37  ;;  %v8470_v30 = vpack.c.bf16 %v4202_v61, %v4201_v6 }
 0x3ad   :  { %v9718_v13 = vadd.f32 %v3047_v44, %v2882_v57  ;;  %v3049_v39 = vpop.f32.mrb[25].mxu0  ;;  %v9720_v60 = vadd.f32 %v3201_v40, %v2890_v2  ;;  %v3203_v8 = vpop.f32.mrb[25].mxu1  ;;  %v4204_v44 = vld [vmem:[#allocation8 + $0x78] sm:$0xff]  ;;  %v4518_v40 = vld [vmem:[#allocation8 + $0x300] sm:$0xff] }
 0x3ae   :  { %v9722_v34 = vadd.f32 %v3049_v39, %v2886_v19  ;;  %v9726_v62 = vadd.f32 %v3203_v8, %v2894_v38  ;;  %v4519_v39 = vld [vmem:[#allocation8 + $0x308] sm:$0xff] }
 0x3af   :  { %v3362_v32 = vmax.f32 %v9624_v36, %v9718_v13  ;;  %8499 = vmatpush3.bf16.msra.mxu1 %v8498_v1  ;;  %v3364_v4 = vmax.f32 %v9629_v0, %v9720_v60  ;;  %8467 = vmatpush3.bf16.msra.mxu0 %v8466_v27  ;;  %v4203_v1 = vld [vmem:[#allocation8 + $0x70] sm:$0xff] }
 0x3b0   :  { %v3363_v48 = vmax.f32 %v9634_v45, %v9722_v34  ;;  %v3053_v3 = vpop.f32.mrb[26].mxu0  ;;  %8501 = vmatprep.subr.bf16.mxu1 %v8500_v35  ;;  %v3365_v14 = vmax.f32 %v9639_v28, %v9726_v62  ;;  %v3207_v26 = vpop.f32.mrb[26].mxu1  ;;  %8469 = vmatprep.subr.bf16.mxu0 %v8468_v33  ;;  %v8474_v54 = vpack.c.bf16 %v4204_v44, %v4203_v1  ;;  %v4504_v45 = vld [vmem:[#allocation8 + $0x290] sm:$0xff]  ;;  %v4505_v34 = vld [vmem:[#allocation8 + $0x298] sm:$0xff] }
 0x3b1   :  { %v9734_v21 = vadd.f32 %v3053_v3, %v2882_v57  ;;  %v3055_v53 = vpop.f32.mrb[27].mxu0  ;;  %v9736_v24 = vadd.f32 %v3207_v26, %v2890_v2  ;;  %v3209_v29 = vpop.f32.mrb[27].mxu1  ;;  %v4235_v2 = vld [vmem:[#allocation8 + $0x170] sm:$0xff] }
 0x3b2   :  { %v9738_v31 = vadd.f32 %v3055_v53, %v2886_v19  ;;  %v9742_v22 = vadd.f32 %v3209_v29, %v2894_v38  ;;  %v4236_v38 = vld [vmem:[#allocation8 + $0x178] sm:$0xff] }
 0x3b3   :  { %v3367_v42 = vmax.f32 %v9644_v58, %v9734_v21  ;;  %8503 = vmatpush3.bf16.msra.mxu1 %v8502_v16  ;;  %v3369_v17 = vmax.f32 %v9649_v51, %v9736_v24  ;;  %8471 = vmatpush3.bf16.msra.mxu0 %v8470_v30  ;;  %v8506_v35 = vpack.c.bf16 %v4236_v38, %v4235_v2  ;;  %v4502_v38 = vld [vmem:[#allocation8 + $0x280] sm:$0xff]  ;;  %v4507_v24 = vld [vmem:[#allocation8 + $0x2a8] sm:$0xff] }
 0x3b4   :  { %v3368_v12 = vmax.f32 %v9654_v5, %v9738_v31  ;;  %v3370_v52 = vmax.f32 %v9659_v18, %v9742_v22  ;;  %8505 = vmatprep.subr.bf16.mxu1 %v8504_v59  ;;  %8473 = vmatprep.subr.bf16.mxu0 %v8472_v15  ;;  %v8540_v16 = vpack.c.bf16 %v4519_v39, %v4518_v40  ;;  %v4259_v31 = vld [vmem:[#allocation8 + $0x230] sm:$0xff]  ;;  %v4525_v18 = vld [vmem:[#allocation8 + $0x338] sm:$0xff] }
 0x3b5   :  { %v8546_v21 = vpack.c.bf16 %v4505_v34, %v4504_v45  ;;  %v4267_v45 = vld [vmem:[#allocation8 + $0x270] sm:$0xff]  ;;  %v4268_v34 = vld [vmem:[#allocation8 + $0x278] sm:$0xff] }
 0x3b7   :  { %8507 = vmatpush3.bf16.msra.mxu1 %v8506_v35  ;;  %8475 = vmatpush3.bf16.msra.mxu0 %v8474_v54  ;;  %v4503_v35 = vld [vmem:[#allocation8 + $0x288] sm:$0xff]  ;;  %v4255_v54 = vld [vmem:[#allocation8 + $0x210] sm:$0xff] }
 0x3b8   :  { %8541 = vmatprep.subr.bf16.mxu1 %v8540_v16 }
 0x3cc   :  { %v6079_v63 = vpop.f32.mrb[28].mxu0  ;;  %v6117_v37 = vpop.f32.mrb[28].mxu1 }
 0x3cd   :  { %v6080_v57 = vpop.f32.mrb[29].mxu0  ;;  %v6118_v43 = vpop.f32.mrb[29].mxu1 }
 0x3ce   :  { %v6081_v19 = vadd.f32 %v6080_v57, %v6079_v63  ;;  %v6119_v27 = vadd.f32 %v6118_v43, %v6117_v37  ;;  %v8508_v57 = vpack.c.bf16 %v4254_v11, %v4253_v23  ;;  %v9760_v37 = vld [vmem:[#allocation7 + $0x14] sm:$0x1f] }
 0x3cf   :  { %v3699_v59 = vrot.slane %v9760_v37, %v9480_v49  ;;  %v3707_v9 = vrot.slane %v9760_v37, %v9483_v50  ;;  %v3711_v47 = vrot.slane %v9760_v37, %v9489_v56  ;;  %v4256_v49 = vld [vmem:[#allocation8 + $0x218] sm:$0xff] }
 0x3d0   :  { %v3279_v7 = vadd.f32 %v6081_v19, %v2898_v25  ;;  %v6082_v10 = vpop.f32.mrb[30].mxu0  ;;  %v6120_v8 = vpop.f32.mrb[30].mxu1  ;;  %8509 = vmatprep.subr.bf16.mxu0 %v8508_v57  ;;  %v8512_v16 = vpack.c.bf16 %v4256_v49, %v4255_v54  ;;  %v4529_v54 = vld [vmem:[#allocation8 + $0x358] sm:$0xff] }
 0x3d1   :  { %v6083_v33 = vpop.f32.mrb[31].mxu0  ;;  %v6121_v53 = vpop.f32.mrb[31].mxu1 }
 0x3d2   :  { %v9752_v3 = vadd.f32 %v6119_v27, %v3279_v7  ;;  %v6084_v26 = vadd.f32 %v6083_v33, %v6082_v10  ;;  %v6122_v29 = vadd.f32 %v6121_v53, %v6120_v8  ;;  %v4520_v7 = vld [vmem:[#allocation8 + $0x310] sm:$0xff]  ;;  %v4521_v10 = vld [vmem:[#allocation8 + $0x318] sm:$0xff]  ;;  %v8542_v8 = vpack.c.bf16 %v4503_v35, %v4502_v38  ;;  %v4257_v53 = vld [vmem:[#allocation8 + $0x220] sm:$0xff] }
 0x3d3   :  { %v4528_v35 = vld [vmem:[#allocation8 + $0x350] sm:$0xff] }
 0x3d4   :  { %v3366_v6 = vmax.f32 %v9666_v41, %v9752_v3  ;;  %v3284_v61 = vadd.f32 %v6084_v26, %v2898_v25  ;;  %v3703_v25 = vrot.slane %v9760_v37, %v9486_v55  ;;  %v4573_v41 = vld [vmem:[#allocation8 + $0x4b8] sm:$0xff] }
 0x3d6   :  { %v9756_v30 = vadd.f32 %v6122_v29, %v3284_v61  ;;  %v4258_v29 = vld [vmem:[#allocation8 + $0x228] sm:$0xff] }
 0x3d7   :  { %v8516_v5 = vpack.c.bf16 %v4258_v29, %v4257_v53  ;;  %v4516_v53 = vld [vmem:[#allocation8 + $0x2f0] sm:$0xff]  ;;  %v8536_v29 = vpack.c.bf16 %v4268_v34, %v4267_v45 }
 0x3d8   :  { %v3371_v63 = vmax.f32 %v9671_v20, %v9756_v30  ;;  %v4574_v30 = vld [vmem:[#allocation8 + $0x4c0] sm:$0xff] }
 0x44c   :  { %v3864_v2 = vpop.f32.mrb[32].mxu0  ;;  %v4018_v43 = vpop.f32.mrb[32].mxu1 }
 0x44d   :  { %v8956_v19 = vadd.f32 %v3864_v2, %v3699_v59  ;;  %v3866_v15 = vpop.f32.mrb[33].mxu0  ;;  %v8960_v1 = vadd.f32 %v4018_v43, %v3707_v9  ;;  %v4020_v27 = vpop.f32.mrb[33].mxu1  ;;  %v4527_v2 = vld [vmem:[#allocation8 + $0x348] sm:$0xff]  ;;  %v4510_v43 = vld [vmem:[#allocation8 + $0x2c0] sm:$0xff] }
 0x44e   :  { %v8957_v44 = vadd.f32 %v3866_v15, %v3703_v25  ;;  %v8961_v55 = vadd.f32 %v4020_v27, %v3711_v47  ;;  %v4264_v27 = vld [vmem:[#allocation8 + $0x258] sm:$0xff] }
 0x44f   :  { %v9773_v50 = vmax.f32 %v3362_v32, %v8956_v19  ;;  %v9778_v56 = vmax.f32 %v3364_v4, %v8960_v1  ;;  %v8544_v4 = vpack.c.bf16 %v4521_v10, %v4520_v7  ;;  %v4511_v1 = vld [vmem:[#allocation8 + $0x2c8] sm:$0xff]  ;;  %v8560_v10 = vpack.c.bf16 %v4529_v54, %v4528_v35  ;;  %v4570_v35 = vld [vmem:[#allocation8 + $0x4a0] sm:$0xff] }
 0x450   :  { %v9783_v40 = vmax.f32 %v3363_v48, %v8957_v44  ;;  %v3870_v39 = vpop.f32.mrb[34].mxu0  ;;  %v9788_v36 = vmax.f32 %v3365_v14, %v8961_v55  ;;  %v4024_v32 = vpop.f32.mrb[34].mxu1  ;;  %v4522_v48 = vld [vmem:[#allocation8 + $0x320] sm:$0xff]  ;;  %v4523_v14 = vld [vmem:[#allocation8 + $0x328] sm:$0xff]  ;;  %v4263_v44 = vld [vmem:[#allocation8 + $0x250] sm:$0xff]  ;;  %v8558_v49 = vpack.c.bf16 %v4511_v1, %v4510_v43 }
 0x451   :  { %v8958_v13 = vadd.f32 %v3870_v39, %v3699_v59  ;;  %v3872_v33 = vpop.f32.mrb[35].mxu0  ;;  %v8962_v26 = vadd.f32 %v4024_v32, %v3707_v9  ;;  %v4026_v60 = vpop.f32.mrb[35].mxu1  ;;  %v8548_v51 = vpack.c.bf16 %v4523_v14, %v4522_v48  ;;  %v4509_v59 = vld [vmem:[#allocation8 + $0x2b8] sm:$0xff]  ;;  %v4261_v9 = vld [vmem:[#allocation8 + $0x240] sm:$0xff]  ;;  %v4512_v55 = vld [vmem:[#allocation8 + $0x2d0] sm:$0xff]  ;;  %v8528_v7 = vpack.c.bf16 %v4264_v27, %v4263_v44 }
 0x452   :  { %v8959_v0 = vadd.f32 %v3872_v33, %v3703_v25  ;;  %4340 = vmatprep.mubr.f32.mxu0 %v9783_v40  ;;  %v8963_v62 = vadd.f32 %v4026_v60, %v3711_v47  ;;  %4415 = vmatprep.mubr.f32.mxu1 %v9788_v36  ;;  %v4262_v25 = vld [vmem:[#allocation8 + $0x248] sm:$0xff]  ;;  %v4526_v47 = vld [vmem:[#allocation8 + $0x340] sm:$0xff]  ;;  %v4513_v39 = vld [vmem:[#allocation8 + $0x2d8] sm:$0xff] }
 0x453   :  { %v9794_v28 = vmax.f32 %v3367_v42, %v8958_v13  ;;  %4341 = vmatmul.mubr.f32.vlgmr.msra.gmra.mrb[40].mxu0 %v9773_v50  ;;  %v9801_v61 = vmax.f32 %v3369_v17, %v8962_v26  ;;  %4416 = vmatmul.mubr.f32.vlgmr.msra.gmra.mrb[40].mxu1 %v9778_v56  ;;  %v4506_v42 = vld [vmem:[#allocation8 + $0x2a0] sm:$0xff]  ;;  %v4260_v17 = vld [vmem:[#allocation8 + $0x238] sm:$0xff]  ;;  %v8524_v15 = vpack.c.bf16 %v4262_v25, %v4261_v9  ;;  %v4266_v32 = vld [vmem:[#allocation8 + $0x268] sm:$0xff] }
 0x454   :  { %v9806_v23 = vmax.f32 %v3368_v12, %v8959_v0  ;;  %8511 = vmatpush3.bf16.msra.mxu0 %v8508_v57  ;;  %v9812_v58 = vmax.f32 %v3370_v52, %v8963_v62  ;;  %8543 = vmatpush3.bf16.msra.mxu1 %v8542_v8  ;;  %v4524_v12 = vld [vmem:[#allocation8 + $0x330] sm:$0xff]  ;;  %v8550_v22 = vpack.c.bf16 %v4507_v24, %v4506_v42  ;;  %v4265_v13 = vld [vmem:[#allocation8 + $0x260] sm:$0xff]  ;;  %v4531_v8 = vld [vmem:[#allocation8 + $0x368] sm:$0xff] }
 0x455   :  { %8513 = vmatprep.subr.bf16.mxu0 %v8512_v16  ;;  %8545 = vmatprep.subr.bf16.mxu1 %v8544_v4  ;;  %v4508_v52 = vld [vmem:[#allocation8 + $0x2b0] sm:$0xff]  ;;  %v8520_v11 = vpack.c.bf16 %v4260_v17, %v4259_v31  ;;  %v8552_v57 = vpack.c.bf16 %v4525_v18, %v4524_v12  ;;  %v8556_v38 = vpack.c.bf16 %v4527_v2, %v4526_v47  ;;  %v4530_v33 = vld [vmem:[#allocation8 + $0x360] sm:$0xff]  ;;  %v4515_v4 = vld [vmem:[#allocation8 + $0x2e8] sm:$0xff] }
 0x456   :  { %4345 = vmatprep.mubr.f32.mxu0 %v9806_v23  ;;  %4420 = vmatprep.mubr.f32.mxu1 %v9812_v58  ;;  %v8554_v19 = vpack.c.bf16 %v4509_v59, %v4508_v52  ;;  %v4514_v26 = vld [vmem:[#allocation8 + $0x2e0] sm:$0xff]  ;;  %v8532_v0 = vpack.c.bf16 %v4266_v32, %v4265_v13  ;;  %v8564_v60 = vpack.c.bf16 %v4531_v8, %v4530_v33  ;;  %v4532_v48 = vld [vmem:[#allocation8 + $0x370] sm:$0xff]  ;;  %v4533_v62 = vld [vmem:[#allocation8 + $0x378] sm:$0xff] }
 0x457   :  { %4346 = vmatmul.mubr.f32.gmra.mrb[42].mxu0 %v9794_v28  ;;  %4421 = vmatmul.mubr.f32.gmra.mrb[42].mxu1 %v9801_v61  ;;  %v8566_v14 = vpack.c.bf16 %v4515_v4, %v4514_v26  ;;  %v4517_v42 = vld [vmem:[#allocation8 + $0x2f8] sm:$0xff]  ;;  %v4551_v24 = vld [vmem:[#allocation8 + $0x408] sm:$0xff]  ;;  %v3715_v12 = vrot.slane %v9760_v37, %v9432_v46  ;;  %v4568_v47 = vld [vmem:[#allocation8 + $0x490] sm:$0xff] }
 0x458   :  { %8515 = vmatpush3.bf16.msra.mxu0 %v8512_v16  ;;  %8547 = vmatpush3.bf16.msra.mxu1 %v8546_v21  ;;  %v8562_v16 = vpack.c.bf16 %v4513_v39, %v4512_v55  ;;  %v8568_v21 = vpack.c.bf16 %v4533_v62, %v4532_v48  ;;  %v4567_v31 = vld [vmem:[#allocation8 + $0x488] sm:$0xff]  ;;  %v8570_v52 = vpack.c.bf16 %v4517_v42, %v4516_v53  ;;  %v4569_v2 = vld [vmem:[#allocation8 + $0x498] sm:$0xff]  ;;  %v4552_v39 = vld [vmem:[#allocation8 + $0x410] sm:$0xff] }
 0x459   :  { %4654 = vmatprep.mubr.f32.mxu1 %v9783_v40  ;;  %8549 = vmatprep.subr.bf16.mxu1 %v8548_v51  ;;  %v4550_v51 = vld [vmem:[#allocation8 + $0x400] sm:$0xff]  ;;  %v8608_v44 = vpack.c.bf16 %v4569_v2, %v4568_v47  ;;  %v4571_v54 = vld [vmem:[#allocation8 + $0x4a8] sm:$0xff]  ;;  %v4553_v13 = vld [vmem:[#allocation8 + $0x418] sm:$0xff] }
 0x45a   :  { %8517 = vmatprep.subr.bf16.mxu0 %v8516_v5  ;;  %v8612_v33 = vpack.c.bf16 %v4571_v54, %v4570_v35  ;;  %v4536_v26 = vld [vmem:[#allocation8 + $0x390] sm:$0xff]  ;;  %v4555_v4 = vld [vmem:[#allocation8 + $0x428] sm:$0xff]  ;;  %v4538_v48 = vld [vmem:[#allocation8 + $0x3a0] sm:$0xff] }
 0x45b   :  { %v4539_v62 = vld [vmem:[#allocation8 + $0x3a8] sm:$0xff]  ;;  %v4557_v53 = vld [vmem:[#allocation8 + $0x438] sm:$0xff]  ;;  %v4576_v42 = vld [vmem:[#allocation8 + $0x4d0] sm:$0xff] }
 0x45c   :  { %8519 = vmatpush3.bf16.msra.mxu0 %v8516_v5  ;;  %8551 = vmatpush3.bf16.msra.mxu1 %v8550_v22  ;;  %v4566_v5 = vld [vmem:[#allocation8 + $0x480] sm:$0xff]  ;;  %v4561_v47 = vld [vmem:[#allocation8 + $0x458] sm:$0xff] }
 0x45d   :  { %8521 = vmatprep.subr.bf16.mxu0 %v8520_v11  ;;  %8553 = vmatprep.subr.bf16.mxu1 %v8552_v57  ;;  %v8604_v9 = vpack.c.bf16 %v4567_v31, %v4566_v5  ;;  %v4540_v5 = vld [vmem:[#allocation8 + $0x3b0] sm:$0xff]  ;;  %v4541_v31 = vld [vmem:[#allocation8 + $0x3b8] sm:$0xff]  ;;  %v4866_v54 = vld [vmem:[#allocation8 + $0x680] sm:$0xff] }
 0x460   :  { %8523 = vmatpush3.bf16.msra.mxu0 %v8520_v11  ;;  %8555 = vmatpush3.bf16.msra.mxu1 %v8554_v19  ;;  %v8572_v11 = vpack.c.bf16 %v4551_v24, %v4550_v51  ;;  %v4577_v51 = vld [vmem:[#allocation8 + $0x4d8] sm:$0xff] }
 0x461   :  { %8525 = vmatprep.subr.bf16.mxu0 %v8524_v15  ;;  %8557 = vmatprep.subr.bf16.mxu1 %v8556_v38 }
 0x464   :  { %8527 = vmatpush3.bf16.msra.mxu0 %v8524_v15  ;;  %8559 = vmatpush3.bf16.msra.mxu1 %v8558_v49 }
 0x465   :  { %8529 = vmatprep.subr.bf16.mxu0 %v8528_v7  ;;  %8561 = vmatprep.subr.bf16.mxu1 %v8560_v10  ;;  %v4535_v10 = vld [vmem:[#allocation8 + $0x388] sm:$0xff] }
 0x468   :  { %8531 = vmatpush3.bf16.msra.mxu0 %v8528_v7  ;;  %8563 = vmatpush3.bf16.msra.mxu1 %v8562_v16  ;;  %v4534_v7 = vld [vmem:[#allocation8 + $0x380] sm:$0xff]  ;;  %v4572_v16 = vld [vmem:[#allocation8 + $0x4b0] sm:$0xff] }
 0x469   :  { %8533 = vmatprep.subr.bf16.mxu0 %v8532_v0  ;;  %8565 = vmatprep.subr.bf16.mxu1 %v8564_v60  ;;  %v8574_v8 = vpack.c.bf16 %v4535_v10, %v4534_v7  ;;  %v4554_v60 = vld [vmem:[#allocation8 + $0x420] sm:$0xff]  ;;  %v8616_v45 = vpack.c.bf16 %v4573_v41, %v4572_v16  ;;  %v4851_v16 = vld [vmem:[#allocation8 + $0x608] sm:$0xff] }
 0x46a   :  { %v8580_v34 = vpack.c.bf16 %v4555_v4, %v4554_v60  ;;  %v4546_v10 = vld [vmem:[#allocation8 + $0x3e0] sm:$0xff]  ;;  %v4548_v60 = vld [vmem:[#allocation8 + $0x3f0] sm:$0xff]  ;;  %v4549_v4 = vld [vmem:[#allocation8 + $0x3f8] sm:$0xff] }
 0x46c   :  { %v6155_v17 = vpop.f32.mrb[36].mxu0  ;;  %8535 = vmatpush3.bf16.msra.mxu0 %v8532_v0  ;;  %8567 = vmatpush3.bf16.msra.mxu1 %v8566_v14  ;;  %v6193_v22 = vpop.f32.mrb[36].mxu1  ;;  %v4537_v0 = vld [vmem:[#allocation8 + $0x398] sm:$0xff]  ;;  %v4556_v14 = vld [vmem:[#allocation8 + $0x430] sm:$0xff] }
 0x46d   :  { %v6156_v18 = vpop.f32.mrb[37].mxu0  ;;  %8537 = vmatprep.subr.bf16.mxu0 %v8536_v29  ;;  %v6194_v59 = vpop.f32.mrb[37].mxu1  ;;  %8569 = vmatprep.subr.bf16.mxu1 %v8568_v21  ;;  %v8578_v20 = vpack.c.bf16 %v4537_v0, %v4536_v26  ;;  %v8582_v21 = vpack.c.bf16 %v4539_v62, %v4538_v48  ;;  %v8584_v24 = vpack.c.bf16 %v4557_v53, %v4556_v14  ;;  %v4869_v26 = vld [vmem:[#allocation8 + $0x698] sm:$0xff]  ;;  %v4870_v14 = vld [vmem:[#allocation8 + $0x6a0] sm:$0xff]  ;;  %v4871_v53 = vld [vmem:[#allocation8 + $0x6a8] sm:$0xff] }
 0x46e   :  { %v6157_v57 = vadd.f32 %v6156_v18, %v6155_v17  ;;  %v6195_v25 = vadd.f32 %v6194_v59, %v6193_v22  ;;  %v4558_v17 = vld [vmem:[#allocation8 + $0x440] sm:$0xff]  ;;  %v8624_v18 = vpack.c.bf16 %v4577_v51, %v4576_v42  ;;  %v8586_v22 = vpack.c.bf16 %v4541_v31, %v4540_v5  ;;  %v4853_v48 = vld [vmem:[#allocation8 + $0x618] sm:$0xff]  ;;  %v4819_v42 = vld [vmem:[#allocation8 + $0x508] sm:$0xff] }
 0x46f   :  { %v4542_v59 = vld [vmem:[#allocation8 + $0x3c0] sm:$0xff]  ;;  %v8602_v62 = vpack.c.bf16 %v4549_v4, %v4548_v60  ;;  %v4837_v5 = vld [vmem:[#allocation8 + $0x598] sm:$0xff]  ;;  %v8676_v31 = vpack.c.bf16 %v4871_v53, %v4870_v14  ;;  %v4860_v60 = vld [vmem:[#allocation8 + $0x650] sm:$0xff] }
 0x470   :  { %v4096_v19 = vadd.f32 %v6157_v57, %v3715_v12  ;;  %v6158_v43 = vpop.f32.mrb[38].mxu0  ;;  %8539 = vmatpush3.bf16.msra.mxu0 %v8536_v29  ;;  %8571 = vmatpush3.bf16.msra.mxu1 %v8570_v52  ;;  %v6196_v46 = vpop.f32.mrb[38].mxu1  ;;  %v4578_v52 = vld [vmem:[#allocation8 + $0x4e0] sm:$0xff]  ;;  %v4861_v4 = vld [vmem:[#allocation8 + $0x658] sm:$0xff]  ;;  %v4844_v14 = vld [vmem:[#allocation8 + $0x5d0] sm:$0xff] }
 0x471   :  { %v6159_v15 = vpop.f32.mrb[39].mxu0  ;;  %8573 = vmatprep.subr.bf16.mxu0 %v8572_v11  ;;  %v6197_v1 = vpop.f32.mrb[39].mxu1  ;;  %8605 = vmatprep.subr.bf16.mxu1 %v8604_v9  ;;  %v4579_v11 = vld [vmem:[#allocation8 + $0x4e8] sm:$0xff]  ;;  %v4845_v53 = vld [vmem:[#allocation8 + $0x5d8] sm:$0xff] }
 0x472   :  { %v4171_v37 = vadd.f32 %v6195_v25, %v4096_v19  ;;  %v6160_v38 = vadd.f32 %v6159_v15, %v6158_v43  ;;  %v6198_v27 = vadd.f32 %v6197_v1, %v6196_v46  ;;  %v4560_v25 = vld [vmem:[#allocation8 + $0x450] sm:$0xff]  ;;  %v8628_v2 = vpack.c.bf16 %v4579_v11, %v4578_v52  ;;  %v4581_v15 = vld [vmem:[#allocation8 + $0x4f8] sm:$0xff]  ;;  %v4562_v1 = vld [vmem:[#allocation8 + $0x460] sm:$0xff] }
 0x473   :  { %4655 = vmatmul.mubr.f32.vlgmr.msra.gmra.mrb[44].mxu1 %v9773_v50  ;;  %v4580_v43 = vld [vmem:[#allocation8 + $0x4f0] sm:$0xff]  ;;  %v8592_v46 = vpack.c.bf16 %v4561_v47, %v4560_v25  ;;  %v4873_v52 = vld [vmem:[#allocation8 + $0x6b8] sm:$0xff]  ;;  %v4838_v25 = vld [vmem:[#allocation8 + $0x5a0] sm:$0xff] }
 0x474   :  { %v9824_v49 = vmax.f32 %v3366_v6, %v4171_v37  ;;  %v4101_v55 = vadd.f32 %v6160_v38, %v3715_v12  ;;  %4659 = vmatprep.mubr.f32.mxu1 %v9806_v23  ;;  %8607 = vmatpush3.bf16.msra.mxu1 %v8604_v9  ;;  %v8576_v6 = vpack.c.bf16 %v4553_v13, %v4552_v39  ;;  %v4559_v12 = vld [vmem:[#allocation8 + $0x448] sm:$0xff]  ;;  %v4544_v37 = vld [vmem:[#allocation8 + $0x3d0] sm:$0xff]  ;;  %v4545_v38 = vld [vmem:[#allocation8 + $0x3d8] sm:$0xff] }
 0x475   :  { %8609 = vmatprep.subr.bf16.mxu1 %v8608_v44  ;;  %v8588_v57 = vpack.c.bf16 %v4559_v12, %v4558_v17  ;;  %v4543_v9 = vld [vmem:[#allocation8 + $0x3c8] sm:$0xff]  ;;  %v8594_v35 = vpack.c.bf16 %v4545_v38, %v4544_v37  ;;  %v4564_v13 = vld [vmem:[#allocation8 + $0x470] sm:$0xff]  ;;  %v4854_v17 = vld [vmem:[#allocation8 + $0x620] sm:$0xff] }
 0x476   :  { %v4176_v32 = vadd.f32 %v6198_v27, %v4101_v55  ;;  %6701 = vmatprep.mubr.f32.mxu0 %v9824_v49  ;;  %v8590_v19 = vpack.c.bf16 %v4543_v9, %v4542_v59  ;;  %v8632_v27 = vpack.c.bf16 %v4581_v15, %v4580_v43  ;;  %v4867_v55 = vld [vmem:[#allocation8 + $0x688] sm:$0xff]  ;;  %v4821_v59 = vld [vmem:[#allocation8 + $0x518] sm:$0xff] }
 0x477   :  { %4660 = vmatmul.mubr.f32.gmra.mrb[46].mxu1 %v9794_v28  ;;  %v4547_v39 = vld [vmem:[#allocation8 + $0x3e8] sm:$0xff]  ;;  %v4857_v43 = vld [vmem:[#allocation8 + $0x638] sm:$0xff] }
 0x478   :  { %v9832_v3 = vmax.f32 %v3371_v63, %v4176_v32  ;;  %8611 = vmatpush3.bf16.msra.mxu1 %v8608_v44  ;;  %6736 = vmatprep.mubr.f32.mxu1 %v9824_v49  ;;  %v4575_v63 = vld [vmem:[#allocation8 + $0x4c8] sm:$0xff]  ;;  %v4565_v32 = vld [vmem:[#allocation8 + $0x478] sm:$0xff]  ;;  %v8598_v41 = vpack.c.bf16 %v4547_v39, %v4546_v10 }
 0x479   :  { %8613 = vmatprep.subr.bf16.mxu1 %v8612_v33  ;;  %v8620_v29 = vpack.c.bf16 %v4575_v63, %v4574_v30  ;;  %v4563_v44 = vld [vmem:[#allocation8 + $0x468] sm:$0xff]  ;;  %v8600_v0 = vpack.c.bf16 %v4565_v32, %v4564_v13  ;;  %v4876_v13 = vld [vmem:[#allocation8 + $0x6d0] sm:$0xff]  ;;  %v4877_v32 = vld [vmem:[#allocation8 + $0x6d8] sm:$0xff] }
 0x47a   :  { %6702 = vmatmul.mubr.f32.vlgmr.msra.gmra.mrb[44].mxu0 %v9832_v3  ;;  %v8596_v7 = vpack.c.bf16 %v4563_v44, %v4562_v1  ;;  %v4835_v30 = vld [vmem:[#allocation8 + $0x588] sm:$0xff]  ;;  %v4822_v1 = vld [vmem:[#allocation8 + $0x520] sm:$0xff] }
 0x47b   :  { %8575 = vmatpush3.bf16.msra.mxu0 %v8574_v8  ;;  %4729 = vmatprep.mubr.f32.mxu0 %v9788_v36  ;;  %v4850_v8 = vld [vmem:[#allocation8 + $0x600] sm:$0xff]  ;;  %v4855_v12 = vld [vmem:[#allocation8 + $0x628] sm:$0xff] }
 0x47c   :  { %8577 = vmatprep.subr.bf16.mxu0 %v8576_v6  ;;  %8615 = vmatpush3.bf16.msra.mxu1 %v8612_v33  ;;  %v8668_v33 = vpack.c.bf16 %v4867_v55, %v4866_v54  ;;  %v4868_v6 = vld [vmem:[#allocation8 + $0x690] sm:$0xff]  ;;  %v8678_v9 = vpack.c.bf16 %v4855_v12, %v4854_v17  ;;  %v4839_v47 = vld [vmem:[#allocation8 + $0x5a8] sm:$0xff]  ;;  %v4841_v54 = vld [vmem:[#allocation8 + $0x5b8] sm:$0xff] }
 0x47d   :  { %8617 = vmatprep.subr.bf16.mxu1 %v8616_v45  ;;  %v8672_v63 = vpack.c.bf16 %v4869_v26, %v4868_v6  ;;  %v4875_v37 = vld [vmem:[#allocation8 + $0x6c8] sm:$0xff]  ;;  %v8644_v38 = vpack.c.bf16 %v4839_v47, %v4838_v25  ;;  %v4842_v6 = vld [vmem:[#allocation8 + $0x5c0] sm:$0xff]  ;;  %v4828_v17 = vld [vmem:[#allocation8 + $0x550] sm:$0xff] }
 0x47e   :  { %v4823_v44 = vld [vmem:[#allocation8 + $0x528] sm:$0xff]  ;;  %v4829_v12 = vld [vmem:[#allocation8 + $0x558] sm:$0xff]  ;;  %v5150_v25 = vld [vmem:[#allocation8 + $0x800] sm:$0xff] }
 0x47f   :  { %8579 = vmatpush3.bf16.msra.mxu0 %v8578_v20  ;;  %v4834_v20 = vld [vmem:[#allocation8 + $0x580] sm:$0xff]  ;;  %v4859_v10 = vld [vmem:[#allocation8 + $0x648] sm:$0xff]  ;;  %v8646_v39 = vpack.c.bf16 %v4823_v44, %v4822_v1 }
 0x480   :  { %8581 = vmatprep.subr.bf16.mxu0 %v8580_v34  ;;  %8619 = vmatpush3.bf16.msra.mxu1 %v8616_v45  ;;  %v8670_v45 = vpack.c.bf16 %v4851_v16, %v4850_v8  ;;  %v4852_v34 = vld [vmem:[#allocation8 + $0x610] sm:$0xff]  ;;  %v4825_v16 = vld [vmem:[#allocation8 + $0x538] sm:$0xff]  ;;  %v4843_v26 = vld [vmem:[#allocation8 + $0x5c8] sm:$0xff] }
 0x481   :  { %8621 = vmatprep.subr.bf16.mxu1 %v8620_v29  ;;  %v8674_v51 = vpack.c.bf16 %v4853_v48, %v4852_v34  ;;  %v4824_v8 = vld [vmem:[#allocation8 + $0x530] sm:$0xff]  ;;  %v4826_v34 = vld [vmem:[#allocation8 + $0x540] sm:$0xff]  ;;  %v4827_v48 = vld [vmem:[#allocation8 + $0x548] sm:$0xff] }
 0x482   :  { %v5151_v47 = vld [vmem:[#allocation8 + $0x808] sm:$0xff]  ;;  %v5134_v1 = vld [vmem:[#allocation8 + $0x780] sm:$0xff] }
 0x483   :  { %8583 = vmatpush3.bf16.msra.mxu0 %v8582_v21  ;;  %v4818_v21 = vld [vmem:[#allocation8 + $0x500] sm:$0xff]  ;;  %v5135_v44 = vld [vmem:[#allocation8 + $0x788] sm:$0xff] }
 0x484   :  { %8585 = vmatprep.subr.bf16.mxu0 %v8584_v24  ;;  %8623 = vmatpush3.bf16.msra.mxu1 %v8620_v29  ;;  %v8636_v29 = vpack.c.bf16 %v4835_v30, %v4834_v20  ;;  %v4836_v24 = vld [vmem:[#allocation8 + $0x590] sm:$0xff]  ;;  %v4878_v20 = vld [vmem:[#allocation8 + $0x6e0] sm:$0xff]  ;;  %v4879_v30 = vld [vmem:[#allocation8 + $0x6e8] sm:$0xff] }
 0x485   :  { %8625 = vmatprep.subr.bf16.mxu1 %v8624_v18  ;;  %v8640_v11 = vpack.c.bf16 %v4837_v5, %v4836_v24  ;;  %v4880_v24 = vld [vmem:[#allocation8 + $0x6f0] sm:$0xff]  ;;  %v4881_v5 = vld [vmem:[#allocation8 + $0x6f8] sm:$0xff] }
 0x487   :  { %8587 = vmatpush3.bf16.msra.mxu0 %v8586_v22  ;;  %v4872_v22 = vld [vmem:[#allocation8 + $0x6b0] sm:$0xff] }
 0x488   :  { %8589 = vmatprep.subr.bf16.mxu0 %v8588_v57  ;;  %8627 = vmatpush3.bf16.msra.mxu1 %v8624_v18  ;;  %v8638_v18 = vpack.c.bf16 %v4819_v42, %v4818_v21  ;;  %v4820_v57 = vld [vmem:[#allocation8 + $0x510] sm:$0xff]  ;;  %v4862_v21 = vld [vmem:[#allocation8 + $0x660] sm:$0xff]  ;;  %v4863_v42 = vld [vmem:[#allocation8 + $0x668] sm:$0xff] }
 0x489   :  { %8629 = vmatprep.subr.bf16.mxu1 %v8628_v2  ;;  %v8642_v15 = vpack.c.bf16 %v4821_v59, %v4820_v57  ;;  %v4864_v57 = vld [vmem:[#allocation8 + $0x670] sm:$0xff]  ;;  %v4865_v59 = vld [vmem:[#allocation8 + $0x678] sm:$0xff] }
 0x48b   :  { %8591 = vmatpush3.bf16.msra.mxu0 %v8590_v19  ;;  %v4856_v19 = vld [vmem:[#allocation8 + $0x630] sm:$0xff] }
 0x48c   :  { %8593 = vmatprep.subr.bf16.mxu0 %v8592_v46  ;;  %8631 = vmatpush3.bf16.msra.mxu1 %v8628_v2  ;;  %v8680_v2 = vpack.c.bf16 %v4873_v52, %v4872_v22  ;;  %v4874_v46 = vld [vmem:[#allocation8 + $0x6c0] sm:$0xff]  ;;  %v4847_v52 = vld [vmem:[#allocation8 + $0x5e8] sm:$0xff] }
 0x48d   :  { %8633 = vmatprep.subr.bf16.mxu1 %v8632_v27  ;;  %v8684_v55 = vpack.c.bf16 %v4875_v37, %v4874_v46  ;;  %v4846_v22 = vld [vmem:[#allocation8 + $0x5e0] sm:$0xff]  ;;  %v4848_v46 = vld [vmem:[#allocation8 + $0x5f0] sm:$0xff]  ;;  %v4849_v37 = vld [vmem:[#allocation8 + $0x5f8] sm:$0xff] }
 0x48f   :  { %8595 = vmatpush3.bf16.msra.mxu0 %v8594_v35  ;;  %v4840_v35 = vld [vmem:[#allocation8 + $0x5b0] sm:$0xff] }
 0x490   :  { %8597 = vmatprep.subr.bf16.mxu0 %v8596_v7  ;;  %8635 = vmatpush3.bf16.msra.mxu1 %v8632_v27  ;;  %v8682_v27 = vpack.c.bf16 %v4857_v43, %v4856_v19  ;;  %v4858_v7 = vld [vmem:[#allocation8 + $0x640] sm:$0xff]  ;;  %v4831_v43 = vld [vmem:[#allocation8 + $0x568] sm:$0xff] }
 0x491   :  { %8669 = vmatprep.subr.bf16.mxu1 %v8668_v33  ;;  %v8648_v33 = vpack.c.bf16 %v4841_v54, %v4840_v35  ;;  %v4830_v19 = vld [vmem:[#allocation8 + $0x560] sm:$0xff]  ;;  %v5152_v35 = vld [vmem:[#allocation8 + $0x810] sm:$0xff]  ;;  %v5153_v54 = vld [vmem:[#allocation8 + $0x818] sm:$0xff] }
 0x493   :  { %8599 = vmatpush3.bf16.msra.mxu0 %v8598_v41  ;;  %6737 = vmatmul.mubr.f32.vlgmr.msra.gmra.mrb[48].mxu1 %v9832_v3  ;;  %v8686_v41 = vpack.c.bf16 %v4859_v10, %v4858_v7  ;;  %v4832_v7 = vld [vmem:[#allocation8 + $0x570] sm:$0xff]  ;;  %v4833_v10 = vld [vmem:[#allocation8 + $0x578] sm:$0xff] }
 0x494   :  { %8601 = vmatprep.subr.bf16.mxu0 %v8600_v0  ;;  %8671 = vmatpush3.bf16.msra.mxu1 %v8670_v45  ;;  %v8688_v0 = vpack.c.bf16 %v4877_v32, %v4876_v13  ;;  %v8650_v45 = vpack.c.bf16 %v4825_v16, %v4824_v8  ;;  %v4882_v13 = vld [vmem:[#allocation8 + $0x700] sm:$0xff]  ;;  %v4883_v32 = vld [vmem:[#allocation8 + $0x708] sm:$0xff]  ;;  %v5136_v8 = vld [vmem:[#allocation8 + $0x790] sm:$0xff] }
 0x495   :  { %5045 = vmatprep.mubr.f32.mxu1 %v9788_v36  ;;  %8673 = vmatprep.subr.bf16.mxu1 %v8672_v63  ;;  %v8652_v63 = vpack.c.bf16 %v4843_v26, %v4842_v6  ;;  %v5137_v16 = vld [vmem:[#allocation8 + $0x798] sm:$0xff]  ;;  %v5154_v6 = vld [vmem:[#allocation8 + $0x820] sm:$0xff]  ;;  %v5155_v26 = vld [vmem:[#allocation8 + $0x828] sm:$0xff] }
 0x497   :  { %8603 = vmatpush3.bf16.msra.mxu0 %v8602_v62  ;;  %v8690_v62 = vpack.c.bf16 %v4861_v4, %v4860_v60  ;;  %v8738_v60 = vpack.c.bf16 %v5137_v16, %v5136_v8  ;;  %v4884_v4 = vld [vmem:[#allocation8 + $0x710] sm:$0xff] }
 0x498   :  { %8637 = vmatprep.subr.bf16.mxu0 %v8636_v29  ;;  %8675 = vmatpush3.bf16.msra.mxu1 %v8674_v51  ;;  %v8692_v29 = vpack.c.bf16 %v4879_v30, %v4878_v20  ;;  %v8654_v51 = vpack.c.bf16 %v4827_v48, %v4826_v34  ;;  %v8740_v20 = vpack.c.bf16 %v5155_v26, %v5154_v6  ;;  %v5138_v30 = vld [vmem:[#allocation8 + $0x7a0] sm:$0xff]  ;;  %v5156_v34 = vld [vmem:[#allocation8 + $0x830] sm:$0xff]  ;;  %v5157_v48 = vld [vmem:[#allocation8 + $0x838] sm:$0xff] }
 0x499   :  { %8677 = vmatprep.subr.bf16.mxu1 %v8676_v31  ;;  %v8656_v31 = vpack.c.bf16 %v4845_v53, %v4844_v14  ;;  %v4886_v53 = vld [vmem:[#allocation8 + $0x720] sm:$0xff]  ;;  %v5148_v16 = vld [vmem:[#allocation8 + $0x7f0] sm:$0xff]  ;;  %v5199_v26 = vld [vmem:[#allocation8 + $0x988] sm:$0xff] }
 0x49a   :  { %4730 = vmatmul.mubr.f32.vlgmr.msra.gmra.mrb[46].mxu0 %v9778_v56  ;;  %v5198_v6 = vld [vmem:[#allocation8 + $0x980] sm:$0xff] }
 0x49b   :  { %4734 = vmatprep.mubr.f32.mxu0 %v9812_v58  ;;  %8639 = vmatpush3.bf16.msra.mxu0 %v8638_v18  ;;  %v8694_v18 = vpack.c.bf16 %v4863_v42, %v4862_v21  ;;  %v8744_v21 = vpack.c.bf16 %v5157_v48, %v5156_v34  ;;  %v5140_v42 = vld [vmem:[#allocation8 + $0x7b0] sm:$0xff]  ;;  %v5182_v48 = vld [vmem:[#allocation8 + $0x900] sm:$0xff] }
 0x49c   :  { %8641 = vmatprep.subr.bf16.mxu0 %v8640_v11  ;;  %8679 = vmatpush3.bf16.msra.mxu1 %v8678_v9  ;;  %v8696_v11 = vpack.c.bf16 %v4881_v5, %v4880_v24  ;;  %v8658_v9 = vpack.c.bf16 %v4829_v12, %v4828_v17  ;;  %v5158_v24 = vld [vmem:[#allocation8 + $0x840] sm:$0xff]  ;;  %v5159_v5 = vld [vmem:[#allocation8 + $0x848] sm:$0xff]  ;;  %v4888_v12 = vld [vmem:[#allocation8 + $0x730] sm:$0xff] }
 0x49d   :  { %8681 = vmatprep.subr.bf16.mxu1 %v8680_v2  ;;  %v8660_v2 = vpack.c.bf16 %v4847_v52, %v4846_v22  ;;  %v8748_v22 = vpack.c.bf16 %v5159_v5, %v5158_v24  ;;  %v5142_v52 = vld [vmem:[#allocation8 + $0x7c0] sm:$0xff]  ;;  %v5184_v24 = vld [vmem:[#allocation8 + $0x910] sm:$0xff]  ;;  %v5185_v5 = vld [vmem:[#allocation8 + $0x918] sm:$0xff] }
 0x49e   :  { %4735 = vmatmul.mubr.f32.gmra.mrb[48].mxu0 %v9801_v61 }
 0x49f   :  { %8643 = vmatpush3.bf16.msra.mxu0 %v8642_v15  ;;  %4970 = vmatprep.mubr.f32.mxu0 %v9783_v40  ;;  %v8698_v15 = vpack.c.bf16 %v4865_v59, %v4864_v57  ;;  %v5160_v57 = vld [vmem:[#allocation8 + $0x850] sm:$0xff]  ;;  %v5161_v59 = vld [vmem:[#allocation8 + $0x858] sm:$0xff] }
 0x4a0   :  { %8645 = vmatprep.subr.bf16.mxu0 %v8644_v38  ;;  %8683 = vmatpush3.bf16.msra.mxu1 %v8682_v27  ;;  %v8732_v38 = vpack.c.bf16 %v5151_v47, %v5150_v25  ;;  %v8662_v27 = vpack.c.bf16 %v4831_v43, %v4830_v19  ;;  %v4890_v47 = vld [vmem:[#allocation8 + $0x740] sm:$0xff]  ;;  %v8752_v19 = vpack.c.bf16 %v5161_v59, %v5160_v57  ;;  %v5144_v43 = vld [vmem:[#allocation8 + $0x7d0] sm:$0xff]  ;;  %v5187_v59 = vld [vmem:[#allocation8 + $0x928] sm:$0xff] }
 0x4a1   :  { %8685 = vmatprep.subr.bf16.mxu1 %v8684_v55  ;;  %v8664_v55 = vpack.c.bf16 %v4849_v37, %v4848_v46  ;;  %v5162_v46 = vld [vmem:[#allocation8 + $0x860] sm:$0xff]  ;;  %v5163_v37 = vld [vmem:[#allocation8 + $0x868] sm:$0xff] }
 0x4a2   :  { %v5186_v57 = vld [vmem:[#allocation8 + $0x920] sm:$0xff] }
 0x4a3   :  { %8647 = vmatpush3.bf16.msra.mxu0 %v8646_v39  ;;  %v8734_v39 = vpack.c.bf16 %v5135_v44, %v5134_v1  ;;  %v4892_v44 = vld [vmem:[#allocation8 + $0x750] sm:$0xff] }
 0x4a4   :  { %8649 = vmatprep.subr.bf16.mxu0 %v8648_v33  ;;  %8687 = vmatpush3.bf16.msra.mxu1 %v8686_v41  ;;  %v8736_v33 = vpack.c.bf16 %v5153_v54, %v5152_v35  ;;  %v8666_v41 = vpack.c.bf16 %v4833_v10, %v4832_v7  ;;  %v8756_v35 = vpack.c.bf16 %v5163_v37, %v5162_v46  ;;  %v5146_v54 = vld [vmem:[#allocation8 + $0x7e0] sm:$0xff]  ;;  %v5164_v7 = vld [vmem:[#allocation8 + $0x870] sm:$0xff]  ;;  %v5165_v10 = vld [vmem:[#allocation8 + $0x878] sm:$0xff] }
 0x4a5   :  { %8689 = vmatprep.subr.bf16.mxu1 %v8688_v0  ;;  %v8700_v0 = vpack.c.bf16 %v4883_v32, %v4882_v13  ;;  %v4894_v32 = vld [vmem:[#allocation8 + $0x760] sm:$0xff]  ;;  %v8760_v8 = vpack.c.bf16 %v5165_v10, %v5164_v7  ;;  %v5188_v46 = vld [vmem:[#allocation8 + $0x930] sm:$0xff]  ;;  %v5189_v37 = vld [vmem:[#allocation8 + $0x938] sm:$0xff] }
 0x4a6   :  { %v5190_v7 = vld [vmem:[#allocation8 + $0x940] sm:$0xff]  ;;  %v5191_v10 = vld [vmem:[#allocation8 + $0x948] sm:$0xff] }
 0x4a7   :  { %8651 = vmatpush3.bf16.msra.mxu0 %v8650_v45  ;;  %v4885_v45 = vld [vmem:[#allocation8 + $0x718] sm:$0xff] }
 0x4a8   :  { %8653 = vmatprep.subr.bf16.mxu0 %v8652_v63  ;;  %8691 = vmatpush3.bf16.msra.mxu1 %v8690_v62  ;;  %v5139_v63 = vld [vmem:[#allocation8 + $0x7a8] sm:$0xff]  ;;  %v8704_v62 = vpack.c.bf16 %v4885_v45, %v4884_v4  ;;  %v4896_v4 = vld [vmem:[#allocation8 + $0x770] sm:$0xff]  ;;  %v4897_v45 = vld [vmem:[#allocation8 + $0x778] sm:$0xff] }
 0x4a9   :  { %8693 = vmatprep.subr.bf16.mxu1 %v8692_v29  ;;  %v8742_v14 = vpack.c.bf16 %v5139_v63, %v5138_v30  ;;  %v4887_v29 = vld [vmem:[#allocation8 + $0x728] sm:$0xff]  ;;  %v5200_v30 = vld [vmem:[#allocation8 + $0x990] sm:$0xff]  ;;  %v5201_v63 = vld [vmem:[#allocation8 + $0x998] sm:$0xff]  ;;  %v8728_v34 = vpack.c.bf16 %v4897_v45, %v4896_v4 }
 0x4aa   :  { %v5212_v4 = vld [vmem:[#allocation8 + $0x9f0] sm:$0xff]  ;;  %v5213_v45 = vld [vmem:[#allocation8 + $0x9f8] sm:$0xff] }
 0x4ab   :  { %8655 = vmatpush3.bf16.msra.mxu0 %v8654_v51  ;;  %v5141_v51 = vld [vmem:[#allocation8 + $0x7b8] sm:$0xff] }
 0x4ac   :  { %8657 = vmatprep.subr.bf16.mxu0 %v8656_v31  ;;  %8695 = vmatpush3.bf16.msra.mxu1 %v8694_v18  ;;  %v8708_v31 = vpack.c.bf16 %v4887_v29, %v4886_v53  ;;  %v8746_v17 = vpack.c.bf16 %v5141_v51, %v5140_v42  ;;  %v4889_v18 = vld [vmem:[#allocation8 + $0x738] sm:$0xff]  ;;  %v5202_v53 = vld [vmem:[#allocation8 + $0x9a0] sm:$0xff]  ;;  %v5203_v29 = vld [vmem:[#allocation8 + $0x9a8] sm:$0xff] }
 0x4ad   :  { %8697 = vmatprep.subr.bf16.mxu1 %v8696_v11  ;;  %v5143_v11 = vld [vmem:[#allocation8 + $0x7c8] sm:$0xff]  ;;  %v5166_v42 = vld [vmem:[#allocation8 + $0x880] sm:$0xff] }
 0x4ae   :  { %v8750_v25 = vpack.c.bf16 %v5143_v11, %v5142_v52  ;;  %v5167_v51 = vld [vmem:[#allocation8 + $0x888] sm:$0xff]  ;;  %v5168_v52 = vld [vmem:[#allocation8 + $0x890] sm:$0xff]  ;;  %v5169_v11 = vld [vmem:[#allocation8 + $0x898] sm:$0xff] }
 0x4af   :  { %8659 = vmatpush3.bf16.msra.mxu0 %v8658_v9  ;;  %v8712_v9 = vpack.c.bf16 %v4889_v18, %v4888_v12  ;;  %v5204_v12 = vld [vmem:[#allocation8 + $0x9b0] sm:$0xff]  ;;  %v5205_v18 = vld [vmem:[#allocation8 + $0x9b8] sm:$0xff] }
 0x4b0   :  { %8661 = vmatprep.subr.bf16.mxu0 %v8660_v2  ;;  %8699 = vmatpush3.bf16.msra.mxu1 %v8698_v15  ;;  %v4891_v2 = vld [vmem:[#allocation8 + $0x748] sm:$0xff]  ;;  %v5145_v15 = vld [vmem:[#allocation8 + $0x7d8] sm:$0xff] }
 0x4b1   :  { %8733 = vmatprep.subr.bf16.mxu1 %v8732_v38  ;;  %v8716_v38 = vpack.c.bf16 %v4891_v2, %v4890_v47  ;;  %v8754_v1 = vpack.c.bf16 %v5145_v15, %v5144_v43  ;;  %v5206_v47 = vld [vmem:[#allocation8 + $0x9c0] sm:$0xff]  ;;  %v5207_v2 = vld [vmem:[#allocation8 + $0x9c8] sm:$0xff] }
 0x4b2   :  { %v5170_v43 = vld [vmem:[#allocation8 + $0x8a0] sm:$0xff]  ;;  %v5171_v15 = vld [vmem:[#allocation8 + $0x8a8] sm:$0xff] }
 0x4b3   :  { %8663 = vmatpush3.bf16.msra.mxu0 %v8662_v27  ;;  %5046 = vmatmul.mubr.f32.vlgmr.msra.gmra.mrb[50].mxu1 %v9778_v56  ;;  %v4893_v27 = vld [vmem:[#allocation8 + $0x758] sm:$0xff] }
 0x4b4   :  { %8665 = vmatprep.subr.bf16.mxu0 %v8664_v55  ;;  %5050 = vmatprep.mubr.f32.mxu1 %v9812_v58  ;;  %v5147_v55 = vld [vmem:[#allocation8 + $0x7e8] sm:$0xff] }
 0x4b5   :  { %8735 = vmatpush3.bf16.msra.mxu1 %v8734_v39  ;;  %v8720_v39 = vpack.c.bf16 %v4893_v27, %v4892_v44  ;;  %v8758_v13 = vpack.c.bf16 %v5147_v55, %v5146_v54  ;;  %v5208_v44 = vld [vmem:[#allocation8 + $0x9d0] sm:$0xff]  ;;  %v5209_v27 = vld [vmem:[#allocation8 + $0x9d8] sm:$0xff] }
 0x4b6   :  { %8737 = vmatprep.subr.bf16.mxu1 %v8736_v33  ;;  %v4895_v33 = vld [vmem:[#allocation8 + $0x768] sm:$0xff]  ;;  %v5172_v54 = vld [vmem:[#allocation8 + $0x8b0] sm:$0xff]  ;;  %v5173_v55 = vld [vmem:[#allocation8 + $0x8b8] sm:$0xff] }
 0x4b7   :  { %8667 = vmatpush3.bf16.msra.mxu0 %v8666_v41  ;;  %5051 = vmatmul.mubr.f32.gmra.mrb[52].mxu1 %v9801_v61  ;;  %v5149_v41 = vld [vmem:[#allocation8 + $0x7f8] sm:$0xff] }
 0x4b8   :  { %8701 = vmatprep.subr.bf16.mxu0 %v8700_v0  ;;  %5286 = vmatprep.mubr.f32.mxu1 %v9783_v40 }
 0x4b9   :  { %8739 = vmatpush3.bf16.msra.mxu1 %v8738_v60  ;;  %v8762_v60 = vpack.c.bf16 %v5149_v41, %v5148_v16  ;;  %v5174_v16 = vld [vmem:[#allocation8 + $0x8c0] sm:$0xff]  ;;  %v5175_v41 = vld [vmem:[#allocation8 + $0x8c8] sm:$0xff] }
 0x4ba   :  { %4971 = vmatmul.mubr.f32.vlgmr.msra.gmra.mrb[50].mxu0 %v9773_v50  ;;  %8741 = vmatprep.subr.bf16.mxu1 %v8740_v20  ;;  %v8796_v20 = vpack.c.bf16 %v5199_v26, %v5198_v6  ;;  %v5192_v6 = vld [vmem:[#allocation8 + $0x950] sm:$0xff]  ;;  %v5193_v26 = vld [vmem:[#allocation8 + $0x958] sm:$0xff] }
 0x4bb   :  { %4975 = vmatprep.mubr.f32.mxu0 %v9806_v23  ;;  %8703 = vmatpush3.bf16.msra.mxu0 %v8700_v0  ;;  %v8724_v0 = vpack.c.bf16 %v4895_v33, %v4894_v32  ;;  %v5210_v32 = vld [vmem:[#allocation8 + $0x9e0] sm:$0xff]  ;;  %v5211_v33 = vld [vmem:[#allocation8 + $0x9e8] sm:$0xff] }
 0x4bc   :  { %8705 = vmatprep.subr.bf16.mxu0 %v8704_v62 }
 0x4bd   :  { %8743 = vmatpush3.bf16.msra.mxu1 %v8742_v14  ;;  %v8800_v14 = vpack.c.bf16 %v5201_v63, %v5200_v30  ;;  %v5176_v30 = vld [vmem:[#allocation8 + $0x8d0] sm:$0xff]  ;;  %v5177_v63 = vld [vmem:[#allocation8 + $0x8d8] sm:$0xff] }
 0x4be   :  { %4976 = vmatmul.mubr.f32.gmra.mrb[52].mxu0 %v9794_v28  ;;  %8745 = vmatprep.subr.bf16.mxu1 %v8744_v21 }
 0x4bf   :  { %8707 = vmatpush3.bf16.msra.mxu0 %v8704_v62  ;;  %6771 = vmatprep.mubr.f32.mxu0 %v9824_v49  ;;  %v5183_v62 = vld [vmem:[#allocation8 + $0x908] sm:$0xff] }
 0x4c0   :  { %8709 = vmatprep.subr.bf16.mxu0 %v8708_v31  ;;  %v8764_v21 = vpack.c.bf16 %v5183_v62, %v5182_v48  ;;  %v5195_v48 = vld [vmem:[#allocation8 + $0x968] sm:$0xff]  ;;  %v8824_v62 = vpack.c.bf16 %v5213_v45, %v5212_v4  ;;  %v5506_v45 = vld [vmem:[#allocation8 + $0xbc0] sm:$0xff] }
 0x4c1   :  { %8747 = vmatpush3.bf16.msra.mxu1 %v8746_v17  ;;  %v8766_v17 = vpack.c.bf16 %v5167_v51, %v5166_v42  ;;  %v5178_v42 = vld [vmem:[#allocation8 + $0x8e0] sm:$0xff]  ;;  %v5179_v51 = vld [vmem:[#allocation8 + $0x8e8] sm:$0xff] }
 0x4c2   :  { %8749 = vmatprep.subr.bf16.mxu1 %v8748_v22  ;;  %v8768_v22 = vpack.c.bf16 %v5185_v5, %v5184_v24  ;;  %v5196_v24 = vld [vmem:[#allocation8 + $0x970] sm:$0xff]  ;;  %v5197_v5 = vld [vmem:[#allocation8 + $0x978] sm:$0xff] }
 0x4c3   :  { %8711 = vmatpush3.bf16.msra.mxu0 %v8708_v31  ;;  %v8804_v31 = vpack.c.bf16 %v5203_v29, %v5202_v53  ;;  %v5498_v53 = vld [vmem:[#allocation8 + $0xb80] sm:$0xff]  ;;  %v5499_v29 = vld [vmem:[#allocation8 + $0xb88] sm:$0xff] }
 0x4c4   :  { %8713 = vmatprep.subr.bf16.mxu0 %v8712_v9 }
 0x4c5   :  { %8751 = vmatpush3.bf16.msra.mxu1 %v8750_v25  ;;  %v8770_v25 = vpack.c.bf16 %v5169_v11, %v5168_v52  ;;  %v5501_v52 = vld [vmem:[#allocation8 + $0xb98] sm:$0xff]  ;;  %v8792_v11 = vpack.c.bf16 %v5197_v5, %v5196_v24 }
 0x4c6   :  { %8753 = vmatprep.subr.bf16.mxu1 %v8752_v19  ;;  %v8772_v19 = vpack.c.bf16 %v5187_v59, %v5186_v57  ;;  %v5180_v57 = vld [vmem:[#allocation8 + $0x8f0] sm:$0xff]  ;;  %v5181_v59 = vld [vmem:[#allocation8 + $0x8f8] sm:$0xff] }
 0x4c7   :  { %8715 = vmatpush3.bf16.msra.mxu0 %v8712_v9  ;;  %v8808_v9 = vpack.c.bf16 %v5205_v18, %v5204_v12  ;;  %v5483_v12 = vld [vmem:[#allocation8 + $0xb08] sm:$0xff]  ;;  %v8790_v18 = vpack.c.bf16 %v5179_v51, %v5178_v42  ;;  %v5508_v51 = vld [vmem:[#allocation8 + $0xbd0] sm:$0xff]  ;;  %v5509_v24 = vld [vmem:[#allocation8 + $0xbd8] sm:$0xff] }
 0x4c8   :  { %8717 = vmatprep.subr.bf16.mxu0 %v8716_v38 }
 0x4c9   :  { %8755 = vmatpush3.bf16.msra.mxu1 %v8754_v1  ;;  %v8774_v1 = vpack.c.bf16 %v5171_v15, %v5170_v43  ;;  %v5485_v43 = vld [vmem:[#allocation8 + $0xb18] sm:$0xff]  ;;  %v8794_v15 = vpack.c.bf16 %v5181_v59, %v5180_v57 }
 0x4ca   :  { %8757 = vmatprep.subr.bf16.mxu1 %v8756_v35  ;;  %v8776_v35 = vpack.c.bf16 %v5189_v37, %v5188_v46  ;;  %v5502_v46 = vld [vmem:[#allocation8 + $0xba0] sm:$0xff]  ;;  %v5503_v37 = vld [vmem:[#allocation8 + $0xba8] sm:$0xff]  ;;  %v5493_v57 = vld [vmem:[#allocation8 + $0xb58] sm:$0xff] }
 0x4cb   :  { %8719 = vmatpush3.bf16.msra.mxu0 %v8716_v38  ;;  %v8812_v38 = vpack.c.bf16 %v5207_v2, %v5206_v47  ;;  %v5467_v47 = vld [vmem:[#allocation8 + $0xa88] sm:$0xff] }
 0x4cc   :  { %8721 = vmatprep.subr.bf16.mxu0 %v8720_v39 }
 0x4cd   :  { %8759 = vmatpush3.bf16.msra.mxu1 %v8758_v13  ;;  %v8778_v13 = vpack.c.bf16 %v5173_v55, %v5172_v54  ;;  %v5469_v54 = vld [vmem:[#allocation8 + $0xa98] sm:$0xff]  ;;  %v8868_v55 = vpack.c.bf16 %v5503_v37, %v5502_v46  ;;  %v5494_v37 = vld [vmem:[#allocation8 + $0xb60] sm:$0xff] }
 0x4ce   :  { %8761 = vmatprep.subr.bf16.mxu1 %v8760_v8  ;;  %v8780_v8 = vpack.c.bf16 %v5191_v10, %v5190_v7  ;;  %v5486_v7 = vld [vmem:[#allocation8 + $0xb20] sm:$0xff]  ;;  %v5487_v10 = vld [vmem:[#allocation8 + $0xb28] sm:$0xff] }
 0x4cf   :  { %8723 = vmatpush3.bf16.msra.mxu0 %v8720_v39  ;;  %v8816_v39 = vpack.c.bf16 %v5209_v27, %v5208_v44  ;;  %v5451_v44 = vld [vmem:[#allocation8 + $0xa08] sm:$0xff] }
 0x4d0   :  { %8725 = vmatprep.subr.bf16.mxu0 %v8724_v0 }
 0x4d1   :  { %8763 = vmatpush3.bf16.msra.mxu1 %v8762_v60  ;;  %v8782_v60 = vpack.c.bf16 %v5175_v41, %v5174_v16  ;;  %v5453_v16 = vld [vmem:[#allocation8 + $0xa18] sm:$0xff]  ;;  %v8870_v41 = vpack.c.bf16 %v5487_v10, %v5486_v7  ;;  %v5478_v10 = vld [vmem:[#allocation8 + $0xae0] sm:$0xff] }
 0x4d2   :  { %8797 = vmatprep.subr.bf16.mxu1 %v8796_v20 }
 0x4d3   :  { %8727 = vmatpush3.bf16.msra.mxu0 %v8724_v0  ;;  %v8820_v0 = vpack.c.bf16 %v5211_v33, %v5210_v32  ;;  %v5505_v32 = vld [vmem:[#allocation8 + $0xbb8] sm:$0xff] }
 0x4d4   :  { %5287 = vmatmul.mubr.f32.vlgmr.msra.gmra.mrb[54].mxu1 %v9773_v50  ;;  %8729 = vmatprep.subr.bf16.mxu0 %v8728_v34 }
 0x4d5   :  { %5291 = vmatprep.mubr.f32.mxu1 %v9806_v23  ;;  %8799 = vmatpush3.bf16.msra.mxu1 %v8796_v20  ;;  %v8784_v20 = vpack.c.bf16 %v5193_v26, %v5192_v6  ;;  %v5470_v6 = vld [vmem:[#allocation8 + $0xaa0] sm:$0xff]  ;;  %v5471_v26 = vld [vmem:[#allocation8 + $0xaa8] sm:$0xff] }
 0x4d6   :  { %8801 = vmatprep.subr.bf16.mxu1 %v8800_v14 }
 0x4d7   :  { %8731 = vmatpush3.bf16.msra.mxu0 %v8728_v34  ;;  %v5194_v34 = vld [vmem:[#allocation8 + $0x960] sm:$0xff] }
 0x4d8   :  { %5292 = vmatmul.mubr.f32.gmra.mrb[56].mxu1 %v9794_v28  ;;  %8765 = vmatprep.subr.bf16.mxu0 %v8764_v21  ;;  %v8788_v21 = vpack.c.bf16 %v5195_v48, %v5194_v34  ;;  %v5455_v34 = vld [vmem:[#allocation8 + $0xa28] sm:$0xff] }
 0x4d9   :  { %8803 = vmatpush3.bf16.msra.mxu1 %v8800_v14  ;;  %6806 = vmatprep.mubr.f32.mxu1 %v9824_v49  ;;  %v8786_v14 = vpack.c.bf16 %v5177_v63, %v5176_v30  ;;  %v8836_v30 = vpack.c.bf16 %v5471_v26, %v5470_v6  ;;  %v5454_v63 = vld [vmem:[#allocation8 + $0xa20] sm:$0xff]  ;;  %v5463_v6 = vld [vmem:[#allocation8 + $0xa68] sm:$0xff] }
 0x4da   :  { %6772 = vmatmul.mubr.f32.vlgmr.msra.gmra.mrb[54].mxu0 %v9832_v3  ;;  %8805 = vmatprep.subr.bf16.mxu1 %v8804_v31  ;;  %v8838_v42 = vpack.c.bf16 %v5455_v34, %v5454_v63  ;;  %v5515_v63 = vld [vmem:[#allocation8 + $0xc08] sm:$0xff] }
 0x4db   :  { %8767 = vmatpush3.bf16.msra.mxu0 %v8766_v17  ;;  %5361 = vmatprep.mubr.f32.mxu0 %v9788_v36  ;;  %v5482_v17 = vld [vmem:[#allocation8 + $0xb00] sm:$0xff] }
 0x4dc   :  { %8769 = vmatprep.subr.bf16.mxu0 %v8768_v22  ;;  %v5500_v22 = vld [vmem:[#allocation8 + $0xb90] sm:$0xff] }
 0x4dd   :  { %8807 = vmatpush3.bf16.msra.mxu1 %v8804_v31  ;;  %v8860_v31 = vpack.c.bf16 %v5499_v29, %v5498_v53  ;;  %v8864_v2 = vpack.c.bf16 %v5501_v52, %v5500_v22  ;;  %v5490_v29 = vld [vmem:[#allocation8 + $0xb40] sm:$0xff]  ;;  %v5475_v22 = vld [vmem:[#allocation8 + $0xac8] sm:$0xff]  ;;  %v8880_v52 = vpack.c.bf16 %v5509_v24, %v5508_v51  ;;  %v5521_v51 = vld [vmem:[#allocation8 + $0xc38] sm:$0xff] }
 0x4de   :  { %8809 = vmatprep.subr.bf16.mxu1 %v8808_v9  ;;  %v5523_v24 = vld [vmem:[#allocation8 + $0xc48] sm:$0xff] }
 0x4df   :  { %8771 = vmatpush3.bf16.msra.mxu0 %v8770_v25  ;;  %v5466_v25 = vld [vmem:[#allocation8 + $0xa80] sm:$0xff] }
 0x4e0   :  { %8773 = vmatprep.subr.bf16.mxu0 %v8772_v19  ;;  %v5484_v19 = vld [vmem:[#allocation8 + $0xb10] sm:$0xff] }
 0x4e1   :  { %8811 = vmatpush3.bf16.msra.mxu1 %v8808_v9  ;;  %v8862_v9 = vpack.c.bf16 %v5483_v12, %v5482_v17  ;;  %v8866_v27 = vpack.c.bf16 %v5485_v43, %v5484_v19  ;;  %v5457_v17 = vld [vmem:[#allocation8 + $0xa38] sm:$0xff]  ;;  %v5476_v43 = vld [vmem:[#allocation8 + $0xad0] sm:$0xff] }
 0x4e2   :  { %8813 = vmatprep.subr.bf16.mxu1 %v8812_v38 }
 0x4e3   :  { %8775 = vmatpush3.bf16.msra.mxu0 %v8774_v1  ;;  %v5450_v1 = vld [vmem:[#allocation8 + $0xa00] sm:$0xff] }
 0x4e4   :  { %8777 = vmatprep.subr.bf16.mxu0 %v8776_v35  ;;  %v5468_v35 = vld [vmem:[#allocation8 + $0xa90] sm:$0xff] }
 0x4e5   :  { %8815 = vmatpush3.bf16.msra.mxu1 %v8812_v38  ;;  %v8828_v38 = vpack.c.bf16 %v5467_v47, %v5466_v25  ;;  %v8832_v33 = vpack.c.bf16 %v5469_v54, %v5468_v35  ;;  %v5511_v25 = vld [vmem:[#allocation8 + $0xbe8] sm:$0xff]  ;;  %v5458_v47 = vld [vmem:[#allocation8 + $0xa40] sm:$0xff]  ;;  %v5460_v54 = vld [vmem:[#allocation8 + $0xa50] sm:$0xff] }
 0x4e6   :  { %8817 = vmatprep.subr.bf16.mxu1 %v8816_v39 }
 0x4e7   :  { %8779 = vmatpush3.bf16.msra.mxu0 %v8778_v13  ;;  %v5504_v13 = vld [vmem:[#allocation8 + $0xbb0] sm:$0xff] }
 0x4e8   :  { %8781 = vmatprep.subr.bf16.mxu0 %v8780_v8  ;;  %v5452_v8 = vld [vmem:[#allocation8 + $0xa10] sm:$0xff] }
 0x4e9   :  { %8819 = vmatpush3.bf16.msra.mxu1 %v8816_v39  ;;  %v8830_v39 = vpack.c.bf16 %v5451_v44, %v5450_v1  ;;  %v8834_v4 = vpack.c.bf16 %v5453_v16, %v5452_v8  ;;  %v5512_v44 = vld [vmem:[#allocation8 + $0xbf0] sm:$0xff] }
 0x4ea   :  { %8821 = vmatprep.subr.bf16.mxu1 %v8820_v0 }
 0x4eb   :  { %8783 = vmatpush3.bf16.msra.mxu0 %v8782_v60  ;;  %v5489_v60 = vld [vmem:[#allocation8 + $0xb38] sm:$0xff] }
 0x4ec   :  { %8785 = vmatprep.subr.bf16.mxu0 %v8784_v20  ;;  %v5507_v20 = vld [vmem:[#allocation8 + $0xbc8] sm:$0xff] }
 0x4ed   :  { %8823 = vmatpush3.bf16.msra.mxu1 %v8820_v0  ;;  %v5488_v0 = vld [vmem:[#allocation8 + $0xb30] sm:$0xff]  ;;  %v8876_v53 = vpack.c.bf16 %v5507_v20, %v5506_v45  ;;  %v5465_v20 = vld [vmem:[#allocation8 + $0xa78] sm:$0xff] }
 0x4ee   :  { %8825 = vmatprep.subr.bf16.mxu1 %v8824_v62  ;;  %v8874_v48 = vpack.c.bf16 %v5489_v60, %v5488_v0  ;;  %v5481_v0 = vld [vmem:[#allocation8 + $0xaf8] sm:$0xff]  ;;  %v5464_v45 = vld [vmem:[#allocation8 + $0xa70] sm:$0xff] }
 0x4ef   :  { %8787 = vmatpush3.bf16.msra.mxu0 %v8786_v14  ;;  %v5473_v14 = vld [vmem:[#allocation8 + $0xab8] sm:$0xff]  ;;  %v8858_v34 = vpack.c.bf16 %v5465_v20, %v5464_v45 }
 0x4f0   :  { %8789 = vmatprep.subr.bf16.mxu0 %v8788_v21  ;;  %v5491_v21 = vld [vmem:[#allocation8 + $0xb48] sm:$0xff] }
 0x4f1   :  { %8827 = vmatpush3.bf16.msra.mxu1 %v8824_v62  ;;  %v5472_v62 = vld [vmem:[#allocation8 + $0xab0] sm:$0xff]  ;;  %v8878_v12 = vpack.c.bf16 %v5491_v21, %v5490_v29  ;;  %v5518_v29 = vld [vmem:[#allocation8 + $0xc20] sm:$0xff]  ;;  %v5519_v21 = vld [vmem:[#allocation8 + $0xc28] sm:$0xff] }
 0x4f2   :  { %8861 = vmatprep.subr.bf16.mxu1 %v8860_v31  ;;  %v8840_v5 = vpack.c.bf16 %v5473_v14, %v5472_v62  ;;  %v5456_v31 = vld [vmem:[#allocation8 + $0xa30] sm:$0xff]  ;;  %v5517_v14 = vld [vmem:[#allocation8 + $0xc18] sm:$0xff] }
 0x4f3   :  { %8791 = vmatpush3.bf16.msra.mxu0 %v8790_v18  ;;  %v5474_v18 = vld [vmem:[#allocation8 + $0xac0] sm:$0xff]  ;;  %v8842_v59 = vpack.c.bf16 %v5457_v17, %v5456_v31  ;;  %v5516_v62 = vld [vmem:[#allocation8 + $0xc10] sm:$0xff]  ;;  %v5525_v31 = vld [vmem:[#allocation8 + $0xc58] sm:$0xff] }
 0x4f4   :  { %6807 = vmatmul.mubr.f32.vlgmr.msra.gmra.mrb[58].mxu1 %v9832_v3  ;;  %8793 = vmatprep.subr.bf16.mxu0 %v8792_v11  ;;  %v5492_v11 = vld [vmem:[#allocation8 + $0xb50] sm:$0xff] }
 0x4f5   :  { %8863 = vmatpush3.bf16.msra.mxu1 %v8862_v9  ;;  %5677 = vmatprep.mubr.f32.mxu1 %v9788_v36  ;;  %v8872_v36 = vpack.c.bf16 %v5505_v32, %v5504_v13  ;;  %v5510_v9 = vld [vmem:[#allocation8 + $0xbe0] sm:$0xff]  ;;  %v8882_v19 = vpack.c.bf16 %v5493_v57, %v5492_v11  ;;  %v5496_v32 = vld [vmem:[#allocation8 + $0xb70] sm:$0xff]  ;;  %v5527_v57 = vld [vmem:[#allocation8 + $0xc68] sm:$0xff] }
 0x4f6   :  { %8865 = vmatprep.subr.bf16.mxu1 %v8864_v2  ;;  %v5459_v2 = vld [vmem:[#allocation8 + $0xa48] sm:$0xff]  ;;  %v8884_v46 = vpack.c.bf16 %v5511_v25, %v5510_v9 }
 0x4f7   :  { %8795 = vmatpush3.bf16.msra.mxu0 %v8794_v15  ;;  %v5477_v15 = vld [vmem:[#allocation8 + $0xad8] sm:$0xff]  ;;  %v8846_v1 = vpack.c.bf16 %v5459_v2, %v5458_v47 }
 0x4f8   :  { %8829 = vmatprep.subr.bf16.mxu0 %v8828_v38  ;;  %v5495_v38 = vld [vmem:[#allocation8 + $0xb68] sm:$0xff]  ;;  %v8848_v35 = vpack.c.bf16 %v5477_v15, %v5476_v43 }
 0x4f9   :  { %8867 = vmatpush3.bf16.msra.mxu1 %v8866_v27  ;;  %v5513_v27 = vld [vmem:[#allocation8 + $0xbf8] sm:$0xff]  ;;  %v8886_v7 = vpack.c.bf16 %v5495_v38, %v5494_v37 }
 0x4fa   :  { %5362 = vmatmul.mubr.f32.vlgmr.msra.gmra.mrb[56].mxu0 %v9778_v56  ;;  %8869 = vmatprep.subr.bf16.mxu1 %v8868_v55  ;;  %v5461_v55 = vld [vmem:[#allocation8 + $0xa58] sm:$0xff]  ;;  %v8888_v13 = vpack.c.bf16 %v5513_v27, %v5512_v44 }
 0x4fb   :  { %5366 = vmatprep.mubr.f32.mxu0 %v9812_v58  ;;  %8831 = vmatpush3.bf16.msra.mxu0 %v8830_v39  ;;  %v5479_v39 = vld [vmem:[#allocation8 + $0xae8] sm:$0xff]  ;;  %v8850_v8 = vpack.c.bf16 %v5461_v55, %v5460_v54  ;;  %v5529_v37 = vld [vmem:[#allocation8 + $0xc78] sm:$0xff] }
 0x4fc   :  { %8833 = vmatprep.subr.bf16.mxu0 %v8832_v33  ;;  %v5497_v33 = vld [vmem:[#allocation8 + $0xb78] sm:$0xff]  ;;  %v8852_v16 = vpack.c.bf16 %v5479_v39, %v5478_v10 }
 0x4fd   :  { %8871 = vmatpush3.bf16.msra.mxu1 %v8870_v41  ;;  %v5462_v41 = vld [vmem:[#allocation8 + $0xa60] sm:$0xff]  ;;  %v8890_v26 = vpack.c.bf16 %v5497_v33, %v5496_v32 }
 0x4fe   :  { %5367 = vmatmul.mubr.f32.gmra.mrb[58].mxu0 %v9801_v61  ;;  %8873 = vmatprep.subr.bf16.mxu1 %v8872_v36  ;;  %v5480_v36 = vld [vmem:[#allocation8 + $0xaf0] sm:$0xff]  ;;  %v8854_v60 = vpack.c.bf16 %v5463_v6, %v5462_v41  ;;  %v5811_v41 = vld [vmem:[#allocation10 + $0x1] ss:$0 sm:$0xff] }
 0x4ff   :  { %8835 = vmatpush3.bf16.msra.mxu0 %v8834_v4  ;;  %5602 = vmatprep.mubr.f32.mxu0 %v9783_v40  ;;  %v8844_v40 = vpack.c.bf16 %v5475_v22, %v5474_v18  ;;  %v8856_v4 = vpack.c.bf16 %v5481_v0, %v5480_v36 }
 0x500   :  { %8837 = vmatprep.subr.bf16.mxu0 %v8836_v30  ;;  %v5514_v30 = vld [vmem:[#allocation8 + $0xc00] sm:$0xff] }
 0x501   :  { %8875 = vmatpush3.bf16.msra.mxu1 %v8874_v48  ;;  %v8892_v48 = vpack.c.bf16 %v5515_v63, %v5514_v30 }
 0x502   :  { %8877 = vmatprep.subr.bf16.mxu1 %v8876_v53  ;;  %v8896_v53 = vpack.c.bf16 %v5517_v14, %v5516_v62 }
 0x503   :  { %8839 = vmatpush3.bf16.msra.mxu0 %v8838_v42  ;;  %v5520_v42 = vld [vmem:[#allocation8 + $0xc30] sm:$0xff] }
 0x504   :  { %8841 = vmatprep.subr.bf16.mxu0 %v8840_v5 }
 0x505   :  { %8879 = vmatpush3.bf16.msra.mxu1 %v8878_v12  ;;  %v5810_v12 = vld [vmem:[#allocation10] ss:$0 sm:$0xff] }
 0x506   :  { %8881 = vmatprep.subr.bf16.mxu1 %v8880_v52 }
 0x507   :  { %8843 = vmatpush3.bf16.msra.mxu0 %v8842_v59 }
 0x508   :  { %8845 = vmatprep.subr.bf16.mxu0 %v8844_v40 }
 0x509   :  { %8883 = vmatpush3.bf16.msra.mxu1 %v8882_v19 }
 0x50a   :  { %8885 = vmatprep.subr.bf16.mxu1 %v8884_v46  ;;  %v5528_v46 = vld [vmem:[#allocation8 + $0xc70] sm:$0xff] }
 0x50b   :  { %8847 = vmatpush3.bf16.msra.mxu0 %v8846_v1  ;;  %v8920_v1 = vpack.c.bf16 %v5529_v37, %v5528_v46 }
 0x50c   :  { %8849 = vmatprep.subr.bf16.mxu0 %v8848_v35 }
 0x50d   :  { %8887 = vmatpush3.bf16.msra.mxu1 %v8886_v7 }
 0x50e   :  { %8889 = vmatprep.subr.bf16.mxu1 %v8888_v13 }
 0x50f   :  { %8851 = vmatpush3.bf16.msra.mxu0 %v8850_v8 }
 0x510   :  { %8853 = vmatprep.subr.bf16.mxu0 %v8852_v16 }
 0x511   :  { %8891 = vmatpush3.bf16.msra.mxu1 %v8890_v26 }
 0x513   :  { %8855 = vmatpush3.bf16.msra.mxu0 %v8854_v60 }
 0x514   :  { %5678 = vmatmul.mubr.f32.vlgmr.msra.gmra.mrb[60].mxu1 %v9778_v56  ;;  %8857 = vmatprep.subr.bf16.mxu0 %v8856_v4  ;;  %v8900_v56 = vpack.c.bf16 %v5519_v21, %v5518_v29 }
 0x515   :  { %5682 = vmatprep.mubr.f32.mxu1 %v9812_v58  ;;  %v5522_v58 = vld [vmem:[#allocation8 + $0xc40] sm:$0xff] }
 0x516   :  { %v8908_v5 = vpack.c.bf16 %v5523_v24, %v5522_v58 }
 0x517   :  { %8859 = vmatpush3.bf16.msra.mxu0 %v8858_v34 }
 0x518   :  { %5683 = vmatmul.mubr.f32.gmra.mrb[62].mxu1 %v9801_v61  ;;  %8893 = vmatprep.subr.bf16.mxu0 %v8892_v48  ;;  %v8904_v61 = vpack.c.bf16 %v5521_v51, %v5520_v42 }
 0x51a   :  { %5603 = vmatmul.mubr.f32.vlgmr.msra.gmra.mrb[60].mxu0 %v9773_v50  ;;  %v5524_v50 = vld [vmem:[#allocation8 + $0xc50] sm:$0xff] }
 0x51b   :  { %5607 = vmatprep.mubr.f32.mxu0 %v9806_v23  ;;  %8895 = vmatpush3.bf16.msra.mxu0 %v8892_v48 }
 0x51c   :  { %8897 = vmatprep.subr.bf16.mxu0 %v8896_v53 }
 0x51e   :  { %5608 = vmatmul.mubr.f32.gmra.mrb[62].mxu0 %v9794_v28  ;;  %v8912_v28 = vpack.c.bf16 %v5525_v31, %v5524_v50 }
 0x51f   :  { %8899 = vmatpush3.bf16.msra.mxu0 %v8896_v53  ;;  %6841 = vmatprep.mubr.f32.mxu0 %v9824_v49  ;;  %v5526_v49 = vld [vmem:[#allocation8 + $0xc60] sm:$0xff] }
 0x520   :  { %8901 = vmatprep.subr.bf16.mxu0 %v8900_v56  ;;  %v8916_v19 = vpack.c.bf16 %v5527_v57, %v5526_v49 }
 0x523   :  { %8903 = vmatpush3.bf16.msra.mxu0 %v8900_v56 }
 0x524   :  { %8905 = vmatprep.subr.bf16.mxu0 %v8904_v61 }
 0x526   :  { %v6231_v23 = vpop.f32.mrb[40].mxu0  ;;  %v6269_v17 = vpop.f32.mrb[40].mxu1 }
 0x527   :  { %8907 = vmatpush3.bf16.msra.mxu0 %v8904_v61  ;;  %v6232_v18 = vpop.f32.mrb[41].mxu0  ;;  %v6270_v52 = vpop.f32.mrb[41].mxu1  ;;  %v5812_v61 = vld [vmem:[#allocation10 + $0x2] ss:$0 sm:$0xff] }
 0x528   :  { %v6233_v22 = vadd.f32 %v6232_v18, %v6231_v23  ;;  %8909 = vmatprep.subr.bf16.mxu0 %v8908_v5  ;;  %v6271_v11 = vadd.f32 %v6270_v52, %v6269_v17 }
 0x52a   :  { %v4343_v59 = vadd.f32 %v6233_v22, %v5810_v12  ;;  %v6234_v9 = vpop.f32.mrb[42].mxu0  ;;  %v6272_v25 = vpop.f32.mrb[42].mxu1 }
 0x52b   :  { %8911 = vmatpush3.bf16.msra.mxu0 %v8908_v5  ;;  %v6235_v40 = vpop.f32.mrb[43].mxu0  ;;  %v6273_v2 = vpop.f32.mrb[43].mxu1 }
 0x52c   :  { %v6236_v47 = vadd.f32 %v6235_v40, %v6234_v9  ;;  %8913 = vmatprep.subr.bf16.mxu0 %v8912_v28  ;;  %v4418_v43 = vadd.f32 %v6271_v11, %v4343_v59  ;;  %v6274_v15 = vadd.f32 %v6273_v2, %v6272_v25 }
 0x52e   :  { %v4348_v38 = vadd.f32 %v6236_v47, %v5810_v12 }
 0x52f   :  { %8915 = vmatpush3.bf16.msra.mxu0 %v8912_v28 }
 0x530   :  { %8917 = vmatprep.subr.bf16.mxu0 %v8916_v19  ;;  %v4423_v44 = vadd.f32 %v6274_v15, %v4348_v38  ;;  %v5813_v15 = vld [vmem:[#allocation10 + $0x3] ss:$0 sm:$0xff] }
 0x533   :  { %8919 = vmatpush3.bf16.msra.mxu0 %v8916_v19 }
 0x534   :  { %8921 = vmatprep.subr.bf16.mxu0 %v8920_v1 }
 0x537   :  { %8923 = vmatpush3.bf16.msra.mxu0 %v8920_v1 }
 0x53a   :  { %6842 = vmatmul.mubr.f32.vlgmr.msra.gmra.mrb[64].mxu0 %v9832_v3 }
 0x546   :  { %v6325_v27 = vpop.f32.mrb[44].mxu1 }
 0x547   :  { %v6326_v35 = vpop.f32.mrb[45].mxu1 }
 0x548   :  { %v6327_v54 = vadd.f32 %v6326_v35, %v6325_v27 }
 0x54a   :  { %v6328_v55 = vpop.f32.mrb[46].mxu1  ;;  %v4657_v36 = vadd.f32 %v6327_v54, %v5811_v41 }
 0x54b   :  { %v6329_v7 = vpop.f32.mrb[47].mxu1 }
 0x54c   :  { %v6330_v10 = vadd.f32 %v6329_v7, %v6328_v55 }
 0x54d   :  { %v6703_v39 = vpop.f32.mrb[44].mxu0 }
 0x54e   :  { %v4498_v13 = vadd.f32 %v6703_v39, %v4423_v44  ;;  %v4492_v32 = vpop.f32.mrb[45].mxu0  ;;  %v4662_v45 = vadd.f32 %v6330_v10, %v5811_v41 }
 0x54f   :  { %v4493_v33 = vadd.f32 %v4492_v32, %v4418_v43 }
 0x566   :  { %v6738_v8 = vpop.f32.mrb[48].mxu1 }
 0x567   :  { %v4806_v16 = vpop.f32.mrb[49].mxu1 }
 0x56d   :  { %v6363_v6 = vpop.f32.mrb[46].mxu0 }
 0x56e   :  { %v6364_v26 = vpop.f32.mrb[47].mxu0 }
 0x56f   :  { %v6365_v0 = vadd.f32 %v6364_v26, %v6363_v6 }
 0x571   :  { %v4732_v60 = vadd.f32 %v6365_v0, %v4657_v36  ;;  %v6366_v4 = vpop.f32.mrb[48].mxu0  ;;  %v5814_v0 = vld [vmem:[#allocation10 + $0x4] ss:$0 sm:$0xff] }
 0x572   :  { %v6367_v3 = vpop.f32.mrb[49].mxu0 }
 0x573   :  { %v4807_v20 = vadd.f32 %v4806_v16, %v4732_v60  ;;  %v6368_v30 = vadd.f32 %v6367_v3, %v6366_v4 }
 0x575   :  { %v4737_v63 = vadd.f32 %v6368_v30, %v4662_v45  ;;  %v4815_v34 = vmax.f32 %v4493_v33, %v4807_v20 }
 0x577   :  { %v4812_v48 = vadd.f32 %v6738_v8, %v4737_v63 }
 0x579   :  { %v4816_v62 = vmax.f32 %v4498_v13, %v4812_v48 }
 0x586   :  { %v6457_v14 = vpop.f32.mrb[50].mxu1 }
 0x587   :  { %v6458_v53 = vpop.f32.mrb[51].mxu1 }
 0x588   :  { %v6459_v29 = vadd.f32 %v6458_v53, %v6457_v14 }
 0x58a   :  { %v6460_v21 = vpop.f32.mrb[52].mxu1 }
 0x58b   :  { %v6461_v56 = vpop.f32.mrb[53].mxu1 }
 0x58c   :  { %v6462_v42 = vadd.f32 %v6461_v56, %v6460_v21  ;;  %v5815_v56 = vld [vmem:[#allocation11] ss:$0 sm:$0xff] }
 0x58d   :  { %v6419_v51 = vpop.f32.mrb[50].mxu0 }
 0x58e   :  { %v6420_v58 = vpop.f32.mrb[51].mxu0 }
 0x58f   :  { %v6421_v24 = vadd.f32 %v6420_v58, %v6419_v51  ;;  %v5816_v58 = vld [vmem:[#allocation2] ss:$0 sm:$0xff] }
 0x591   :  { %v4973_v5 = vadd.f32 %v6421_v24, %v5812_v61  ;;  %v6422_v50 = vpop.f32.mrb[52].mxu0 }
 0x592   :  { %v6423_v31 = vpop.f32.mrb[53].mxu0 }
 0x593   :  { %v6424_v23 = vadd.f32 %v6423_v31, %v6422_v50  ;;  %v5048_v17 = vadd.f32 %v6459_v29, %v4973_v5 }
 0x595   :  { %v4978_v12 = vadd.f32 %v6424_v23, %v5812_v61 }
 0x597   :  { %v5053_v18 = vadd.f32 %v6462_v42, %v4978_v12 }
 0x5a7   :  { %v6513_v22 = vpop.f32.mrb[54].mxu1 }
 0x5a8   :  { %v6514_v52 = vpop.f32.mrb[55].mxu1 }
 0x5a9   :  { %v6515_v28 = vadd.f32 %v6514_v52, %v6513_v22 }
 0x5ab   :  { %v6516_v11 = vpop.f32.mrb[56].mxu1  ;;  %v5289_v38 = vadd.f32 %v6515_v28, %v5813_v15 }
 0x5ac   :  { %v6517_v49 = vpop.f32.mrb[57].mxu1 }
 0x5ad   :  { %v6518_v57 = vadd.f32 %v6517_v49, %v6516_v11  ;;  %v6773_v59 = vpop.f32.mrb[54].mxu0 }
 0x5ae   :  { %v5128_v9 = vadd.f32 %v6773_v59, %v5053_v18  ;;  %v5122_v25 = vpop.f32.mrb[55].mxu0 }
 0x5af   :  { %v5123_v40 = vadd.f32 %v5122_v25, %v5048_v17  ;;  %v5294_v54 = vadd.f32 %v6518_v57, %v5813_v15 }
 0x5b0   :  { %v5132_v47 = vmax.f32 %v4816_v62, %v5128_v9 }
 0x5b1   :  { %v5131_v2 = vmax.f32 %v4815_v34, %v5123_v40 }
 0x5c7   :  { %v6808_v19 = vpop.f32.mrb[58].mxu1 }
 0x5c8   :  { %v5438_v43 = vpop.f32.mrb[59].mxu1 }
 0x5cd   :  { %v6551_v46 = vpop.f32.mrb[56].mxu0 }
 0x5ce   :  { %v6552_v37 = vpop.f32.mrb[57].mxu0 }
 0x5cf   :  { %v6553_v1 = vadd.f32 %v6552_v37, %v6551_v46 }
 0x5d1   :  { %v5364_v44 = vadd.f32 %v6553_v1, %v5289_v38  ;;  %v6554_v27 = vpop.f32.mrb[58].mxu0 }
 0x5d2   :  { %v6555_v35 = vpop.f32.mrb[59].mxu0 }
 0x5d3   :  { %v5439_v55 = vadd.f32 %v5438_v43, %v5364_v44  ;;  %v6556_v7 = vadd.f32 %v6555_v35, %v6554_v27 }
 0x5d5   :  { %v5369_v10 = vadd.f32 %v6556_v7, %v5294_v54  ;;  %v5447_v39 = vmax.f32 %v5131_v2, %v5439_v55 }
 0x5d7   :  { %v5444_v13 = vadd.f32 %v6808_v19, %v5369_v10 }
 0x5d9   :  { %v5448_v32 = vmax.f32 %v5132_v47, %v5444_v13 }
 0x5e7   :  { %v6645_v33 = vpop.f32.mrb[60].mxu1 }
 0x5e8   :  { %v6646_v8 = vpop.f32.mrb[61].mxu1 }
 0x5e9   :  { %v6647_v16 = vadd.f32 %v6646_v8, %v6645_v33 }
 0x5eb   :  { %v6648_v41 = vpop.f32.mrb[62].mxu1 }
 0x5ec   :  { %v6649_v6 = vpop.f32.mrb[63].mxu1 }
 0x5ed   :  { %v6650_v26 = vadd.f32 %v6649_v6, %v6648_v41  ;;  %v6607_v36 = vpop.f32.mrb[60].mxu0 }
 0x5ee   :  { %v6608_v60 = vpop.f32.mrb[61].mxu0 }
 0x5ef   :  { %v6609_v4 = vadd.f32 %v6608_v60, %v6607_v36 }
 0x5f1   :  { %v5605_v3 = vadd.f32 %v6609_v4, %v5814_v0  ;;  %v6610_v45 = vpop.f32.mrb[62].mxu0 }
 0x5f2   :  { %v6611_v20 = vpop.f32.mrb[63].mxu0 }
 0x5f3   :  { %v6612_v30 = vadd.f32 %v6611_v20, %v6610_v45  ;;  %v5680_v63 = vadd.f32 %v6647_v16, %v5605_v3 }
 0x5f5   :  { %v5610_v34 = vadd.f32 %v6612_v30, %v5814_v0 }
 0x5f7   :  { %v5685_v48 = vadd.f32 %v6650_v26, %v5610_v34 }
 0x60d   :  { %v6843_v62 = vpop.f32.mrb[64].mxu0 }
 0x60e   :  { %v5760_v14 = vadd.f32 %v6843_v62, %v5685_v48  ;;  %v5754_v53 = vpop.f32.mrb[65].mxu0 }
 0x60f   :  { %v5755_v29 = vadd.f32 %v5754_v53, %v5680_v63 }
 0x610   :  { %v5764_v21 = vmax.f32 %v5448_v32, %v5760_v14 }
 0x611   :  { %v5763_v42 = vmax.f32 %v5447_v39, %v5755_v29 }
 0x612   :  { %v5773_v61 = vmul.f32 %v5815_v56, %v5764_v21 }
 0x613   :  { %v5772_v51 = vmul.f32 %v5815_v56, %v5763_v42 }
 0x615   :  { %5774 = vadd.xlane.f32.xlu0 %v5772_v51 }
 0x619   :  { %5776 = vadd.xlane.f32.xlu0 %v5773_v61 }
 0x6a2   :  { %v5775_v24 = vpop.xlane.xlu0 %5774 }
 0x6a3   :  { %v5785_v5 = vadd.f32 %v5816_v58, %v5775_v24 }
 0x6a5   :  { %v5817_v50 = vmul.f32 -1.442695, %v5785_v5 }
 0x6a6   :  { %v5777_v31 = vpop.xlane.xlu0 %5776 }
 0x6a7   :  { %9020 = vpow2.f32 %v5817_v50  ;;  %v5786_v23 = vadd.f32 %v5816_v58, %v5777_v31 }
 0x6a9   :  { %v5818_v17 = vmul.f32 -1.442695, %v5786_v23 }
 0x6ab   :  { %9022 = vpow2.f32 %v5818_v17 }
 0x6b1   :  { %v9021_v12 = vpop.eup %9020 }
 0x6b2   :  { %v5793_v18 = vadd.f32 1.0, %v9021_v12 }
 0x6b4   :  { %9024 = vrcp.f32 %v5793_v18 }
 0x6b5   :  { %v9023_v22 = vpop.eup %9022 }
 0x6b6   :  { %v5794_v52 = vadd.f32 1.0, %v9023_v22 }
 0x6b8   :  { %9026 = vrcp.f32 %v5794_v52 }
 0x6be   :  { %v9025_v28 = vpop.eup %9024 }
 0x6bf   :  { %5800 = vst.msk [vmem:[%s9885_s7] sm:$0xff] %vm5799_vm0, %v9025_v28 }
 0x6c2   :  { %v9027_v11 = vpop.eup %9026 }
 0x6c3   :  { %5801 = vst.msk [vmem:[%s9885_s7 + $0x8] sm:$0xff] %vm5799_vm0, %v9027_v11 }
 0x6c4   :  { %5806 = vsyncpa [#allocation4], 1 }
 0x6c5   :  { %5807 = vsyncpa [#allocation6], 1 }
 0x6c6   :  { %5808 = vsyncpa [#allocation9], 1 }
 0x6c7   :  { %5809 = vsyncpa [#allocation12], 1 }

</bundles_post_ra>
